<compile_context>
chip_gen: v6e
topology: v6e:2x2x1
jax: 0.10.0
libtpu: 0.0.40
codegen_flags: <defaults>
</compile_context>

<pallas_src>
import numpy as np

import jax
import jax.numpy as jnp
from jax import lax
from jax.experimental import pallas as pl
from jax.experimental.pallas import tpu as pltpu

# ----------------------------- model configuration (small test sizes) ------------
INPUT_DIM = 32                 # latent dim per object
HIDDEN_DIM = 32                # MLP hidden size == deconv1 output channels (C1)
NUM_OBJECTS = 4                # number of object slots (channels of h_conv)
OUTPUT_SIZE = (3, 20, 20)      # (C, H, W) of the decoded image
COUT = OUTPUT_SIZE[0]
MAP_W = OUTPUT_SIZE[1] // 5    # 4
MAP_H = OUTPUT_SIZE[2] // 5    # 4
P_PIX = MAP_W * MAP_H          # fc3 output dim (pixels per object map)
K1 = 5                         # deconv1 kernel / stride
K2 = 9                         # deconv2 kernel
PAD2 = 4                       # deconv2 padding
HOUT = K1 * MAP_W              # 20
WOUT = K1 * MAP_H              # 20
HP = HOUT + 2 * PAD2           # 28
WP = WOUT + 2 * PAD2           # 28
LN_EPS = 1e-5
BN_EPS = 1e-5


# ----------------------------- fused kernel ---------------------------------------
def _decoder_kernel(ins_ref, w1_ref, b1_ref, w2_ref, b2_ref, lng_ref, lnb_ref,
                    w3_ref, b3_ref, wd1_ref, s1_ref, t1_ref, w2e_ref, bcv_ref,
                    out_ref, slab_ref):
    f32 = jnp.float32
    C1 = HIDDEN_DIM

    # ---- MLP (transposed orientation: (features, objects)) ----
    x = ins_ref[0]                                                     # (Din, K)
    h = jnp.dot(w1_ref[...], x, preferred_element_type=f32) + b1_ref[...]
    h = jnp.maximum(h, 0.0)
    h = jnp.dot(w2_ref[...], h, preferred_element_type=f32) + b2_ref[...]
    mu = jnp.mean(h, axis=0, keepdims=True)                            # LN over features
    var = jnp.mean(jnp.square(h - mu), axis=0, keepdims=True)
    h = (h - mu) * lax.rsqrt(var + LN_EPS) * lng_ref[...] + lnb_ref[...]
    h = jnp.maximum(h, 0.0)
    h3t = jnp.dot(w3_ref[...], h, preferred_element_type=f32) + b3_ref[...]   # (P_PIX, K)

    # ---- deconv1 (stride == kernel) as one matmul + folded BatchNorm(eval) + ReLU ----
    z = jnp.dot(h3t, wd1_ref[...], preferred_element_type=f32)         # (P_PIX, 25*C1)
    z = jnp.maximum(z * s1_ref[...] + t1_ref[...], 0.0)

    # ---- scatter per-pixel 5x5xC1 blocks into the zero-padded NHWC slab (VMEM) ----
    slab_ref[...] = jnp.zeros_like(slab_ref)
    blk = K1 * C1                                                      # 160
    for ki in range(K1):
        zk = z[:, ki * blk:(ki + 1) * blk]                             # (P_PIX, 160)
        for i in range(MAP_W):
            row = PAD2 + K1 * i + ki
            for j in range(MAP_H):
                p = i * MAP_H + j
                col0 = (PAD2 + K1 * j) * C1
                slab_ref[row:row + 1, col0:col0 + blk] = zk[p:p + 1, :]

    # ---- deconv2 == 9x9 "same" correlation, as 9 banded matmuls ----
    acc = jnp.zeros((HOUT, WOUT * COUT), f32)
    for ky in range(K2):
        acc = acc + jnp.dot(slab_ref[ky:ky + HOUT, :], w2e_ref[ky],
                            preferred_element_type=f32)
    out_ref[0] = acc + bcv_ref[...]


# ----------------------------- wrapper --------------------------------------------
def decoder_cnn_medium_forward(ins, params):
    """ins: (B, num_objects, input_dim) f32. Returns (B, C, H, W) like the PyTorch module."""
    B, K, Din = ins.shape
    ins_t = jnp.swapaxes(ins.astype(jnp.float32), 1, 2)                # (B, Din, K)

    def full(a):
        return pl.BlockSpec(a.shape, lambda b, _nd=a.ndim: (0,) * _nd)

    args = (params["w1t"], params["b1c"], params["w2t"], params["b2c"],
            params["lngc"], params["lnbc"], params["w3t"], params["b3c"],
            params["wd1r"], params["d1_scale"], params["d1_bias"],
            params["w2e"], params["b2row"])

    out = pl.pallas_call(
        _decoder_kernel,
        grid=(B,),
        out_shape=jax.ShapeDtypeStruct((B, HOUT, WOUT * COUT), jnp.float32),
        in_specs=[pl.BlockSpec((1, Din, K), lambda b: (b, 0, 0))] + [full(a) for a in args],
        out_specs=pl.BlockSpec((1, HOUT, WOUT * COUT), lambda b: (b, 0, 0)),
        scratch_shapes=[pltpu.VMEM((HP, WP * HIDDEN_DIM), jnp.float32)],
        compiler_params=pltpu.CompilerParams(dimension_semantics=("parallel",)),
    )(ins_t, *args)

    # tiny layout plumbing only: (B, 20, 60) -> (B, 3, 20, 20)
    return out.reshape(B, HOUT, WOUT, COUT).transpose(0, 3, 1, 2)


# ----------------------------- parameters -----------------------------------------
def init_params(key):
    ks = jax.random.split(key, 16)

    def uni(k, shape, scale):
        return jax.random.uniform(k, shape, jnp.float32, minval=-scale, maxval=scale)

    D, Hd, K, C1 = INPUT_DIM, HIDDEN_DIM, NUM_OBJECTS, HIDDEN_DIM
    Cout = COUT

    # Linear layers, stored (in, out) so the reference does x @ W + b.
    w1 = uni(ks[0], (D, Hd), (1.0 / D) ** 0.5)
    b1 = uni(ks[1], (1, Hd), (1.0 / D) ** 0.5)
    w2 = uni(ks[2], (Hd, Hd), (1.0 / Hd) ** 0.5)
    b2 = uni(ks[3], (1, Hd), (1.0 / Hd) ** 0.5)
    ln_g = 1.0 + 0.05 * jax.random.normal(ks[4], (1, Hd), jnp.float32)
    ln_b = 0.05 * jax.random.normal(ks[5], (1, Hd), jnp.float32)
    w3 = uni(ks[6], (Hd, P_PIX), (1.0 / Hd) ** 0.5)
    b3 = uni(ks[7], (1, P_PIX), (1.0 / Hd) ** 0.5)

    # deconv1: ConvTranspose2d(num_objects, hidden_dim, 5, stride=5), weight (K, C1, 5, 5)
    wd1 = uni(ks[8], (K, C1, K1, K1), (1.0 / (K * K1 * K1)) ** 0.5)
    bd1 = uni(ks[9], (C1,), (1.0 / (K * K1 * K1)) ** 0.5)

    # BatchNorm2d(hidden_dim) eval-mode buffers / affine
    bn_g = 1.0 + 0.1 * jax.random.normal(ks[10], (C1,), jnp.float32)
    bn_b = 0.1 * jax.random.normal(ks[11], (C1,), jnp.float32)
    bn_m = 0.05 * jax.random.normal(ks[12], (C1,), jnp.float32)
    bn_v = 0.9 + 0.2 * jax.random.uniform(ks[13], (C1,), jnp.float32)

    # deconv2: ConvTranspose2d(hidden_dim, Cout, 9, padding=4), weight (C1, Cout, 9, 9)
    wd2 = uni(ks[14], (C1, Cout, K2, K2), (1.0 / (C1 * K2 * K2)) ** 0.5)
    bd2 = uni(ks[15], (Cout,), (1.0 / (C1 * K2 * K2)) ** 0.5)

    # ---- host-side folds / kernel layouts (pure plumbing, done once) ----
    s = bn_g / jnp.sqrt(bn_v + BN_EPS)
    t = bn_b - bn_m * s + bd1 * s                            # deconv1 bias folded into BN shift
    wd1r = jnp.transpose(wd1, (0, 2, 3, 1)).reshape(K, K1 * K1 * C1)   # cols = (ki, kj, c)
    d1_scale = jnp.tile(s, (K1 * K1,)).reshape(1, K1 * K1 * C1)
    d1_bias = jnp.tile(t, (K1 * K1,)).reshape(1, K1 * K1 * C1)

    # Band-expanded deconv2 weight: per ky a (Wp*C1, Wout*Cout) matrix whose zero band
    # encodes the kx shifts, so the 9x9 conv becomes 9 dense matmuls on whole slab strips.
    wflip = np.asarray(wd2)[:, :, ::-1, ::-1]                          # [c, co, ry, rx]
    w2e = np.zeros((K2, WP * C1, WOUT * Cout), np.float32)
    for ry in range(K2):
        for rx in range(K2):
            wtap = wflip[:, :, ry, rx]                                 # (C1, Cout)
            for x in range(WOUT):
                u = x + rx
                w2e[ry, u * C1:(u + 1) * C1, x * Cout:(x + 1) * Cout] = wtap
    b2row = np.tile(np.asarray(bd2), WOUT).reshape(1, WOUT * Cout)

    return dict(
        # logical params (used by the pure-JAX reference)
        w1=w1, b1=b1, w2=w2, b2=b2, ln_g=ln_g, ln_b=ln_b, w3=w3, b3=b3,
        wd1=wd1, bd1=bd1, bn_g=bn_g, bn_b=bn_b, bn_m=bn_m, bn_v=bn_v,
        wd2=wd2, bd2=bd2,
        # kernel-layout params
        w1t=w1.T, b1c=b1.T, w2t=w2.T, b2c=b2.T, lngc=ln_g.T, lnbc=ln_b.T,
        w3t=w3.T, b3c=b3.T,
        wd1r=wd1r, d1_scale=d1_scale, d1_bias=d1_bias,
        w2e=jnp.asarray(w2e), b2row=jnp.asarray(b2row))


# ----------------------------- pure-JAX reference (same math, no Pallas) ----------
def reference_forward(ins, p):
    B, K, Din = ins.shape
    C1 = p["wd1"].shape[1]
    Cout = p["wd2"].shape[1]

    x = ins.reshape(B * K, Din)
    h = jax.nn.relu(x @ p["w1"] + p["b1"])
    h = h @ p["w2"] + p["b2"]
    mu = h.mean(-1, keepdims=True)
    var = ((h - mu) ** 2).mean(-1, keepdims=True)
    h = (h - mu) / jnp.sqrt(var + LN_EPS) * p["ln_g"] + p["ln_b"]
    h = jax.nn.relu(h)
    h = h @ p["w3"] + p["b3"]
    hc = h.reshape(B, K, MAP_W, MAP_H)

    # deconv1 (stride 5, kernel 5)
    y = jnp.einsum("bkij,kcrs->bcirjs", hc, p["wd1"])
    y = y.reshape(B, C1, HOUT, WOUT) + p["bd1"][None, :, None, None]
    s = p["bn_g"] / jnp.sqrt(p["bn_v"] + BN_EPS)
    y = (y - p["bn_m"][None, :, None, None]) * s[None, :, None, None] + p["bn_b"][None, :, None, None]
    y = jax.nn.relu(y)

    # deconv2 (stride 1, pad 4, kernel 9)
    ypad = jnp.pad(y, ((0, 0), (0, 0), (PAD2, PAD2), (PAD2, PAD2)))
    out = jnp.zeros((B, Cout, HOUT, WOUT), jnp.float32)
    for r in range(K2):
        for t in range(K2):
            patch = ypad[:, :, 8 - r:8 - r + HOUT, 8 - t:8 - t + WOUT]
            out = out + jnp.einsum("bcyx,co->boyx", patch, p["wd2"][:, :, r, t])
    return out + p["bd2"][None, :, None, None]


# ----------------------------- main ------------------------------------------------
if __name__ == "__main__":
    key = jax.random.PRNGKey(0)
    k_in, k_p = jax.random.split(key)

    B = 2
    ins = jax.random.normal(k_in, (B, NUM_OBJECTS, INPUT_DIM), jnp.float32)
    params = init_params(k_p)

    fwd = jax.jit(decoder_cnn_medium_forward)
    out = jax.block_until_ready(fwd(ins, params))
    assert out.shape == (B, OUTPUT_SIZE[0], OUTPUT_SIZE[1], OUTPUT_SIZE[2]), out.shape
    assert bool(jnp.all(jnp.isfinite(out)))

    ref = jax.block_until_ready(jax.jit(reference_forward)(ins, params))
    max_err = float(jnp.max(jnp.abs(out - ref)))
    assert max_err < 2e-3, f"mismatch vs reference: {max_err}"

    print("KERNEL_OK")
</pallas_src>

<mosaic_0001>
module attributes {stable_mosaic.version = 11 : i64} {
  func.func @_decoder_kernel(%arg0: i32, %arg1: memref<1x32x4xf32, #tpu.memory_space<vmem>>, %arg2: memref<32x32xf32, #tpu.memory_space<vmem>>, %arg3: memref<32x1xf32, #tpu.memory_space<vmem>>, %arg4: memref<32x32xf32, #tpu.memory_space<vmem>>, %arg5: memref<32x1xf32, #tpu.memory_space<vmem>>, %arg6: memref<32x1xf32, #tpu.memory_space<vmem>>, %arg7: memref<32x1xf32, #tpu.memory_space<vmem>>, %arg8: memref<16x32xf32, #tpu.memory_space<vmem>>, %arg9: memref<16x1xf32, #tpu.memory_space<vmem>>, %arg10: memref<4x800xf32, #tpu.memory_space<vmem>>, %arg11: memref<1x800xf32, #tpu.memory_space<vmem>>, %arg12: memref<1x800xf32, #tpu.memory_space<vmem>>, %arg13: memref<9x896x60xf32, #tpu.memory_space<vmem>>, %arg14: memref<1x60xf32, #tpu.memory_space<vmem>>, %arg15: memref<1x20x60xf32, #tpu.memory_space<vmem>>, %arg16: memref<28x896xf32, #tpu.memory_space<vmem>>) attributes {dimension_semantics = [#tpu.dimension_semantics<parallel>], iteration_bounds = array<i64: 2>, scalar_prefetch = 0 : i64, scratch_operands = 1 : i64, tpu.core_type = #tpu.core_type<tc>, window_params = [{transform_indices = @transform_0, window_bounds = array<i64: 1, 32, 4>}, {pipeline_mode = #tpu.pipeline_mode<synchronous>, transform_indices = @transform_1, window_bounds = array<i64: 32, 32>}, {pipeline_mode = #tpu.pipeline_mode<synchronous>, transform_indices = @transform_2, window_bounds = array<i64: 32, 1>}, {pipeline_mode = #tpu.pipeline_mode<synchronous>, transform_indices = @transform_3, window_bounds = array<i64: 32, 32>}, {pipeline_mode = #tpu.pipeline_mode<synchronous>, transform_indices = @transform_4, window_bounds = array<i64: 32, 1>}, {pipeline_mode = #tpu.pipeline_mode<synchronous>, transform_indices = @transform_5, window_bounds = array<i64: 32, 1>}, {pipeline_mode = #tpu.pipeline_mode<synchronous>, transform_indices = @transform_6, window_bounds = array<i64: 32, 1>}, {pipeline_mode = #tpu.pipeline_mode<synchronous>, transform_indices = @transform_7, window_bounds = array<i64: 16, 32>}, {pipeline_mode = #tpu.pipeline_mode<synchronous>, transform_indices = @transform_8, window_bounds = array<i64: 16, 1>}, {pipeline_mode = #tpu.pipeline_mode<synchronous>, transform_indices = @transform_9, window_bounds = array<i64: 4, 800>}, {pipeline_mode = #tpu.pipeline_mode<synchronous>, transform_indices = @transform_10, window_bounds = array<i64: 1, 800>}, {pipeline_mode = #tpu.pipeline_mode<synchronous>, transform_indices = @transform_11, window_bounds = array<i64: 1, 800>}, {pipeline_mode = #tpu.pipeline_mode<synchronous>, transform_indices = @transform_12, window_bounds = array<i64: 9, 896, 60>}, {pipeline_mode = #tpu.pipeline_mode<synchronous>, transform_indices = @transform_13, window_bounds = array<i64: 1, 60>}, {transform_indices = @transform_14, window_bounds = array<i64: 1, 20, 60>}]} {
    %c0 = arith.constant 0 : index
    %c0_0 = arith.constant 0 : index
    %c0_1 = arith.constant 0 : index
    %0 = vector.load %arg1[%c0, %c0_0, %c0_1] : memref<1x32x4xf32, #tpu.memory_space<vmem>>, vector<1x32x4xf32>
    %1 = vector.shape_cast %0 : vector<1x32x4xf32> to vector<32x4xf32>
    %c0_2 = arith.constant 0 : index
    %c0_3 = arith.constant 0 : index
    %2 = vector.load %arg2[%c0_2, %c0_3] : memref<32x32xf32, #tpu.memory_space<vmem>>, vector<32x32xf32>
    %cst = arith.constant dense<0.000000e+00> : vector<32x4xf32>
    %3 = tpu.matmul %2, %1, %cst {dimension_numbers = #tpu.dot_dimension_numbers<[1], [0], [0], [1], [0, 0, 1, 1], [], []>} : vector<32x32xf32>, vector<32x4xf32>, vector<32x4xf32> -> vector<32x4xf32>
    %c0_4 = arith.constant 0 : index
    %c0_5 = arith.constant 0 : index
    %4 = vector.load %arg3[%c0_4, %c0_5] : memref<32x1xf32, #tpu.memory_space<vmem>>, vector<32x1xf32>
    %5 = vector.broadcast %4 : vector<32x1xf32> to vector<32x4xf32>
    %6 = arith.addf %3, %5 : vector<32x4xf32>
    %cst_6 = arith.constant 0.000000e+00 : f32
    %7 = vector.broadcast %cst_6 : f32 to vector<32x4xf32>
    %8 = arith.maximumf %6, %7 : vector<32x4xf32>
    %c0_7 = arith.constant 0 : index
    %c0_8 = arith.constant 0 : index
    %9 = vector.load %arg4[%c0_7, %c0_8] : memref<32x32xf32, #tpu.memory_space<vmem>>, vector<32x32xf32>
    %cst_9 = arith.constant dense<0.000000e+00> : vector<32x4xf32>
    %10 = tpu.matmul %9, %8, %cst_9 {dimension_numbers = #tpu.dot_dimension_numbers<[1], [0], [0], [1], [0, 0, 1, 1], [], []>} : vector<32x32xf32>, vector<32x4xf32>, vector<32x4xf32> -> vector<32x4xf32>
    %c0_10 = arith.constant 0 : index
    %c0_11 = arith.constant 0 : index
    %11 = vector.load %arg5[%c0_10, %c0_11] : memref<32x1xf32, #tpu.memory_space<vmem>>, vector<32x1xf32>
    %12 = vector.broadcast %11 : vector<32x1xf32> to vector<32x4xf32>
    %13 = arith.addf %10, %12 : vector<32x4xf32>
    %cst_12 = arith.constant dense<0.000000e+00> : vector<4xf32>
    %14 = vector.multi_reduction <add>, %13, %cst_12 [0] : vector<32x4xf32> to vector<4xf32>
    %15 = vector.shape_cast %14 : vector<4xf32> to vector<1x4xf32>
    %cst_13 = arith.constant 3.200000e+01 : f32
    %16 = vector.broadcast %cst_13 : f32 to vector<1x4xf32>
    %17 = arith.divf %15, %16 : vector<1x4xf32>
    %18 = vector.broadcast %17 : vector<1x4xf32> to vector<32x4xf32>
    %19 = arith.subf %13, %18 : vector<32x4xf32>
    %20 = arith.mulf %19, %19 : vector<32x4xf32>
    %cst_14 = arith.constant dense<0.000000e+00> : vector<4xf32>
    %21 = vector.multi_reduction <add>, %20, %cst_14 [0] : vector<32x4xf32> to vector<4xf32>
    %22 = vector.shape_cast %21 : vector<4xf32> to vector<1x4xf32>
    %cst_15 = arith.constant 3.200000e+01 : f32
    %23 = vector.broadcast %cst_15 : f32 to vector<1x4xf32>
    %24 = arith.divf %22, %23 : vector<1x4xf32>
    %25 = vector.broadcast %17 : vector<1x4xf32> to vector<32x4xf32>
    %26 = arith.subf %13, %25 : vector<32x4xf32>
    %cst_16 = arith.constant 9.99999974E-6 : f32
    %27 = vector.broadcast %cst_16 : f32 to vector<1x4xf32>
    %28 = arith.addf %24, %27 : vector<1x4xf32>
    %29 = math.rsqrt %28 : vector<1x4xf32>
    %30 = vector.broadcast %29 : vector<1x4xf32> to vector<32x4xf32>
    %31 = arith.mulf %26, %30 : vector<32x4xf32>
    %c0_17 = arith.constant 0 : index
    %c0_18 = arith.constant 0 : index
    %32 = vector.load %arg6[%c0_17, %c0_18] : memref<32x1xf32, #tpu.memory_space<vmem>>, vector<32x1xf32>
    %33 = vector.broadcast %32 : vector<32x1xf32> to vector<32x4xf32>
    %34 = arith.mulf %31, %33 : vector<32x4xf32>
    %c0_19 = arith.constant 0 : index
    %c0_20 = arith.constant 0 : index
    %35 = vector.load %arg7[%c0_19, %c0_20] : memref<32x1xf32, #tpu.memory_space<vmem>>, vector<32x1xf32>
    %36 = vector.broadcast %35 : vector<32x1xf32> to vector<32x4xf32>
    %37 = arith.addf %34, %36 : vector<32x4xf32>
    %cst_21 = arith.constant 0.000000e+00 : f32
    %38 = vector.broadcast %cst_21 : f32 to vector<32x4xf32>
    %39 = arith.maximumf %37, %38 : vector<32x4xf32>
    %c0_22 = arith.constant 0 : index
    %c0_23 = arith.constant 0 : index
    %40 = vector.load %arg8[%c0_22, %c0_23] : memref<16x32xf32, #tpu.memory_space<vmem>>, vector<16x32xf32>
    %cst_24 = arith.constant dense<0.000000e+00> : vector<16x4xf32>
    %41 = tpu.matmul %40, %39, %cst_24 {dimension_numbers = #tpu.dot_dimension_numbers<[1], [0], [0], [1], [0, 0, 1, 1], [], []>} : vector<16x32xf32>, vector<32x4xf32>, vector<16x4xf32> -> vector<16x4xf32>
    %c0_25 = arith.constant 0 : index
    %c0_26 = arith.constant 0 : index
    %42 = vector.load %arg9[%c0_25, %c0_26] : memref<16x1xf32, #tpu.memory_space<vmem>>, vector<16x1xf32>
    %43 = vector.broadcast %42 : vector<16x1xf32> to vector<16x4xf32>
    %44 = arith.addf %41, %43 : vector<16x4xf32>
    %c0_27 = arith.constant 0 : index
    %c0_28 = arith.constant 0 : index
    %45 = vector.load %arg10[%c0_27, %c0_28] : memref<4x800xf32, #tpu.memory_space<vmem>>, vector<4x800xf32>
    %cst_29 = arith.constant dense<0.000000e+00> : vector<16x800xf32>
    %46 = tpu.matmul %44, %45, %cst_29 {dimension_numbers = #tpu.dot_dimension_numbers<[1], [0], [0], [1], [0, 0, 1, 1], [], []>} : vector<16x4xf32>, vector<4x800xf32>, vector<16x800xf32> -> vector<16x800xf32>
    %c0_30 = arith.constant 0 : index
    %c0_31 = arith.constant 0 : index
    %47 = vector.load %arg11[%c0_30, %c0_31] : memref<1x800xf32, #tpu.memory_space<vmem>>, vector<1x800xf32>
    %48 = vector.broadcast %47 : vector<1x800xf32> to vector<16x800xf32>
    %49 = arith.mulf %46, %48 : vector<16x800xf32>
    %c0_32 = arith.constant 0 : index
    %c0_33 = arith.constant 0 : index
    %50 = vector.load %arg12[%c0_32, %c0_33] : memref<1x800xf32, #tpu.memory_space<vmem>>, vector<1x800xf32>
    %51 = vector.broadcast %50 : vector<1x800xf32> to vector<16x800xf32>
    %52 = arith.addf %49, %51 : vector<16x800xf32>
    %cst_34 = arith.constant 0.000000e+00 : f32
    %53 = vector.broadcast %cst_34 : f32 to vector<16x800xf32>
    %54 = arith.maximumf %52, %53 : vector<16x800xf32>
    %cst_35 = arith.constant 0.000000e+00 : f32
    %55 = vector.broadcast %cst_35 : f32 to vector<28x896xf32>
    %c0_36 = arith.constant 0 : index
    %c0_37 = arith.constant 0 : index
    %56 = vector.load %arg16[%c0_36, %c0_37] : memref<28x896xf32, #tpu.memory_space<vmem>>, vector<28x896xf32>
    tpu.vector_store %arg16[%c0_36, %c0_37], %55 {strides = array<i32>} : memref<28x896xf32, #tpu.memory_space<vmem>>, vector<28x896xf32>,
    %57 = vector.extract_strided_slice %54 {offsets = [0, 0], sizes = [16, 160], strides = [1, 1]} : vector<16x800xf32> to vector<16x160xf32>
    %58 = vector.extract_strided_slice %57 {offsets = [0, 0], sizes = [1, 160], strides = [1, 1]} : vector<16x160xf32> to vector<1x160xf32>
    %c4 = arith.constant 4 : index
    %c128 = arith.constant 128 : index
    %59 = vector.load %arg16[%c4, %c128] : memref<28x896xf32, #tpu.memory_space<vmem>>, vector<1x160xf32>
    tpu.vector_store %arg16[%c4, %c128], %58 {strides = array<i32>} : memref<28x896xf32, #tpu.memory_space<vmem>>, vector<1x160xf32>,
    %60 = vector.extract_strided_slice %57 {offsets = [1, 0], sizes = [1, 160], strides = [1, 1]} : vector<16x160xf32> to vector<1x160xf32>
    %c4_38 = arith.constant 4 : index
    %c288 = arith.constant 288 : index
    %61 = vector.load %arg16[%c4_38, %c288] : memref<28x896xf32, #tpu.memory_space<vmem>>, vector<1x160xf32>
    tpu.vector_store %arg16[%c4_38, %c288], %60 {strides = array<i32>} : memref<28x896xf32, #tpu.memory_space<vmem>>, vector<1x160xf32>,
    %62 = vector.extract_strided_slice %57 {offsets = [2, 0], sizes = [1, 160], strides = [1, 1]} : vector<16x160xf32> to vector<1x160xf32>
    %c4_39 = arith.constant 4 : index
    %c448 = arith.constant 448 : index
    %63 = vector.load %arg16[%c4_39, %c448] : memref<28x896xf32, #tpu.memory_space<vmem>>, vector<1x160xf32>
    tpu.vector_store %arg16[%c4_39, %c448], %62 {strides = array<i32>} : memref<28x896xf32, #tpu.memory_space<vmem>>, vector<1x160xf32>,
    %64 = vector.extract_strided_slice %57 {offsets = [3, 0], sizes = [1, 160], strides = [1, 1]} : vector<16x160xf32> to vector<1x160xf32>
    %c4_40 = arith.constant 4 : index
    %c608 = arith.constant 608 : index
    %65 = vector.load %arg16[%c4_40, %c608] : memref<28x896xf32, #tpu.memory_space<vmem>>, vector<1x160xf32>
    tpu.vector_store %arg16[%c4_40, %c608], %64 {strides = array<i32>} : memref<28x896xf32, #tpu.memory_space<vmem>>, vector<1x160xf32>,
    %66 = vector.extract_strided_slice %57 {offsets = [4, 0], sizes = [1, 160], strides = [1, 1]} : vector<16x160xf32> to vector<1x160xf32>
    %c9 = arith.constant 9 : index
    %c128_41 = arith.constant 128 : index
    %67 = vector.load %arg16[%c9, %c128_41] : memref<28x896xf32, #tpu.memory_space<vmem>>, vector<1x160xf32>
    tpu.vector_store %arg16[%c9, %c128_41], %66 {strides = array<i32>} : memref<28x896xf32, #tpu.memory_space<vmem>>, vector<1x160xf32>,
    %68 = vector.extract_strided_slice %57 {offsets = [5, 0], sizes = [1, 160], strides = [1, 1]} : vector<16x160xf32> to vector<1x160xf32>
    %c9_42 = arith.constant 9 : index
    %c288_43 = arith.constant 288 : index
    %69 = vector.load %arg16[%c9_42, %c288_43] : memref<28x896xf32, #tpu.memory_space<vmem>>, vector<1x160xf32>
    tpu.vector_store %arg16[%c9_42, %c288_43], %68 {strides = array<i32>} : memref<28x896xf32, #tpu.memory_space<vmem>>, vector<1x160xf32>,
    %70 = vector.extract_strided_slice %57 {offsets = [6, 0], sizes = [1, 160], strides = [1, 1]} : vector<16x160xf32> to vector<1x160xf32>
    %c9_44 = arith.constant 9 : index
    %c448_45 = arith.constant 448 : index
    %71 = vector.load %arg16[%c9_44, %c448_45] : memref<28x896xf32, #tpu.memory_space<vmem>>, vector<1x160xf32>
    tpu.vector_store %arg16[%c9_44, %c448_45], %70 {strides = array<i32>} : memref<28x896xf32, #tpu.memory_space<vmem>>, vector<1x160xf32>,
    %72 = vector.extract_strided_slice %57 {offsets = [7, 0], sizes = [1, 160], strides = [1, 1]} : vector<16x160xf32> to vector<1x160xf32>
    %c9_46 = arith.constant 9 : index
    %c608_47 = arith.constant 608 : index
    %73 = vector.load %arg16[%c9_46, %c608_47] : memref<28x896xf32, #tpu.memory_space<vmem>>, vector<1x160xf32>
    tpu.vector_store %arg16[%c9_46, %c608_47], %72 {strides = array<i32>} : memref<28x896xf32, #tpu.memory_space<vmem>>, vector<1x160xf32>,
    %74 = vector.extract_strided_slice %57 {offsets = [8, 0], sizes = [1, 160], strides = [1, 1]} : vector<16x160xf32> to vector<1x160xf32>
    %c14 = arith.constant 14 : index
    %c128_48 = arith.constant 128 : index
    %75 = vector.load %arg16[%c14, %c128_48] : memref<28x896xf32, #tpu.memory_space<vmem>>, vector<1x160xf32>
    tpu.vector_store %arg16[%c14, %c128_48], %74 {strides = array<i32>} : memref<28x896xf32, #tpu.memory_space<vmem>>, vector<1x160xf32>,
    %76 = vector.extract_strided_slice %57 {offsets = [9, 0], sizes = [1, 160], strides = [1, 1]} : vector<16x160xf32> to vector<1x160xf32>
    %c14_49 = arith.constant 14 : index
    %c288_50 = arith.constant 288 : index
    %77 = vector.load %arg16[%c14_49, %c288_50] : memref<28x896xf32, #tpu.memory_space<vmem>>, vector<1x160xf32>
    tpu.vector_store %arg16[%c14_49, %c288_50], %76 {strides = array<i32>} : memref<28x896xf32, #tpu.memory_space<vmem>>, vector<1x160xf32>,
    %78 = vector.extract_strided_slice %57 {offsets = [10, 0], sizes = [1, 160], strides = [1, 1]} : vector<16x160xf32> to vector<1x160xf32>
    %c14_51 = arith.constant 14 : index
    %c448_52 = arith.constant 448 : index
    %79 = vector.load %arg16[%c14_51, %c448_52] : memref<28x896xf32, #tpu.memory_space<vmem>>, vector<1x160xf32>
    tpu.vector_store %arg16[%c14_51, %c448_52], %78 {strides = array<i32>} : memref<28x896xf32, #tpu.memory_space<vmem>>, vector<1x160xf32>,
    %80 = vector.extract_strided_slice %57 {offsets = [11, 0], sizes = [1, 160], strides = [1, 1]} : vector<16x160xf32> to vector<1x160xf32>
    %c14_53 = arith.constant 14 : index
    %c608_54 = arith.constant 608 : index
    %81 = vector.load %arg16[%c14_53, %c608_54] : memref<28x896xf32, #tpu.memory_space<vmem>>, vector<1x160xf32>
    tpu.vector_store %arg16[%c14_53, %c608_54], %80 {strides = array<i32>} : memref<28x896xf32, #tpu.memory_space<vmem>>, vector<1x160xf32>,
    %82 = vector.extract_strided_slice %57 {offsets = [12, 0], sizes = [1, 160], strides = [1, 1]} : vector<16x160xf32> to vector<1x160xf32>
    %c19 = arith.constant 19 : index
    %c128_55 = arith.constant 128 : index
    %83 = vector.load %arg16[%c19, %c128_55] : memref<28x896xf32, #tpu.memory_space<vmem>>, vector<1x160xf32>
    tpu.vector_store %arg16[%c19, %c128_55], %82 {strides = array<i32>} : memref<28x896xf32, #tpu.memory_space<vmem>>, vector<1x160xf32>,
    %84 = vector.extract_strided_slice %57 {offsets = [13, 0], sizes = [1, 160], strides = [1, 1]} : vector<16x160xf32> to vector<1x160xf32>
    %c19_56 = arith.constant 19 : index
    %c288_57 = arith.constant 288 : index
    %85 = vector.load %arg16[%c19_56, %c288_57] : memref<28x896xf32, #tpu.memory_space<vmem>>, vector<1x160xf32>
    tpu.vector_store %arg16[%c19_56, %c288_57], %84 {strides = array<i32>} : memref<28x896xf32, #tpu.memory_space<vmem>>, vector<1x160xf32>,
    %86 = vector.extract_strided_slice %57 {offsets = [14, 0], sizes = [1, 160], strides = [1, 1]} : vector<16x160xf32> to vector<1x160xf32>
    %c19_58 = arith.constant 19 : index
    %c448_59 = arith.constant 448 : index
    %87 = vector.load %arg16[%c19_58, %c448_59] : memref<28x896xf32, #tpu.memory_space<vmem>>, vector<1x160xf32>
    tpu.vector_store %arg16[%c19_58, %c448_59], %86 {strides = array<i32>} : memref<28x896xf32, #tpu.memory_space<vmem>>, vector<1x160xf32>,
    %88 = vector.extract_strided_slice %57 {offsets = [15, 0], sizes = [1, 160], strides = [1, 1]} : vector<16x160xf32> to vector<1x160xf32>
    %c19_60 = arith.constant 19 : index
    %c608_61 = arith.constant 608 : index
    %89 = vector.load %arg16[%c19_60, %c608_61] : memref<28x896xf32, #tpu.memory_space<vmem>>, vector<1x160xf32>
    tpu.vector_store %arg16[%c19_60, %c608_61], %88 {strides = array<i32>} : memref<28x896xf32, #tpu.memory_space<vmem>>, vector<1x160xf32>,
    %90 = vector.extract_strided_slice %54 {offsets = [0, 160], sizes = [16, 160], strides = [1, 1]} : vector<16x800xf32> to vector<16x160xf32>
    %91 = vector.extract_strided_slice %90 {offsets = [0, 0], sizes = [1, 160], strides = [1, 1]} : vector<16x160xf32> to vector<1x160xf32>
    %c5 = arith.constant 5 : index
    %c128_62 = arith.constant 128 : index
    %92 = vector.load %arg16[%c5, %c128_62] : memref<28x896xf32, #tpu.memory_space<vmem>>, vector<1x160xf32>
    tpu.vector_store %arg16[%c5, %c128_62], %91 {strides = array<i32>} : memref<28x896xf32, #tpu.memory_space<vmem>>, vector<1x160xf32>,
    %93 = vector.extract_strided_slice %90 {offsets = [1, 0], sizes = [1, 160], strides = [1, 1]} : vector<16x160xf32> to vector<1x160xf32>
    %c5_63 = arith.constant 5 : index
    %c288_64 = arith.constant 288 : index
    %94 = vector.load %arg16[%c5_63, %c288_64] : memref<28x896xf32, #tpu.memory_space<vmem>>, vector<1x160xf32>
    tpu.vector_store %arg16[%c5_63, %c288_64], %93 {strides = array<i32>} : memref<28x896xf32, #tpu.memory_space<vmem>>, vector<1x160xf32>,
    %95 = vector.extract_strided_slice %90 {offsets = [2, 0], sizes = [1, 160], strides = [1, 1]} : vector<16x160xf32> to vector<1x160xf32>
    %c5_65 = arith.constant 5 : index
    %c448_66 = arith.constant 448 : index
    %96 = vector.load %arg16[%c5_65, %c448_66] : memref<28x896xf32, #tpu.memory_space<vmem>>, vector<1x160xf32>
    tpu.vector_store %arg16[%c5_65, %c448_66], %95 {strides = array<i32>} : memref<28x896xf32, #tpu.memory_space<vmem>>, vector<1x160xf32>,
    %97 = vector.extract_strided_slice %90 {offsets = [3, 0], sizes = [1, 160], strides = [1, 1]} : vector<16x160xf32> to vector<1x160xf32>
    %c5_67 = arith.constant 5 : index
    %c608_68 = arith.constant 608 : index
    %98 = vector.load %arg16[%c5_67, %c608_68] : memref<28x896xf32, #tpu.memory_space<vmem>>, vector<1x160xf32>
    tpu.vector_store %arg16[%c5_67, %c608_68], %97 {strides = array<i32>} : memref<28x896xf32, #tpu.memory_space<vmem>>, vector<1x160xf32>,
    %99 = vector.extract_strided_slice %90 {offsets = [4, 0], sizes = [1, 160], strides = [1, 1]} : vector<16x160xf32> to vector<1x160xf32>
    %c10 = arith.constant 10 : index
    %c128_69 = arith.constant 128 : index
    %100 = vector.load %arg16[%c10, %c128_69] : memref<28x896xf32, #tpu.memory_space<vmem>>, vector<1x160xf32>
    tpu.vector_store %arg16[%c10, %c128_69], %99 {strides = array<i32>} : memref<28x896xf32, #tpu.memory_space<vmem>>, vector<1x160xf32>,
    %101 = vector.extract_strided_slice %90 {offsets = [5, 0], sizes = [1, 160], strides = [1, 1]} : vector<16x160xf32> to vector<1x160xf32>
    %c10_70 = arith.constant 10 : index
    %c288_71 = arith.constant 288 : index
    %102 = vector.load %arg16[%c10_70, %c288_71] : memref<28x896xf32, #tpu.memory_space<vmem>>, vector<1x160xf32>
    tpu.vector_store %arg16[%c10_70, %c288_71], %101 {strides = array<i32>} : memref<28x896xf32, #tpu.memory_space<vmem>>, vector<1x160xf32>,
    %103 = vector.extract_strided_slice %90 {offsets = [6, 0], sizes = [1, 160], strides = [1, 1]} : vector<16x160xf32> to vector<1x160xf32>
    %c10_72 = arith.constant 10 : index
    %c448_73 = arith.constant 448 : index
    %104 = vector.load %arg16[%c10_72, %c448_73] : memref<28x896xf32, #tpu.memory_space<vmem>>, vector<1x160xf32>
    tpu.vector_store %arg16[%c10_72, %c448_73], %103 {strides = array<i32>} : memref<28x896xf32, #tpu.memory_space<vmem>>, vector<1x160xf32>,
    %105 = vector.extract_strided_slice %90 {offsets = [7, 0], sizes = [1, 160], strides = [1, 1]} : vector<16x160xf32> to vector<1x160xf32>
    %c10_74 = arith.constant 10 : index
    %c608_75 = arith.constant 608 : index
    %106 = vector.load %arg16[%c10_74, %c608_75] : memref<28x896xf32, #tpu.memory_space<vmem>>, vector<1x160xf32>
    tpu.vector_store %arg16[%c10_74, %c608_75], %105 {strides = array<i32>} : memref<28x896xf32, #tpu.memory_space<vmem>>, vector<1x160xf32>,
    %107 = vector.extract_strided_slice %90 {offsets = [8, 0], sizes = [1, 160], strides = [1, 1]} : vector<16x160xf32> to vector<1x160xf32>
    %c15 = arith.constant 15 : index
    %c128_76 = arith.constant 128 : index
    %108 = vector.load %arg16[%c15, %c128_76] : memref<28x896xf32, #tpu.memory_space<vmem>>, vector<1x160xf32>
    tpu.vector_store %arg16[%c15, %c128_76], %107 {strides = array<i32>} : memref<28x896xf32, #tpu.memory_space<vmem>>, vector<1x160xf32>,
    %109 = vector.extract_strided_slice %90 {offsets = [9, 0], sizes = [1, 160], strides = [1, 1]} : vector<16x160xf32> to vector<1x160xf32>
    %c15_77 = arith.constant 15 : index
    %c288_78 = arith.constant 288 : index
    %110 = vector.load %arg16[%c15_77, %c288_78] : memref<28x896xf32, #tpu.memory_space<vmem>>, vector<1x160xf32>
    tpu.vector_store %arg16[%c15_77, %c288_78], %109 {strides = array<i32>} : memref<28x896xf32, #tpu.memory_space<vmem>>, vector<1x160xf32>,
    %111 = vector.extract_strided_slice %90 {offsets = [10, 0], sizes = [1, 160], strides = [1, 1]} : vector<16x160xf32> to vector<1x160xf32>
    %c15_79 = arith.constant 15 : index
    %c448_80 = arith.constant 448 : index
    %112 = vector.load %arg16[%c15_79, %c448_80] : memref<28x896xf32, #tpu.memory_space<vmem>>, vector<1x160xf32>
    tpu.vector_store %arg16[%c15_79, %c448_80], %111 {strides = array<i32>} : memref<28x896xf32, #tpu.memory_space<vmem>>, vector<1x160xf32>,
    %113 = vector.extract_strided_slice %90 {offsets = [11, 0], sizes = [1, 160], strides = [1, 1]} : vector<16x160xf32> to vector<1x160xf32>
    %c15_81 = arith.constant 15 : index
    %c608_82 = arith.constant 608 : index
    %114 = vector.load %arg16[%c15_81, %c608_82] : memref<28x896xf32, #tpu.memory_space<vmem>>, vector<1x160xf32>
    tpu.vector_store %arg16[%c15_81, %c608_82], %113 {strides = array<i32>} : memref<28x896xf32, #tpu.memory_space<vmem>>, vector<1x160xf32>,
    %115 = vector.extract_strided_slice %90 {offsets = [12, 0], sizes = [1, 160], strides = [1, 1]} : vector<16x160xf32> to vector<1x160xf32>
    %c20 = arith.constant 20 : index
    %c128_83 = arith.constant 128 : index
    %116 = vector.load %arg16[%c20, %c128_83] : memref<28x896xf32, #tpu.memory_space<vmem>>, vector<1x160xf32>
    tpu.vector_store %arg16[%c20, %c128_83], %115 {strides = array<i32>} : memref<28x896xf32, #tpu.memory_space<vmem>>, vector<1x160xf32>,
    %117 = vector.extract_strided_slice %90 {offsets = [13, 0], sizes = [1, 160], strides = [1, 1]} : vector<16x160xf32> to vector<1x160xf32>
    %c20_84 = arith.constant 20 : index
    %c288_85 = arith.constant 288 : index
    %118 = vector.load %arg16[%c20_84, %c288_85] : memref<28x896xf32, #tpu.memory_space<vmem>>, vector<1x160xf32>
    tpu.vector_store %arg16[%c20_84, %c288_85], %117 {strides = array<i32>} : memref<28x896xf32, #tpu.memory_space<vmem>>, vector<1x160xf32>,
    %119 = vector.extract_strided_slice %90 {offsets = [14, 0], sizes = [1, 160], strides = [1, 1]} : vector<16x160xf32> to vector<1x160xf32>
    %c20_86 = arith.constant 20 : index
    %c448_87 = arith.constant 448 : index
    %120 = vector.load %arg16[%c20_86, %c448_87] : memref<28x896xf32, #tpu.memory_space<vmem>>, vector<1x160xf32>
    tpu.vector_store %arg16[%c20_86, %c448_87], %119 {strides = array<i32>} : memref<28x896xf32, #tpu.memory_space<vmem>>, vector<1x160xf32>,
    %121 = vector.extract_strided_slice %90 {offsets = [15, 0], sizes = [1, 160], strides = [1, 1]} : vector<16x160xf32> to vector<1x160xf32>
    %c20_88 = arith.constant 20 : index
    %c608_89 = arith.constant 608 : index
    %122 = vector.load %arg16[%c20_88, %c608_89] : memref<28x896xf32, #tpu.memory_space<vmem>>, vector<1x160xf32>
    tpu.vector_store %arg16[%c20_88, %c608_89], %121 {strides = array<i32>} : memref<28x896xf32, #tpu.memory_space<vmem>>, vector<1x160xf32>,
    %123 = vector.extract_strided_slice %54 {offsets = [0, 320], sizes = [16, 160], strides = [1, 1]} : vector<16x800xf32> to vector<16x160xf32>
    %124 = vector.extract_strided_slice %123 {offsets = [0, 0], sizes = [1, 160], strides = [1, 1]} : vector<16x160xf32> to vector<1x160xf32>
    %c6 = arith.constant 6 : index
    %c128_90 = arith.constant 128 : index
    %125 = vector.load %arg16[%c6, %c128_90] : memref<28x896xf32, #tpu.memory_space<vmem>>, vector<1x160xf32>
    tpu.vector_store %arg16[%c6, %c128_90], %124 {strides = array<i32>} : memref<28x896xf32, #tpu.memory_space<vmem>>, vector<1x160xf32>,
    %126 = vector.extract_strided_slice %123 {offsets = [1, 0], sizes = [1, 160], strides = [1, 1]} : vector<16x160xf32> to vector<1x160xf32>
    %c6_91 = arith.constant 6 : index
    %c288_92 = arith.constant 288 : index
    %127 = vector.load %arg16[%c6_91, %c288_92] : memref<28x896xf32, #tpu.memory_space<vmem>>, vector<1x160xf32>
    tpu.vector_store %arg16[%c6_91, %c288_92], %126 {strides = array<i32>} : memref<28x896xf32, #tpu.memory_space<vmem>>, vector<1x160xf32>,
    %128 = vector.extract_strided_slice %123 {offsets = [2, 0], sizes = [1, 160], strides = [1, 1]} : vector<16x160xf32> to vector<1x160xf32>
    %c6_93 = arith.constant 6 : index
    %c448_94 = arith.constant 448 : index
    %129 = vector.load %arg16[%c6_93, %c448_94] : memref<28x896xf32, #tpu.memory_space<vmem>>, vector<1x160xf32>
    tpu.vector_store %arg16[%c6_93, %c448_94], %128 {strides = array<i32>} : memref<28x896xf32, #tpu.memory_space<vmem>>, vector<1x160xf32>,
    %130 = vector.extract_strided_slice %123 {offsets = [3, 0], sizes = [1, 160], strides = [1, 1]} : vector<16x160xf32> to vector<1x160xf32>
    %c6_95 = arith.constant 6 : index
    %c608_96 = arith.constant 608 : index
    %131 = vector.load %arg16[%c6_95, %c608_96] : memref<28x896xf32, #tpu.memory_space<vmem>>, vector<1x160xf32>
    tpu.vector_store %arg16[%c6_95, %c608_96], %130 {strides = array<i32>} : memref<28x896xf32, #tpu.memory_space<vmem>>, vector<1x160xf32>,
    %132 = vector.extract_strided_slice %123 {offsets = [4, 0], sizes = [1, 160], strides = [1, 1]} : vector<16x160xf32> to vector<1x160xf32>
    %c11 = arith.constant 11 : index
    %c128_97 = arith.constant 128 : index
    %133 = vector.load %arg16[%c11, %c128_97] : memref<28x896xf32, #tpu.memory_space<vmem>>, vector<1x160xf32>
    tpu.vector_store %arg16[%c11, %c128_97], %132 {strides = array<i32>} : memref<28x896xf32, #tpu.memory_space<vmem>>, vector<1x160xf32>,
    %134 = vector.extract_strided_slice %123 {offsets = [5, 0], sizes = [1, 160], strides = [1, 1]} : vector<16x160xf32> to vector<1x160xf32>
    %c11_98 = arith.constant 11 : index
    %c288_99 = arith.constant 288 : index
    %135 = vector.load %arg16[%c11_98, %c288_99] : memref<28x896xf32, #tpu.memory_space<vmem>>, vector<1x160xf32>
    tpu.vector_store %arg16[%c11_98, %c288_99], %134 {strides = array<i32>} : memref<28x896xf32, #tpu.memory_space<vmem>>, vector<1x160xf32>,
    %136 = vector.extract_strided_slice %123 {offsets = [6, 0], sizes = [1, 160], strides = [1, 1]} : vector<16x160xf32> to vector<1x160xf32>
    %c11_100 = arith.constant 11 : index
    %c448_101 = arith.constant 448 : index
    %137 = vector.load %arg16[%c11_100, %c448_101] : memref<28x896xf32, #tpu.memory_space<vmem>>, vector<1x160xf32>
    tpu.vector_store %arg16[%c11_100, %c448_101], %136 {strides = array<i32>} : memref<28x896xf32, #tpu.memory_space<vmem>>, vector<1x160xf32>,
    %138 = vector.extract_strided_slice %123 {offsets = [7, 0], sizes = [1, 160], strides = [1, 1]} : vector<16x160xf32> to vector<1x160xf32>
    %c11_102 = arith.constant 11 : index
    %c608_103 = arith.constant 608 : index
    %139 = vector.load %arg16[%c11_102, %c608_103] : memref<28x896xf32, #tpu.memory_space<vmem>>, vector<1x160xf32>
    tpu.vector_store %arg16[%c11_102, %c608_103], %138 {strides = array<i32>} : memref<28x896xf32, #tpu.memory_space<vmem>>, vector<1x160xf32>,
    %140 = vector.extract_strided_slice %123 {offsets = [8, 0], sizes = [1, 160], strides = [1, 1]} : vector<16x160xf32> to vector<1x160xf32>
    %c16 = arith.constant 16 : index
    %c128_104 = arith.constant 128 : index
    %141 = vector.load %arg16[%c16, %c128_104] : memref<28x896xf32, #tpu.memory_space<vmem>>, vector<1x160xf32>
    tpu.vector_store %arg16[%c16, %c128_104], %140 {strides = array<i32>} : memref<28x896xf32, #tpu.memory_space<vmem>>, vector<1x160xf32>,
    %142 = vector.extract_strided_slice %123 {offsets = [9, 0], sizes = [1, 160], strides = [1, 1]} : vector<16x160xf32> to vector<1x160xf32>
    %c16_105 = arith.constant 16 : index
    %c288_106 = arith.constant 288 : index
    %143 = vector.load %arg16[%c16_105, %c288_106] : memref<28x896xf32, #tpu.memory_space<vmem>>, vector<1x160xf32>
    tpu.vector_store %arg16[%c16_105, %c288_106], %142 {strides = array<i32>} : memref<28x896xf32, #tpu.memory_space<vmem>>, vector<1x160xf32>,
    %144 = vector.extract_strided_slice %123 {offsets = [10, 0], sizes = [1, 160], strides = [1, 1]} : vector<16x160xf32> to vector<1x160xf32>
    %c16_107 = arith.constant 16 : index
    %c448_108 = arith.constant 448 : index
    %145 = vector.load %arg16[%c16_107, %c448_108] : memref<28x896xf32, #tpu.memory_space<vmem>>, vector<1x160xf32>
    tpu.vector_store %arg16[%c16_107, %c448_108], %144 {strides = array<i32>} : memref<28x896xf32, #tpu.memory_space<vmem>>, vector<1x160xf32>,
    %146 = vector.extract_strided_slice %123 {offsets = [11, 0], sizes = [1, 160], strides = [1, 1]} : vector<16x160xf32> to vector<1x160xf32>
    %c16_109 = arith.constant 16 : index
    %c608_110 = arith.constant 608 : index
    %147 = vector.load %arg16[%c16_109, %c608_110] : memref<28x896xf32, #tpu.memory_space<vmem>>, vector<1x160xf32>
    tpu.vector_store %arg16[%c16_109, %c608_110], %146 {strides = array<i32>} : memref<28x896xf32, #tpu.memory_space<vmem>>, vector<1x160xf32>,
    %148 = vector.extract_strided_slice %123 {offsets = [12, 0], sizes = [1, 160], strides = [1, 1]} : vector<16x160xf32> to vector<1x160xf32>
    %c21 = arith.constant 21 : index
    %c128_111 = arith.constant 128 : index
    %149 = vector.load %arg16[%c21, %c128_111] : memref<28x896xf32, #tpu.memory_space<vmem>>, vector<1x160xf32>
    tpu.vector_store %arg16[%c21, %c128_111], %148 {strides = array<i32>} : memref<28x896xf32, #tpu.memory_space<vmem>>, vector<1x160xf32>,
    %150 = vector.extract_strided_slice %123 {offsets = [13, 0], sizes = [1, 160], strides = [1, 1]} : vector<16x160xf32> to vector<1x160xf32>
    %c21_112 = arith.constant 21 : index
    %c288_113 = arith.constant 288 : index
    %151 = vector.load %arg16[%c21_112, %c288_113] : memref<28x896xf32, #tpu.memory_space<vmem>>, vector<1x160xf32>
    tpu.vector_store %arg16[%c21_112, %c288_113], %150 {strides = array<i32>} : memref<28x896xf32, #tpu.memory_space<vmem>>, vector<1x160xf32>,
    %152 = vector.extract_strided_slice %123 {offsets = [14, 0], sizes = [1, 160], strides = [1, 1]} : vector<16x160xf32> to vector<1x160xf32>
    %c21_114 = arith.constant 21 : index
    %c448_115 = arith.constant 448 : index
    %153 = vector.load %arg16[%c21_114, %c448_115] : memref<28x896xf32, #tpu.memory_space<vmem>>, vector<1x160xf32>
    tpu.vector_store %arg16[%c21_114, %c448_115], %152 {strides = array<i32>} : memref<28x896xf32, #tpu.memory_space<vmem>>, vector<1x160xf32>,
    %154 = vector.extract_strided_slice %123 {offsets = [15, 0], sizes = [1, 160], strides = [1, 1]} : vector<16x160xf32> to vector<1x160xf32>
    %c21_116 = arith.constant 21 : index
    %c608_117 = arith.constant 608 : index
    %155 = vector.load %arg16[%c21_116, %c608_117] : memref<28x896xf32, #tpu.memory_space<vmem>>, vector<1x160xf32>
    tpu.vector_store %arg16[%c21_116, %c608_117], %154 {strides = array<i32>} : memref<28x896xf32, #tpu.memory_space<vmem>>, vector<1x160xf32>,
    %156 = vector.extract_strided_slice %54 {offsets = [0, 480], sizes = [16, 160], strides = [1, 1]} : vector<16x800xf32> to vector<16x160xf32>
    %157 = vector.extract_strided_slice %156 {offsets = [0, 0], sizes = [1, 160], strides = [1, 1]} : vector<16x160xf32> to vector<1x160xf32>
    %c7 = arith.constant 7 : index
    %c128_118 = arith.constant 128 : index
    %158 = vector.load %arg16[%c7, %c128_118] : memref<28x896xf32, #tpu.memory_space<vmem>>, vector<1x160xf32>
    tpu.vector_store %arg16[%c7, %c128_118], %157 {strides = array<i32>} : memref<28x896xf32, #tpu.memory_space<vmem>>, vector<1x160xf32>,
    %159 = vector.extract_strided_slice %156 {offsets = [1, 0], sizes = [1, 160], strides = [1, 1]} : vector<16x160xf32> to vector<1x160xf32>
    %c7_119 = arith.constant 7 : index
    %c288_120 = arith.constant 288 : index
    %160 = vector.load %arg16[%c7_119, %c288_120] : memref<28x896xf32, #tpu.memory_space<vmem>>, vector<1x160xf32>
    tpu.vector_store %arg16[%c7_119, %c288_120], %159 {strides = array<i32>} : memref<28x896xf32, #tpu.memory_space<vmem>>, vector<1x160xf32>,
    %161 = vector.extract_strided_slice %156 {offsets = [2, 0], sizes = [1, 160], strides = [1, 1]} : vector<16x160xf32> to vector<1x160xf32>
    %c7_121 = arith.constant 7 : index
    %c448_122 = arith.constant 448 : index
    %162 = vector.load %arg16[%c7_121, %c448_122] : memref<28x896xf32, #tpu.memory_space<vmem>>, vector<1x160xf32>
    tpu.vector_store %arg16[%c7_121, %c448_122], %161 {strides = array<i32>} : memref<28x896xf32, #tpu.memory_space<vmem>>, vector<1x160xf32>,
    %163 = vector.extract_strided_slice %156 {offsets = [3, 0], sizes = [1, 160], strides = [1, 1]} : vector<16x160xf32> to vector<1x160xf32>
    %c7_123 = arith.constant 7 : index
    %c608_124 = arith.constant 608 : index
    %164 = vector.load %arg16[%c7_123, %c608_124] : memref<28x896xf32, #tpu.memory_space<vmem>>, vector<1x160xf32>
    tpu.vector_store %arg16[%c7_123, %c608_124], %163 {strides = array<i32>} : memref<28x896xf32, #tpu.memory_space<vmem>>, vector<1x160xf32>,
    %165 = vector.extract_strided_slice %156 {offsets = [4, 0], sizes = [1, 160], strides = [1, 1]} : vector<16x160xf32> to vector<1x160xf32>
    %c12 = arith.constant 12 : index
    %c128_125 = arith.constant 128 : index
    %166 = vector.load %arg16[%c12, %c128_125] : memref<28x896xf32, #tpu.memory_space<vmem>>, vector<1x160xf32>
    tpu.vector_store %arg16[%c12, %c128_125], %165 {strides = array<i32>} : memref<28x896xf32, #tpu.memory_space<vmem>>, vector<1x160xf32>,
    %167 = vector.extract_strided_slice %156 {offsets = [5, 0], sizes = [1, 160], strides = [1, 1]} : vector<16x160xf32> to vector<1x160xf32>
    %c12_126 = arith.constant 12 : index
    %c288_127 = arith.constant 288 : index
    %168 = vector.load %arg16[%c12_126, %c288_127] : memref<28x896xf32, #tpu.memory_space<vmem>>, vector<1x160xf32>
    tpu.vector_store %arg16[%c12_126, %c288_127], %167 {strides = array<i32>} : memref<28x896xf32, #tpu.memory_space<vmem>>, vector<1x160xf32>,
    %169 = vector.extract_strided_slice %156 {offsets = [6, 0], sizes = [1, 160], strides = [1, 1]} : vector<16x160xf32> to vector<1x160xf32>
    %c12_128 = arith.constant 12 : index
    %c448_129 = arith.constant 448 : index
    %170 = vector.load %arg16[%c12_128, %c448_129] : memref<28x896xf32, #tpu.memory_space<vmem>>, vector<1x160xf32>
    tpu.vector_store %arg16[%c12_128, %c448_129], %169 {strides = array<i32>} : memref<28x896xf32, #tpu.memory_space<vmem>>, vector<1x160xf32>,
    %171 = vector.extract_strided_slice %156 {offsets = [7, 0], sizes = [1, 160], strides = [1, 1]} : vector<16x160xf32> to vector<1x160xf32>
    %c12_130 = arith.constant 12 : index
    %c608_131 = arith.constant 608 : index
    %172 = vector.load %arg16[%c12_130, %c608_131] : memref<28x896xf32, #tpu.memory_space<vmem>>, vector<1x160xf32>
    tpu.vector_store %arg16[%c12_130, %c608_131], %171 {strides = array<i32>} : memref<28x896xf32, #tpu.memory_space<vmem>>, vector<1x160xf32>,
    %173 = vector.extract_strided_slice %156 {offsets = [8, 0], sizes = [1, 160], strides = [1, 1]} : vector<16x160xf32> to vector<1x160xf32>
    %c17 = arith.constant 17 : index
    %c128_132 = arith.constant 128 : index
    %174 = vector.load %arg16[%c17, %c128_132] : memref<28x896xf32, #tpu.memory_space<vmem>>, vector<1x160xf32>
    tpu.vector_store %arg16[%c17, %c128_132], %173 {strides = array<i32>} : memref<28x896xf32, #tpu.memory_space<vmem>>, vector<1x160xf32>,
    %175 = vector.extract_strided_slice %156 {offsets = [9, 0], sizes = [1, 160], strides = [1, 1]} : vector<16x160xf32> to vector<1x160xf32>
    %c17_133 = arith.constant 17 : index
    %c288_134 = arith.constant 288 : index
    %176 = vector.load %arg16[%c17_133, %c288_134] : memref<28x896xf32, #tpu.memory_space<vmem>>, vector<1x160xf32>
    tpu.vector_store %arg16[%c17_133, %c288_134], %175 {strides = array<i32>} : memref<28x896xf32, #tpu.memory_space<vmem>>, vector<1x160xf32>,
    %177 = vector.extract_strided_slice %156 {offsets = [10, 0], sizes = [1, 160], strides = [1, 1]} : vector<16x160xf32> to vector<1x160xf32>
    %c17_135 = arith.constant 17 : index
    %c448_136 = arith.constant 448 : index
    %178 = vector.load %arg16[%c17_135, %c448_136] : memref<28x896xf32, #tpu.memory_space<vmem>>, vector<1x160xf32>
    tpu.vector_store %arg16[%c17_135, %c448_136], %177 {strides = array<i32>} : memref<28x896xf32, #tpu.memory_space<vmem>>, vector<1x160xf32>,
    %179 = vector.extract_strided_slice %156 {offsets = [11, 0], sizes = [1, 160], strides = [1, 1]} : vector<16x160xf32> to vector<1x160xf32>
    %c17_137 = arith.constant 17 : index
    %c608_138 = arith.constant 608 : index
    %180 = vector.load %arg16[%c17_137, %c608_138] : memref<28x896xf32, #tpu.memory_space<vmem>>, vector<1x160xf32>
    tpu.vector_store %arg16[%c17_137, %c608_138], %179 {strides = array<i32>} : memref<28x896xf32, #tpu.memory_space<vmem>>, vector<1x160xf32>,
    %181 = vector.extract_strided_slice %156 {offsets = [12, 0], sizes = [1, 160], strides = [1, 1]} : vector<16x160xf32> to vector<1x160xf32>
    %c22 = arith.constant 22 : index
    %c128_139 = arith.constant 128 : index
    %182 = vector.load %arg16[%c22, %c128_139] : memref<28x896xf32, #tpu.memory_space<vmem>>, vector<1x160xf32>
    tpu.vector_store %arg16[%c22, %c128_139], %181 {strides = array<i32>} : memref<28x896xf32, #tpu.memory_space<vmem>>, vector<1x160xf32>,
    %183 = vector.extract_strided_slice %156 {offsets = [13, 0], sizes = [1, 160], strides = [1, 1]} : vector<16x160xf32> to vector<1x160xf32>
    %c22_140 = arith.constant 22 : index
    %c288_141 = arith.constant 288 : index
    %184 = vector.load %arg16[%c22_140, %c288_141] : memref<28x896xf32, #tpu.memory_space<vmem>>, vector<1x160xf32>
    tpu.vector_store %arg16[%c22_140, %c288_141], %183 {strides = array<i32>} : memref<28x896xf32, #tpu.memory_space<vmem>>, vector<1x160xf32>,
    %185 = vector.extract_strided_slice %156 {offsets = [14, 0], sizes = [1, 160], strides = [1, 1]} : vector<16x160xf32> to vector<1x160xf32>
    %c22_142 = arith.constant 22 : index
    %c448_143 = arith.constant 448 : index
    %186 = vector.load %arg16[%c22_142, %c448_143] : memref<28x896xf32, #tpu.memory_space<vmem>>, vector<1x160xf32>
    tpu.vector_store %arg16[%c22_142, %c448_143], %185 {strides = array<i32>} : memref<28x896xf32, #tpu.memory_space<vmem>>, vector<1x160xf32>,
    %187 = vector.extract_strided_slice %156 {offsets = [15, 0], sizes = [1, 160], strides = [1, 1]} : vector<16x160xf32> to vector<1x160xf32>
    %c22_144 = arith.constant 22 : index
    %c608_145 = arith.constant 608 : index
    %188 = vector.load %arg16[%c22_144, %c608_145] : memref<28x896xf32, #tpu.memory_space<vmem>>, vector<1x160xf32>
    tpu.vector_store %arg16[%c22_144, %c608_145], %187 {strides = array<i32>} : memref<28x896xf32, #tpu.memory_space<vmem>>, vector<1x160xf32>,
    %189 = vector.extract_strided_slice %54 {offsets = [0, 640], sizes = [16, 160], strides = [1, 1]} : vector<16x800xf32> to vector<16x160xf32>
    %190 = vector.extract_strided_slice %189 {offsets = [0, 0], sizes = [1, 160], strides = [1, 1]} : vector<16x160xf32> to vector<1x160xf32>
    %c8 = arith.constant 8 : index
    %c128_146 = arith.constant 128 : index
    %191 = vector.load %arg16[%c8, %c128_146] : memref<28x896xf32, #tpu.memory_space<vmem>>, vector<1x160xf32>
    tpu.vector_store %arg16[%c8, %c128_146], %190 {strides = array<i32>} : memref<28x896xf32, #tpu.memory_space<vmem>>, vector<1x160xf32>,
    %192 = vector.extract_strided_slice %189 {offsets = [1, 0], sizes = [1, 160], strides = [1, 1]} : vector<16x160xf32> to vector<1x160xf32>
    %c8_147 = arith.constant 8 : index
    %c288_148 = arith.constant 288 : index
    %193 = vector.load %arg16[%c8_147, %c288_148] : memref<28x896xf32, #tpu.memory_space<vmem>>, vector<1x160xf32>
    tpu.vector_store %arg16[%c8_147, %c288_148], %192 {strides = array<i32>} : memref<28x896xf32, #tpu.memory_space<vmem>>, vector<1x160xf32>,
    %194 = vector.extract_strided_slice %189 {offsets = [2, 0], sizes = [1, 160], strides = [1, 1]} : vector<16x160xf32> to vector<1x160xf32>
    %c8_149 = arith.constant 8 : index
    %c448_150 = arith.constant 448 : index
    %195 = vector.load %arg16[%c8_149, %c448_150] : memref<28x896xf32, #tpu.memory_space<vmem>>, vector<1x160xf32>
    tpu.vector_store %arg16[%c8_149, %c448_150], %194 {strides = array<i32>} : memref<28x896xf32, #tpu.memory_space<vmem>>, vector<1x160xf32>,
    %196 = vector.extract_strided_slice %189 {offsets = [3, 0], sizes = [1, 160], strides = [1, 1]} : vector<16x160xf32> to vector<1x160xf32>
    %c8_151 = arith.constant 8 : index
    %c608_152 = arith.constant 608 : index
    %197 = vector.load %arg16[%c8_151, %c608_152] : memref<28x896xf32, #tpu.memory_space<vmem>>, vector<1x160xf32>
    tpu.vector_store %arg16[%c8_151, %c608_152], %196 {strides = array<i32>} : memref<28x896xf32, #tpu.memory_space<vmem>>, vector<1x160xf32>,
    %198 = vector.extract_strided_slice %189 {offsets = [4, 0], sizes = [1, 160], strides = [1, 1]} : vector<16x160xf32> to vector<1x160xf32>
    %c13 = arith.constant 13 : index
    %c128_153 = arith.constant 128 : index
    %199 = vector.load %arg16[%c13, %c128_153] : memref<28x896xf32, #tpu.memory_space<vmem>>, vector<1x160xf32>
    tpu.vector_store %arg16[%c13, %c128_153], %198 {strides = array<i32>} : memref<28x896xf32, #tpu.memory_space<vmem>>, vector<1x160xf32>,
    %200 = vector.extract_strided_slice %189 {offsets = [5, 0], sizes = [1, 160], strides = [1, 1]} : vector<16x160xf32> to vector<1x160xf32>
    %c13_154 = arith.constant 13 : index
    %c288_155 = arith.constant 288 : index
    %201 = vector.load %arg16[%c13_154, %c288_155] : memref<28x896xf32, #tpu.memory_space<vmem>>, vector<1x160xf32>
    tpu.vector_store %arg16[%c13_154, %c288_155], %200 {strides = array<i32>} : memref<28x896xf32, #tpu.memory_space<vmem>>, vector<1x160xf32>,
    %202 = vector.extract_strided_slice %189 {offsets = [6, 0], sizes = [1, 160], strides = [1, 1]} : vector<16x160xf32> to vector<1x160xf32>
    %c13_156 = arith.constant 13 : index
    %c448_157 = arith.constant 448 : index
    %203 = vector.load %arg16[%c13_156, %c448_157] : memref<28x896xf32, #tpu.memory_space<vmem>>, vector<1x160xf32>
    tpu.vector_store %arg16[%c13_156, %c448_157], %202 {strides = array<i32>} : memref<28x896xf32, #tpu.memory_space<vmem>>, vector<1x160xf32>,
    %204 = vector.extract_strided_slice %189 {offsets = [7, 0], sizes = [1, 160], strides = [1, 1]} : vector<16x160xf32> to vector<1x160xf32>
    %c13_158 = arith.constant 13 : index
    %c608_159 = arith.constant 608 : index
    %205 = vector.load %arg16[%c13_158, %c608_159] : memref<28x896xf32, #tpu.memory_space<vmem>>, vector<1x160xf32>
    tpu.vector_store %arg16[%c13_158, %c608_159], %204 {strides = array<i32>} : memref<28x896xf32, #tpu.memory_space<vmem>>, vector<1x160xf32>,
    %206 = vector.extract_strided_slice %189 {offsets = [8, 0], sizes = [1, 160], strides = [1, 1]} : vector<16x160xf32> to vector<1x160xf32>
    %c18 = arith.constant 18 : index
    %c128_160 = arith.constant 128 : index
    %207 = vector.load %arg16[%c18, %c128_160] : memref<28x896xf32, #tpu.memory_space<vmem>>, vector<1x160xf32>
    tpu.vector_store %arg16[%c18, %c128_160], %206 {strides = array<i32>} : memref<28x896xf32, #tpu.memory_space<vmem>>, vector<1x160xf32>,
    %208 = vector.extract_strided_slice %189 {offsets = [9, 0], sizes = [1, 160], strides = [1, 1]} : vector<16x160xf32> to vector<1x160xf32>
    %c18_161 = arith.constant 18 : index
    %c288_162 = arith.constant 288 : index
    %209 = vector.load %arg16[%c18_161, %c288_162] : memref<28x896xf32, #tpu.memory_space<vmem>>, vector<1x160xf32>
    tpu.vector_store %arg16[%c18_161, %c288_162], %208 {strides = array<i32>} : memref<28x896xf32, #tpu.memory_space<vmem>>, vector<1x160xf32>,
    %210 = vector.extract_strided_slice %189 {offsets = [10, 0], sizes = [1, 160], strides = [1, 1]} : vector<16x160xf32> to vector<1x160xf32>
    %c18_163 = arith.constant 18 : index
    %c448_164 = arith.constant 448 : index
    %211 = vector.load %arg16[%c18_163, %c448_164] : memref<28x896xf32, #tpu.memory_space<vmem>>, vector<1x160xf32>
    tpu.vector_store %arg16[%c18_163, %c448_164], %210 {strides = array<i32>} : memref<28x896xf32, #tpu.memory_space<vmem>>, vector<1x160xf32>,
    %212 = vector.extract_strided_slice %189 {offsets = [11, 0], sizes = [1, 160], strides = [1, 1]} : vector<16x160xf32> to vector<1x160xf32>
    %c18_165 = arith.constant 18 : index
    %c608_166 = arith.constant 608 : index
    %213 = vector.load %arg16[%c18_165, %c608_166] : memref<28x896xf32, #tpu.memory_space<vmem>>, vector<1x160xf32>
    tpu.vector_store %arg16[%c18_165, %c608_166], %212 {strides = array<i32>} : memref<28x896xf32, #tpu.memory_space<vmem>>, vector<1x160xf32>,
    %214 = vector.extract_strided_slice %189 {offsets = [12, 0], sizes = [1, 160], strides = [1, 1]} : vector<16x160xf32> to vector<1x160xf32>
    %c23 = arith.constant 23 : index
    %c128_167 = arith.constant 128 : index
    %215 = vector.load %arg16[%c23, %c128_167] : memref<28x896xf32, #tpu.memory_space<vmem>>, vector<1x160xf32>
    tpu.vector_store %arg16[%c23, %c128_167], %214 {strides = array<i32>} : memref<28x896xf32, #tpu.memory_space<vmem>>, vector<1x160xf32>,
    %216 = vector.extract_strided_slice %189 {offsets = [13, 0], sizes = [1, 160], strides = [1, 1]} : vector<16x160xf32> to vector<1x160xf32>
    %c23_168 = arith.constant 23 : index
    %c288_169 = arith.constant 288 : index
    %217 = vector.load %arg16[%c23_168, %c288_169] : memref<28x896xf32, #tpu.memory_space<vmem>>, vector<1x160xf32>
    tpu.vector_store %arg16[%c23_168, %c288_169], %216 {strides = array<i32>} : memref<28x896xf32, #tpu.memory_space<vmem>>, vector<1x160xf32>,
    %218 = vector.extract_strided_slice %189 {offsets = [14, 0], sizes = [1, 160], strides = [1, 1]} : vector<16x160xf32> to vector<1x160xf32>
    %c23_170 = arith.constant 23 : index
    %c448_171 = arith.constant 448 : index
    %219 = vector.load %arg16[%c23_170, %c448_171] : memref<28x896xf32, #tpu.memory_space<vmem>>, vector<1x160xf32>
    tpu.vector_store %arg16[%c23_170, %c448_171], %218 {strides = array<i32>} : memref<28x896xf32, #tpu.memory_space<vmem>>, vector<1x160xf32>,
    %220 = vector.extract_strided_slice %189 {offsets = [15, 0], sizes = [1, 160], strides = [1, 1]} : vector<16x160xf32> to vector<1x160xf32>
    %c23_172 = arith.constant 23 : index
    %c608_173 = arith.constant 608 : index
    %221 = vector.load %arg16[%c23_172, %c608_173] : memref<28x896xf32, #tpu.memory_space<vmem>>, vector<1x160xf32>
    tpu.vector_store %arg16[%c23_172, %c608_173], %220 {strides = array<i32>} : memref<28x896xf32, #tpu.memory_space<vmem>>, vector<1x160xf32>,
    %cst_174 = arith.constant 0.000000e+00 : f32
    %222 = vector.broadcast %cst_174 : f32 to vector<20x60xf32>
    %c0_175 = arith.constant 0 : index
    %c0_176 = arith.constant 0 : index
    %223 = vector.load %arg16[%c0_175, %c0_176] : memref<28x896xf32, #tpu.memory_space<vmem>>, vector<20x896xf32>
    %c0_177 = arith.constant 0 : index
    %c0_178 = arith.constant 0 : index
    %c0_179 = arith.constant 0 : index
    %224 = vector.load %arg13[%c0_177, %c0_178, %c0_179] : memref<9x896x60xf32, #tpu.memory_space<vmem>>, vector<1x896x60xf32>
    %225 = vector.shape_cast %224 : vector<1x896x60xf32> to vector<896x60xf32>
    %cst_180 = arith.constant dense<0.000000e+00> : vector<20x60xf32>
    %226 = tpu.matmul %223, %225, %cst_180 {dimension_numbers = #tpu.dot_dimension_numbers<[1], [0], [0], [1], [0, 0, 1, 1], [], []>} : vector<20x896xf32>, vector<896x60xf32>, vector<20x60xf32> -> vector<20x60xf32>
    %227 = arith.addf %222, %226 : vector<20x60xf32>
    %c1 = arith.constant 1 : index
    %c0_181 = arith.constant 0 : index
    %228 = vector.load %arg16[%c1, %c0_181] : memref<28x896xf32, #tpu.memory_space<vmem>>, vector<20x896xf32>
    %c1_182 = arith.constant 1 : index
    %c0_183 = arith.constant 0 : index
    %c0_184 = arith.constant 0 : index
    %229 = vector.load %arg13[%c1_182, %c0_183, %c0_184] : memref<9x896x60xf32, #tpu.memory_space<vmem>>, vector<1x896x60xf32>
    %230 = vector.shape_cast %229 : vector<1x896x60xf32> to vector<896x60xf32>
    %cst_185 = arith.constant dense<0.000000e+00> : vector<20x60xf32>
    %231 = tpu.matmul %228, %230, %cst_185 {dimension_numbers = #tpu.dot_dimension_numbers<[1], [0], [0], [1], [0, 0, 1, 1], [], []>} : vector<20x896xf32>, vector<896x60xf32>, vector<20x60xf32> -> vector<20x60xf32>
    %232 = arith.addf %227, %231 : vector<20x60xf32>
    %c2 = arith.constant 2 : index
    %c0_186 = arith.constant 0 : index
    %233 = vector.load %arg16[%c2, %c0_186] : memref<28x896xf32, #tpu.memory_space<vmem>>, vector<20x896xf32>
    %c2_187 = arith.constant 2 : index
    %c0_188 = arith.constant 0 : index
    %c0_189 = arith.constant 0 : index
    %234 = vector.load %arg13[%c2_187, %c0_188, %c0_189] : memref<9x896x60xf32, #tpu.memory_space<vmem>>, vector<1x896x60xf32>
    %235 = vector.shape_cast %234 : vector<1x896x60xf32> to vector<896x60xf32>
    %cst_190 = arith.constant dense<0.000000e+00> : vector<20x60xf32>
    %236 = tpu.matmul %233, %235, %cst_190 {dimension_numbers = #tpu.dot_dimension_numbers<[1], [0], [0], [1], [0, 0, 1, 1], [], []>} : vector<20x896xf32>, vector<896x60xf32>, vector<20x60xf32> -> vector<20x60xf32>
    %237 = arith.addf %232, %236 : vector<20x60xf32>
    %c3 = arith.constant 3 : index
    %c0_191 = arith.constant 0 : index
    %238 = vector.load %arg16[%c3, %c0_191] : memref<28x896xf32, #tpu.memory_space<vmem>>, vector<20x896xf32>
    %c3_192 = arith.constant 3 : index
    %c0_193 = arith.constant 0 : index
    %c0_194 = arith.constant 0 : index
    %239 = vector.load %arg13[%c3_192, %c0_193, %c0_194] : memref<9x896x60xf32, #tpu.memory_space<vmem>>, vector<1x896x60xf32>
    %240 = vector.shape_cast %239 : vector<1x896x60xf32> to vector<896x60xf32>
    %cst_195 = arith.constant dense<0.000000e+00> : vector<20x60xf32>
    %241 = tpu.matmul %238, %240, %cst_195 {dimension_numbers = #tpu.dot_dimension_numbers<[1], [0], [0], [1], [0, 0, 1, 1], [], []>} : vector<20x896xf32>, vector<896x60xf32>, vector<20x60xf32> -> vector<20x60xf32>
    %242 = arith.addf %237, %241 : vector<20x60xf32>
    %c4_196 = arith.constant 4 : index
    %c0_197 = arith.constant 0 : index
    %243 = vector.load %arg16[%c4_196, %c0_197] : memref<28x896xf32, #tpu.memory_space<vmem>>, vector<20x896xf32>
    %c4_198 = arith.constant 4 : index
    %c0_199 = arith.constant 0 : index
    %c0_200 = arith.constant 0 : index
    %244 = vector.load %arg13[%c4_198, %c0_199, %c0_200] : memref<9x896x60xf32, #tpu.memory_space<vmem>>, vector<1x896x60xf32>
    %245 = vector.shape_cast %244 : vector<1x896x60xf32> to vector<896x60xf32>
    %cst_201 = arith.constant dense<0.000000e+00> : vector<20x60xf32>
    %246 = tpu.matmul %243, %245, %cst_201 {dimension_numbers = #tpu.dot_dimension_numbers<[1], [0], [0], [1], [0, 0, 1, 1], [], []>} : vector<20x896xf32>, vector<896x60xf32>, vector<20x60xf32> -> vector<20x60xf32>
    %247 = arith.addf %242, %246 : vector<20x60xf32>
    %c5_202 = arith.constant 5 : index
    %c0_203 = arith.constant 0 : index
    %248 = vector.load %arg16[%c5_202, %c0_203] : memref<28x896xf32, #tpu.memory_space<vmem>>, vector<20x896xf32>
    %c5_204 = arith.constant 5 : index
    %c0_205 = arith.constant 0 : index
    %c0_206 = arith.constant 0 : index
    %249 = vector.load %arg13[%c5_204, %c0_205, %c0_206] : memref<9x896x60xf32, #tpu.memory_space<vmem>>, vector<1x896x60xf32>
    %250 = vector.shape_cast %249 : vector<1x896x60xf32> to vector<896x60xf32>
    %cst_207 = arith.constant dense<0.000000e+00> : vector<20x60xf32>
    %251 = tpu.matmul %248, %250, %cst_207 {dimension_numbers = #tpu.dot_dimension_numbers<[1], [0], [0], [1], [0, 0, 1, 1], [], []>} : vector<20x896xf32>, vector<896x60xf32>, vector<20x60xf32> -> vector<20x60xf32>
    %252 = arith.addf %247, %251 : vector<20x60xf32>
    %c6_208 = arith.constant 6 : index
    %c0_209 = arith.constant 0 : index
    %253 = vector.load %arg16[%c6_208, %c0_209] : memref<28x896xf32, #tpu.memory_space<vmem>>, vector<20x896xf32>
    %c6_210 = arith.constant 6 : index
    %c0_211 = arith.constant 0 : index
    %c0_212 = arith.constant 0 : index
    %254 = vector.load %arg13[%c6_210, %c0_211, %c0_212] : memref<9x896x60xf32, #tpu.memory_space<vmem>>, vector<1x896x60xf32>
    %255 = vector.shape_cast %254 : vector<1x896x60xf32> to vector<896x60xf32>
    %cst_213 = arith.constant dense<0.000000e+00> : vector<20x60xf32>
    %256 = tpu.matmul %253, %255, %cst_213 {dimension_numbers = #tpu.dot_dimension_numbers<[1], [0], [0], [1], [0, 0, 1, 1], [], []>} : vector<20x896xf32>, vector<896x60xf32>, vector<20x60xf32> -> vector<20x60xf32>
    %257 = arith.addf %252, %256 : vector<20x60xf32>
    %c7_214 = arith.constant 7 : index
    %c0_215 = arith.constant 0 : index
    %258 = vector.load %arg16[%c7_214, %c0_215] : memref<28x896xf32, #tpu.memory_space<vmem>>, vector<20x896xf32>
    %c7_216 = arith.constant 7 : index
    %c0_217 = arith.constant 0 : index
    %c0_218 = arith.constant 0 : index
    %259 = vector.load %arg13[%c7_216, %c0_217, %c0_218] : memref<9x896x60xf32, #tpu.memory_space<vmem>>, vector<1x896x60xf32>
    %260 = vector.shape_cast %259 : vector<1x896x60xf32> to vector<896x60xf32>
    %cst_219 = arith.constant dense<0.000000e+00> : vector<20x60xf32>
    %261 = tpu.matmul %258, %260, %cst_219 {dimension_numbers = #tpu.dot_dimension_numbers<[1], [0], [0], [1], [0, 0, 1, 1], [], []>} : vector<20x896xf32>, vector<896x60xf32>, vector<20x60xf32> -> vector<20x60xf32>
    %262 = arith.addf %257, %261 : vector<20x60xf32>
    %c8_220 = arith.constant 8 : index
    %c0_221 = arith.constant 0 : index
    %263 = vector.load %arg16[%c8_220, %c0_221] : memref<28x896xf32, #tpu.memory_space<vmem>>, vector<20x896xf32>
    %c8_222 = arith.constant 8 : index
    %c0_223 = arith.constant 0 : index
    %c0_224 = arith.constant 0 : index
    %264 = vector.load %arg13[%c8_222, %c0_223, %c0_224] : memref<9x896x60xf32, #tpu.memory_space<vmem>>, vector<1x896x60xf32>
    %265 = vector.shape_cast %264 : vector<1x896x60xf32> to vector<896x60xf32>
    %cst_225 = arith.constant dense<0.000000e+00> : vector<20x60xf32>
    %266 = tpu.matmul %263, %265, %cst_225 {dimension_numbers = #tpu.dot_dimension_numbers<[1], [0], [0], [1], [0, 0, 1, 1], [], []>} : vector<20x896xf32>, vector<896x60xf32>, vector<20x60xf32> -> vector<20x60xf32>
    %267 = arith.addf %262, %266 : vector<20x60xf32>
    %c0_226 = arith.constant 0 : index
    %c0_227 = arith.constant 0 : index
    %268 = vector.load %arg14[%c0_226, %c0_227] : memref<1x60xf32, #tpu.memory_space<vmem>>, vector<1x60xf32>
    %269 = vector.broadcast %268 : vector<1x60xf32> to vector<20x60xf32>
    %270 = arith.addf %267, %269 : vector<20x60xf32>
    %c0_228 = arith.constant 0 : index
    %c0_229 = arith.constant 0 : index
    %c0_230 = arith.constant 0 : index
    %271 = vector.load %arg15[%c0_228, %c0_229, %c0_230] : memref<1x20x60xf32, #tpu.memory_space<vmem>>, vector<1x20x60xf32>
    %272 = vector.shape_cast %271 : vector<1x20x60xf32> to vector<20x60xf32>
    %273 = vector.shape_cast %270 : vector<20x60xf32> to vector<1x20x60xf32>
    tpu.vector_store %arg15[%c0_228, %c0_229, %c0_230], %273 {strides = array<i32>} : memref<1x20x60xf32, #tpu.memory_space<vmem>>, vector<1x20x60xf32>,
    return
  }
  func.func @transform_0(%arg0: i32) -> (i32, i32, i32) {
    %c0_i32 = arith.constant 0 : i32
    %c0_i32_0 = arith.constant 0 : i32
    %c0_i32_1 = arith.constant 0 : i32
    return %arg0, %c0_i32, %c0_i32_0 : i32, i32, i32
  }
  func.func @transform_1(%arg0: i32) -> (i32, i32) {
    %c0_i32 = arith.constant 0 : i32
    %c0_i32_0 = arith.constant 0 : i32
    %c0_i32_1 = arith.constant 0 : i32
    return %c0_i32, %c0_i32_0 : i32, i32
  }
  func.func @transform_2(%arg0: i32) -> (i32, i32) {
    %c0_i32 = arith.constant 0 : i32
    %c0_i32_0 = arith.constant 0 : i32
    %c0_i32_1 = arith.constant 0 : i32
    return %c0_i32, %c0_i32_0 : i32, i32
  }
  func.func @transform_3(%arg0: i32) -> (i32, i32) {
    %c0_i32 = arith.constant 0 : i32
    %c0_i32_0 = arith.constant 0 : i32
    %c0_i32_1 = arith.constant 0 : i32
    return %c0_i32, %c0_i32_0 : i32, i32
  }
  func.func @transform_4(%arg0: i32) -> (i32, i32) {
    %c0_i32 = arith.constant 0 : i32
    %c0_i32_0 = arith.constant 0 : i32
    %c0_i32_1 = arith.constant 0 : i32
    return %c0_i32, %c0_i32_0 : i32, i32
  }
  func.func @transform_5(%arg0: i32) -> (i32, i32) {
    %c0_i32 = arith.constant 0 : i32
    %c0_i32_0 = arith.constant 0 : i32
    %c0_i32_1 = arith.constant 0 : i32
    return %c0_i32, %c0_i32_0 : i32, i32
  }
  func.func @transform_6(%arg0: i32) -> (i32, i32) {
    %c0_i32 = arith.constant 0 : i32
    %c0_i32_0 = arith.constant 0 : i32
    %c0_i32_1 = arith.constant 0 : i32
    return %c0_i32, %c0_i32_0 : i32, i32
  }
  func.func @transform_7(%arg0: i32) -> (i32, i32) {
    %c0_i32 = arith.constant 0 : i32
    %c0_i32_0 = arith.constant 0 : i32
    %c0_i32_1 = arith.constant 0 : i32
    return %c0_i32, %c0_i32_0 : i32, i32
  }
  func.func @transform_8(%arg0: i32) -> (i32, i32) {
    %c0_i32 = arith.constant 0 : i32
    %c0_i32_0 = arith.constant 0 : i32
    %c0_i32_1 = arith.constant 0 : i32
    return %c0_i32, %c0_i32_0 : i32, i32
  }
  func.func @transform_9(%arg0: i32) -> (i32, i32) {
    %c0_i32 = arith.constant 0 : i32
    %c0_i32_0 = arith.constant 0 : i32
    %c0_i32_1 = arith.constant 0 : i32
    return %c0_i32, %c0_i32_0 : i32, i32
  }
  func.func @transform_10(%arg0: i32) -> (i32, i32) {
    %c0_i32 = arith.constant 0 : i32
    %c0_i32_0 = arith.constant 0 : i32
    %c0_i32_1 = arith.constant 0 : i32
    return %c0_i32, %c0_i32_0 : i32, i32
  }
  func.func @transform_11(%arg0: i32) -> (i32, i32) {
    %c0_i32 = arith.constant 0 : i32
    %c0_i32_0 = arith.constant 0 : i32
    %c0_i32_1 = arith.constant 0 : i32
    return %c0_i32, %c0_i32_0 : i32, i32
  }
  func.func @transform_12(%arg0: i32) -> (i32, i32, i32) {
    %c0_i32 = arith.constant 0 : i32
    %c0_i32_0 = arith.constant 0 : i32
    %c0_i32_1 = arith.constant 0 : i32
    %c0_i32_2 = arith.constant 0 : i32
    return %c0_i32, %c0_i32_0, %c0_i32_1 : i32, i32, i32
  }
  func.func @transform_13(%arg0: i32) -> (i32, i32) {
    %c0_i32 = arith.constant 0 : i32
    %c0_i32_0 = arith.constant 0 : i32
    %c0_i32_1 = arith.constant 0 : i32
    return %c0_i32, %c0_i32_0 : i32, i32
  }
  func.func @transform_14(%arg0: i32) -> (i32, i32, i32) {
    %c0_i32 = arith.constant 0 : i32
    %c0_i32_0 = arith.constant 0 : i32
    %c0_i32_1 = arith.constant 0 : i32
    return %arg0, %c0_i32, %c0_i32_0 : i32, i32, i32
  }
}

</mosaic_0001>

<bundles_post_ra>
// kernel: decoder_cnn_medium_forward.1
= control target key start
LH: loop header
LB: loop body
LE: loop exit
PB: predicated region body
PF: predicated region fallthrough
CT: control target
= control target key end

     0   :  { %s9976_s29 = smov 0   ;;  %s14605_s0 = inlined_call_operand.vmem [shape: f32[2,32,4], index: 0, kind: input, shape index: {}]   ;;  %s14606_s1 = inlined_call_operand.vmem [shape: f32[32,32], index: 1, kind: input, shape index: {}]   ;;  %s14607_s2 = inlined_call_operand.vmem [shape: f32[32,1], index: 2, kind: input, shape index: {}]   ;;  %s14608_s3 = inlined_call_operand.vmem [shape: f32[32,32], index: 3, kind: input, shape index: {}]   ;;  %s14609_s4 = inlined_call_operand.vmem [shape: f32[32,1], index: 4, kind: input, shape index: {}]   ;;  %s14610_s5 = inlined_call_operand.vmem [shape: f32[32,1], index: 5, kind: input, shape index: {}]   ;;  %s14611_s6 = inlined_call_operand.vmem [shape: f32[32,1], index: 6, kind: input, shape index: {}]   ;;  %s14612_s7 = inlined_call_operand.vmem [shape: f32[16,32], index: 7, kind: input, shape index: {}]   ;;  %s14613_s8 = inlined_call_operand.vmem [shape: f32[16,1], index: 8, kind: input, shape index: {}]   ;;  %s14614_s9 = inlined_call_operand.vmem [shape: f32[4,800], index: 9, kind: input, shape index: {}]   ;;  %s14615_s10 = inlined_call_operand.vmem [shape: f32[1,800], index: 10, kind: input, shape index: {}]   ;;  %s14616_s11 = inlined_call_operand.vmem [shape: f32[1,800], index: 11, kind: input, shape index: {}]   ;;  %s14617_s12 = inlined_call_operand.vmem [shape: f32[9,896,60], index: 12, kind: input, shape index: {}]   ;;  %s14618_s13 = inlined_call_operand.vmem [shape: f32[1,60], index: 13, kind: input, shape index: {}]   ;;  %s14619_s14 = inlined_call_operand.vmem [shape: f32[2,20,60], index: 14, kind: output, shape index: {}]  }
   0x1 LB: > { %s7183_s30 = sadd.s32 4294967295, %s9892_s29   ;;  %p7187_p0 = scmp.ge.s32.totalorder %s9892_s29, 1  ;;  %s9892_s29 = sphi %s9976_s29, %s24_s29  }
   0x2   : > { %p412_p1 = scmp.lt.s32.totalorder %s9892_s29, 3 }
   0x4   : > { %p413_p2 = pnand %p7187_p0, %p412_p1 }
   0x5   : > { %p458_p3 = scmp.lt.s32.totalorder (!%p413_p2), %s7183_s30, 1  ;;  %s9897_s17 = smov (!%p413_p2), 96  }
   0x6   : > { %416 = sbr.rel (%p413_p2) target bundleno = 1955 (0x7a3), region = 76  ;;  %s9898_s18 = smov (!%p413_p2), 64  }
   0x7   : > { %s9899_s19 = smov (!%p413_p2), 32  }
   0xb   : > { %v472_v0 = vld [vmem:[%s14606_s1] sm:$0xff]  ;;  %vm500_vm0 = vcmask 261120   ;;  %v9894_v1 = vmov 0   ;;  %v479_v2 = vld [vmem:[%s14607_s2 + $0x18] sm:$0xff]  ;;  %s14629_s30 = smov (!%p458_p3, %s7183_s30), 1  ;;  %v477_v3 = vld [vmem:[%s14607_s2 + $0x8] sm:$0xff] }
   0xc   : > { %9427 = vmatprep.mubr.msk.f32.mxu0 %vm500_vm0, %v472_v0  ;;  %9848 = vset.pattern.permute.xlu0 %v9894_v1  ;;  %v478_v4 = vld [vmem:[%s14607_s2 + $0x10] sm:$0xff]  ;;  %s8115_s23 = sshll.u32 %s14629_s30, 5  ;;  %v476_v5 = vld [vmem:[%s14607_s2] sm:$0xff]  ;;  %v607_v10 = vld [vmem:[%s14609_s4 + $0x8] sm:$0xff]  ;;  %vm943_vm1 = vcmask 1043456   ;;  %vm727_vm2 = vcmask 31744  }
   0xd   : > { %497 = vperm.xlu0 %9848, %v479_v2   ;;  %9849 = vset.pattern.permute.xlu1 %v9894_v1  ;;  %s462_s28 = scalar_lea.vmem %s14605_s0, %s8115_s23  ;;  %v606_v8 = vld [vmem:[%s14609_s4] sm:$0xff]  ;;  %v608_v12 = vld [vmem:[%s14609_s4 + $0x10] sm:$0xff]  ;;  %v473_v13 = vld [vmem:[%s14606_s1 + $0x8] sm:$0xff]  ;;  %vm1469_vm6 = vcmask 785408   ;;  %vm1456_vm8 = vcmask 523264   ;;  %vm2778_vm12 = vcmask 1046528  }
   0xe   : > { %487 = vperm.xlu1 %9849, %v477_v3   ;;  %v471_v6 = vld [vmem:[%s462_s28 + $0x18] sm:$0xff]  ;;  %v470_v7 = vld [vmem:[%s462_s28 + $0x10] sm:$0xff]  ;;  %v469_v9 = vld [vmem:[%s462_s28 + $0x8] sm:$0xff]  ;;  %s9832_s25 = smul.u32 24, %s14629_s30 }
   0xf   : > { %9419 = vmatprep.subr.mxu0 %v471_v6  ;;  %v468_v11 = vld [vmem:[%s462_s28] sm:$0xff]  ;;  %v609_v14 = vld [vmem:[%s14609_s4 + $0x18] sm:$0xff]  ;;  %v474_v15 = vld [vmem:[%s14606_s1 + $0x10] sm:$0xff] }
  0x10   : > { %9420 = vmatpush3.msra.mxu0 %v471_v6  ;;  %v774_v16 = vld [vmem:[%s14610_s5 + $0x18] sm:$0xff]  ;;  %v773_v18 = vld [vmem:[%s14610_s5 + $0x10] sm:$0xff]  ;;  %v772_v20 = vld [vmem:[%s14610_s5 + $0x8] sm:$0xff] }
  0x11   : > { %492 = vperm.xlu0 %9848, %v478_v4   ;;  %9421 = vmatprep.subr.mxu0 %v470_v7  ;;  %v475_v17 = vld [vmem:[%s14606_s1 + $0x18] sm:$0xff]  ;;  %v801_v21 = vld [vmem:[%s14611_s6 + $0x10] sm:$0xff]  ;;  %v771_v22 = vld [vmem:[%s14610_s5] sm:$0xff] }
  0x12   : > { %482 = vperm.xlu1 %9849, %v476_v5   ;;  %9422 = vmatpush3.msra.mxu0 %v470_v7  ;;  %v802_v19 = vld [vmem:[%s14611_s6 + $0x18] sm:$0xff]  ;;  %v800_v23 = vld [vmem:[%s14611_s6 + $0x8] sm:$0xff]  ;;  %v799_v24 = vld [vmem:[%s14611_s6] sm:$0xff] }
  0x13   : > { %9423 = vmatprep.subr.mxu0 %v469_v9  ;;  %v833_v25 = vld [vmem:[%s14613_s8] sm:$0xff]  ;;  %v834_v26 = vld [vmem:[%s14613_s8 + $0x8] sm:$0xff]  ;;  %v604_v45 = vld [vmem:[%s14608_s3 + $0x10] sm:$0xff] }
  0x14   : > { %9424 = vmatpush3.msra.mxu0 %v469_v9  ;;  %v602_v27 = vld [vmem:[%s14608_s3] sm:$0xff]  ;;  %v603_v44 = vld [vmem:[%s14608_s3 + $0x8] sm:$0xff]  ;;  %v605_v46 = vld [vmem:[%s14608_s3 + $0x18] sm:$0xff] }
  0x15   : > { %612 = vperm.xlu0 %9848, %v606_v8   ;;  %9425 = vmatprep.subr.mxu0 %v468_v11  ;;  %v831_v47 = vld [vmem:[%s14612_s7] sm:$0xff] }
  0x16   : > { %617 = vperm.xlu1 %9849, %v607_v10   ;;  %9426 = vmatpush3.msra.mxu0 %v468_v11  ;;  %v926_v48 = vld [vmem:[%s14614_s9] sm:$0xff] }
  0x17   : > { %9428 = vmatmul.mubr.msk.f32.vlgmr.msra.gmra.mxu0 %vm500_vm0, %v473_v13  ;;  %9441 = vmatprep.mubr.msk.f32.mxu1 %vm500_vm0, %v602_v27  ;;  %v934_v49 = vcombine.high %v926_v48, %v926_v48 }
  0x18   : > { %9430 = vmatprep.mubr.msk.f32.mxu0 %vm500_vm0, %v474_v15 }
  0x19   : > { %622 = vperm.xlu0 %9848, %v608_v12  }
  0x1a   : > { %627 = vperm.xlu1 %9849, %v609_v14  }
  0x1b   : > { %9431 = vmatmul.mubr.msk.f32.gmra.mxu0 %vm500_vm0, %v475_v17 }
  0x1c   : > { %9455 = vmatprep.mubr.msk.f32.mxu0 %vm500_vm0, %v831_v47 }
  0x1d   : > { %792 = vperm.xlu0 %9848, %v774_v16  }
  0x1e   : > { %787 = vperm.xlu1 %9849, %v773_v18  }
  0x21   : > { %820 = vperm.xlu0 %9848, %v802_v19  }
  0x22   : > { %782 = vperm.xlu1 %9849, %v772_v20  }
  0x25   : > { %815 = vperm.xlu0 %9848, %v801_v21  }
  0x26   : > { %777 = vperm.xlu1 %9849, %v771_v22  }
  0x29   : > { %810 = vperm.xlu0 %9848, %v800_v23  }
  0x2a   : > { %805 = vperm.xlu1 %9849, %v799_v24  }
  0x2d   : > { %837 = vperm.xlu0 %9848, %v833_v25  }
  0x2e   : > { %842 = vperm.xlu1 %9849, %v834_v26  }
  0x88   : > { %v498_v28 = vpop.permute.xlu0 %497 }
  0x89   : > { %v488_v30 = vpop.permute.xlu1 %487 }
  0x8c   : > { %v493_v34 = vpop.permute.xlu0 %492 }
  0x8d   : > { %v483_v39 = vpop.permute.xlu1 %482 }
  0x90   : > { %v613_v50 = vpop.permute.xlu0 %612 }
  0x91   : > { %v618_v51 = vpop.permute.xlu1 %617 }
  0x94   : > { %v623_v57 = vpop.permute.xlu0 %622 }
  0x95   : > { %v628_v59 = vpop.permute.xlu1 %627 }
  0xd7   : > { %v9429_v29 = vpop.f32.mrf.mxu0 }
  0xd8   : > { %v585_v36 = vadd.f32 %v9429_v29, %v488_v30 }
  0xd9   : > { %v579_v31 = vpop.f32.mrf.mxu0 }
  0xda   : > { %v580_v40 = vadd.f32 %v579_v31, %v483_v39  ;;  %v599_v42 = vmax.f32 %v585_v36, 0.0  ;;  %v788_v36 = vpop.permute.xlu1 %787 }
  0xdb   : > { %v9432_v32 = vpop.f32.mrf.mxu0 }
  0xdc   : > { %v595_v33 = vadd.f32 %v9432_v32, %v498_v28  ;;  %v598_v43 = vmax.f32 %v580_v40, 0.0 }
  0xdd   : > { %v589_v35 = vpop.f32.mrf.mxu0 }
  0xde   : > { %v601_v37 = vmax.f32 %v595_v33, 0.0  ;;  %v590_v38 = vadd.f32 %v589_v35, %v493_v34  ;;  %v793_v35 = vpop.permute.xlu0 %792 }
  0xe0   : > { %v600_v41 = vmax.f32 %v590_v38, 0.0  ;;  %9433 = vmatprep.subr.mxu1 %v601_v37  ;;  %v783_v38 = vpop.permute.xlu1 %782 }
  0xe1   : > { %9434 = vmatpush3.msra.mxu1 %v601_v37 }
  0xe2   : > { %9435 = vmatprep.subr.mxu1 %v600_v41  ;;  %v821_v37 = vpop.permute.xlu0 %820 }
  0xe3   : > { %9436 = vmatpush3.msra.mxu1 %v600_v41 }
  0xe4   : > { %9437 = vmatprep.subr.mxu1 %v599_v42 }
  0xe5   : > { %9438 = vmatpush3.msra.mxu1 %v599_v42 }
  0xe6   : > { %9439 = vmatprep.subr.mxu1 %v598_v43  ;;  %v816_v40 = vpop.permute.xlu0 %815 }
  0xe7   : > { %9440 = vmatpush3.msra.mxu1 %v598_v43 }
  0xe8   : > { %9442 = vmatmul.mubr.msk.f32.vlgmr.msra.gmra.mxu1 %vm500_vm0, %v603_v44  ;;  %7201 = vmatprep.subr.msk.mxu1 %vm943_vm1, %v934_v49 }
  0xe9   : > { %9444 = vmatprep.mubr.msk.f32.mxu1 %vm500_vm0, %v604_v45  ;;  %7202 = vmatpush1.msk.msra.mxu1 %vm943_vm1, %v926_v48  ;;  %v778_v45 = vpop.permute.xlu1 %777 }
  0xec   : > { %9445 = vmatmul.mubr.msk.f32.gmra.mxu1 %vm500_vm0, %v605_v46 }
 0x1a8   : > { %v9443_v52 = vpop.f32.mrf.mxu1 }
 0x1a9   : > { %v714_v54 = vadd.f32 %v9443_v52, %v618_v51  ;;  %v811_v52 = vpop.permute.xlu0 %810 }
 0x1aa   : > { %v708_v53 = vpop.f32.mrf.mxu1 }
 0x1ab   : > { %v709_v55 = vadd.f32 %v708_v53, %v613_v50  ;;  %v729_v61 = vsel %vm727_vm2, %v714_v54, 0.0 }
 0x1ac   : > { %v9446_v56 = vpop.f32.mrf.mxu1 }
 0x1ad   : > { %v728_v58 = vsel %vm727_vm2, %v709_v55, 0.0  ;;  %v724_v62 = vadd.f32 %v9446_v56, %v628_v59 }
 0x1ae   : > { %v718_v60 = vpop.f32.mrf.mxu1  ;;  %v730_v0 = vadd.f32 %v729_v61, %v728_v58  ;;  %v927_v61 = vld [vmem:[%s14614_s9 + $0x8] sm:$0xff] }
 0x1af   : > { %v719_v63 = vadd.f32 %v718_v60, %v623_v57  ;;  %v733_v3 = vsel %vm727_vm2, %v724_v62, 0.0  ;;  %v832_v60 = vld [vmem:[%s14612_s7 + $0x8] sm:$0xff] }
 0x1b1   : > { %v731_v1 = vsel %vm727_vm2, %v719_v63, 0.0 }
 0x1b2   : > { %v732_v2 = vadd.f32 %v731_v1, %v730_v0  ;;  %v928_v0 = vld [vmem:[%s14614_s9 + $0x10] sm:$0xff] }
 0x1b3   : > { %v936_v1 = vcombine.high %v928_v0, %v928_v0 }
 0x1b4   : > { %v734_v4 = vadd.f32 %v733_v3, %v732_v2  ;;  %v929_v2 = vld [vmem:[%s14614_s9 + $0x18] sm:$0xf] }
 0x1b5   : > { %7209 = vmatprep.subr.msk.mxu1 %vm943_vm1, %v936_v1 }
 0x1b6   : > { %v735_v5 = vrot.slane %v734_v4, 4 }
 0x1b8   : > { %v736_v6 = vadd.f32 %v735_v5, %v734_v4  ;;  %v838_v4 = vpop.permute.xlu0 %837 }
 0x1ba   : > { %v737_v7 = vrot.slane %v736_v6, 2 }
 0x1bc   : > { %v738_v8 = vadd.f32 %v737_v7, %v736_v6 }
 0x1be   : > { %v739_v9 = vrot.slane %v738_v8, 1 }
 0x1c0   : > { %v740_v10 = vadd.f32 %v739_v9, %v738_v8  ;;  %v1266_v9 = vlaneseq }
 0x1c2   : > { %v742_v11 = vmul.f32 0.03125, %v740_v10  ;;  %v10153_v10 = vshrl.u32 %v1266_v9, 7  ;;  %vm10229_vm3 = vcmp.lt.s32.totalorder %v1266_v9, 160  ;;  %vm1446_vm4 = vcmp.ge.s32.totalorder %v1266_v9, 32 }
 0x1c3   : > { %vm1447_vm5 = vcmp.lt.s32.totalorder %v1266_v9, 192  ;;  %vm1459_vm9 = vcmp.ge.s32.totalorder %v1266_v9, 64  ;;  %vm1460_vm10 = vcmp.lt.s32.totalorder %v1266_v9, 224  ;;  %vm1472_vm13 = vcmp.ge.s32.totalorder %v1266_v9, 96 }
 0x1c4   : > { %v743_v12 = vsub.f32 %v709_v55, %v742_v11  ;;  %v744_v13 = vsub.f32 %v714_v54, %v742_v11  ;;  %v745_v14 = vsub.f32 %v719_v63, %v742_v11  ;;  %v746_v15 = vsub.f32 %v724_v62, %v742_v11  ;;  %v806_v55 = vpop.permute.xlu1 %805  ;;  %vm10764_vm7 = vmand %vm1446_vm4, %vm1447_vm5 }
 0x1c5   : > { %v935_v62 = vcombine.high %v927_v61, %v927_v61  ;;  %v9895_v63 = vmov 0.0   ;;  %v1276_v11 = vsub.s32 2, %v10153_v10  ;;  %vm10798_vm11 = vmand %vm1459_vm9, %vm1460_vm10  ;;  %vm1473_vm14 = vcmp.lt.s32.totalorder %v1266_v9, 256  ;;  %v7307_v9 = vld [vmem:[%s14617_s12 + $0x658] sm:$0xff] }
 0x1c6   : > { %v747_v16 = vmul.f32 %v743_v12, %v743_v12  ;;  %v748_v17 = vmul.f32 %v744_v13, %v744_v13  ;;  %v749_v18 = vmul.f32 %v745_v14, %v745_v14  ;;  %v750_v19 = vmul.f32 %v746_v15, %v746_v15  ;;  %1022 = vmatprep.mubr.f32.mxu1 %v9895_v63  ;;  %vm10919_vm15 = vmand %vm1472_vm13, %vm1473_vm14 }
 0x1c7   : > { %1380 = vst [vmem:[#allocation2] sm:$0xff] %v9895_v63  ;;  %1381 = vst [vmem:[#allocation2 + $0x8] sm:$0xff] %v9895_v63  ;;  %vm5741_vm4 = vcmask 1041408   ;;  %vm6276_vm5 = vcmask 1040384  }
 0x1c8   : > { %v751_v20 = vsel %vm727_vm2, %v747_v16, 0.0  ;;  %v752_v21 = vsel %vm727_vm2, %v748_v17, 0.0  ;;  %v754_v23 = vsel %vm727_vm2, %v749_v18, 0.0  ;;  %v756_v25 = vsel %vm727_vm2, %v750_v19, 0.0  ;;  %1382 = vst [vmem:[#allocation2 + $0x10] sm:$0xff] %v9895_v63  ;;  %1383 = vst [vmem:[#allocation2 + $0x18] sm:$0xff] %v9895_v63  ;;  %v843_v7 = vpop.permute.xlu1 %842 }
 0x1c9   : > { %v753_v22 = vadd.f32 %v752_v21, %v751_v20  ;;  %1384 = vst [vmem:[#allocation2 + $0x20] sm:$0xff] %v9895_v63  ;;  %1385 = vst [vmem:[#allocation2 + $0x28] sm:$0xff] %v9895_v63  ;;  %v1268_v17 = vsub.s32 0, %v10153_v10  ;;  %v9896_v21 = vmov 1966171168  }
 0x1ca   : > { %1386 = vst [vmem:[#allocation2 + $0x30] sm:$0xff] %v9895_v63  ;;  %1388 = vst [vmem:[#allocation2 + $0x40] sm:$0xff] %v9895_v63 }
 0x1cb   : > { %v755_v24 = vadd.f32 %v754_v23, %v753_v22  ;;  %1389 = vst [vmem:[#allocation2 + $0x48] sm:$0xff] %v9895_v63  ;;  %1390 = vst [vmem:[#allocation2 + $0x50] sm:$0xff] %v9895_v63  ;;  %v1412_v22 = vunpack.c.l.s4 %v9896_v21 }
 0x1cc   : > { %1391 = vst [vmem:[#allocation2 + $0x58] sm:$0xff] %v9895_v63  ;;  %1392 = vst [vmem:[#allocation2 + $0x60] sm:$0xff] %v9895_v63 }
 0x1cd   : > { %v757_v26 = vadd.f32 %v756_v25, %v755_v24  ;;  %1394 = vst [vmem:[#allocation2 + $0x70] sm:$0xff] %v9895_v63  ;;  %1395 = vst [vmem:[#allocation2 + $0x78] sm:$0xff] %v9895_v63 }
 0x1ce   : > { %1396 = vst [vmem:[#allocation2 + $0x80] sm:$0xff] %v9895_v63  ;;  %1397 = vst [vmem:[#allocation2 + $0x88] sm:$0xff] %v9895_v63 }
 0x1cf   : > { %v758_v27 = vrot.slane %v757_v26, 4  ;;  %1398 = vst [vmem:[#allocation2 + $0x90] sm:$0xff] %v9895_v63  ;;  %1399 = vst [vmem:[#allocation2 + $0x98] sm:$0xff] %v9895_v63 }
 0x1d0   : > { %1400 = vst [vmem:[#allocation2 + $0xa0] sm:$0xff] %v9895_v63  ;;  %1401 = vst [vmem:[#allocation2 + $0xa8] sm:$0xf] %v9895_v63 }
 0x1d1   : > { %v759_v28 = vadd.f32 %v758_v27, %v757_v26  ;;  %1402 = vst [vmem:[#allocation2 + $0xb0] sm:$0xf] %v9895_v63  ;;  %1403 = vst [vmem:[#allocation2 + $0xb8] sm:$0xf] %v9895_v63 }
 0x1d2   : > { %1404 = vst [vmem:[#allocation2 + $0xc0] sm:$0xf] %v9895_v63  ;;  %1405 = vst [vmem:[#allocation2 + $0xc8] sm:$0xf] %v9895_v63 }
 0x1d3   : > { %v760_v29 = vrot.slane %v759_v28, 2  ;;  %1406 = vst [vmem:[#allocation2 + $0xd0] sm:$0xf] %v9895_v63  ;;  %1407 = vst [vmem:[#allocation2 + $0xd8] sm:$0xf] %v9895_v63 }
 0x1d5   : > { %v761_v30 = vadd.f32 %v760_v29, %v759_v28 }
 0x1d7   : > { %v762_v31 = vrot.slane %v761_v30, 1 }
 0x1d9   : > { %v763_v32 = vadd.f32 %v762_v31, %v761_v30 }
 0x1db   : > { %v764_v33 = vmul.f32 0.03125, %v763_v32 }
 0x1dd   : > { %v765_v34 = vadd.f32 1e-05, %v764_v33  ;;  %v1413_v33 = vunpack.c.0.s8 %v1412_v22 }
 0x1df   : > { %9853 = vrsqrt.f32 %v765_v34 }
 0x1ec   : > { %v9854_v39 = vpop.eup %9853 }
 0x1ed   : > { %v769_v41 = vmul.f32 %v9854_v39, %v745_v14  ;;  %v770_v42 = vmul.f32 %v9854_v39, %v746_v15  ;;  %v768_v43 = vmul.f32 %v9854_v39, %v744_v13  ;;  %v767_v44 = vmul.f32 %v9854_v39, %v743_v12  ;;  %v1264_v12 = vld [vmem:[%s14615_s10] sm:$0x7f] }
 0x1ee   : > { %v1272_v13 = vsub.s32 1, %v10153_v10  ;;  %v1280_v14 = vsub.s32 3, %v10153_v10  ;;  %v1315_v15 = vld [vmem:[%s14616_s11] sm:$0x7f]  ;;  %v10164_v16 = vrot.slane %v1264_v12, %v1276_v11  ;;  %v1269_v30 = vrot.slane %v1264_v12, %v1268_v17 }
 0x1ef   : > { %v798_v46 = vmul.f32 %v793_v35, %v770_v42  ;;  %v797_v47 = vmul.f32 %v788_v36, %v769_v41  ;;  %v796_v48 = vmul.f32 %v783_v38, %v768_v43  ;;  %v795_v51 = vmul.f32 %v778_v45, %v767_v44 }
 0x1f0   : > { %v1273_v18 = vrot.slane %v1264_v12, %v1272_v13  ;;  %v1281_v19 = vrot.slane %v1264_v12, %v1280_v14  ;;  %v10167_v24 = vrot.slane %v1315_v15, %v1276_v11  ;;  %v1324_v26 = vrot.slane %v1315_v15, %v1272_v13 }
 0x1f1   : > { %v826_v49 = vadd.f32 %v821_v37, %v798_v46  ;;  %v825_v50 = vadd.f32 %v816_v40, %v797_v47  ;;  %v824_v54 = vadd.f32 %v811_v52, %v796_v48  ;;  %v823_v57 = vadd.f32 %v806_v55, %v795_v51 }
 0x1f2   : > { %v1332_v27 = vrot.slane %v1315_v15, %v1280_v14  ;;  %v1320_v39 = vrot.slane %v1315_v15, %v1268_v17  ;;  %v1284_v44 = vsub.s32 4, %v10153_v10  ;;  %v1288_v45 = vsub.s32 5, %v10153_v10 }
 0x1f3   : > { %v830_v53 = vmax.f32 %v826_v49, 0.0  ;;  %v829_v56 = vmax.f32 %v825_v50, 0.0  ;;  %v828_v58 = vmax.f32 %v824_v54, 0.0  ;;  %v827_v59 = vmax.f32 %v823_v57, 0.0 }
 0x1f4   : > { %v10176_v46 = vsub.s32 %v1413_v33, %v10153_v10  ;;  %v1292_v50 = vsub.s32 6, %v10153_v10  ;;  %v1285_v57 = vrot.slane %v1264_v12, %v1284_v44 }
 0x1f5   : > { %9447 = vmatprep.subr.mxu0 %v830_v53 }
 0x1f6   : > { %9448 = vmatpush3.msra.mxu0 %v830_v53  ;;  %v1344_v14 = vrot.slane %v1315_v15, %v1292_v50 }
 0x1f7   : > { %9449 = vmatprep.subr.mxu0 %v829_v56 }
 0x1f8   : > { %9450 = vmatpush3.msra.mxu0 %v829_v56 }
 0x1f9   : > { %9451 = vmatprep.subr.mxu0 %v828_v58 }
 0x1fa   : > { %9452 = vmatpush3.msra.mxu0 %v828_v58  ;;  %v1289_v58 = vrot.slane %v1264_v12, %v1288_v45 }
 0x1fb   : > { %9453 = vmatprep.subr.mxu0 %v827_v59 }
 0x1fc   : > { %9454 = vmatpush3.msra.mxu0 %v827_v59  ;;  %v1293_v59 = vrot.slane %v1264_v12, %v1292_v50 }
 0x1fd   : > { %9456 = vmatmul.mubr.msk.f32.vlgmr.msra.gmra.mxu0 %vm500_vm0, %v832_v60  ;;  %7205 = vmatprep.subr.msk.mxu0 %vm943_vm1, %v935_v62 }
 0x1fe   : > { %7206 = vmatpush1.msk.msra.mxu0 %vm943_vm1, %v927_v61  ;;  %1099 = vmatprep.mubr.f32.mxu0 %v9895_v63 }
 0x1ff   : > { %9458 = vmatprep.subr.msk.mxu0 %vm943_vm1, %v929_v2 }
 0x2bd   : > { %v9457_v3 = vpop.f32.mrf.mxu0 }
 0x2be   : > { %v923_v8 = vadd.f32 %v9457_v3, %v843_v7 }
 0x2bf   : > { %v917_v5 = vpop.f32.mrf.mxu0 }
 0x2c0   : > { %v918_v6 = vadd.f32 %v917_v5, %v838_v4 }
 0x2c2   : > { %7203 = vmatmul.mubr.msk.f32.vlgmr.msra.gmra.mxu1 %vm727_vm2, %v918_v6  ;;  %7207 = vmatmul.mubr.msk.f32.vlgmr.msra.gmra.mxu0 %vm727_vm2, %v918_v6 }
 0x2c3   : > { %1028 = vmatprep.mubr.f32.mxu1 %v9895_v63  ;;  %1105 = vmatprep.mubr.f32.mxu0 %v9895_v63 }
 0x2c4   : > { %7210 = vmatpush1.msk.msra.mxu1 %vm943_vm1, %v928_v0  ;;  %9459 = vmatpush3.msk.msra.mxu0 %vm943_vm1, %v929_v2  ;;  %v10189_v2 = vrot.slane %v1315_v15, %v1284_v44 }
 0x2c6   : > { %7204 = vmatmul.mubr.msk.f32.gmra.mxu1 %vm727_vm2, %v923_v8  ;;  %7208 = vmatmul.mubr.msk.f32.gmra.mxu0 %vm727_vm2, %v923_v8 }
 0x2c7   : > { %9460 = vmatprep.mubr.msk.f32.mxu0 %vm727_vm2, %v918_v6  ;;  %1176 = vmatprep.mubr.f32.mxu1 %v9895_v63 }
 0x2ca   : > { %7211 = vmatmul.mubr.msk.f32.vlgmr.msra.gmra.mxu1 %vm727_vm2, %v918_v6  ;;  %9461 = vmatmul.mubr.msk.f32.vlgmr.msra.gmra.mxu0 %vm727_vm2, %v923_v8  ;;  %v1340_v6 = vrot.slane %v1315_v15, %v1288_v45 }
 0x2cb   : > { %1182 = vmatprep.mubr.f32.mxu1 %v9895_v63 }
 0x2ce   : > { %7212 = vmatmul.mubr.msk.f32.gmra.mxu1 %vm727_vm2, %v923_v8  ;;  %vm9900_vm2 = vmmov 0  }
 0x382   : > { %v1024_v20 = vpop.f32.mrf.mxu1  ;;  %v1101_v23 = vpop.f32.mrf.mxu0 }
 0x383   : > { %v1303_v25 = vmul.f32 %v10164_v16, %v1101_v23  ;;  %v1301_v42 = vmul.f32 %v1269_v30, %v1024_v20 }
 0x384   : > { %v1026_v28 = vpop.f32.mrf.mxu1  ;;  %v1103_v29 = vpop.f32.mrf.mxu0 }
 0x385   : > { %v1302_v31 = vmul.f32 %v1273_v18, %v1026_v28  ;;  %v1304_v32 = vmul.f32 %v1281_v19, %v1103_v29  ;;  %v1354_v34 = vadd.f32 %v10167_v24, %v1303_v25  ;;  %v1352_v56 = vadd.f32 %v1320_v39, %v1301_v42 }
 0x386   : > { %v1030_v35 = vpop.f32.mrf.mxu1  ;;  %v10171_v36 = vpop.f32.mrf.mxu0 }
 0x387   : > { %v1353_v37 = vadd.f32 %v1324_v26, %v1302_v31  ;;  %v1355_v38 = vadd.f32 %v1332_v27, %v1304_v32  ;;  %v1368_v47 = vmax.f32 %v1354_v34, 0.0  ;;  %v1366_v10 = vmax.f32 %v1352_v56, 0.0 }
 0x388   : > { %v1032_v40 = vpop.f32.mrf.mxu1  ;;  %v1109_v41 = vpop.f32.mrf.mxu0 }
 0x389   : > { %v1367_v43 = vmax.f32 %v1353_v37, 0.0  ;;  %v10181_v51 = vmax.f32 %v1355_v38, 0.0  ;;  %v1311_v52 = vmul.f32 %v1281_v19, %v1109_v41  ;;  %v1309_v5 = vmul.f32 %v1273_v18, %v1032_v40 }
 0x38a   : > { %v10178_v48 = vpop.f32.mrf.mxu1  ;;  %v9462_v49 = vpop.f32.mrf.mxu0  ;;  %v1308_v19 = vmul.f32 %v1269_v30, %v1030_v35  ;;  %v1310_v38 = vmul.f32 %v10164_v16, %v10171_v36 }
 0x38b   : > { %v1693_v54 = vcombine.high %v1367_v43, %v1368_v47  ;;  %v1640_v55 = vcombine.low %v1367_v43, %v1368_v47  ;;  %v1362_v1 = vadd.f32 %v1332_v27, %v1311_v52  ;;  %v1854_v4 = vcombine.low %v1368_v47, %v10181_v51 }
 0x38c   : > { %v1180_v53 = vpop.f32.mrf.mxu1  ;;  %v1255_v60 = vpop.f32.mrf.mxu0  ;;  %v1907_v18 = vcombine.high %v1368_v47, %v10181_v51  ;;  %v1478_v22 = vcombine.high %v1366_v10, %v1367_v43  ;;  %v1360_v23 = vadd.f32 %v1324_v26, %v1309_v5  ;;  %v1410_v28 = vcombine.low %v1366_v10, %v1367_v43 }
 0x38d   : > { %v10184_v62 = vrot.slane %v1693_v54, %v10176_v46  ;;  %v10187_v0 = vrot.slane %v1640_v55, %v10176_v46  ;;  %v1306_v11 = vmul.f32 %v1289_v58, %v1180_v53  ;;  %v1307_v12 = vmul.f32 %v1293_v59, %v1255_v60 }
 0x38e   : > { %v1184_v61 = vpop.f32.mrf.mxu1  ;;  %v1861_v17 = vrot.slane %v1854_v4, %v10176_v46  ;;  %v10209_v20 = vmax.f32 %v1362_v1, 0.0  ;;  %v1914_v27 = vrot.slane %v1907_v18, %v10176_v46  ;;  %v1485_v30 = vrot.slane %v1478_v22, %v10176_v46 }
 0x38f   : > { %v1312_v3 = vmul.f32 %v1285_v57, %v1184_v61  ;;  %v10194_v7 = vrot.slane %v10184_v62, %v10176_v46  ;;  %v10198_v8 = vrot.slane %v10187_v0, %v10176_v46  ;;  %v1357_v29 = vadd.f32 %v1340_v6, %v1306_v11 }
 0x390   : > { %v1186_v25 = vpop.f32.mrf.mxu1  ;;  %v10213_v15 = vrot.slane %v1861_v17, %v10176_v46  ;;  %v1358_v31 = vadd.f32 %v1344_v14, %v1307_v12  ;;  %v10223_v26 = vrot.slane %v1914_v27, %v10176_v46  ;;  %v1359_v33 = vadd.f32 %v1320_v39, %v1308_v19 }
 0x391   : > { %v10201_v13 = vadd.f32 %v10189_v2, %v1312_v3  ;;  %1708 = vrot.lane.b32.xlu1 %v10194_v7, %s9897_s17  ;;  %1655 = vrot.lane.b32.xlu0 %v10198_v8, %s9897_s17  ;;  %v1313_v35 = vmul.f32 %v1289_v58, %v1186_v25  ;;  %v1314_v40 = vmul.f32 %v9462_v49, %v1293_v59  ;;  %v10238_v39 = vmax.f32 %v1360_v23, 0.0 }
 0x392   : > { %v1497_v41 = vcombine.high %v1485_v30, %v1485_v30  ;;  %v1417_v42 = vrot.slane %v1410_v28, %v10176_v46  ;;  %v1371_v43 = vmax.f32 %v1357_v29, 0.0  ;;  %v1372_v44 = vmax.f32 %v1358_v31, 0.0 }
 0x393   : > { %v1377_v21 = vmax.f32 %v10201_v13, 0.0  ;;  %v1492_v45 = vrot.slane %v1485_v30, %v10176_v46  ;;  %v1877_v52 = vcombine.high %v1861_v17, %v1861_v17  ;;  %v1373_v36 = vmax.f32 %v1359_v33, 0.0  ;;  %v7250_v13 = vld [vmem:[%s14617_s12 + $0x490] sm:$0xff] }
 0x394   : > { %v10242_v47 = vrot.slane %v1497_v41, %v10176_v46  ;;  %v1433_v50 = vcombine.high %v1417_v42, %v1417_v42  ;;  %v1424_v16 = vrot.slane %v1417_v42, %v10176_v46  ;;  %v1305_v49 = vmul.f32 %v1285_v57, %v10178_v48 }
 0x395   : > { %v2228_v32 = vcombine.high %v10209_v20, %v1377_v21  ;;  %1869 = vrot.lane.b32.xlu1 %v10213_v15, %s9898_s18  ;;  %1922 = vrot.lane.b32.xlu0 %v10223_v26, %s9898_s18  ;;  %v1364_v53 = vadd.f32 %v1340_v6, %v1313_v35  ;;  %1495 = vst.msk [vmem:[#allocation2 + $0x41] ss:$8 sm:$0x3] %vm10229_vm3, %v1492_v45 }
 0x396   : > { %v1361_v54 = vadd.f32 %v10167_v24, %v1310_v38  ;;  %v10252_v55 = vrot.slane %v1433_v50, %v10176_v46  ;;  %v1930_v56 = vcombine.high %v1914_v27, %v1914_v27  ;;  %1431 = vst.msk [vmem:[#allocation2 + $0xc] ss:$8 sm:$0x3] %vm10229_vm3, %v1424_v16  ;;  %v1365_v58 = vadd.f32 %v1344_v14, %v1314_v40 }
 0x397   : > { %v10226_v34 = vrot.slane %v2228_v32, %v10176_v46  ;;  %v1533_v48 = vcombine.low %v1373_v36, %v10238_v39  ;;  %v2283_v57 = vcombine.low %v1371_v43, %v1372_v44  ;;  %v2336_v59 = vcombine.high %v1371_v43, %v1372_v44 }
 0x398   : > { %v10260_v24 = vrot.slane %v1877_v52, %v10176_v46  ;;  %v1586_v60 = vcombine.high %v1373_v36, %v10238_v39  ;;  %v1356_v61 = vadd.f32 %v10189_v2, %v1305_v49  ;;  %v1378_v1 = vmax.f32 %v1364_v53, 0.0 }
 0x399   : > { %1505 = vrot.lane.b32.xlu0 %v10242_v47, %s9899_s19  ;;  %1441 = vrot.lane.b32.xlu1 %v10252_v55, %s9899_s19  ;;  %v10265_v3 = vrot.slane %v1533_v48, %v10176_v46  ;;  %v1375_v4 = vmax.f32 %v1361_v54, 0.0  ;;  %v10270_v5 = vrot.slane %v1930_v56, %v10176_v46  ;;  %v1379_v10 = vmax.f32 %v1365_v58, 0.0 }
 0x39a   : > { %v10273_v6 = vrot.slane %v1586_v60, %v10176_v46  ;;  %v10280_v2 = vrot.slane %v2283_v57, %v10176_v46  ;;  %v10283_v12 = vrot.slane %v2336_v59, %v10176_v46  ;;  %v1452_v14 = vcombine.high %v1424_v16, %v1424_v16 }
 0x39b   : > { %v10277_v11 = vrot.slane %v10265_v3, %v10176_v46  ;;  %v1747_v17 = vcombine.low %v10238_v39, %v1375_v4  ;;  %v1370_v18 = vmax.f32 %v1356_v61, 0.0  ;;  %v2391_v19 = vcombine.low %v1378_v1, %v1379_v10 }
 0x39c   : > { %v10293_v22 = vrot.slane %v10273_v6, %v10176_v46  ;;  %v1513_v23 = vcombine.high %v1492_v45, %v1492_v45  ;;  %v1961_v25 = vcombine.low %v1375_v4, %v10209_v20  ;;  %v1728_v27 = vcombine.high %v10194_v7, %v10194_v7 }
 0x39d   : > { %1885 = vrot.lane.b32.xlu0 %v10260_v24, %s9897_s17  ;;  %1938 = vrot.lane.b32.xlu1 %v10270_v5, %s9897_s17  ;;  %1550 = vst.msk [vmem:[#allocation2 + $0x46] ss:$8 sm:$0x3] %vm10229_vm3, %v10277_v11  ;;  %v10304_v28 = vrot.slane %v1747_v17, %v10176_v46  ;;  %v1800_v29 = vcombine.high %v10238_v39, %v1375_v4 }
 0x39e   : > { %1603 = vst.msk [vmem:[#allocation2 + $0x7b] ss:$8 sm:$0x3] %vm10229_vm3, %v10293_v22  ;;  %v10309_v31 = vrot.slane %v10283_v12, %v10176_v46  ;;  %v10313_v32 = vrot.slane %v10280_v2, %v10176_v46  ;;  %v2068_v7 = vcombine.low %v10181_v51, %v1370_v18  ;;  %v10317_v30 = vrot.slane %v2391_v19, %v10176_v46 }
 0x39f   : > { %v2444_v33 = vcombine.high %v1378_v1, %v1379_v10  ;;  %v1675_v35 = vcombine.high %v10198_v8, %v10198_v8  ;;  %v10323_v38 = vrot.slane %v1961_v25, %v10176_v46  ;;  %v1663_v40 = vcombine.high %v10187_v0, %v10187_v0  ;;  %v7247_v10 = vld [vmem:[%s14617_s12 + $0x478] sm:$0xff] }
 0x3a0   : > { %2353 = vst.msk [vmem:[#allocation2 + $0x45] ss:$8 sm:$0x3] %vm10229_vm3, %v10309_v31  ;;  %2300 = vst.msk [vmem:[#allocation2 + $0x40] ss:$8 sm:$0x3] %vm10229_vm3, %v10313_v32  ;;  %v1716_v41 = vcombine.high %v10184_v62, %v10184_v62  ;;  %v2121_v8 = vcombine.high %v10181_v51, %v1370_v18  ;;  %v1761_v42 = vrot.slane %v10304_v28, %v10176_v46  ;;  %8141 = vmatprep.subr.mxu1 %v7247_v10 }
 0x3a1   : > { %1453 = vrot.lane.b32.xlu0 %v1452_v14, %s9898_s18  ;;  %1514 = vrot.lane.b32.xlu1 %v1513_v23, %s9898_s18  ;;  %v1807_v39 = vrot.slane %v1800_v29, %v10176_v46  ;;  %v10341_v43 = vrot.slane %v1663_v40, %v10176_v46  ;;  %v10344_v44 = vrot.slane %v2068_v7, %v10176_v46  ;;  %v7231_v14 = vld [vmem:[%s14617_s12 + $0x3f8] sm:$0xff]  ;;  %v7246_v29 = vld [vmem:[%s14617_s12 + $0x470] sm:$0xff] }
 0x3a2   : > { %v10347_v0 = vrot.slane %v1716_v41, %v10176_v46  ;;  %v10351_v62 = vrot.slane %v10317_v30, %v10176_v46  ;;  %v2451_v51 = vrot.slane %v2444_v33, %v10176_v46  ;;  %v10356_v45 = vrot.slane %v10323_v38, %v10176_v46  ;;  %v7279_v18 = vld [vmem:[%s14617_s12 + $0x578] sm:$0xff]  ;;  %8142 = vmatpush3.msra.mxu1 %v7231_v14  ;;  %v7278_v33 = vld [vmem:[%s14617_s12 + $0x570] sm:$0xff]  ;;  %v7229_v40 = vld [vmem:[%s14617_s12 + $0x3e8] sm:$0xff] }
 0x3a3   : > { %v10365_v50 = vrot.slane %v1807_v39, %v10176_v46  ;;  %v10368_v52 = vrot.slane %v2121_v8, %v10176_v46  ;;  %v1823_v16 = vcombine.high %v1807_v39, %v1807_v39  ;;  %v10372_v36 = vrot.slane %v10344_v44, %v10176_v46  ;;  %8182 = vmatprep.subr.mxu0 %v7279_v18  ;;  %v7263_v7 = vld [vmem:[%s14617_s12 + $0x4f8] sm:$0xff]  ;;  %v7277_v41 = vld [vmem:[%s14617_s12 + $0x568] sm:$0xff]  ;;  %v7242_v10 = vld [vmem:[%s14617_s12 + $0x450] sm:$0xff] }
 0x3a4   : > { %2408 = vst.msk [vmem:[#allocation2 + $0x7a] ss:$8 sm:$0x3] %vm10229_vm3, %v10351_v62  ;;  %v2014_v49 = vcombine.high %v1375_v4, %v10209_v20  ;;  %v2251_v53 = vcombine.high %v10226_v34, %v10226_v34  ;;  %v10379_v54 = vrot.slane %v10226_v34, %v10176_v46  ;;  %v1552_v56 = vcombine.high %v10265_v3, %v10265_v3  ;;  %v7261_v39 = vld [vmem:[%s14617_s12 + $0x4e8] sm:$0xff]  ;;  %v7259_v14 = vld [vmem:[%s14617_s12 + $0x4d8] sm:$0xff]  ;;  %v7274_v18 = vld [vmem:[%s14617_s12 + $0x550] sm:$0xff] }
 0x3a5   : > { %1729 = vrot.lane.b32.xlu0 %v1728_v27, %s9899_s19  ;;  %1676 = vrot.lane.b32.xlu1 %v1675_v35, %s9899_s19  ;;  %v10386_v58 = vrot.slane %v1823_v16, %v10176_v46  ;;  %v2463_v48 = vcombine.high %v2451_v51, %v2451_v51  ;;  %v10389_v57 = vrot.slane %v2451_v51, %v10176_v46  ;;  %v7262_v35 = vld [vmem:[%s14617_s12 + $0x4f0] sm:$0xff]  ;;  %v7228_v51 = vld [vmem:[%s14617_s12 + $0x3e0] sm:$0xff] }
 0x3a6   : > { %v2021_v59 = vrot.slane %v2014_v49, %v10176_v46  ;;  %v10393_v60 = vrot.slane %v2251_v53, %v10176_v46  ;;  %v10399_v34 = vrot.slane %v10368_v52, %v10176_v46  ;;  %v10413_v4 = vrot.slane %v1552_v56, %v10176_v46  ;;  %8143 = vmatprep.subr.mxu1 %v7246_v29  ;;  %v7276_v16 = vld [vmem:[%s14617_s12 + $0x560] sm:$0xff]  ;;  %v7243_v56 = vld [vmem:[%s14617_s12 + $0x458] sm:$0xff]  ;;  %v7273_v29 = vld [vmem:[%s14617_s12 + $0x548] sm:$0xff] }
 0x3a7   : > { %v10402_v61 = vrot.slane %v2463_v48, %v10176_v46  ;;  %2461 = vst.msk [vmem:[#allocation2 + $0x7f] ss:$8 sm:$0x3] %vm10229_vm3, %v10389_v57  ;;  %v1568_v19 = vcombine.high %v10277_v11, %v10277_v11  ;;  %v1984_v23 = vcombine.high %v10323_v38, %v10323_v38  ;;  %v1782_v25 = vcombine.high %v1761_v42, %v1761_v42  ;;  %v7230_v11 = vld [vmem:[%s14617_s12 + $0x3f0] sm:$0xff]  ;;  %v7260_v48 = vld [vmem:[%s14617_s12 + $0x4e0] sm:$0xff] }
 0x3a8   : > { %v10408_v1 = vrot.slane %v2021_v59, %v10176_v46  ;;  %v2037_v3 = vcombine.high %v2021_v59, %v2021_v59  ;;  %v1605_v27 = vcombine.high %v10273_v6, %v10273_v6  ;;  %8183 = vmatpush3.msra.mxu0 %v7263_v7  ;;  %v7245_v6 = vld [vmem:[%s14617_s12 + $0x468] sm:$0xff]  ;;  %8144 = vmatpush3.msra.mxu1 %v7230_v11  ;;  %v7227_v59 = vld [vmem:[%s14617_s12 + $0x3d8] sm:$0xff] }
 0x3a9   : > { %1762 = vrot.lane.b32.xlu0 %v1761_v42, %s9897_s17  ;;  %1976 = vrot.lane.b32.xlu1 %v10356_v45, %s9898_s18  ;;  %v10456_v38 = vrot.slane %v1984_v23, %v10176_v46  ;;  %v7244_v42 = vld [vmem:[%s14617_s12 + $0x460] sm:$0xff]  ;;  %v1835_v49 = vcombine.high %v10365_v50, %v10365_v50  ;;  %v2091_v53 = vcombine.high %v10344_v44, %v10344_v44 }
 0x3aa   : > { %v10422_v17 = vrot.slane %v2037_v3, %v10176_v46  ;;  %8184 = vmatprep.subr.mxu0 %v7278_v33  ;;  %8145 = vmatprep.subr.mxu1 %v7245_v6  ;;  %v10467_v8 = vrot.slane %v1605_v27, %v10176_v46  ;;  %v1621_v44 = vcombine.high %v10293_v22, %v10293_v22  ;;  %v7275_v3 = vld [vmem:[%s14617_s12 + $0x558] sm:$0xff]  ;;  %v7225_v27 = vld [vmem:[%s14617_s12 + $0x3c8] sm:$0xff]  ;;  %v7240_v33 = vld [vmem:[%s14617_s12 + $0x440] sm:$0xff] }
 0x3ab   : > { %8185 = vmatpush3.msra.mxu0 %v7262_v35  ;;  %8146 = vmatpush3.msra.mxu1 %v7229_v40  ;;  %v10512_v22 = vrot.slane %v2091_v53, %v10176_v46  ;;  %v2107_v7 = vcombine.high %v10372_v36, %v10372_v36  ;;  %v2302_v11 = vcombine.high %v10280_v2, %v10280_v2  ;;  %v7257_v6 = vld [vmem:[%s14617_s12 + $0x4c8] sm:$0xff]  ;;  %v7224_v35 = vld [vmem:[%s14617_s12 + $0x3c0] sm:$0xff]  ;;  %v7222_v53 = vld [vmem:[%s14617_s12 + $0x3b0] sm:$0xff] }
 0x3ac   : > { %8186 = vmatprep.subr.mxu0 %v7277_v41  ;;  %8147 = vmatprep.subr.mxu1 %v7244_v42  ;;  %v2355_v2 = vcombine.high %v10283_v12, %v10283_v12  ;;  %v7272_v40 = vld [vmem:[%s14617_s12 + $0x540] sm:$0xff]  ;;  %v7239_v41 = vld [vmem:[%s14617_s12 + $0x438] sm:$0xff] }
 0x3ad   : > { %1815 = vrot.lane.b32.xlu0 %v10365_v50, %s9897_s17  ;;  %2083 = vrot.lane.b32.xlu1 %v10372_v36, %s9899_s19  ;;  %v2144_v50 = vcombine.high %v10368_v52, %v10368_v52  ;;  %v7226_v52 = vld [vmem:[%s14617_s12 + $0x3d0] sm:$0xff]  ;;  %v2160_v36 = vcombine.high %v10399_v34, %v10399_v34  ;;  %v10568_v42 = vrot.slane %v2302_v11, %v10176_v46  ;;  %v7223_v12 = vld [vmem:[%s14617_s12 + $0x3b8] sm:$0xff] }
 0x3ae   : > { %8187 = vmatpush3.msra.mxu0 %v7261_v39  ;;  %8148 = vmatpush3.msra.mxu1 %v7228_v51  ;;  %v7271_v39 = vld [vmem:[%s14617_s12 + $0x538] sm:$0xff]  ;;  %v7238_v51 = vld [vmem:[%s14617_s12 + $0x430] sm:$0xff] }
 0x3af   : > { %8188 = vmatprep.subr.mxu0 %v7276_v16  ;;  %8149 = vmatprep.subr.mxu1 %v7243_v56  ;;  %v10526_v23 = vrot.slane %v2144_v50, %v10176_v46  ;;  %v10580_v16 = vrot.slane %v2355_v2, %v10176_v46  ;;  %v7270_v56 = vld [vmem:[%s14617_s12 + $0x530] sm:$0xff]  ;;  %v7221_v50 = vld [vmem:[%s14617_s12 + $0x3a8] sm:$0xff] }
 0x3b0   : > { %8189 = vmatpush3.msra.mxu0 %v7260_v48  ;;  %8150 = vmatpush3.msra.mxu1 %v7227_v59  ;;  %v2318_v48 = vcombine.high %v10313_v32, %v10313_v32  ;;  %v7237_v59 = vld [vmem:[%s14617_s12 + $0x428] sm:$0xff]  ;;  %v7234_v11 = vld [vmem:[%s14617_s12 + $0x410] sm:$0xff] }
 0x3b1   : > { %2136 = vrot.lane.b32.xlu0 %v10399_v34, %s9899_s19  ;;  %1560 = vrot.lane.b32.xlu1 %v10413_v4, %s9899_s19  ;;  %v7256_v34 = vld [vmem:[%s14617_s12 + $0x4c0] sm:$0xff]  ;;  %v7269_v32 = vld [vmem:[%s14617_s12 + $0x528] sm:$0xff] }
 0x3b2   : > { %8190 = vmatprep.subr.mxu0 %v7275_v3  ;;  %8151 = vmatprep.subr.mxu1 %v7242_v10  ;;  %v2371_v3 = vcombine.high %v10309_v31, %v10309_v31  ;;  %v7236_v10 = vld [vmem:[%s14617_s12 + $0x420] sm:$0xff]  ;;  %v1522_v31 = vcombine.high %v10242_v47, %v10242_v47  ;;  %v1465_v47 = vcombine.high %v10252_v55, %v10252_v55  ;;  %v7266_v2 = vld [vmem:[%s14617_s12 + $0x510] sm:$0xff] }
 0x3b3   : > { %8191 = vmatpush3.msra.mxu0 %v7259_v14  ;;  %8152 = vmatpush3.msra.mxu1 %v7226_v52  ;;  %v7253_v14 = vld [vmem:[%s14617_s12 + $0x4a8] sm:$0xff]  ;;  %v1770_v52 = vcombine.high %v10304_v28, %v10304_v28  ;;  %v7252_v28 = vld [vmem:[%s14617_s12 + $0x4a0] sm:$0xff]  ;;  %v1684_v55 = vcombine.high %v10341_v43, %v10341_v43 }
 0x3b4   : > { %8192 = vmatprep.subr.mxu0 %v7274_v18  ;;  %v7220_v18 = vld [vmem:[%s14617_s12 + $0x3a0] sm:$0xff] }
 0x3b5   : > { %1569 = vrot.lane.b32.xlu0 %v1568_v19, %s9898_s18  ;;  %1783 = vrot.lane.b32.xlu1 %v1782_v25, %s9899_s19  ;;  %v7241_v19 = vld [vmem:[%s14617_s12 + $0x448] sm:$0xff]  ;;  %v7258_v25 = vld [vmem:[%s14617_s12 + $0x4d0] sm:$0xff] }
 0x3b6   : > { %8153 = vmatprep.subr.mxu1 %v7241_v19  ;;  %8193 = vmatpush3.msra.mxu0 %v7258_v25  ;;  %v7268_v19 = vld [vmem:[%s14617_s12 + $0x520] sm:$0xff]  ;;  %v7235_v25 = vld [vmem:[%s14617_s12 + $0x418] sm:$0xff] }
 0x3b7   : > { %8154 = vmatpush3.msra.mxu1 %v7225_v27  ;;  %8194 = vmatprep.subr.mxu0 %v7273_v29  ;;  %v7219_v27 = vld [vmem:[%s14617_s12 + $0x398] sm:$0xff] }
 0x3b8   : > { %8155 = vmatprep.subr.mxu1 %v7240_v33  ;;  %8195 = vmatpush3.msra.mxu0 %v7257_v6  ;;  %v7267_v29 = vld [vmem:[%s14617_s12 + $0x518] sm:$0xff]  ;;  %v7218_v6 = vld [vmem:[%s14617_s12 + $0x390] sm:$0xff] }
 0x3b9   : > { %1992 = vrot.lane.b32.xlu0 %v10456_v38, %s9897_s17  ;;  %1613 = vrot.lane.b32.xlu1 %v10467_v8, %s9899_s19  ;;  %v7251_v33 = vld [vmem:[%s14617_s12 + $0x498] sm:$0xff] }
 0x3ba   : > { %8156 = vmatpush3.msra.mxu1 %v7224_v35  ;;  %8196 = vmatprep.subr.mxu0 %v7272_v40  ;;  %v2175_v35 = vcombine.low %v10209_v20, %v1377_v21  ;;  %v7233_v40 = vld [vmem:[%s14617_s12 + $0x408] sm:$0xff] }
 0x3bb   : > { %8157 = vmatprep.subr.mxu1 %v7239_v41  ;;  %8197 = vmatpush3.msra.mxu0 %v7256_v34  ;;  %v7217_v21 = vld [vmem:[%s14617_s12 + $0x388] sm:$0xff]  ;;  %v7232_v41 = vld [vmem:[%s14617_s12 + $0x400] sm:$0xff] }
 0x3bc   : > { %8158 = vmatpush3.msra.mxu1 %v7223_v12  ;;  %8198 = vmatprep.subr.mxu0 %v7271_v39  ;;  %v2182_v34 = vrot.slane %v2175_v35, %v10176_v46  ;;  %v1737_v12 = vcombine.high %v10347_v0, %v10347_v0  ;;  %v7249_v39 = vld [vmem:[%s14617_s12 + $0x488] sm:$0xff] }
 0x3bd   : > { %1836 = vrot.lane.b32.xlu0 %v1835_v49, %s9899_s19  ;;  %1622 = vrot.lane.b32.xlu1 %v1621_v44, %s9898_s18  ;;  %v7255_v49 = vld [vmem:[%s14617_s12 + $0x4b8] sm:$0xff]  ;;  %v7254_v44 = vld [vmem:[%s14617_s12 + $0x4b0] sm:$0xff] }
 0x3be   : > { %8159 = vmatprep.subr.mxu1 %v7238_v51  ;;  %8199 = vmatpush3.msra.mxu0 %v7255_v49  ;;  %v7216_v51 = vld [vmem:[%s14617_s12 + $0x380] sm:$0xff] }
 0x3bf   : > { %8160 = vmatpush3.msra.mxu1 %v7222_v53  ;;  %8200 = vmatprep.subr.mxu0 %v7270_v56  ;;  %v7264_v49 = vld [vmem:[%s14617_s12 + $0x500] sm:$0xff]  ;;  %v1951_v53 = vcombine.high %v10270_v5, %v10270_v5  ;;  %v2189_v5 = vrot.slane %v2182_v34, %v10176_v46 }
 0x3c0   : > { %8161 = vmatprep.subr.mxu1 %v7237_v59  ;;  %8201 = vmatpush3.msra.mxu0 %v7254_v44  ;;  %v7248_v56 = vld [vmem:[%s14617_s12 + $0x480] sm:$0xff]  ;;  %v1898_v59 = vcombine.high %v10260_v24, %v10260_v24  ;;  %v2198_v44 = vcombine.high %v2182_v34, %v2182_v34  ;;  %v1946_v34 = vcombine.high %v10223_v26, %v10223_v26 }
 0x3c1   : > { %2099 = vrot.lane.b32.xlu0 %v10512_v22, %s9898_s18  ;;  %2152 = vrot.lane.b32.xlu1 %v10526_v23, %s9898_s18 }
 0x3c2   : > { %8162 = vmatpush3.msra.mxu1 %v7221_v50  ;;  %8202 = vmatprep.subr.mxu0 %v7269_v32  ;;  %v2410_v50 = vcombine.high %v10317_v30, %v10317_v30  ;;  %v2214_v32 = vcombine.high %v2189_v5, %v2189_v5  ;;  %v2426_v30 = vcombine.high %v10351_v62, %v10351_v62 }
 0x3c3   : > { %8163 = vmatprep.subr.mxu1 %v7236_v10  ;;  %8203 = vmatpush3.msra.mxu0 %v7253_v14  ;;  %v2380_v10 = vcombine.high %v10580_v16, %v10580_v16  ;;  %v1844_v62 = vcombine.high %v10386_v58, %v10386_v58 }
 0x3c4   : > { %8164 = vmatpush3.msra.mxu1 %v7220_v18  ;;  %8204 = vmatprep.subr.mxu0 %v7268_v19  ;;  %v2417_v24 = vrot.slane %v2410_v50, %v10176_v46  ;;  %v2479_v18 = vcombine.high %v10389_v57, %v10389_v57  ;;  %v2528_v19 = vld [vmem:[%s14617_s12 + $0x50] sm:$0xff] }
 0x3c5   : > { %2108 = vrot.lane.b32.xlu0 %v2107_v7, %s9897_s17  ;;  %2161 = vrot.lane.b32.xlu1 %v2160_v36, %s9897_s17  ;;  %v10648_v7 = vrot.slane %v1770_v52, %v10176_v46  ;;  %v1577_v36 = vcombine.high %v10413_v4, %v10413_v4  ;;  %v7265_v4 = vld [vmem:[%s14617_s12 + $0x508] sm:$0xff] }
 0x3c6   : > { %8165 = vmatprep.subr.mxu1 %v7235_v25  ;;  %8205 = vmatpush3.msra.mxu0 %v7252_v28  ;;  %v2435_v14 = vcombine.high %v2417_v24, %v2417_v24 }
 0x3c7   : > { %8166 = vmatpush3.msra.mxu1 %v7219_v27  ;;  %8206 = vmatprep.subr.mxu0 %v7267_v29  ;;  %v1791_v20 = vcombine.high %v10648_v7, %v10648_v7 }
 0x3c8   : > { %8167 = vmatprep.subr.mxu1 %v7234_v11  ;;  %8207 = vmatpush3.msra.mxu0 %v7251_v33 }
 0x3c9   : > { %2310 = vrot.lane.b32.xlu0 %v10568_v42, %s9899_s19  ;;  %2363 = vrot.lane.b32.xlu1 %v10580_v16, %s9899_s19 }
 0x3ca   : > { %8168 = vmatpush3.msra.mxu1 %v7218_v6  ;;  %8208 = vmatprep.subr.mxu0 %v7266_v2 }
 0x3cb   : > { %8169 = vmatprep.subr.mxu1 %v7233_v40  ;;  %8209 = vmatpush3.msra.mxu0 %v7250_v13  ;;  %v2527_v40 = vld [vmem:[%s14617_s12 + $0x48] sm:$0xff] }
 0x3cc   : > { %8170 = vmatpush3.msra.mxu1 %v7217_v21  ;;  %8210 = vmatprep.subr.mxu0 %v7265_v4 }
 0x3cd   : > { %2319 = vrot.lane.b32.xlu0 %v2318_v48, %s9898_s18  ;;  %2372 = vrot.lane.b32.xlu1 %v2371_v3, %s9898_s18  ;;  %v7311_v48 = vld [vmem:[%s14617_s12 + $0x678] sm:$0xff]  ;;  %v10717_v3 = vrot.slane %v2198_v44, %v10176_v46  ;;  %v1630_v46 = vcombine.high %v10467_v8, %v10467_v8  ;;  %v2058_v8 = vcombine.high %v10422_v17, %v10422_v17 }
 0x3ce   : > { %8171 = vmatprep.subr.mxu1 %v7232_v41  ;;  %8211 = vmatpush3.msra.mxu0 %v7249_v39 }
 0x3cf   : > { %8172 = vmatpush3.msra.mxu1 %v7216_v51  ;;  %8212 = vmatprep.subr.mxu0 %v7264_v49 }
 0x3d0   : > { %8213 = vmatpush3.msra.mxu0 %v7248_v56  ;;  %8223 = vmatprep.subr.mxu1 %v7311_v48 }
 0x3d1   : > { %1523 = vrot.lane.b32.xlu0 %v1522_v31, %s9897_s17  ;;  %1466 = vrot.lane.b32.xlu1 %v1465_v47, %s9897_s17  ;;  %v2488_v47 = vcombine.high %v10402_v61, %v10402_v61 }
 0x3d2   : > { %9463 = vmatprep.subr.mxu0 %v9895_v63  ;;  %v2327_v63 = vcombine.high %v10568_v42, %v10568_v42  ;;  %v2005_v42 = vcombine.high %v10456_v38, %v10456_v38  ;;  %v2267_v38 = vcombine.high %v10379_v54, %v10379_v54 }
 0x3d5   : > { %1685 = vrot.lane.b32.xlu0 %v1684_v55, %s9898_s18  ;;  %1578 = vrot.lane.b32.xlu1 %v1577_v36, %s9897_s17 }
 0x3d9   : > { %1792 = vrot.lane.b32.xlu0 %v1791_v20, %s9898_s18  ;;  %1738 = vrot.lane.b32.xlu1 %v1737_v12, %s9898_s18  ;;  %v1893_v20 = vcombine.high %v10213_v15, %v10213_v15 }
 0x3dd   : > { %1952 = vrot.lane.b32.xlu0 %v1951_v53, %s9899_s19  ;;  %1899 = vrot.lane.b32.xlu1 %v1898_v59, %s9899_s19 }
 0x3e1   : > { %2190 = vrot.lane.b32.xlu0 %v2189_v5, %s9899_s19  ;;  %2206 = vrot.lane.b32.xlu1 %v10717_v3, %s9898_s18 }
 0x3e5   : > { %2418 = vrot.lane.b32.xlu0 %v2417_v24, %s9899_s19  ;;  %2215 = vrot.lane.b32.xlu1 %v2214_v32, %s9897_s17 }
 0x3e9   : > { %2427 = vrot.lane.b32.xlu0 %v2426_v30, %s9898_s18  ;;  %2328 = vrot.lane.b32.xlu1 %v2327_v63, %s9897_s17 }
 0x3ed   : > { %2381 = vrot.lane.b32.xlu0 %v2380_v10, %s9897_s17  ;;  %1631 = vrot.lane.b32.xlu1 %v1630_v46, %s9897_s17 }
 0x3f1   : > { %1845 = vrot.lane.b32.xlu0 %v1844_v62, %s9898_s18  ;;  %2006 = vrot.lane.b32.xlu1 %v2005_v42, %s9899_s19 }
 0x3f5   : > { %2436 = vrot.lane.b32.xlu0 %v2435_v14, %s9897_s17  ;;  %2029 = vrot.lane.b32.xlu1 %v10408_v1, %s9898_s18 }
 0x3f9   : > { %2045 = vrot.lane.b32.xlu0 %v10422_v17, %s9897_s17  ;;  %2059 = vrot.lane.b32.xlu1 %v2058_v8, %s9899_s19 }
 0x3fd   : > { %2243 = vrot.lane.b32.xlu0 %v10379_v54, %s9899_s19  ;;  %2259 = vrot.lane.b32.xlu1 %v10393_v60, %s9898_s18 }
 0x401   : > { %2268 = vrot.lane.b32.xlu0 %v2267_v38, %s9897_s17  ;;  %2471 = vrot.lane.b32.xlu1 %v10402_v61, %s9899_s19 }
 0x403   : > { %v1709_v16 = vpop.permute.xlu1 %1708  ;;  %v1656_v17 = vpop.permute.xlu0 %1655 }
 0x404   : > { %v1710_v31 = vrot.slane %v1709_v16, 1  ;;  %v1657_v52 = vrot.slane %v1656_v17, 1 }
 0x405   : > { %2480 = vrot.lane.b32.xlu0 %v2479_v18, %s9898_s18  ;;  %2489 = vrot.lane.b32.xlu1 %v2488_v47, %s9897_s17  ;;  %v2630_v47 = vld [vmem:[#allocation2] sm:$0xfe]  ;;  %s467_s18 = scalar_lea.vmem %s14619_s14, %s9832_s25 }
 0x406   : > { %v1711_v54 = vsel %vm1469_vm6, %v1709_v16, %v1710_v31  ;;  %v1658_v25 = vsel %vm1469_vm6, %v1656_v17, %v1657_v52 }
 0x407   : > { %1714 = vst.msk [vmem:[#allocation2 + $0x42] ss:$8 sm:$0x3] %vm10229_vm3, %v1711_v54  ;;  %1661 = vst.msk [vmem:[#allocation2 + $0xd] ss:$8 sm:$0x3] %vm10229_vm3, %v1658_v25  ;;  %v1870_v57 = vpop.permute.xlu1 %1869  ;;  %v1923_v27 = vpop.permute.xlu0 %1922 }
 0x408   : > { %v1871_v28 = vrot.slane %v1870_v57, 1  ;;  %1673 = vst.msk [vmem:[#allocation2 + $0x15] ss:$8 sm:$0x3] %vm10764_vm7, %v10341_v43  ;;  %v1924_v55 = vrot.slane %v1923_v27, 1 }
 0x409   : > { %1726 = vst.msk [vmem:[#allocation2 + $0x4a] ss:$8 sm:$0x3] %vm10764_vm7, %v10347_v0 }
 0x40a   : > { %v1872_v29 = vsel %vm1456_vm8, %v1870_v57, %v1871_v28  ;;  %v1925_v61 = vsel %vm1456_vm8, %v1923_v27, %v1924_v55 }
 0x40b   : > { %1875 = vst.msk [vmem:[#allocation2 + $0xe] ss:$8 sm:$0x3] %vm10229_vm3, %v1872_v29  ;;  %1928 = vst.msk [vmem:[#allocation2 + $0x43] ss:$8 sm:$0x3] %vm10229_vm3, %v1925_v61  ;;  %v1506_v11 = vpop.permute.xlu0 %1505  ;;  %v1442_v33 = vpop.permute.xlu1 %1441 }
 0x40c   : > { %v1507_v43 = vrot.slane %v1506_v11, 7  ;;  %v1443_v0 = vrot.slane %v1442_v33, 7 }
 0x40e   : > { %v1508_v6 = vsel %vm500_vm0, %v1507_v43, %v1506_v11  ;;  %v1444_v36 = vsel %vm500_vm0, %v1443_v0, %v1442_v33  ;;  %v2779_v11 = vrot.slane %v2630_v47, 1  ;;  %v10856_v43 = vld [vmem:[#allocation2] sm:$0xff]  ;;  %v2000_v0 = vcombine.high %v10356_v45, %v10356_v45 }
 0x40f   : > { %1511 = vst.msk [vmem:[#allocation2 + $0x49] ss:$8 sm:$0x3] %vm10764_vm7, %v1508_v6  ;;  %v1886_v35 = vpop.permute.xlu0 %1885  ;;  %1450 = vst.msk [vmem:[#allocation2 + $0x14] ss:$8 sm:$0x3] %vm10764_vm7, %v1444_v36  ;;  %v1939_v13 = vpop.permute.xlu1 %1938 }
 0x410   : > { %v1887_v2 = vrot.slane %v1886_v35, 1  ;;  %v1940_v4 = vrot.slane %v1939_v13, 1  ;;  %v10859_v33 = vrot.slane %v10856_v43, 1 }
 0x412   : > { %v1888_v21 = vsel %vm1469_vm6, %v1886_v35, %v1887_v2  ;;  %v1941_v12 = vsel %vm1469_vm6, %v1939_v13, %v1940_v4  ;;  %v2781_v45 = vsel %vm2778_vm12, %v2779_v11, %v10859_v33 }
 0x413   : > { %1891 = vst.msk [vmem:[#allocation2 + $0x16] ss:$8 sm:$0x3] %vm10764_vm7, %v1888_v21  ;;  %v1454_v41 = vpop.permute.xlu0 %1453  ;;  %1944 = vst.msk [vmem:[#allocation2 + $0x4b] ss:$8 sm:$0x3] %vm10764_vm7, %v1941_v12  ;;  %v1515_v15 = vpop.permute.xlu1 %1514 }
 0x414   : > { %1896 = vst.msk [vmem:[#allocation2 + $0x1e] ss:$8 sm:$0x3] %vm10798_vm11, %v1893_v20  ;;  %v1455_v39 = vrot.slane %v1454_v41, 7  ;;  %v1516_v51 = vrot.slane %v1515_v15, 7 }
 0x415   : > { %1949 = vst.msk [vmem:[#allocation2 + $0x53] ss:$8 sm:$0x3] %vm10798_vm11, %v1946_v34 }
 0x416   : > { %v1457_v49 = vsel %vm1456_vm8, %v1455_v39, %v1454_v41  ;;  %v1517_v53 = vsel %vm1456_vm8, %v1516_v51, %v1515_v15  ;;  %v7295_v39 = vld [vmem:[%s14617_s12 + $0x5f8] sm:$0xff] }
 0x417   : > { %1463 = vst.msk [vmem:[#allocation2 + $0x1c] ss:$8 sm:$0x3] %vm10798_vm11, %v1457_v49  ;;  %v1730_v26 = vpop.permute.xlu0 %1729  ;;  %1520 = vst.msk [vmem:[#allocation2 + $0x51] ss:$8 sm:$0x3] %vm10798_vm11, %v1517_v53  ;;  %v1677_v48 = vpop.permute.xlu1 %1676 }
 0x418   : > { %v1731_v56 = vrot.slane %v1730_v26, 7  ;;  %v1678_v59 = vrot.slane %v1677_v48, 7  ;;  %v7310_v49 = vld [vmem:[%s14617_s12 + $0x670] sm:$0xff] }
 0x419   : > { %v7294_v53 = vld [vmem:[%s14617_s12 + $0x5f0] sm:$0xff] }
 0x41a   : > { %v1732_v44 = vsel %vm500_vm0, %v1731_v56, %v1730_v26  ;;  %v1679_v50 = vsel %vm500_vm0, %v1678_v59, %v1677_v48  ;;  %v7309_v59 = vld [vmem:[%s14617_s12 + $0x668] sm:$0xff] }
 0x41b   : > { %1735 = vst.msk [vmem:[#allocation2 + $0x52] ss:$8 sm:$0x3] %vm10798_vm11, %v1732_v44  ;;  %v1763_v5 = vpop.permute.xlu0 %1762  ;;  %1682 = vst.msk [vmem:[#allocation2 + $0x1d] ss:$8 sm:$0x3] %vm10798_vm11, %v1679_v50  ;;  %v1977_v32 = vpop.permute.xlu1 %1976 }
 0x41c   : > { %v1764_v24 = vrot.slane %v1763_v5, 1  ;;  %v1978_v30 = vrot.slane %v1977_v32, 1 }
 0x41e   : > { %v1765_v63 = vsel %vm1469_vm6, %v1763_v5, %v1764_v24  ;;  %v1979_v46 = vsel %vm1456_vm8, %v1977_v32, %v1978_v30  ;;  %v7293_v5 = vld [vmem:[%s14617_s12 + $0x5e8] sm:$0xff]  ;;  %v7308_v32 = vld [vmem:[%s14617_s12 + $0x660] sm:$0xff] }
 0x41f   : > { %1768 = vst.msk [vmem:[#allocation2 + $0x47] ss:$8 sm:$0x3] %vm10229_vm3, %v1765_v63  ;;  %v1816_v10 = vpop.permute.xlu0 %1815  ;;  %1982 = vst.msk [vmem:[#allocation2 + $0x78] ss:$8 sm:$0x3] %vm10229_vm3, %v1979_v46  ;;  %v2084_v42 = vpop.permute.xlu1 %2083 }
 0x420   : > { %1780 = vst.msk [vmem:[#allocation2 + $0x4f] ss:$8 sm:$0x3] %vm10764_vm7, %v10648_v7  ;;  %v1817_v62 = vrot.slane %v1816_v10, 1  ;;  %v2085_v8 = vrot.slane %v2084_v42, 1  ;;  %v7292_v63 = vld [vmem:[%s14617_s12 + $0x5e0] sm:$0xff] }
 0x422   : > { %v1818_v14 = vsel %vm1469_vm6, %v1816_v10, %v1817_v62  ;;  %v2086_v16 = vsel %vm500_vm0, %v2084_v42, %v2085_v8  ;;  %v2116_v8 = vcombine.high %v10512_v22, %v10512_v22  ;;  %v2169_v22 = vcombine.high %v10526_v23, %v10526_v23  ;;  %v7289_v23 = vld [vmem:[%s14617_s12 + $0x5c8] sm:$0xff]  ;;  %v2576_v62 = vld [vmem:[%s14617_s12 + $0x1d0] sm:$0xff] }
 0x423   : > { %1821 = vst.msk [vmem:[#allocation2 + $0x7c] ss:$8 sm:$0x3] %vm10229_vm3, %v1818_v14  ;;  %v2137_v38 = vpop.permute.xlu0 %2136  ;;  %2089 = vst.msk [vmem:[#allocation2 + $0xf] ss:$8 sm:$0x3] %vm10229_vm3, %v2086_v16  ;;  %v1561_v7 = vpop.permute.xlu1 %1560 }
 0x424   : > { %1833 = vst.msk [vmem:[#allocation2 + $0x84] ss:$8 sm:$0x3] %vm10764_vm7, %v10386_v58  ;;  %v2138_v17 = vrot.slane %v2137_v38, 1  ;;  %v1562_v52 = vrot.slane %v1561_v7, 7  ;;  %v7291_v14 = vld [vmem:[%s14617_s12 + $0x5d8] sm:$0xff] }
 0x426   : > { %v2139_v31 = vsel %vm500_vm0, %v2137_v38, %v2138_v17  ;;  %v1563_v54 = vsel %vm500_vm0, %v1562_v52, %v1561_v7  ;;  %v7306_v17 = vld [vmem:[%s14617_s12 + $0x650] sm:$0xff] }
 0x427   : > { %2142 = vst.msk [vmem:[#allocation2 + $0x44] ss:$8 sm:$0x3] %vm10229_vm3, %v2139_v31  ;;  %v1570_v18 = vpop.permute.xlu0 %1569  ;;  %v1784_v58 = vpop.permute.xlu1 %1783  ;;  %v7290_v31 = vld [vmem:[%s14617_s12 + $0x5d0] sm:$0xff] }
 0x428   : > { %v1571_v25 = vrot.slane %v1570_v18, 7  ;;  %1566 = vst.msk [vmem:[#allocation2 + $0x4e] ss:$8 sm:$0x3] %vm10764_vm7, %v1563_v54  ;;  %v1785_v28 = vrot.slane %v1784_v58, 7  ;;  %v7305_v54 = vld [vmem:[%s14617_s12 + $0x648] sm:$0xff] }
 0x42a   : > { %v1572_v57 = vsel %vm1456_vm8, %v1571_v25, %v1570_v18  ;;  %v1786_v29 = vsel %vm500_vm0, %v1785_v28, %v1784_v58  ;;  %v2631_v61 = vld [vmem:[#allocation2 + $0x8] sm:$0xfe] }
 0x42b   : > { %1575 = vst.msk [vmem:[#allocation2 + $0x56] ss:$8 sm:$0x3] %vm10798_vm11, %v1572_v57  ;;  %v1993_v27 = vpop.permute.xlu0 %1992  ;;  %1789 = vst.msk [vmem:[#allocation2 + $0x57] ss:$8 sm:$0x3] %vm10798_vm11, %v1786_v29  ;;  %v1614_v6 = vpop.permute.xlu1 %1613 }
 0x42c   : > { %v1994_v55 = vrot.slane %v1993_v27, 1  ;;  %v1615_v36 = vrot.slane %v1614_v6, 7  ;;  %v2782_v20 = vrot.slane %v2631_v61, 1  ;;  %v7304_v57 = vld [vmem:[%s14617_s12 + $0x640] sm:$0xff]  ;;  %v7303_v61 = vld [vmem:[%s14617_s12 + $0x638] sm:$0xff] }
 0x42e   : > { %v1995_v35 = vsel %vm1469_vm6, %v1993_v27, %v1994_v55  ;;  %v10866_v2 = vld [vmem:[#allocation2 + $0x40] sm:$0xff]  ;;  %v1616_v4 = vsel %vm500_vm0, %v1615_v36, %v1614_v6  ;;  %v7287_v6 = vld [vmem:[%s14617_s12 + $0x5b8] sm:$0xff]  ;;  %v7302_v36 = vld [vmem:[%s14617_s12 + $0x630] sm:$0xff] }
 0x42f   : > { %1998 = vst.msk [vmem:[#allocation2 + $0x80] ss:$8 sm:$0x3] %vm10764_vm7, %v1995_v35  ;;  %v1837_v13 = vpop.permute.xlu0 %1836  ;;  %v2783_v21 = vrot.slane %v10866_v2, 1  ;;  %v1623_v34 = vpop.permute.xlu1 %1622  ;;  %v7288_v27 = vld [vmem:[%s14617_s12 + $0x5c0] sm:$0xff] }
 0x430   : > { %2003 = vst.msk [vmem:[#allocation2 + $0x88] ss:$8 sm:$0x3] %vm10798_vm11, %v2000_v0  ;;  %v1838_v41 = vrot.slane %v1837_v13, 7  ;;  %v1624_v51 = vrot.slane %v1623_v34, 7 }
 0x431   : > { %1619 = vst.msk [vmem:[#allocation2 + $0x83] ss:$8 sm:$0x3] %vm10764_vm7, %v1616_v4  ;;  %v2784_v12 = vsel %vm2778_vm12, %v2782_v20, %v2783_v21  ;;  %v7286_v20 = vld [vmem:[%s14617_s12 + $0x5b0] sm:$0xff] }
 0x432   : > { %v1839_v15 = vsel %vm500_vm0, %v1838_v41, %v1837_v13  ;;  %2899 = vmatprep.mubr.f32.mxu1 %v2784_v12  ;;  %v1625_v56 = vsel %vm1456_vm8, %v1624_v51, %v1623_v34  ;;  %v7285_v12 = vld [vmem:[%s14617_s12 + $0x5a8] sm:$0xff]  ;;  %v7300_v51 = vld [vmem:[%s14617_s12 + $0x620] sm:$0xff] }
 0x433   : > { %1842 = vst.msk [vmem:[#allocation2 + $0x8c] ss:$8 sm:$0x3] %vm10798_vm11, %v1839_v15  ;;  %v2100_v26 = vpop.permute.xlu0 %2099  ;;  %2900 = vmatmul.mubr.f32.vlgmr.msra.gmra.mxu1 %v2781_v45  ;;  %1628 = vst.msk [vmem:[#allocation2 + $0x8b] ss:$8 sm:$0x3] %vm10798_vm11, %v1625_v56  ;;  %v2153_v44 = vpop.permute.xlu1 %2152 }
 0x434   : > { %v2101_v48 = vrot.slane %v2100_v26, 1  ;;  %8224 = vmatpush3.msra.mxu1 %v7295_v39  ;;  %v2154_v24 = vrot.slane %v2153_v44, 1  ;;  %v7301_v45 = vld [vmem:[%s14617_s12 + $0x628] sm:$0xff] }
 0x435   : > { %8225 = vmatprep.subr.mxu1 %v7310_v49 }
 0x436   : > { %v2102_v50 = vsel %vm1456_vm8, %v2100_v26, %v2101_v48  ;;  %8226 = vmatpush3.msra.mxu1 %v7294_v53  ;;  %v2155_v10 = vsel %vm1456_vm8, %v2153_v44, %v2154_v24  ;;  %v7284_v26 = vld [vmem:[%s14617_s12 + $0x5a0] sm:$0xff]  ;;  %v7299_v48 = vld [vmem:[%s14617_s12 + $0x618] sm:$0xff] }
 0x437   : > { %2105 = vst.msk [vmem:[#allocation2 + $0x17] ss:$8 sm:$0x3] %vm10764_vm7, %v2102_v50  ;;  %v2109_v30 = vpop.permute.xlu0 %2108  ;;  %8227 = vmatprep.subr.mxu1 %v7309_v59  ;;  %2158 = vst.msk [vmem:[#allocation2 + $0x4c] ss:$8 sm:$0x3] %vm10764_vm7, %v2155_v10  ;;  %v2162_v42 = vpop.permute.xlu1 %2161 }
 0x438   : > { %v2110_v46 = vrot.slane %v2109_v30, 1  ;;  %8228 = vmatpush3.msra.mxu1 %v7293_v5  ;;  %v2163_v38 = vrot.slane %v2162_v42, 1  ;;  %v7283_v5 = vld [vmem:[%s14617_s12 + $0x598] sm:$0xff] }
 0x439   : > { %8229 = vmatprep.subr.mxu1 %v7308_v32 }
 0x43a   : > { %v2111_v16 = vsel %vm1469_vm6, %v2109_v30, %v2110_v46  ;;  %8230 = vmatpush3.msra.mxu1 %v7292_v63  ;;  %v2164_v52 = vsel %vm1469_vm6, %v2162_v42, %v2163_v38  ;;  %v7298_v30 = vld [vmem:[%s14617_s12 + $0x610] sm:$0xff]  ;;  %v7297_v38 = vld [vmem:[%s14617_s12 + $0x608] sm:$0xff] }
 0x43b   : > { %2114 = vst.msk [vmem:[#allocation2 + $0x1f] ss:$8 sm:$0x3] %vm10798_vm11, %v2111_v16  ;;  %v2311_v7 = vpop.permute.xlu0 %2310  ;;  %8231 = vmatprep.subr.mxu1 %v7307_v9  ;;  %2167 = vst.msk [vmem:[#allocation2 + $0x54] ss:$8 sm:$0x3] %vm10798_vm11, %v2164_v52  ;;  %v2364_v25 = vpop.permute.xlu1 %2363 }
 0x43c   : > { %2119 = vst.msk [vmem:[#allocation2 + $0x27] ss:$8 sm:$0x3] %vm10919_vm15, %v2116_v8  ;;  %v2312_v18 = vrot.slane %v2311_v7, 7  ;;  %8232 = vmatpush3.msra.mxu1 %v7291_v14  ;;  %v2365_v58 = vrot.slane %v2364_v25, 7  ;;  %v7282_v46 = vld [vmem:[%s14617_s12 + $0x590] sm:$0xff] }
 0x43d   : > { %8233 = vmatprep.subr.mxu1 %v7306_v17  ;;  %2172 = vst.msk [vmem:[#allocation2 + $0x5c] ss:$8 sm:$0x3] %vm10919_vm15, %v2169_v22 }
 0x43e   : > { %v2313_v47 = vsel %vm500_vm0, %v2312_v18, %v2311_v7  ;;  %8234 = vmatpush3.msra.mxu1 %v7290_v31  ;;  %v2366_v29 = vsel %vm500_vm0, %v2365_v58, %v2364_v25  ;;  %v2632_v10 = vld [vmem:[#allocation2 + $0x10] sm:$0xfe]  ;;  %v7281_v31 = vld [vmem:[%s14617_s12 + $0x588] sm:$0xff]  ;;  %v7327_v58 = vld [vmem:[%s14617_s12 + $0x6f8] sm:$0xff] }
 0x43f   : > { %2316 = vst.msk [vmem:[#allocation2 + $0x48] ss:$8 sm:$0x3] %vm10764_vm7, %v2313_v47  ;;  %v2320_v28 = vpop.permute.xlu0 %2319  ;;  %8235 = vmatprep.subr.mxu1 %v7305_v54  ;;  %2369 = vst.msk [vmem:[#allocation2 + $0x4d] ss:$8 sm:$0x3] %vm10764_vm7, %v2366_v29  ;;  %v2373_v11 = vpop.permute.xlu1 %2372 }
 0x440   : > { %v2321_v55 = vrot.slane %v2320_v28, 7  ;;  %8236 = vmatpush3.msra.mxu1 %v7289_v23  ;;  %v2374_v0 = vrot.slane %v2373_v11, 7  ;;  %v2785_v18 = vrot.slane %v2632_v10, 1  ;;  %v7296_v54 = vld [vmem:[%s14617_s12 + $0x600] sm:$0xff]  ;;  %v2549_v29 = vld [vmem:[%s14617_s12 + $0xf8] sm:$0xff] }
 0x441   : > { %8237 = vmatprep.subr.mxu1 %v7304_v57  ;;  %v7280_v47 = vld [vmem:[%s14617_s12 + $0x580] sm:$0xff] }
 0x442   : > { %v2322_v35 = vsel %vm1456_vm8, %v2321_v55, %v2320_v28  ;;  %8238 = vmatpush3.msra.mxu1 %v7288_v27  ;;  %v2375_v4 = vsel %vm1456_vm8, %v2374_v0, %v2373_v11  ;;  %v2633_v32 = vld [vmem:[#allocation2 + $0x18] sm:$0xfe] }
 0x443   : > { %2325 = vst.msk [vmem:[#allocation2 + $0x50] ss:$8 sm:$0x3] %vm10798_vm11, %v2322_v35  ;;  %v1524_v13 = vpop.permute.xlu0 %1523  ;;  %8239 = vmatprep.subr.mxu1 %v7303_v61  ;;  %2378 = vst.msk [vmem:[#allocation2 + $0x55] ss:$8 sm:$0x3] %vm10798_vm11, %v2375_v4  ;;  %v1467_v34 = vpop.permute.xlu1 %1466 }
 0x444   : > { %v1525_v41 = vrot.slane %v1524_v13, 7  ;;  %8240 = vmatpush3.msra.mxu1 %v7287_v6  ;;  %v1468_v39 = vrot.slane %v1467_v34, 7  ;;  %v2788_v17 = vrot.slane %v2633_v32, 1  ;;  %v7326_v61 = vld [vmem:[%s14617_s12 + $0x6f0] sm:$0xff]  ;;  %v7325_v35 = vld [vmem:[%s14617_s12 + $0x6e8] sm:$0xff]  ;;  %v7324_v4 = vld [vmem:[%s14617_s12 + $0x6e0] sm:$0xff] }
 0x445   : > { %8241 = vmatprep.subr.mxu1 %v7302_v36 }
 0x446   : > { %v1526_v15 = vsel %vm1469_vm6, %v1525_v41, %v1524_v13  ;;  %8242 = vmatpush3.msra.mxu1 %v7286_v20  ;;  %v1470_v53 = vsel %vm1469_vm6, %v1468_v39, %v1467_v34  ;;  %v11003_v44 = vld [vmem:[#allocation2 + $0x48] sm:$0xff] }
 0x447   : > { %1529 = vst.msk [vmem:[#allocation2 + $0x59] ss:$8 sm:$0x3] %vm10919_vm15, %v1526_v15  ;;  %v1686_v49 = vpop.permute.xlu0 %1685  ;;  %8243 = vmatprep.subr.mxu1 %v7301_v45  ;;  %1476 = vst.msk [vmem:[#allocation2 + $0x24] ss:$8 sm:$0x3] %vm10919_vm15, %v1470_v53  ;;  %v1579_v59 = vpop.permute.xlu1 %1578 }
 0x448   : > { %v1687_v56 = vrot.slane %v1686_v49, 7  ;;  %8244 = vmatpush3.msra.mxu1 %v7285_v12  ;;  %v1580_v50 = vrot.slane %v1579_v59, 7  ;;  %v2786_v8 = vrot.slane %v11003_v44, 1  ;;  %v7323_v12 = vld [vmem:[%s14617_s12 + $0x6d8] sm:$0xff] }
 0x449   : > { %8245 = vmatprep.subr.mxu1 %v7300_v51 }
 0x44a   : > { %v1688_v24 = vsel %vm1456_vm8, %v1687_v56, %v1686_v49  ;;  %8246 = vmatpush3.msra.mxu1 %v7284_v26  ;;  %v1581_v9 = vsel %vm1469_vm6, %v1580_v50, %v1579_v59  ;;  %v11018_v14 = vld [vmem:[#allocation2 + $0x50] sm:$0xff]  ;;  %v2787_v27 = vsel %vm2778_vm12, %v2785_v18, %v2786_v8  ;;  %v7321_v59 = vld [vmem:[%s14617_s12 + $0x6c8] sm:$0xff] }
 0x44b   : > { %1691 = vst.msk [vmem:[#allocation2 + $0x25] ss:$8 sm:$0x3] %vm10919_vm15, %v1688_v24  ;;  %v1793_v63 = vpop.permute.xlu0 %1792  ;;  %8247 = vmatprep.subr.mxu1 %v7299_v48  ;;  %1584 = vst.msk [vmem:[#allocation2 + $0x5e] ss:$8 sm:$0x3] %vm10919_vm15, %v1581_v9  ;;  %v1739_v16 = vpop.permute.xlu1 %1738 }
 0x44c   : > { %v1794_v42 = vrot.slane %v1793_v63, 7  ;;  %8248 = vmatpush3.msra.mxu1 %v7283_v5  ;;  %v2789_v7 = vrot.slane %v11018_v14, 1  ;;  %v1740_v22 = vrot.slane %v1739_v16, 7  ;;  %v7322_v49 = vld [vmem:[%s14617_s12 + $0x6d0] sm:$0xff]  ;;  %v2223_v5 = vcombine.high %v10717_v3, %v10717_v3 }
 0x44d   : > { %8249 = vmatprep.subr.mxu1 %v7298_v30  ;;  %v2637_v26 = vld [vmem:[#allocation2 + $0x70] sm:$0x1f] }
 0x44e   : > { %v1795_v52 = vsel %vm1456_vm8, %v1794_v42, %v1793_v63  ;;  %8250 = vmatpush3.msra.mxu1 %v7282_v46  ;;  %v2790_v25 = vsel %vm2778_vm12, %v2788_v17, %v2789_v7  ;;  %v1741_v57 = vsel %vm1456_vm8, %v1740_v22, %v1739_v16  ;;  %v2800_v32 = vrot.slane %v2637_v26, 1  ;;  %v7320_v63 = vld [vmem:[%s14617_s12 + $0x6c0] sm:$0xff]  ;;  %v7318_v18 = vld [vmem:[%s14617_s12 + $0x6b0] sm:$0xff] }
 0x44f   : > { %1798 = vst.msk [vmem:[#allocation2 + $0x5f] ss:$8 sm:$0x3] %vm10919_vm15, %v1795_v52  ;;  %v1953_v23 = vpop.permute.xlu0 %1952  ;;  %8251 = vmatprep.subr.mxu1 %v7297_v38  ;;  %2979 = vmatprep.mubr.f32.mxu0 %v2790_v25  ;;  %1744 = vst.msk [vmem:[#allocation2 + $0x5a] ss:$8 sm:$0x3] %vm10919_vm15, %v1741_v57  ;;  %v1900_v55 = vpop.permute.xlu1 %1899 }
 0x450   : > { %v1954_v28 = vrot.slane %v1953_v23, 7  ;;  %8252 = vmatpush3.msra.mxu1 %v7281_v31  ;;  %2980 = vmatmul.mubr.f32.vlgmr.msra.gmra.mxu0 %v2787_v27  ;;  %v1901_v11 = vrot.slane %v1900_v55, 7  ;;  %v7319_v38 = vld [vmem:[%s14617_s12 + $0x6b8] sm:$0xff]  ;;  %v2801_v31 = vsel %vm2778_vm12, %v10859_v33, %v2800_v32  ;;  %v7316_v27 = vld [vmem:[%s14617_s12 + $0x6a0] sm:$0xff] }
 0x451   : > { %8253 = vmatprep.subr.mxu1 %v7296_v54  ;;  %9464 = vmatpush3.msra.mxu0 %v7327_v58 }
 0x452   : > { %v1955_v6 = vsel %vm500_vm0, %v1954_v28, %v1953_v23  ;;  %8254 = vmatpush3.msra.mxu1 %v7280_v47  ;;  %9465 = vmatprep.subr.mxu0 %v10856_v43  ;;  %v1902_v36 = vsel %vm500_vm0, %v1901_v11, %v1900_v55 }
 0x453   : > { %1958 = vst.msk [vmem:[#allocation2 + $0x5b] ss:$8 sm:$0x3] %vm10919_vm15, %v1955_v6  ;;  %v2191_v0 = vpop.permute.xlu0 %2190  ;;  %8283 = vmatprep.subr.mxu1 %v2549_v29  ;;  %9466 = vmatpush3.msra.mxu0 %v7326_v61  ;;  %1905 = vst.msk [vmem:[#allocation2 + $0x26] ss:$8 sm:$0x3] %vm10919_vm15, %v1902_v36  ;;  %v2207_v20 = vpop.permute.xlu1 %2206 }
 0x454   : > { %v2192_v13 = vrot.slane %v2191_v0, 1  ;;  %9467 = vmatprep.subr.mxu0 %v10856_v43  ;;  %v2208_v41 = vrot.slane %v2207_v20, 1 }
 0x455   : > { %9468 = vmatpush3.msra.mxu0 %v7325_v35  ;;  %v7315_v35 = vld [vmem:[%s14617_s12 + $0x698] sm:$0xff] }
 0x456   : > { %v2193_v45 = vsel %vm500_vm0, %v2191_v0, %v2192_v13  ;;  %9469 = vmatprep.subr.mxu0 %v10856_v43  ;;  %v2209_v39 = vsel %vm1456_vm8, %v2207_v20, %v2208_v41 }
 0x457   : > { %2196 = vst.msk [vmem:[#allocation2 + $0x79] ss:$8 sm:$0x3] %vm10229_vm3, %v2193_v45  ;;  %v2419_v34 = vpop.permute.xlu0 %2418  ;;  %9470 = vmatpush3.msra.mxu0 %v7324_v4  ;;  %v2216_v51 = vpop.permute.xlu1 %2215 }
 0x458   : > { %v2420_v15 = vrot.slane %v2419_v34, 7  ;;  %2212 = vst.msk [vmem:[#allocation2 + $0x81] ss:$8 sm:$0x3] %vm10764_vm7, %v2209_v39  ;;  %9471 = vmatprep.subr.mxu0 %v10856_v43  ;;  %v2217_v53 = vrot.slane %v2216_v51, 1 }
 0x459   : > { %9472 = vmatpush3.msra.mxu0 %v7323_v12 }
 0x45a   : > { %v2421_v56 = vsel %vm500_vm0, %v2420_v15, %v2419_v34  ;;  %9473 = vmatprep.subr.mxu0 %v10856_v43  ;;  %v2218_v50 = vsel %vm1469_vm6, %v2216_v51, %v2217_v53  ;;  %v2635_v20 = vld [vmem:[#allocation2 + $0x28] sm:$0xfe]  ;;  %v2634_v4 = vld [vmem:[#allocation2 + $0x20] sm:$0xfe]  ;;  %v7314_v34 = vld [vmem:[%s14617_s12 + $0x690] sm:$0xff] }
 0x45b   : > { %2424 = vst.msk [vmem:[#allocation2 + $0x82] ss:$8 sm:$0x3] %vm10764_vm7, %v2421_v56  ;;  %v2428_v48 = vpop.permute.xlu0 %2427  ;;  %9474 = vmatpush3.msra.mxu0 %v7322_v49  ;;  %v2329_v30 = vpop.permute.xlu1 %2328  ;;  %v2794_v53 = vrot.slane %v2635_v20, 1 }
 0x45c   : > { %v2429_v24 = vrot.slane %v2428_v48, 7  ;;  %2221 = vst.msk [vmem:[#allocation2 + $0x89] ss:$8 sm:$0x3] %vm10798_vm11, %v2218_v50  ;;  %9475 = vmatprep.subr.mxu0 %v10856_v43  ;;  %v2330_v10 = vrot.slane %v2329_v30, 7 }
 0x45d   : > { %2226 = vst.msk [vmem:[#allocation2 + $0x91] ss:$8 sm:$0x3] %vm10919_vm15, %v2223_v5  ;;  %9476 = vmatpush3.msra.mxu0 %v7321_v59 }
 0x45e   : > { %v2430_v3 = vsel %vm1456_vm8, %v2429_v24, %v2428_v48  ;;  %v2638_v46 = vld [vmem:[#allocation2 + $0x78] sm:$0x1f]  ;;  %9477 = vmatprep.subr.mxu0 %v10856_v43  ;;  %v2331_v16 = vsel %vm1469_vm6, %v2330_v10, %v2329_v30  ;;  %v7313_v48 = vld [vmem:[%s14617_s12 + $0x688] sm:$0xff] }
 0x45f   : > { %2433 = vst.msk [vmem:[#allocation2 + $0x8a] ss:$8 sm:$0x3] %vm10798_vm11, %v2430_v3  ;;  %v2382_v9 = vpop.permute.xlu0 %2381  ;;  %v2802_v42 = vrot.slane %v2638_v46, 1  ;;  %9478 = vmatpush3.msra.mxu0 %v7320_v63  ;;  %v1632_v22 = vpop.permute.xlu1 %1631  ;;  %v2533_v63 = vld [vmem:[%s14617_s12 + $0x78] sm:$0xff]  ;;  %v2053_v3 = vcombine.high %v10408_v1, %v10408_v1  ;;  %v2532_v1 = vld [vmem:[%s14617_s12 + $0x70] sm:$0xff] }
 0x460   : > { %v2383_v17 = vrot.slane %v2382_v9, 7  ;;  %2334 = vst.msk [vmem:[#allocation2 + $0x58] ss:$8 sm:$0x3] %vm10919_vm15, %v2331_v16  ;;  %9479 = vmatprep.subr.mxu0 %v10856_v43  ;;  %v1633_v54 = vrot.slane %v1632_v22, 7 }
 0x461   : > { %v2803_v52 = vsel %vm2778_vm12, %v2783_v21, %v2802_v42  ;;  %9480 = vmatpush3.msra.mxu0 %v7319_v38  ;;  %v7317_v21 = vld [vmem:[%s14617_s12 + $0x6a8] sm:$0xff]  ;;  %v7312_v38 = vld [vmem:[%s14617_s12 + $0x680] sm:$0xff] }
 0x462   : > { %v2384_v25 = vsel %vm1469_vm6, %v2383_v17, %v2382_v9  ;;  %2904 = vmatprep.mubr.f32.mxu1 %v2803_v52  ;;  %9481 = vmatprep.subr.mxu0 %v10856_v43  ;;  %v11129_v58 = vld [vmem:[#allocation2 + $0x80] sm:$0x1f]  ;;  %v1634_v47 = vsel %vm1469_vm6, %v1633_v54, %v1632_v22  ;;  %v2547_v22 = vld [vmem:[%s14617_s12 + $0xe8] sm:$0xff]  ;;  %v2581_v52 = vld [vmem:[%s14617_s12 + $0x1f8] sm:$0xff] }
 0x463   : > { %2387 = vst.msk [vmem:[#allocation2 + $0x5d] ss:$8 sm:$0x3] %vm10919_vm15, %v2384_v25  ;;  %v1846_v23 = vpop.permute.xlu0 %1845  ;;  %2905 = vmatmul.mubr.f32.gmra.mxu1 %v2801_v31  ;;  %9482 = vmatpush3.msra.mxu0 %v7318_v18  ;;  %1637 = vst.msk [vmem:[#allocation2 + $0x93] ss:$8 sm:$0x3] %vm10919_vm15, %v1634_v47  ;;  %v2007_v28 = vpop.permute.xlu1 %2006 }
 0x464   : > { %v1847_v57 = vrot.slane %v1846_v23, 7  ;;  %2909 = vmatprep.mubr.f32.mxu1 %v2802_v42  ;;  %9483 = vmatprep.subr.mxu0 %v10856_v43  ;;  %v2008_v29 = vrot.slane %v2007_v28, 7  ;;  %v2804_v11 = vrot.slane %v11129_v58, 1  ;;  %v2548_v42 = vld [vmem:[%s14617_s12 + $0xf0] sm:$0xff]  ;;  %v11209_v18 = vld [vmem:[#allocation2 + $0xa0] sm:$0x1f] }
 0x465   : > { %9484 = vmatpush3.msra.mxu0 %v7317_v21  ;;  %v2565_v21 = vld [vmem:[%s14617_s12 + $0x178] sm:$0xff] }
 0x466   : > { %v1848_v55 = vsel %vm1456_vm8, %v1847_v57, %v1846_v23  ;;  %v2640_v61 = vld [vmem:[#allocation2 + $0x88] sm:$0x1f]  ;;  %9485 = vmatprep.subr.mxu0 %v10856_v43  ;;  %v2009_v36 = vsel %vm500_vm0, %v2008_v29, %v2007_v28  ;;  %v2805_v15 = vsel %vm2778_vm12, %v2786_v8, %v2804_v11  ;;  %v2791_v8 = vrot.slane %v2634_v4, 1  ;;  %v2546_v57 = vld [vmem:[%s14617_s12 + $0xe0] sm:$0xff]  ;;  %v2545_v4 = vld [vmem:[%s14617_s12 + $0xd8] sm:$0xff] }
 0x467   : > { %1851 = vst.msk [vmem:[#allocation2 + $0x94] ss:$8 sm:$0x3] %vm10919_vm15, %v1848_v55  ;;  %v2437_v6 = vpop.permute.xlu0 %2436  ;;  %2910 = vmatmul.mubr.f32.gmra.mxu1 %v2800_v32  ;;  %v2806_v0 = vrot.slane %v2640_v61, 1  ;;  %9486 = vmatpush3.msra.mxu0 %v7316_v27  ;;  %v2030_v41 = vpop.permute.xlu1 %2029  ;;  %v2531_v23 = vld [vmem:[%s14617_s12 + $0x68] sm:$0xff]  ;;  %v2580_v55 = vld [vmem:[%s14617_s12 + $0x1f0] sm:$0xff] }
 0x468   : > { %v2438_v13 = vrot.slane %v2437_v6, 7  ;;  %2012 = vst.msk [vmem:[#allocation2 + $0x90] ss:$8 sm:$0x3] %vm10919_vm15, %v2009_v36  ;;  %9487 = vmatprep.subr.mxu0 %v10856_v43  ;;  %v2031_v12 = vrot.slane %v2030_v41, 1  ;;  %v2530_v61 = vld [vmem:[%s14617_s12 + $0x60] sm:$0xff] }
 0x469   : > { %v2807_v45 = vsel %vm2778_vm12, %v2789_v7, %v2806_v0  ;;  %9488 = vmatpush3.msra.mxu0 %v7315_v35  ;;  %v2636_v7 = vld [vmem:[#allocation2 + $0x30] sm:$0xfe] }
 0x46a   : > { %v2439_v39 = vsel %vm1469_vm6, %v2438_v13, %v2437_v6  ;;  %2984 = vmatprep.mubr.f32.mxu0 %v2807_v45  ;;  %v11160_v51 = vld [vmem:[#allocation2 + $0x60] sm:$0xff]  ;;  %v11162_v49 = vld [vmem:[#allocation2 + $0x58] sm:$0xff]  ;;  %9489 = vmatprep.subr.mxu0 %v10856_v43  ;;  %v2032_v5 = vsel %vm1456_vm8, %v2030_v41, %v2031_v12  ;;  %v2797_v10 = vrot.slane %v2636_v7, 1  ;;  %v2564_v36 = vld [vmem:[%s14617_s12 + $0x170] sm:$0xff]  ;;  %v2276_v41 = vcombine.high %v10393_v60, %v10393_v60 }
 0x46b   : > { %2442 = vst.msk [vmem:[#allocation2 + $0x92] ss:$8 sm:$0x3] %vm10919_vm15, %v2439_v39  ;;  %v2046_v26 = vpop.permute.xlu0 %2045  ;;  %2985 = vmatmul.mubr.f32.gmra.mxu0 %v2805_v15  ;;  %v2795_v56 = vrot.slane %v11160_v51, 1  ;;  %v2792_v59 = vrot.slane %v11162_v49, 1  ;;  %v2060_v24 = vpop.permute.xlu1 %2059  ;;  %v2579_v12 = vld [vmem:[%s14617_s12 + $0x1e8] sm:$0xff] }
 0x46c   : > { %v2047_v50 = vrot.slane %v2046_v26, 1  ;;  %2989 = vmatprep.mubr.f32.mxu0 %v2806_v0  ;;  %9490 = vmatpush3.msra.mxu0 %v7314_v34  ;;  %2035 = vst.msk [vmem:[#allocation2 + $0x7d] ss:$8 sm:$0x3] %vm10229_vm3, %v2032_v5  ;;  %v2061_v46 = vrot.slane %v2060_v24, 7  ;;  %v2799_v25 = vsel %vm2778_vm12, %v2797_v10, %v10859_v33  ;;  %v2812_v0 = vrot.slane %v11209_v18, 1 }
 0x46d   : > { %v2796_v32 = vsel %vm2778_vm12, %v2794_v53, %v2795_v56  ;;  %9491 = vmatprep.subr.mxu0 %v10856_v43  ;;  %v2793_v30 = vsel %vm2778_vm12, %v2791_v8, %v2792_v59  ;;  %v2529_v7 = vld [vmem:[%s14617_s12 + $0x58] sm:$0xff]  ;;  %v2578_v8 = vld [vmem:[%s14617_s12 + $0x1e0] sm:$0xff] }
 0x46e   : > { %v2048_v9 = vsel %vm1469_vm6, %v2046_v26, %v2047_v50  ;;  %3059 = vmatprep.mubr.f32.mxu1 %v2796_v32  ;;  %9492 = vmatpush3.msra.mxu0 %v7313_v48  ;;  %v2062_v17 = vsel %vm500_vm0, %v2061_v46, %v2060_v24  ;;  %v2813_v60 = vsel %vm2778_vm12, %v10859_v33, %v2812_v0  ;;  %v2544_v48 = vld [vmem:[%s14617_s12 + $0xd0] sm:$0xff]  ;;  %v2562_v50 = vld [vmem:[%s14617_s12 + $0x160] sm:$0xff]  ;;  %v2543_v24 = vld [vmem:[%s14617_s12 + $0xc8] sm:$0xff] }
 0x46f   : > { %2051 = vst.msk [vmem:[#allocation2 + $0x85] ss:$8 sm:$0x3] %vm10764_vm7, %v2048_v9  ;;  %v2244_v16 = vpop.permute.xlu0 %2243  ;;  %2990 = vmatmul.mubr.f32.gmra.mxu0 %v2804_v11  ;;  %3060 = vmatmul.mubr.f32.vlgmr.msra.gmra.mxu1 %v2793_v30  ;;  %v2260_v54 = vpop.permute.xlu1 %2259  ;;  %v2577_v30 = vld [vmem:[%s14617_s12 + $0x1d8] sm:$0xff]  ;;  %v2542_v10 = vld [vmem:[%s14617_s12 + $0xc0] sm:$0xff]  ;;  %v2498_v46 = vld [vmem:[#allocation2 + $0x8] sm:$0xff] }
 0x470   : > { %2056 = vst.msk [vmem:[#allocation2 + $0x8d] ss:$8 sm:$0x3] %vm10798_vm11, %v2053_v3  ;;  %v2245_v31 = vrot.slane %v2244_v16, 1  ;;  %8284 = vmatpush3.msra.mxu1 %v2533_v63  ;;  %9493 = vmatprep.subr.mxu0 %v10856_v43  ;;  %v2261_v58 = vrot.slane %v2260_v54, 1  ;;  %v2561_v63 = vld [vmem:[%s14617_s12 + $0x158] sm:$0xff] }
 0x471   : > { %2065 = vst.msk [vmem:[#allocation2 + $0x95] ss:$8 sm:$0x3] %vm10919_vm15, %v2062_v17  ;;  %8285 = vmatprep.subr.mxu1 %v2548_v42  ;;  %9494 = vmatpush3.msra.mxu0 %v7312_v38  ;;  %v2526_v3 = vld [vmem:[%s14617_s12 + $0x40] sm:$0xff]  ;;  %v2560_v9 = vld [vmem:[%s14617_s12 + $0x150] sm:$0xff]  ;;  %v2541_v42 = vld [vmem:[%s14617_s12 + $0xb8] sm:$0xff] }
 0x472   : > { %v2246_v47 = vsel %vm500_vm0, %v2244_v16, %v2245_v31  ;;  %8286 = vmatpush3.msra.mxu1 %v2532_v1  ;;  %9495 = vmatprep.mubr.msk.f32.mxu0 %vm9900_vm2, %v10856_v43  ;;  %v2642_v28 = vld [vmem:[#allocation2 + $0x98] sm:$0x1f]  ;;  %v11227_v27 = vld [vmem:[#allocation2 + $0x90] sm:$0x1f]  ;;  %v2262_v35 = vsel %vm1456_vm8, %v2260_v54, %v2261_v58  ;;  %v2575_v16 = vld [vmem:[%s14617_s12 + $0x1c8] sm:$0xff] }
 0x473   : > { %2249 = vst.msk [vmem:[#allocation2 + $0x7e] ss:$8 sm:$0x3] %vm10229_vm3, %v2246_v47  ;;  %8287 = vmatprep.subr.mxu1 %v2547_v22  ;;  %8324 = vmatprep.subr.mxu0 %v2581_v52  ;;  %v2269_v29 = vpop.permute.xlu0 %2268  ;;  %v2810_v11 = vrot.slane %v2642_v28, 1  ;;  %v2808_v6 = vrot.slane %v11227_v27, 1  ;;  %v2472_v13 = vpop.permute.xlu1 %2471  ;;  %v2500_v38 = vld [vmem:[#allocation2 + $0x18] sm:$0xff] }
 0x474   : > { %v2270_v37 = vrot.slane %v2269_v29, 1  ;;  %9496 = vmatmul.mubr.f32.vlgmr.msra.gmra.mxu0 %v2799_v25  ;;  %8288 = vmatpush3.msra.mxu1 %v2531_v23  ;;  %2265 = vst.msk [vmem:[#allocation2 + $0x86] ss:$8 sm:$0x3] %vm10764_vm7, %v2262_v35  ;;  %v2473_v45 = vrot.slane %v2472_v13, 7  ;;  %v2525_v1 = vld [vmem:[%s14617_s12 + $0x38] sm:$0xff] }
 0x475   : > { %8325 = vmatpush3.msra.mxu0 %v2565_v21  ;;  %8289 = vmatprep.subr.mxu1 %v2546_v57  ;;  %v2811_v20 = vsel %vm2778_vm12, %v2795_v56, %v2810_v11  ;;  %v2809_v39 = vsel %vm2778_vm12, %v2792_v59, %v2808_v6  ;;  %v2563_v56 = vld [vmem:[%s14617_s12 + $0x168] sm:$0xff]  ;;  %v2540_v31 = vld [vmem:[%s14617_s12 + $0xb0] sm:$0xff]  ;;  %v2574_v22 = vld [vmem:[%s14617_s12 + $0x1c0] sm:$0xff]  ;;  %vm4137_vm3 = vcmask 1044480  }
 0x476   : > { %v2271_v34 = vsel %vm1469_vm6, %v2269_v29, %v2270_v37  ;;  %8326 = vmatprep.subr.mxu0 %v2580_v55  ;;  %8290 = vmatpush3.msra.mxu1 %v2530_v61  ;;  %v2474_v26 = vsel %vm500_vm0, %v2473_v45, %v2472_v13  ;;  %v2559_v17 = vld [vmem:[%s14617_s12 + $0x148] sm:$0xff]  ;;  %v2524_v52 = vld [vmem:[%s14617_s12 + $0x30] sm:$0xff]  ;;  %v2558_v18 = vld [vmem:[%s14617_s12 + $0x140] sm:$0xff]  ;;  %vm3616_vm0 = vcmask 1045504  }
 0x477   : > { %2274 = vst.msk [vmem:[#allocation2 + $0x8e] ss:$8 sm:$0x3] %vm10798_vm11, %v2271_v34  ;;  %8327 = vmatpush3.msra.mxu0 %v2564_v36  ;;  %3064 = vmatprep.mubr.f32.mxu1 %v2811_v20  ;;  %v2481_v15 = vpop.permute.xlu0 %2480  ;;  %v2490_v33 = vpop.permute.xlu1 %2489  ;;  %v2539_v54 = vld [vmem:[%s14617_s12 + $0xa8] sm:$0xff]  ;;  %v2573_v25 = vld [vmem:[%s14617_s12 + $0x1b8] sm:$0xff]  ;;  %v2538_v58 = vld [vmem:[%s14617_s12 + $0xa0] sm:$0xff] }
 0x478   : > { %2279 = vst.msk [vmem:[#allocation2 + $0x96] ss:$8 sm:$0x3] %vm10919_vm15, %v2276_v41  ;;  %9498 = vmatprep.mubr.msk.f32.mxu0 %vm9900_vm2, %v10856_v43  ;;  %8291 = vmatprep.subr.mxu1 %v2545_v4  ;;  %v2482_v53 = vrot.slane %v2481_v15, 7  ;;  %v2491_v59 = vrot.slane %v2490_v33, 7  ;;  %v2523_v23 = vld [vmem:[%s14617_s12 + $0x28] sm:$0xff] }
 0x479   : > { %2477 = vst.msk [vmem:[#allocation2 + $0x87] ss:$8 sm:$0x3] %vm10764_vm7, %v2474_v26  ;;  %8328 = vmatprep.subr.mxu0 %v2579_v12  ;;  %3065 = vmatmul.mubr.f32.gmra.mxu1 %v2809_v39  ;;  %v2557_v21 = vld [vmem:[%s14617_s12 + $0x138] sm:$0xff]  ;;  %v2572_v47 = vld [vmem:[%s14617_s12 + $0x1b0] sm:$0xff]  ;;  %v2522_v57 = vld [vmem:[%s14617_s12 + $0x20] sm:$0xff] }
 0x47a   : > { %v2483_v5 = vsel %vm1456_vm8, %v2482_v53, %v2481_v15  ;;  %9499 = vmatmul.mubr.f32.gmra.mxu0 %v2813_v60  ;;  %8292 = vmatpush3.msra.mxu1 %v2529_v7  ;;  %v2492_v32 = vsel %vm1469_vm6, %v2491_v59, %v2490_v33  ;;  %v2556_v28 = vld [vmem:[%s14617_s12 + $0x130] sm:$0xff]  ;;  %v2537_v27 = vld [vmem:[%s14617_s12 + $0x98] sm:$0xff]  ;;  %v2571_v29 = vld [vmem:[%s14617_s12 + $0x1a8] sm:$0xff]  ;;  %vm7123_vm6 = vcmask 490496   ;;  %vm7126_vm7 = vcmask 486400  }
 0x47b   : > { %2486 = vst.msk [vmem:[#allocation2 + $0x8f] ss:$8 sm:$0x3] %vm10798_vm11, %v2483_v5  ;;  %8329 = vmatpush3.msra.mxu0 %v2563_v56  ;;  %3069 = vmatprep.mubr.f32.mxu1 %v2810_v11  ;;  %v2521_v55 = vld [vmem:[%s14617_s12 + $0x18] sm:$0xff]  ;;  %v2555_v61 = vld [vmem:[%s14617_s12 + $0x128] sm:$0xff]  ;;  %v2536_v11 = vld [vmem:[%s14617_s12 + $0x90] sm:$0xff] }
 0x47c   : > { %8293 = vmatprep.subr.mxu1 %v2544_v48  ;;  %8330 = vmatprep.subr.mxu0 %v2578_v8  ;;  %2495 = vst.msk [vmem:[#allocation2 + $0x97] ss:$8 sm:$0x3] %vm10919_vm15, %v2492_v32  ;;  %v2554_v35 = vld [vmem:[%s14617_s12 + $0x120] sm:$0xff]  ;;  %v2535_v37 = vld [vmem:[%s14617_s12 + $0x88] sm:$0xff]  ;;  %v2569_v36 = vld [vmem:[%s14617_s12 + $0x198] sm:$0xff] }
 0x47d   : > { %8294 = vmatpush3.msra.mxu1 %v2528_v19  ;;  %8331 = vmatpush3.msra.mxu0 %v2562_v50  ;;  %v2519_v13 = vld [vmem:[%s14617_s12 + $0x8] sm:$0xff]  ;;  %v2553_v20 = vld [vmem:[%s14617_s12 + $0x118] sm:$0xff]  ;;  %v2534_v4 = vld [vmem:[%s14617_s12 + $0x80] sm:$0xff] }
 0x47e   : > { %9501 = vmatprep.mubr.msk.f32.mxu0 %vm9900_vm2, %v10856_v43  ;;  %8295 = vmatprep.subr.mxu1 %v2543_v24  ;;  %v2568_v41 = vld [vmem:[%s14617_s12 + $0x190] sm:$0xff]  ;;  %v2518_v45 = vld [vmem:[%s14617_s12] sm:$0xff]  ;;  %v2567_v12 = vld [vmem:[%s14617_s12 + $0x188] sm:$0xff] }
 0x47f   : > { %8332 = vmatprep.subr.mxu0 %v2577_v30  ;;  %3070 = vmatmul.mubr.f32.gmra.mxu1 %v2808_v6  ;;  %v2570_v6 = vld [vmem:[%s14617_s12 + $0x1a0] sm:$0xff]  ;;  %v2552_v34 = vld [vmem:[%s14617_s12 + $0x110] sm:$0xff]  ;;  %v2613_v39 = vld [vmem:[%s14617_s12 + $0x2f8] sm:$0xff] }
 0x480   : > { %9502 = vmatmul.mubr.f32.gmra.mxu0 %v2812_v0  ;;  %8296 = vmatpush3.msra.mxu1 %v2527_v40  ;;  %v2520_v0 = vld [vmem:[%s14617_s12 + $0x10] sm:$0xff]  ;;  %v2551_v15 = vld [vmem:[%s14617_s12 + $0x108] sm:$0xff]  ;;  %v2597_v60 = vld [vmem:[%s14617_s12 + $0x278] sm:$0xff] }
 0x481   : > { %8333 = vmatpush3.msra.mxu0 %v2561_v63  ;;  %8297 = vmatprep.subr.mxu1 %v2542_v10  ;;  %v2566_v7 = vld [vmem:[%s14617_s12 + $0x180] sm:$0xff]  ;;  %v2612_v26 = vld [vmem:[%s14617_s12 + $0x2f0] sm:$0xff]  ;;  %v2611_v33 = vld [vmem:[%s14617_s12 + $0x2e8] sm:$0xff] }
 0x482   : > { %3219 = vmatprep.mubr.f32.mxu1 %v2498_v46  ;;  %8334 = vmatprep.subr.mxu0 %v2576_v62  ;;  %v2550_v53 = vld [vmem:[%s14617_s12 + $0x100] sm:$0xff]  ;;  %v2596_v56 = vld [vmem:[%s14617_s12 + $0x270] sm:$0xff]  ;;  %v2512_v8 = vld [vmem:[#allocation2 + $0x78] sm:$0xf] }
 0x483   : > { %3299 = vmatprep.mubr.f32.mxu0 %v2500_v38  ;;  %8298 = vmatpush3.msra.mxu1 %v2526_v3  ;;  %v2499_v48 = vld [vmem:[#allocation2 + $0x10] sm:$0xff]  ;;  %v2629_v59 = vld [vmem:[%s14617_s12 + $0x378] sm:$0xff]  ;;  %v2610_v5 = vld [vmem:[%s14617_s12 + $0x2e0] sm:$0xff] }
 0x484   : > { %8335 = vmatpush3.msra.mxu0 %v2560_v9  ;;  %8299 = vmatprep.subr.mxu1 %v2541_v42  ;;  %v2594_v19 = vld [vmem:[%s14617_s12 + $0x260] sm:$0xff]  ;;  %v2628_v50 = vld [vmem:[%s14617_s12 + $0x370] sm:$0xff]  ;;  %v2609_v32 = vld [vmem:[%s14617_s12 + $0x2d8] sm:$0xff] }
 0x485   : > { %8336 = vmatprep.subr.mxu0 %v2575_v16  ;;  %8300 = vmatpush3.msra.mxu1 %v2525_v1  ;;  %v2511_v24 = vld [vmem:[#allocation2 + $0x70] sm:$0xf]  ;;  %v2514_v30 = vld [vmem:[#allocation2 + $0x88] sm:$0xf]  ;;  %v2625_v9 = vld [vmem:[%s14617_s12 + $0x358] sm:$0xff] }
 0x486   : > { %8337 = vmatpush3.msra.mxu0 %v2559_v17  ;;  %8301 = vmatprep.subr.mxu1 %v2540_v31  ;;  %v2627_v40 = vld [vmem:[%s14617_s12 + $0x368] sm:$0xff]  ;;  %v2608_v63 = vld [vmem:[%s14617_s12 + $0x2d0] sm:$0xff]  ;;  %v2513_v42 = vld [vmem:[#allocation2 + $0x80] sm:$0xf] }
 0x487   : > { %8338 = vmatprep.subr.mxu0 %v2574_v22  ;;  %8302 = vmatpush3.msra.mxu1 %v2524_v52  ;;  %v2502_v10 = vld [vmem:[#allocation2 + $0x28] sm:$0xff]  ;;  %v2592_v62 = vld [vmem:[%s14617_s12 + $0x250] sm:$0xff]  ;;  %v2606_v38 = vld [vmem:[%s14617_s12 + $0x2c0] sm:$0xff] }
 0x488   : > { %8339 = vmatpush3.msra.mxu0 %v2558_v18  ;;  %8303 = vmatprep.subr.mxu1 %v2539_v54  ;;  %v2607_v3 = vld [vmem:[%s14617_s12 + $0x2c8] sm:$0xff]  ;;  %v2590_v16 = vld [vmem:[%s14617_s12 + $0x240] sm:$0xff]  ;;  %v2624_v1 = vld [vmem:[%s14617_s12 + $0x350] sm:$0xff] }
 0x489   : > { %8340 = vmatprep.subr.mxu0 %v2573_v25  ;;  %8304 = vmatpush3.msra.mxu1 %v2523_v23  ;;  %v2591_v46 = vld [vmem:[%s14617_s12 + $0x248] sm:$0xff]  ;;  %v2605_v17 = vld [vmem:[%s14617_s12 + $0x2b8] sm:$0xff]  ;;  %v2604_v52 = vld [vmem:[%s14617_s12 + $0x2b0] sm:$0xff] }
 0x48a   : > { %8341 = vmatpush3.msra.mxu0 %v2557_v21  ;;  %8305 = vmatprep.subr.mxu1 %v2538_v58  ;;  %v2589_v31 = vld [vmem:[%s14617_s12 + $0x238] sm:$0xff]  ;;  %v2623_v22 = vld [vmem:[%s14617_s12 + $0x348] sm:$0xff]  ;;  %v2588_v18 = vld [vmem:[%s14617_s12 + $0x230] sm:$0xff] }
 0x48b   : > { %8342 = vmatprep.subr.mxu0 %v2572_v47  ;;  %8306 = vmatpush3.msra.mxu1 %v2522_v57  ;;  %v2622_v54 = vld [vmem:[%s14617_s12 + $0x340] sm:$0xff]  ;;  %v2603_v25 = vld [vmem:[%s14617_s12 + $0x2a8] sm:$0xff]  ;;  %v2621_v21 = vld [vmem:[%s14617_s12 + $0x338] sm:$0xff] }
 0x48c   : > { %8343 = vmatpush3.msra.mxu0 %v2556_v28  ;;  %8307 = vmatprep.subr.mxu1 %v2537_v27  ;;  %v2587_v23 = vld [vmem:[%s14617_s12 + $0x228] sm:$0xff]  ;;  %v2602_v58 = vld [vmem:[%s14617_s12 + $0x2a0] sm:$0xff]  ;;  %v2620_v57 = vld [vmem:[%s14617_s12 + $0x330] sm:$0xff] }
 0x48d   : > { %8344 = vmatprep.subr.mxu0 %v2571_v29  ;;  %8308 = vmatpush3.msra.mxu1 %v2521_v55  ;;  %v2586_v47 = vld [vmem:[%s14617_s12 + $0x220] sm:$0xff]  ;;  %v2601_v28 = vld [vmem:[%s14617_s12 + $0x298] sm:$0xff]  ;;  %v2619_v29 = vld [vmem:[%s14617_s12 + $0x328] sm:$0xff] }
 0x48e   : > { %8345 = vmatpush3.msra.mxu0 %v2555_v61  ;;  %8309 = vmatprep.subr.mxu1 %v2536_v11  ;;  %v2585_v27 = vld [vmem:[%s14617_s12 + $0x218] sm:$0xff]  ;;  %v2600_v55 = vld [vmem:[%s14617_s12 + $0x290] sm:$0xff]  ;;  %v2618_v11 = vld [vmem:[%s14617_s12 + $0x320] sm:$0xff] }
 0x48f   : > { %8346 = vmatprep.subr.mxu0 %v2570_v6  ;;  %8310 = vmatpush3.msra.mxu1 %v2520_v0  ;;  %v2584_v61 = vld [vmem:[%s14617_s12 + $0x210] sm:$0xff]  ;;  %v2599_v6 = vld [vmem:[%s14617_s12 + $0x288] sm:$0xff] }
 0x490   : > { %8347 = vmatpush3.msra.mxu0 %v2554_v35  ;;  %8311 = vmatprep.subr.mxu1 %v2535_v37  ;;  %v2583_v0 = vld [vmem:[%s14617_s12 + $0x208] sm:$0xff]  ;;  %v2617_v35 = vld [vmem:[%s14617_s12 + $0x318] sm:$0xff]  ;;  %v2598_v37 = vld [vmem:[%s14617_s12 + $0x280] sm:$0xff] }
 0x491   : > { %8348 = vmatprep.subr.mxu0 %v2569_v36  ;;  %8312 = vmatpush3.msra.mxu1 %v2519_v13  ;;  %v2582_v36 = vld [vmem:[%s14617_s12 + $0x200] sm:$0xff]  ;;  %v2616_v13 = vld [vmem:[%s14617_s12 + $0x310] sm:$0xff] }
 0x492   : > { %8349 = vmatpush3.msra.mxu0 %v2553_v20  ;;  %8313 = vmatprep.subr.mxu1 %v2534_v4  ;;  %v7359_v20 = vld [vmem:[%s14617_s12 + $0x7f8] sm:$0xff]  ;;  %v2501_v4 = vld [vmem:[#allocation2 + $0x20] sm:$0xff] }
 0x493   : > { %8350 = vmatprep.subr.mxu0 %v2568_v41  ;;  %8314 = vmatpush3.msra.mxu1 %v2518_v45  ;;  %v2615_v41 = vld [vmem:[%s14617_s12 + $0x308] sm:$0xff]  ;;  %v7343_v45 = vld [vmem:[%s14617_s12 + $0x778] sm:$0xff] }
 0x494   : > { %8351 = vmatpush3.msra.mxu0 %v2552_v34  ;;  %3220 = vmatmul.mubr.f32.vlgmr.msra.gmra.mxu1 %v10856_v43  ;;  %v7358_v34 = vld [vmem:[%s14617_s12 + $0x7f0] sm:$0xff] }
 0x495   : > { %8352 = vmatprep.subr.mxu0 %v2567_v12  ;;  %8365 = vmatprep.subr.mxu1 %v2613_v39  ;;  %v2614_v12 = vld [vmem:[%s14617_s12 + $0x300] sm:$0xff]  ;;  %v7342_v39 = vld [vmem:[%s14617_s12 + $0x770] sm:$0xff] }
 0x496   : > { %3224 = vmatprep.mubr.f32.mxu1 %v10866_v2  ;;  %8353 = vmatpush3.msra.mxu0 %v2551_v15  ;;  %v2595_v2 = vld [vmem:[%s14617_s12 + $0x268] sm:$0xff] }
 0x497   : > { %8366 = vmatpush3.msra.mxu1 %v2597_v60  ;;  %8354 = vmatprep.subr.mxu0 %v2566_v7  ;;  %v7357_v15 = vld [vmem:[%s14617_s12 + $0x7e8] sm:$0xff]  ;;  %v7375_v7 = vld [vmem:[%s14617_s12 + $0x878] sm:$0xff] }
 0x498   : > { %8367 = vmatprep.subr.mxu1 %v2612_v26  ;;  %8355 = vmatpush3.msra.mxu0 %v2550_v53  ;;  %v7341_v60 = vld [vmem:[%s14617_s12 + $0x768] sm:$0xff]  ;;  %v2516_v26 = vld [vmem:[#allocation2 + $0x98] sm:$0xf]  ;;  %v7356_v53 = vld [vmem:[%s14617_s12 + $0x7e0] sm:$0xff] }
 0x499   : > { %8368 = vmatpush3.msra.mxu1 %v2596_v56  ;;  %3300 = vmatmul.mubr.f32.vlgmr.msra.gmra.mxu0 %v2499_v48  ;;  %v7390_v56 = vld [vmem:[%s14617_s12 + $0x8f0] sm:$0xff]  ;;  %v3476_v48 = vld [vmem:[#allocation2 + $0x8] sm:$0xfc] }
 0x49a   : > { %3225 = vmatmul.mubr.f32.gmra.mxu1 %v10856_v43  ;;  %8369 = vmatprep.subr.mxu1 %v2611_v33  ;;  %v7340_v33 = vld [vmem:[%s14617_s12 + $0x760] sm:$0xff] }
 0x49b   : > { %9504 = vmatprep.subr.mxu0 %v10856_v43  ;;  %3229 = vmatprep.mubr.f32.mxu1 %v2512_v8  ;;  %v11467_v43 = vld [vmem:[#allocation2] sm:$0xff] }
 0x49c   : > { %3304 = vmatprep.mubr.f32.mxu0 %v11018_v14  ;;  %8370 = vmatpush3.msra.mxu1 %v2595_v2  ;;  %v2593_v14 = vld [vmem:[%s14617_s12 + $0x258] sm:$0xff]  ;;  %v11640_v8 = vld [vmem:[#allocation2 + $0x40] sm:$0xff] }
 0x49d   : > { %9505 = vmatpush3.msra.mxu0 %v2629_v59  ;;  %8371 = vmatprep.subr.mxu1 %v2610_v5  ;;  %v7355_v2 = vld [vmem:[%s14617_s12 + $0x7d8] sm:$0xff]  ;;  %v3621_v59 = vrot.slane %v11640_v8, 2  ;;  %v2515_v5 = vld [vmem:[#allocation2 + $0x90] sm:$0xf] }
 0x49e   : > { %9506 = vmatprep.subr.mxu0 %v11467_v43  ;;  %8372 = vmatpush3.msra.mxu1 %v2594_v19  ;;  %v7389_v19 = vld [vmem:[%s14617_s12 + $0x8e8] sm:$0xff] }
 0x49f   : > { %9507 = vmatpush3.msra.mxu0 %v2628_v50  ;;  %3230 = vmatmul.mubr.f32.gmra.mxu1 %v2511_v24  ;;  %v7339_v50 = vld [vmem:[%s14617_s12 + $0x758] sm:$0xff]  ;;  %v3620_v24 = vrot.slane %v3476_v48, 2  ;;  %v11798_v48 = vld [vmem:[#allocation2 + $0x70] sm:$0x3f] }
 0x4a0   : > { %3305 = vmatmul.mubr.f32.gmra.mxu0 %v11003_v44  ;;  %8373 = vmatprep.subr.mxu1 %v2609_v32  ;;  %v2626_v44 = vld [vmem:[%s14617_s12 + $0x360] sm:$0xff]  ;;  %v7373_v32 = vld [vmem:[%s14617_s12 + $0x868] sm:$0xff] }
 0x4a1   : > { %9508 = vmatprep.subr.mxu0 %v11467_v43  ;;  %3309 = vmatprep.mubr.f32.mxu0 %v2514_v30  ;;  %v7388_v30 = vld [vmem:[%s14617_s12 + $0x8e0] sm:$0xff] }
 0x4a2   : > { %8374 = vmatpush3.msra.mxu1 %v2593_v14  ;;  %3379 = vmatprep.mubr.f32.mxu1 %v2502_v10  ;;  %v7354_v14 = vld [vmem:[%s14617_s12 + $0x7d0] sm:$0xff]  ;;  %v7372_v10 = vld [vmem:[%s14617_s12 + $0x860] sm:$0xff] }
 0x4a3   : > { %9509 = vmatpush3.msra.mxu0 %v2627_v40  ;;  %8375 = vmatprep.subr.mxu1 %v2608_v63  ;;  %v3622_v40 = vsel %vm3616_vm0, %v3620_v24, %v3621_v59  ;;  %v7338_v63 = vld [vmem:[%s14617_s12 + $0x750] sm:$0xff]  ;;  %v7423_v24 = vld [vmem:[%s14617_s12 + $0x9f8] sm:$0xff] }
 0x4a4   : > { %9510 = vmatprep.subr.mxu0 %v11467_v43  ;;  %8376 = vmatpush3.msra.mxu1 %v2592_v62  ;;  %v7353_v62 = vld [vmem:[%s14617_s12 + $0x7c8] sm:$0xff] }
 0x4a5   : > { %9511 = vmatpush3.msra.mxu0 %v2626_v44  ;;  %8377 = vmatprep.subr.mxu1 %v2607_v3  ;;  %v3478_v44 = vld [vmem:[#allocation2 + $0x18] sm:$0xfc]  ;;  %v2517_v3 = vld [vmem:[#allocation2 + $0xa0] sm:$0xf] }
 0x4a6   : > { %3310 = vmatmul.mubr.f32.gmra.mxu0 %v2513_v42  ;;  %9512 = vmatprep.subr.mxu0 %v11467_v43 }
 0x4a7   : > { %8378 = vmatpush3.msra.mxu1 %v2591_v46  ;;  %9513 = vmatpush3.msra.mxu0 %v2625_v9  ;;  %v7387_v46 = vld [vmem:[%s14617_s12 + $0x8d8] sm:$0xff]  ;;  %v11676_v9 = vld [vmem:[#allocation2 + $0x50] sm:$0xff] }
 0x4a8   : > { %8379 = vmatprep.subr.mxu1 %v2606_v38  ;;  %9514 = vmatprep.subr.mxu0 %v11467_v43  ;;  %v3627_v42 = vrot.slane %v11676_v9, 2  ;;  %v7337_v38 = vld [vmem:[%s14617_s12 + $0x748] sm:$0xff] }
 0x4a9   : > { %8380 = vmatpush3.msra.mxu1 %v2590_v16  ;;  %9515 = vmatpush3.msra.mxu0 %v2624_v1  ;;  %v7371_v16 = vld [vmem:[%s14617_s12 + $0x858] sm:$0xff]  ;;  %v3626_v1 = vrot.slane %v3478_v44, 2  ;;  %v3485_v44 = vld [vmem:[#allocation2 + $0x88] sm:$0x3f] }
 0x4aa   : > { %8381 = vmatprep.subr.mxu1 %v2605_v17  ;;  %9516 = vmatprep.subr.mxu0 %v11467_v43  ;;  %v7352_v17 = vld [vmem:[%s14617_s12 + $0x7c0] sm:$0xff] }
 0x4ab   : > { %8382 = vmatpush3.msra.mxu1 %v2589_v31  ;;  %9517 = vmatpush3.msra.mxu0 %v2623_v22  ;;  %v7386_v31 = vld [vmem:[%s14617_s12 + $0x8d0] sm:$0xff]  ;;  %v7336_v22 = vld [vmem:[%s14617_s12 + $0x740] sm:$0xff] }
 0x4ac   : > { %8383 = vmatprep.subr.mxu1 %v2604_v52  ;;  %9518 = vmatprep.subr.mxu0 %v11467_v43  ;;  %v3628_v52 = vsel %vm3616_vm0, %v3626_v1, %v3627_v42 }
 0x4ad   : > { %8384 = vmatpush3.msra.mxu1 %v2588_v18  ;;  %9519 = vmatpush3.msra.mxu0 %v2622_v54  ;;  %v7370_v18 = vld [vmem:[%s14617_s12 + $0x850] sm:$0xff]  ;;  %v7351_v54 = vld [vmem:[%s14617_s12 + $0x7b8] sm:$0xff] }
 0x4ae   : > { %8385 = vmatprep.subr.mxu1 %v2603_v25  ;;  %9520 = vmatprep.subr.mxu0 %v11467_v43  ;;  %v7385_v25 = vld [vmem:[%s14617_s12 + $0x8c8] sm:$0xff] }
 0x4af   : > { %8386 = vmatpush3.msra.mxu1 %v2587_v23  ;;  %9521 = vmatpush3.msra.mxu0 %v2621_v21  ;;  %v7335_v23 = vld [vmem:[%s14617_s12 + $0x738] sm:$0xff]  ;;  %v7369_v21 = vld [vmem:[%s14617_s12 + $0x848] sm:$0xff] }
 0x4b0   : > { %8387 = vmatprep.subr.mxu1 %v2602_v58  ;;  %9522 = vmatprep.subr.mxu0 %v11467_v43  ;;  %v7350_v58 = vld [vmem:[%s14617_s12 + $0x7b0] sm:$0xff] }
 0x4b1   : > { %8388 = vmatpush3.msra.mxu1 %v2586_v47  ;;  %9523 = vmatpush3.msra.mxu0 %v2620_v57  ;;  %v7384_v47 = vld [vmem:[%s14617_s12 + $0x8c0] sm:$0xff]  ;;  %v7334_v57 = vld [vmem:[%s14617_s12 + $0x730] sm:$0xff] }
 0x4b2   : > { %8389 = vmatprep.subr.mxu1 %v2601_v28  ;;  %9524 = vmatprep.subr.mxu0 %v11467_v43  ;;  %v7368_v28 = vld [vmem:[%s14617_s12 + $0x840] sm:$0xff] }
 0x4b3   : > { %8390 = vmatpush3.msra.mxu1 %v2585_v27  ;;  %9525 = vmatpush3.msra.mxu0 %v2619_v29  ;;  %v7349_v27 = vld [vmem:[%s14617_s12 + $0x7a8] sm:$0xff]  ;;  %v7383_v29 = vld [vmem:[%s14617_s12 + $0x8b8] sm:$0xff] }
 0x4b4   : > { %8391 = vmatprep.subr.mxu1 %v2600_v55  ;;  %9526 = vmatprep.subr.mxu0 %v11467_v43  ;;  %v7333_v55 = vld [vmem:[%s14617_s12 + $0x728] sm:$0xff] }
 0x4b5   : > { %8392 = vmatpush3.msra.mxu1 %v2584_v61  ;;  %9527 = vmatpush3.msra.mxu0 %v2618_v11  ;;  %v7367_v61 = vld [vmem:[%s14617_s12 + $0x838] sm:$0xff]  ;;  %v7348_v11 = vld [vmem:[%s14617_s12 + $0x7a0] sm:$0xff] }
 0x4b6   : > { %8393 = vmatprep.subr.mxu1 %v2599_v6  ;;  %9528 = vmatprep.subr.mxu0 %v11467_v43  ;;  %v7382_v6 = vld [vmem:[%s14617_s12 + $0x8b0] sm:$0xff] }
 0x4b7   : > { %8394 = vmatpush3.msra.mxu1 %v2583_v0  ;;  %9529 = vmatpush3.msra.mxu0 %v2617_v35  ;;  %v7332_v0 = vld [vmem:[%s14617_s12 + $0x720] sm:$0xff]  ;;  %v7366_v35 = vld [vmem:[%s14617_s12 + $0x830] sm:$0xff] }
 0x4b8   : > { %8395 = vmatprep.subr.mxu1 %v2598_v37  ;;  %9530 = vmatprep.subr.mxu0 %v11467_v43  ;;  %v7347_v37 = vld [vmem:[%s14617_s12 + $0x798] sm:$0xff] }
 0x4b9   : > { %8396 = vmatpush3.msra.mxu1 %v2582_v36  ;;  %9531 = vmatpush3.msra.mxu0 %v2616_v13  ;;  %v7381_v36 = vld [vmem:[%s14617_s12 + $0x8a8] sm:$0xff]  ;;  %v7331_v13 = vld [vmem:[%s14617_s12 + $0x718] sm:$0xff] }
 0x4ba   : > { %3380 = vmatmul.mubr.f32.vlgmr.msra.gmra.mxu1 %v2501_v4  ;;  %9532 = vmatprep.subr.mxu0 %v11467_v43  ;;  %v7365_v4 = vld [vmem:[%s14617_s12 + $0x828] sm:$0xff] }
 0x4bb   : > { %8425 = vmatprep.subr.mxu1 %v7359_v20  ;;  %3384 = vmatprep.mubr.f32.mxu1 %v11160_v51  ;;  %v7391_v51 = vld [vmem:[%s14617_s12 + $0x8f8] sm:$0xff]  ;;  %v3475_v20 = vld [vmem:[#allocation2] sm:$0xfc] }
 0x4bc   : > { %9533 = vmatpush3.msra.mxu0 %v2615_v41  ;;  %8426 = vmatpush3.msra.mxu1 %v7343_v45  ;;  %v7346_v41 = vld [vmem:[%s14617_s12 + $0x790] sm:$0xff]  ;;  %v7380_v45 = vld [vmem:[%s14617_s12 + $0x8a0] sm:$0xff] }
 0x4bd   : > { %9534 = vmatprep.subr.mxu0 %v11467_v43  ;;  %8427 = vmatprep.subr.mxu1 %v7358_v34  ;;  %v7330_v34 = vld [vmem:[%s14617_s12 + $0x710] sm:$0xff] }
 0x4be   : > { %9535 = vmatpush3.msra.mxu0 %v2614_v12  ;;  %9536 = vmatprep.mubr.msk.f32.mxu0 %vm9900_vm2, %v11467_v43  ;;  %v7364_v12 = vld [vmem:[%s14617_s12 + $0x820] sm:$0xff] }
 0x4bf   : > { %8428 = vmatpush3.msra.mxu1 %v7342_v39  ;;  %9537 = vmatmul.mubr.f32.vlgmr.msra.gmra.mxu0 %v11467_v43  ;;  %v7345_v39 = vld [vmem:[%s14617_s12 + $0x788] sm:$0xff] }
 0x4c0   : > { %3385 = vmatmul.mubr.f32.gmra.mxu1 %v11162_v49  ;;  %8429 = vmatprep.subr.mxu1 %v7357_v15  ;;  %v7374_v49 = vld [vmem:[%s14617_s12 + $0x870] sm:$0xff]  ;;  %v3617_v15 = vrot.slane %v3475_v20, 2  ;;  %v7435_v20 = vld [vmem:[%s14617_s12 + $0xa58] sm:$0xff] }
 0x4c1   : > { %8466 = vmatprep.subr.mxu0 %v7391_v51  ;;  %3389 = vmatprep.mubr.f32.mxu1 %v2516_v26  ;;  %v11778_v51 = vrot.slane %v11467_v43, 2  ;;  %v3483_v26 = vld [vmem:[#allocation2 + $0x78] sm:$0x3f] }
 0x4c2   : > { %8430 = vmatpush3.msra.mxu1 %v7341_v60  ;;  %8467 = vmatpush3.msra.mxu0 %v7375_v7  ;;  %v7379_v60 = vld [vmem:[%s14617_s12 + $0x898] sm:$0xff]  ;;  %v7329_v7 = vld [vmem:[%s14617_s12 + $0x708] sm:$0xff] }
 0x4c3   : > { %8431 = vmatprep.subr.mxu1 %v7356_v53  ;;  %8468 = vmatprep.subr.mxu0 %v7390_v56  ;;  %v7363_v53 = vld [vmem:[%s14617_s12 + $0x818] sm:$0xff]  ;;  %v7344_v56 = vld [vmem:[%s14617_s12 + $0x780] sm:$0xff] }
 0x4c4   : > { %9539 = vmatprep.mubr.msk.f32.mxu0 %vm9900_vm2, %v11467_v43  ;;  %8432 = vmatpush3.msra.mxu1 %v7340_v33  ;;  %v7378_v33 = vld [vmem:[%s14617_s12 + $0x890] sm:$0xff] }
 0x4c5   : > { %8469 = vmatpush3.msra.mxu0 %v7374_v49  ;;  %3390 = vmatmul.mubr.f32.gmra.mxu1 %v2515_v5  ;;  %v7328_v49 = vld [vmem:[%s14617_s12 + $0x700] sm:$0xff]  ;;  %v3619_v5 = vsel %vm3616_vm0, %v3617_v15, %v11778_v51  ;;  %v7433_v15 = vld [vmem:[%s14617_s12 + $0xa48] sm:$0xff] }
 0x4c6   : > { %9540 = vmatmul.mubr.f32.gmra.mxu0 %v11467_v43  ;;  %8433 = vmatprep.subr.mxu1 %v7355_v2  ;;  %v7362_v2 = vld [vmem:[%s14617_s12 + $0x810] sm:$0xff] }
 0x4c7   : > { %8470 = vmatprep.subr.mxu0 %v7389_v19  ;;  %8434 = vmatpush3.msra.mxu1 %v7339_v50  ;;  %v3640_v19 = vrot.slane %v3483_v26, 2  ;;  %v7377_v50 = vld [vmem:[%s14617_s12 + $0x888] sm:$0xff]  ;;  %v7398_v26 = vld [vmem:[%s14617_s12 + $0x930] sm:$0xff] }
 0x4c8   : > { %3737 = vmatprep.mubr.f32.mxu1 %v3622_v40  ;;  %8471 = vmatpush3.msra.mxu0 %v7373_v32  ;;  %v7361_v32 = vld [vmem:[%s14617_s12 + $0x808] sm:$0xff]  ;;  %v7407_v40 = vld [vmem:[%s14617_s12 + $0x978] sm:$0xff] }
 0x4c9   : > { %8435 = vmatprep.subr.mxu1 %v7354_v14  ;;  %8472 = vmatprep.subr.mxu0 %v7388_v30  ;;  %v3638_v14 = vrot.slane %v11798_v48, 2  ;;  %v3477_v30 = vld [vmem:[#allocation2 + $0x10] sm:$0xfc]  ;;  %v7431_v48 = vld [vmem:[%s14617_s12 + $0xa38] sm:$0xff] }
 0x4ca   : > { %9542 = vmatprep.mubr.msk.f32.mxu0 %vm9900_vm2, %v11467_v43  ;;  %8436 = vmatpush3.msra.mxu1 %v7338_v63  ;;  %v7376_v63 = vld [vmem:[%s14617_s12 + $0x880] sm:$0xff]  ;;  %v3623_v1 = vrot.slane %v3477_v30, 2  ;;  %v7394_v30 = vld [vmem:[%s14617_s12 + $0x910] sm:$0xff] }
 0x4cb   : > { %8473 = vmatpush3.msra.mxu0 %v7372_v10  ;;  %8437 = vmatprep.subr.mxu1 %v7353_v62  ;;  %v11821_v10 = vld [vmem:[#allocation2 + $0x48] sm:$0xff] }
 0x4cc   : > { %9543 = vmatmul.mubr.f32.gmra.mxu0 %v2517_v3  ;;  %8474 = vmatprep.subr.mxu0 %v7387_v46  ;;  %v3624_v62 = vrot.slane %v11821_v10, 2  ;;  %v3641_v3 = vsel %vm3616_vm0, %v3621_v59, %v3640_v19  ;;  %v7422_v46 = vld [vmem:[%s14617_s12 + $0x9f0] sm:$0xff]  ;;  %v3639_v59 = vsel %vm3616_vm0, %v11778_v51, %v3638_v14 }
 0x4cd   : > { %8438 = vmatpush3.msra.mxu1 %v7337_v38  ;;  %8475 = vmatpush3.msra.mxu0 %v7371_v16  ;;  %v7360_v38 = vld [vmem:[%s14617_s12 + $0x800] sm:$0xff]  ;;  %v7406_v16 = vld [vmem:[%s14617_s12 + $0x970] sm:$0xff] }
 0x4ce   : > { %3817 = vmatprep.mubr.f32.mxu0 %v3628_v52  ;;  %8439 = vmatprep.subr.mxu1 %v7352_v17  ;;  %v7421_v17 = vld [vmem:[%s14617_s12 + $0x9e8] sm:$0xff]  ;;  %v3484_v52 = vld [vmem:[#allocation2 + $0x80] sm:$0x3f] }
 0x4cf   : > { %8476 = vmatprep.subr.mxu0 %v7386_v31  ;;  %8440 = vmatpush3.msra.mxu1 %v7336_v22  ;;  %v3644_v31 = vrot.slane %v3485_v44, 2  ;;  %v3625_v22 = vsel %vm3616_vm0, %v3623_v1, %v3624_v62  ;;  %v7393_v44 = vld [vmem:[%s14617_s12 + $0x908] sm:$0xff] }
 0x4d0   : > { %8477 = vmatpush3.msra.mxu0 %v7370_v18  ;;  %8441 = vmatprep.subr.mxu1 %v7351_v54  ;;  %v7405_v18 = vld [vmem:[%s14617_s12 + $0x968] sm:$0xff]  ;;  %v7439_v54 = vld [vmem:[%s14617_s12 + $0xa78] sm:$0xff] }
 0x4d1   : > { %8478 = vmatprep.subr.mxu0 %v7385_v25  ;;  %8442 = vmatpush3.msra.mxu1 %v7335_v23  ;;  %v7420_v25 = vld [vmem:[%s14617_s12 + $0x9e0] sm:$0xff]  ;;  %v3645_v23 = vsel %vm3616_vm0, %v3627_v42, %v3644_v31 }
 0x4d2   : > { %8479 = vmatpush3.msra.mxu0 %v7369_v21  ;;  %8443 = vmatprep.subr.mxu1 %v7350_v58  ;;  %v7404_v21 = vld [vmem:[%s14617_s12 + $0x960] sm:$0xff]  ;;  %v3642_v58 = vrot.slane %v3484_v52, 2 }
 0x4d3   : > { %8480 = vmatprep.subr.mxu0 %v7384_v47  ;;  %8444 = vmatpush3.msra.mxu1 %v7334_v57  ;;  %v7438_v47 = vld [vmem:[%s14617_s12 + $0xa70] sm:$0xff]  ;;  %v3480_v57 = vld [vmem:[#allocation2 + $0x28] sm:$0xfc] }
 0x4d4   : > { %8481 = vmatpush3.msra.mxu0 %v7368_v28  ;;  %8445 = vmatprep.subr.mxu1 %v7349_v27  ;;  %v7419_v28 = vld [vmem:[%s14617_s12 + $0x9d8] sm:$0xff]  ;;  %v11864_v27 = vld [vmem:[#allocation2 + $0x60] sm:$0xff] }
 0x4d5   : > { %8482 = vmatprep.subr.mxu0 %v7383_v29  ;;  %8446 = vmatpush3.msra.mxu1 %v7333_v55  ;;  %v3633_v42 = vrot.slane %v11864_v27, 2  ;;  %v3643_v29 = vsel %vm3616_vm0, %v3624_v62, %v3642_v58  ;;  %v7403_v55 = vld [vmem:[%s14617_s12 + $0x958] sm:$0xff] }
 0x4d6   : > { %8483 = vmatpush3.msra.mxu0 %v7367_v61  ;;  %8447 = vmatprep.subr.mxu1 %v7348_v11  ;;  %v3632_v61 = vrot.slane %v3480_v57, 2  ;;  %v7437_v11 = vld [vmem:[%s14617_s12 + $0xa68] sm:$0xff]  ;;  %v3487_v62 = vld [vmem:[#allocation2 + $0x98] sm:$0x3f]  ;;  %v7470_v57 = vld [vmem:[%s14617_s12 + $0xb70] sm:$0xff] }
 0x4d7   : > { %8484 = vmatprep.subr.mxu0 %v7382_v6  ;;  %8448 = vmatpush3.msra.mxu1 %v7332_v0  ;;  %v7418_v6 = vld [vmem:[%s14617_s12 + $0x9d0] sm:$0xff] }
 0x4d8   : > { %8485 = vmatpush3.msra.mxu0 %v7366_v35  ;;  %8449 = vmatprep.subr.mxu1 %v7347_v37  ;;  %v3634_v0 = vsel %vm3616_vm0, %v3632_v61, %v3633_v42  ;;  %v7402_v35 = vld [vmem:[%s14617_s12 + $0x950] sm:$0xff]  ;;  %v7436_v37 = vld [vmem:[%s14617_s12 + $0xa60] sm:$0xff] }
 0x4d9   : > { %8486 = vmatprep.subr.mxu0 %v7381_v36  ;;  %8450 = vmatpush3.msra.mxu1 %v7331_v13  ;;  %v7417_v36 = vld [vmem:[%s14617_s12 + $0x9c8] sm:$0xff]  ;;  %v12019_v61 = vld [vmem:[#allocation2 + $0xa0] sm:$0x3f] }
 0x4da   : > { %8487 = vmatpush3.msra.mxu0 %v7365_v4  ;;  %8451 = vmatprep.subr.mxu1 %v7346_v41  ;;  %v7401_v13 = vld [vmem:[%s14617_s12 + $0x948] sm:$0xff]  ;;  %v7416_v4 = vld [vmem:[%s14617_s12 + $0x9c0] sm:$0xff] }
 0x4db   : > { %8488 = vmatprep.subr.mxu0 %v7380_v45  ;;  %8452 = vmatpush3.msra.mxu1 %v7330_v34  ;;  %v7400_v41 = vld [vmem:[%s14617_s12 + $0x940] sm:$0xff]  ;;  %v7434_v45 = vld [vmem:[%s14617_s12 + $0xa50] sm:$0xff]  ;;  %v7415_v34 = vld [vmem:[%s14617_s12 + $0x9b8] sm:$0xff] }
 0x4dc   : > { %8489 = vmatpush3.msra.mxu0 %v7364_v12  ;;  %8453 = vmatprep.subr.mxu1 %v7345_v39  ;;  %v7399_v39 = vld [vmem:[%s14617_s12 + $0x938] sm:$0xff] }
 0x4dd   : > { %8490 = vmatprep.subr.mxu0 %v7379_v60  ;;  %8454 = vmatpush3.msra.mxu1 %v7329_v7  ;;  %v7414_v60 = vld [vmem:[%s14617_s12 + $0x9b0] sm:$0xff] }
 0x4de   : > { %8491 = vmatpush3.msra.mxu0 %v7363_v53  ;;  %8455 = vmatprep.subr.mxu1 %v7344_v56  ;;  %v7432_v53 = vld [vmem:[%s14617_s12 + $0xa40] sm:$0xff] }
 0x4df   : > { %8492 = vmatprep.subr.mxu0 %v7378_v33  ;;  %8456 = vmatpush3.msra.mxu1 %v7328_v49  ;;  %v7413_v33 = vld [vmem:[%s14617_s12 + $0x9a8] sm:$0xff] }
 0x4e0   : > { %8493 = vmatpush3.msra.mxu0 %v7362_v2  ;;  %3738 = vmatmul.mubr.f32.vlgmr.msra.gmra.mxu1 %v3619_v5  ;;  %v7397_v49 = vld [vmem:[%s14617_s12 + $0x928] sm:$0xff]  ;;  %v7412_v2 = vld [vmem:[%s14617_s12 + $0x9a0] sm:$0xff] }
 0x4e1   : > { %8494 = vmatprep.subr.mxu0 %v7377_v50  ;;  %8507 = vmatprep.subr.mxu1 %v7423_v24  ;;  %v7396_v5 = vld [vmem:[%s14617_s12 + $0x920] sm:$0xff]  ;;  %v7411_v50 = vld [vmem:[%s14617_s12 + $0x998] sm:$0xff] }
 0x4e2   : > { %3742 = vmatprep.mubr.f32.mxu1 %v3641_v3  ;;  %8495 = vmatpush3.msra.mxu0 %v7361_v32  ;;  %v7395_v24 = vld [vmem:[%s14617_s12 + $0x918] sm:$0xff]  ;;  %v7429_v32 = vld [vmem:[%s14617_s12 + $0xa28] sm:$0xff] }
 0x4e3   : > { %8508 = vmatpush3.msra.mxu1 %v7407_v40  ;;  %8496 = vmatprep.subr.mxu0 %v7376_v63  ;;  %v7428_v40 = vld [vmem:[%s14617_s12 + $0xa20] sm:$0xff]  ;;  %v7409_v63 = vld [vmem:[%s14617_s12 + $0x988] sm:$0xff]  ;;  %v7427_v3 = vld [vmem:[%s14617_s12 + $0xa18] sm:$0xff] }
 0x4e4   : > { %8509 = vmatprep.subr.mxu1 %v7422_v46  ;;  %8497 = vmatpush3.msra.mxu0 %v7360_v38  ;;  %v3479_v46 = vld [vmem:[#allocation2 + $0x20] sm:$0xfc] }
 0x4e5   : > { %8510 = vmatpush3.msra.mxu1 %v7406_v16  ;;  %3818 = vmatmul.mubr.f32.vlgmr.msra.gmra.mxu0 %v3625_v22  ;;  %v7408_v38 = vld [vmem:[%s14617_s12 + $0x980] sm:$0xff]  ;;  %v11983_v16 = vld [vmem:[#allocation2 + $0x58] sm:$0xff]  ;;  %v3648_v22 = vrot.slane %v3487_v62, 2  ;;  %v3629_v52 = vrot.slane %v3479_v46, 2  ;;  %v7482_v46 = vld [vmem:[%s14617_s12 + $0xbd0] sm:$0xff] }
 0x4e6   : > { %3743 = vmatmul.mubr.f32.gmra.mxu1 %v3639_v59  ;;  %8511 = vmatprep.subr.mxu1 %v7421_v17  ;;  %v3630_v1 = vrot.slane %v11983_v16, 2  ;;  %v3481_v59 = vld [vmem:[#allocation2 + $0x30] sm:$0xfc]  ;;  %v7392_v17 = vld [vmem:[%s14617_s12 + $0x900] sm:$0xff] }
 0x4e7   : > { %9545 = vmatprep.subr.mxu0 %v11467_v43  ;;  %3747 = vmatprep.mubr.f32.mxu1 %v3640_v19  ;;  %v7430_v19 = vld [vmem:[%s14617_s12 + $0xa30] sm:$0xff] }
 0x4e8   : > { %3822 = vmatprep.mubr.f32.mxu0 %v3645_v23  ;;  %8512 = vmatpush3.msra.mxu1 %v7405_v18  ;;  %v7471_v18 = vld [vmem:[%s14617_s12 + $0xb78] sm:$0xff]  ;;  %v3631_v23 = vsel %vm3616_vm0, %v3629_v52, %v3630_v1  ;;  %v7446_v52 = vld [vmem:[%s14617_s12 + $0xab0] sm:$0xff] }
 0x4e9   : > { %9546 = vmatpush3.msra.mxu0 %v7439_v54  ;;  %8513 = vmatprep.subr.mxu1 %v7420_v25  ;;  %v3486_v54 = vld [vmem:[#allocation2 + $0x90] sm:$0x3f]  ;;  %v3635_v25 = vrot.slane %v3481_v59, 2  ;;  %v7447_v59 = vld [vmem:[%s14617_s12 + $0xab8] sm:$0xff] }
 0x4ea   : > { %9547 = vmatprep.subr.mxu0 %v11467_v43  ;;  %8514 = vmatpush3.msra.mxu1 %v7404_v21  ;;  %v7425_v21 = vld [vmem:[%s14617_s12 + $0xa08] sm:$0xff] }
 0x4eb   : > { %9548 = vmatpush3.msra.mxu0 %v7438_v47  ;;  %3748 = vmatmul.mubr.f32.gmra.mxu1 %v3638_v14  ;;  %v7410_v14 = vld [vmem:[%s14617_s12 + $0x990] sm:$0xff]  ;;  %v3649_v47 = vsel %vm3616_vm0, %v3633_v42, %v3648_v22  ;;  %v3637_v42 = vsel %vm3616_vm0, %v3635_v25, %v11778_v51  ;;  %v7495_v25 = vld [vmem:[%s14617_s12 + $0xc38] sm:$0xff] }
 0x4ec   : > { %3823 = vmatmul.mubr.f32.gmra.mxu0 %v3643_v29  ;;  %8515 = vmatprep.subr.mxu1 %v7419_v28  ;;  %v7424_v28 = vld [vmem:[%s14617_s12 + $0xa00] sm:$0xff]  ;;  %v3646_v29 = vrot.slane %v3486_v54, 2  ;;  %v7461_v54 = vld [vmem:[%s14617_s12 + $0xb28] sm:$0xff] }
 0x4ed   : > { %9549 = vmatprep.subr.mxu0 %v11467_v43  ;;  %3827 = vmatprep.mubr.f32.mxu0 %v3644_v31  ;;  %v7426_v31 = vld [vmem:[%s14617_s12 + $0xa10] sm:$0xff] }
 0x4ee   : > { %8516 = vmatpush3.msra.mxu1 %v7403_v55  ;;  %3897 = vmatprep.mubr.f32.mxu1 %v3634_v0  ;;  %v7454_v55 = vld [vmem:[%s14617_s12 + $0xaf0] sm:$0xff]  ;;  %v3647_v0 = vsel %vm3616_vm0, %v3630_v1, %v3646_v29  ;;  %v7497_v1 = vld [vmem:[%s14617_s12 + $0xc48] sm:$0xff] }
 0x4ef   : > { %9550 = vmatpush3.msra.mxu0 %v7437_v11  ;;  %8517 = vmatprep.subr.mxu1 %v7418_v6  ;;  %v7469_v11 = vld [vmem:[%s14617_s12 + $0xb68] sm:$0xff]  ;;  %v7503_v6 = vld [vmem:[%s14617_s12 + $0xc78] sm:$0xff] }
 0x4f0   : > { %9551 = vmatprep.subr.mxu0 %v11467_v43  ;;  %8518 = vmatpush3.msra.mxu1 %v7402_v35  ;;  %v7453_v35 = vld [vmem:[%s14617_s12 + $0xae8] sm:$0xff] }
 0x4f1   : > { %9552 = vmatpush3.msra.mxu0 %v7436_v37  ;;  %8519 = vmatprep.subr.mxu1 %v7417_v36  ;;  %v7487_v37 = vld [vmem:[%s14617_s12 + $0xbf8] sm:$0xff]  ;;  %v3650_v36 = vrot.slane %v12019_v61, 2  ;;  %v3996_v61 = vld [vmem:[#allocation2] sm:$0xf8] }
 0x4f2   : > { %3828 = vmatmul.mubr.f32.gmra.mxu0 %v3642_v58  ;;  %9553 = vmatprep.subr.mxu0 %v11467_v43  ;;  %v7455_v58 = vld [vmem:[%s14617_s12 + $0xaf8] sm:$0xff] }
 0x4f3   : > { %8520 = vmatpush3.msra.mxu1 %v7401_v13  ;;  %9554 = vmatpush3.msra.mxu0 %v7435_v20  ;;  %v8173_v12 = vpop.f32.mrf.mxu1  ;;  %v7468_v13 = vld [vmem:[%s14617_s12 + $0xb60] sm:$0xff]  ;;  %v7502_v20 = vld [vmem:[%s14617_s12 + $0xc70] sm:$0xff] }
 0x4f4   : > { %8521 = vmatprep.subr.mxu1 %v7416_v4  ;;  %9555 = vmatprep.subr.mxu0 %v11467_v43  ;;  %v7452_v4 = vld [vmem:[%s14617_s12 + $0xae0] sm:$0xff] }
 0x4f5   : > { %8522 = vmatpush3.msra.mxu1 %v7400_v41  ;;  %9556 = vmatpush3.msra.mxu0 %v7434_v45  ;;  %v8174_v7 = vpop.f32.mrf.mxu1  ;;  %v7486_v41 = vld [vmem:[%s14617_s12 + $0xbf0] sm:$0xff]  ;;  %v3997_v45 = vld [vmem:[#allocation2 + $0x8] sm:$0xf8] }
 0x4f6   : > { %8523 = vmatprep.subr.mxu1 %v7415_v34  ;;  %9557 = vmatprep.subr.mxu0 %v11467_v43  ;;  %v11928_v56 = vadd.f32 %v8174_v7, %v8173_v12  ;;  %v3651_v34 = vsel %vm3616_vm0, %v11778_v51, %v3650_v36  ;;  %v7467_v12 = vld [vmem:[%s14617_s12 + $0xb58] sm:$0xff]  ;;  %v4141_v51 = vrot.slane %v3997_v45, 3  ;;  %v7485_v7 = vld [vmem:[%s14617_s12 + $0xbe8] sm:$0xff] }
 0x4f7   : > { %8524 = vmatpush3.msra.mxu1 %v7399_v39  ;;  %9558 = vmatpush3.msra.mxu0 %v7433_v15  ;;  %v4142_v39 = vrot.slane %v11640_v8, 3  ;;  %v7501_v15 = vld [vmem:[%s14617_s12 + $0xc68] sm:$0xff] }
 0x4f8   : > { %8525 = vmatprep.subr.mxu1 %v7414_v60  ;;  %9559 = vmatprep.subr.mxu0 %v11467_v43  ;;  %v7451_v60 = vld [vmem:[%s14617_s12 + $0xad8] sm:$0xff] }
 0x4f9   : > { %8526 = vmatpush3.msra.mxu1 %v7398_v26  ;;  %9560 = vmatpush3.msra.mxu0 %v7432_v53  ;;  %v7466_v53 = vld [vmem:[%s14617_s12 + $0xb50] sm:$0xff] }
 0x4fa   : > { %8527 = vmatprep.subr.mxu1 %v7413_v33  ;;  %9561 = vmatprep.subr.mxu0 %v11467_v43  ;;  %v7500_v33 = vld [vmem:[%s14617_s12 + $0xc60] sm:$0xff] }
 0x4fb   : > { %8528 = vmatpush3.msra.mxu1 %v7397_v49  ;;  %9562 = vmatpush3.msra.mxu0 %v7431_v48  ;;  %v4143_v49 = vsel %vm4137_vm3, %v4141_v51, %v4142_v39  ;;  %v7450_v48 = vld [vmem:[%s14617_s12 + $0xad0] sm:$0xff]  ;;  %v7475_v51 = vld [vmem:[%s14617_s12 + $0xb98] sm:$0xff] }
 0x4fc   : > { %8529 = vmatprep.subr.mxu1 %v7412_v2  ;;  %9563 = vmatprep.subr.mxu0 %v11467_v43 }
 0x4fd   : > { %8530 = vmatpush3.msra.mxu1 %v7396_v5  ;;  %9564 = vmatpush3.msra.mxu0 %v7430_v19  ;;  %v7484_v5 = vld [vmem:[%s14617_s12 + $0xbe0] sm:$0xff]  ;;  %v7465_v19 = vld [vmem:[%s14617_s12 + $0xb48] sm:$0xff] }
 0x4fe   : > { %8531 = vmatprep.subr.mxu1 %v7411_v50  ;;  %9565 = vmatprep.subr.mxu0 %v11467_v43  ;;  %v3999_v50 = vld [vmem:[#allocation2 + $0x18] sm:$0xf8] }
 0x4ff   : > { %8532 = vmatpush3.msra.mxu1 %v7395_v24  ;;  %9566 = vmatpush3.msra.mxu0 %v7429_v32  ;;  %v7499_v32 = vld [vmem:[%s14617_s12 + $0xc58] sm:$0xff]  ;;  %v4147_v62 = vrot.slane %v3999_v50, 3  ;;  %v7489_v50 = vld [vmem:[%s14617_s12 + $0xc08] sm:$0xff] }
 0x500   : > { %8533 = vmatprep.subr.mxu1 %v7410_v14  ;;  %9567 = vmatprep.subr.mxu0 %v11467_v43  ;;  %v4148_v14 = vrot.slane %v11676_v9, 3 }
 0x501   : > { %8534 = vmatpush3.msra.mxu1 %v7394_v30  ;;  %9568 = vmatpush3.msra.mxu0 %v7428_v40  ;;  %v7449_v30 = vld [vmem:[%s14617_s12 + $0xac8] sm:$0xff]  ;;  %v7483_v40 = vld [vmem:[%s14617_s12 + $0xbd8] sm:$0xff] }
 0x502   : > { %8535 = vmatprep.subr.mxu1 %v7409_v63  ;;  %9569 = vmatprep.subr.mxu0 %v11467_v43 }
 0x503   : > { %8536 = vmatpush3.msra.mxu1 %v7393_v44  ;;  %9570 = vmatpush3.msra.mxu0 %v7427_v3  ;;  %v7464_v44 = vld [vmem:[%s14617_s12 + $0xb40] sm:$0xff] }
 0x504   : > { %8537 = vmatprep.subr.mxu1 %v7408_v38  ;;  %9571 = vmatprep.subr.mxu0 %v11467_v43  ;;  %v7448_v3 = vld [vmem:[%s14617_s12 + $0xac0] sm:$0xff]  ;;  %v7463_v38 = vld [vmem:[%s14617_s12 + $0xb38] sm:$0xff] }
 0x505   : > { %8538 = vmatpush3.msra.mxu1 %v7392_v17  ;;  %9572 = vmatpush3.msra.mxu0 %v7426_v31  ;;  %v7481_v17 = vld [vmem:[%s14617_s12 + $0xbc8] sm:$0xff]  ;;  %v7462_v31 = vld [vmem:[%s14617_s12 + $0xb30] sm:$0xff] }
 0x506   : > { %3898 = vmatmul.mubr.f32.vlgmr.msra.gmra.mxu1 %v3631_v23  ;;  %9573 = vmatprep.subr.mxu0 %v11467_v43  ;;  %v7445_v23 = vld [vmem:[%s14617_s12 + $0xaa8] sm:$0xff] }
 0x507   : > { %8567 = vmatprep.subr.mxu1 %v7471_v18  ;;  %3902 = vmatprep.mubr.f32.mxu1 %v3649_v47  ;;  %v7480_v18 = vld [vmem:[%s14617_s12 + $0xbc0] sm:$0xff]  ;;  %v7494_v47 = vld [vmem:[%s14617_s12 + $0xc30] sm:$0xff] }
 0x508   : > { %9574 = vmatpush3.msra.mxu0 %v7425_v21  ;;  %8568 = vmatpush3.msra.mxu1 %v7455_v58  ;;  %v7479_v21 = vld [vmem:[%s14617_s12 + $0xbb8] sm:$0xff]  ;;  %v7460_v58 = vld [vmem:[%s14617_s12 + $0xb20] sm:$0xff] }
 0x509   : > { %9575 = vmatprep.subr.mxu0 %v11467_v43  ;;  %8569 = vmatprep.subr.mxu1 %v7470_v57  ;;  %v7444_v57 = vld [vmem:[%s14617_s12 + $0xaa0] sm:$0xff] }
 0x50a   : > { %9576 = vmatpush3.msra.mxu0 %v7424_v28  ;;  %9577 = vmatprep.mubr.msk.f32.mxu0 %vm9900_vm2, %v11467_v43  ;;  %v7478_v28 = vld [vmem:[%s14617_s12 + $0xbb0] sm:$0xff] }
 0x50b   : > { %8570 = vmatpush3.msra.mxu1 %v7454_v55  ;;  %9578 = vmatmul.mubr.f32.vlgmr.msra.gmra.mxu0 %v3637_v42  ;;  %v7493_v55 = vld [vmem:[%s14617_s12 + $0xc28] sm:$0xff]  ;;  %v7443_v42 = vld [vmem:[%s14617_s12 + $0xa98] sm:$0xff] }
 0x50c   : > { %3903 = vmatmul.mubr.f32.gmra.mxu1 %v3647_v0  ;;  %8571 = vmatprep.subr.mxu1 %v7469_v11  ;;  %v7477_v11 = vld [vmem:[%s14617_s12 + $0xba8] sm:$0xff] }
 0x50d   : > { %8608 = vmatprep.subr.mxu0 %v7503_v6  ;;  %3907 = vmatprep.mubr.f32.mxu1 %v3648_v22  ;;  %v7496_v22 = vld [vmem:[%s14617_s12 + $0xc40] sm:$0xff]  ;;  %v7458_v6 = vld [vmem:[%s14617_s12 + $0xb10] sm:$0xff] }
 0x50e   : > { %8572 = vmatpush3.msra.mxu1 %v7453_v35  ;;  %8609 = vmatpush3.msra.mxu0 %v7487_v37  ;;  %v7492_v35 = vld [vmem:[%s14617_s12 + $0xc20] sm:$0xff]  ;;  %v7442_v37 = vld [vmem:[%s14617_s12 + $0xa90] sm:$0xff] }
 0x50f   : > { %8573 = vmatprep.subr.mxu1 %v7468_v13  ;;  %8610 = vmatprep.subr.mxu0 %v7502_v20  ;;  %v7457_v13 = vld [vmem:[%s14617_s12 + $0xb08] sm:$0xff]  ;;  %v4138_v20 = vrot.slane %v3996_v61, 3 }
 0x510   : > { %9580 = vmatprep.mubr.msk.f32.mxu0 %vm9900_vm2, %v11467_v43  ;;  %8574 = vmatpush3.msra.mxu1 %v7452_v4  ;;  %v8214_v26 = vpop.f32.mrf.mxu0  ;;  %v12190_v4 = vld [vmem:[#allocation2] sm:$0xff] }
 0x511   : > { %8611 = vmatpush3.msra.mxu0 %v7486_v41  ;;  %3908 = vmatmul.mubr.f32.gmra.mxu1 %v3646_v29  ;;  %v7459_v29 = vld [vmem:[%s14617_s12 + $0xb18] sm:$0xff]  ;;  %v12193_v41 = vrot.slane %v12190_v4, 3 }
 0x512   : > { %9581 = vmatmul.mubr.f32.gmra.mxu0 %v3651_v34  ;;  %8575 = vmatprep.subr.mxu1 %v7467_v12  ;;  %v8215_v2 = vpop.f32.mrf.mxu0  ;;  %v7491_v34 = vld [vmem:[%s14617_s12 + $0xc18] sm:$0xff]  ;;  %v7441_v12 = vld [vmem:[%s14617_s12 + $0xa88] sm:$0xff] }
 0x513   : > { %8612 = vmatprep.subr.mxu0 %v7501_v15  ;;  %8576 = vmatpush3.msra.mxu1 %v7451_v60  ;;  %v8216_v24 = vadd.f32 %v8215_v2, %v8214_v26  ;;  %v12201_v15 = vld [vmem:[#allocation2 + $0x78] sm:$0x7f]  ;;  %v4140_v2 = vsel %vm4137_vm3, %v4138_v20, %v12193_v41 }
 0x514   : > { %4258 = vmatprep.mubr.f32.mxu1 %v4143_v49  ;;  %8613 = vmatpush3.msra.mxu0 %v7485_v7  ;;  %v7456_v7 = vld [vmem:[%s14617_s12 + $0xb00] sm:$0xff]  ;;  %v12215_v49 = vld [vmem:[#allocation2 + $0x70] sm:$0x7f] }
 0x515   : > { %8577 = vmatprep.subr.mxu1 %v7466_v53  ;;  %8614 = vmatprep.subr.mxu0 %v7500_v33  ;;  %v12098_v63 = vadd.f32 %v8216_v24, %v11928_v56  ;;  %v4149_v56 = vsel %vm4137_vm3, %v4147_v62, %v4148_v14  ;;  %v7490_v53 = vld [vmem:[%s14617_s12 + $0xc10] sm:$0xff]  ;;  %v7440_v33 = vld [vmem:[%s14617_s12 + $0xa80] sm:$0xff]  ;;  %v7535_v24 = vld [vmem:[%s14617_s12 + $0xd78] sm:$0xff] }
 0x516   : > { %9583 = vmatprep.mubr.msk.f32.mxu0 %vm9900_vm2, %v11467_v43  ;;  %8578 = vmatpush3.msra.mxu1 %v7450_v48  ;;  %v7498_v43 = vld [vmem:[%s14617_s12 + $0xc50] sm:$0xff] }
 0x517   : > { %8615 = vmatpush3.msra.mxu0 %v7484_v5  ;;  %8579 = vmatprep.subr.mxu1 %v7465_v19  ;;  %v7474_v48 = vld [vmem:[%s14617_s12 + $0xb90] sm:$0xff]  ;;  %v4161_v5 = vrot.slane %v12201_v15, 3  ;;  %v7549_v15 = vld [vmem:[%s14617_s12 + $0xde8] sm:$0xff] }
 0x518   : > { %9584 = vmatmul.mubr.f32.gmra.mxu0 %v3650_v36  ;;  %8616 = vmatprep.subr.mxu0 %v7499_v32  ;;  %v7476_v36 = vld [vmem:[%s14617_s12 + $0xba0] sm:$0xff]  ;;  %v3998_v62 = vld [vmem:[#allocation2 + $0x10] sm:$0xf8] }
 0x519   : > { %8580 = vmatpush3.msra.mxu1 %v7449_v30  ;;  %8617 = vmatpush3.msra.mxu0 %v7483_v40  ;;  %v7473_v30 = vld [vmem:[%s14617_s12 + $0xb88] sm:$0xff]  ;;  %v4159_v40 = vrot.slane %v12215_v49, 3 }
 0x51a   : > { %4338 = vmatprep.mubr.f32.mxu0 %v4149_v56  ;;  %8581 = vmatprep.subr.mxu1 %v7464_v44  ;;  %v4145_v56 = vrot.slane %v11821_v10, 3  ;;  %v7518_v10 = vld [vmem:[%s14617_s12 + $0xcf0] sm:$0xff] }
 0x51b   : > { %8618 = vmatprep.subr.mxu0 %v7498_v43  ;;  %8582 = vmatpush3.msra.mxu1 %v7448_v3  ;;  %v7519_v43 = vld [vmem:[%s14617_s12 + $0xcf8] sm:$0xff]  ;;  %v7488_v3 = vld [vmem:[%s14617_s12 + $0xc00] sm:$0xff]  ;;  %v4160_v8 = vsel %vm4137_vm3, %v12193_v41, %v4159_v40 }
 0x51c   : > { %8619 = vmatpush3.msra.mxu0 %v7482_v46  ;;  %8583 = vmatprep.subr.mxu1 %v7463_v38  ;;  %v12240_v46 = vld [vmem:[#allocation2 + $0x88] sm:$0x7f]  ;;  %v4162_v38 = vsel %vm4137_vm3, %v4142_v39, %v4161_v5 }
 0x51d   : > { %8620 = vmatprep.subr.mxu0 %v7497_v1  ;;  %8584 = vmatpush3.msra.mxu1 %v7447_v59  ;;  %v7534_v1 = vld [vmem:[%s14617_s12 + $0xd70] sm:$0xff]  ;;  %v7472_v59 = vld [vmem:[%s14617_s12 + $0xb80] sm:$0xff]  ;;  %v7533_v39 = vld [vmem:[%s14617_s12 + $0xd68] sm:$0xff] }
 0x51e   : > { %8621 = vmatpush3.msra.mxu0 %v7481_v17  ;;  %8585 = vmatprep.subr.mxu1 %v7462_v31  ;;  %v4144_v31 = vrot.slane %v3998_v62, 3  ;;  %v7527_v62 = vld [vmem:[%s14617_s12 + $0xd38] sm:$0xff] }
 0x51f   : > { %8622 = vmatprep.subr.mxu0 %v7496_v22  ;;  %8586 = vmatpush3.msra.mxu1 %v7446_v52  ;;  %v4165_v52 = vrot.slane %v12240_v46, 3 }
 0x520   : > { %8623 = vmatpush3.msra.mxu0 %v7480_v18  ;;  %8587 = vmatprep.subr.mxu1 %v7461_v54 }
 0x521   : > { %8624 = vmatprep.subr.mxu0 %v7495_v25  ;;  %8588 = vmatpush3.msra.mxu1 %v7445_v23  ;;  %v4146_v25 = vsel %vm4137_vm3, %v4144_v31, %v4145_v56  ;;  %v12263_v23 = vld [vmem:[#allocation2 + $0x80] sm:$0x7f]  ;;  %v4166_v61 = vsel %vm4137_vm3, %v4148_v14, %v4165_v52  ;;  %v7531_v14 = vld [vmem:[%s14617_s12 + $0xd58] sm:$0xff] }
 0x522   : > { %8625 = vmatpush3.msra.mxu0 %v7479_v21  ;;  %8589 = vmatprep.subr.mxu1 %v7460_v58  ;;  %v7517_v58 = vld [vmem:[%s14617_s12 + $0xce8] sm:$0xff] }
 0x523   : > { %8626 = vmatprep.subr.mxu0 %v7494_v47  ;;  %8590 = vmatpush3.msra.mxu1 %v7444_v57  ;;  %v8176_v0 = vpop.f32.mrf.mxu1 }
 0x524   : > { %8627 = vmatpush3.msra.mxu0 %v7478_v28  ;;  %8591 = vmatprep.subr.mxu1 %v7459_v29  ;;  %v7551_v28 = vld [vmem:[%s14617_s12 + $0xdf8] sm:$0xff]  ;;  %v7532_v29 = vld [vmem:[%s14617_s12 + $0xd60] sm:$0xff] }
 0x525   : > { %8628 = vmatprep.subr.mxu0 %v7493_v55  ;;  %8592 = vmatpush3.msra.mxu1 %v7443_v42  ;;  %v8177_v45 = vpop.f32.mrf.mxu1 }
 0x526   : > { %8629 = vmatpush3.msra.mxu0 %v7477_v11  ;;  %8593 = vmatprep.subr.mxu1 %v7458_v6  ;;  %v8178_v60 = vadd.f32 %v8177_v45, %v8176_v0  ;;  %v7516_v11 = vld [vmem:[%s14617_s12 + $0xce0] sm:$0xff]  ;;  %v4163_v6 = vrot.slane %v12263_v23, 3  ;;  %v7550_v0 = vld [vmem:[%s14617_s12 + $0xdf0] sm:$0xff] }
 0x527   : > { %8630 = vmatprep.subr.mxu0 %v7492_v35  ;;  %8594 = vmatpush3.msra.mxu1 %v7442_v37  ;;  %v8179_v26 = vpop.f32.mrf.mxu1  ;;  %v4001_v35 = vld [vmem:[#allocation2 + $0x28] sm:$0xf8] }
 0x528   : > { %8631 = vmatpush3.msra.mxu0 %v7476_v36  ;;  %8595 = vmatprep.subr.mxu1 %v7457_v13  ;;  %v4154_v13 = vrot.slane %v11864_v27, 3  ;;  %v7566_v27 = vld [vmem:[%s14617_s12 + $0xe70] sm:$0xff] }
 0x529   : > { %8632 = vmatprep.subr.mxu0 %v7491_v34  ;;  %8596 = vmatpush3.msra.mxu1 %v7441_v12  ;;  %v8180_v19 = vpop.f32.mrf.mxu1  ;;  %v7515_v34 = vld [vmem:[%s14617_s12 + $0xcd8] sm:$0xff]  ;;  %v4153_v12 = vrot.slane %v4001_v35, 3  ;;  %v4151_v35 = vrot.slane %v11983_v16, 3 }
 0x52a   : > { %8633 = vmatpush3.msra.mxu0 %v7475_v51  ;;  %8597 = vmatprep.subr.mxu1 %v7456_v7  ;;  %v8181_v32 = vadd.f32 %v8180_v19, %v8179_v26  ;;  %v7514_v7 = vld [vmem:[%s14617_s12 + $0xcd0] sm:$0xff]  ;;  %v7583_v16 = vld [vmem:[%s14617_s12 + $0xef8] sm:$0xff] }
 0x52b   : > { %8634 = vmatprep.subr.mxu0 %v7490_v53  ;;  %8598 = vmatpush3.msra.mxu1 %v7440_v33  ;;  %v8217_v44 = vpop.f32.mrf.mxu0  ;;  %v4155_v51 = vsel %vm4137_vm3, %v4153_v12, %v4154_v13  ;;  %v7548_v53 = vld [vmem:[%s14617_s12 + $0xde0] sm:$0xff]  ;;  %v7529_v33 = vld [vmem:[%s14617_s12 + $0xd48] sm:$0xff] }
 0x52c   : > { %8635 = vmatpush3.msra.mxu0 %v7474_v48  ;;  %4259 = vmatmul.mubr.f32.vlgmr.msra.gmra.mxu1 %v4140_v2  ;;  %v7513_v2 = vld [vmem:[%s14617_s12 + $0xcc8] sm:$0xff] }
 0x52d   : > { %8636 = vmatprep.subr.mxu0 %v7489_v50  ;;  %8649 = vmatprep.subr.mxu1 %v7535_v24  ;;  %v8218_v17 = vpop.f32.mrf.mxu0  ;;  %v7528_v24 = vld [vmem:[%s14617_s12 + $0xd40] sm:$0xff] }
 0x52e   : > { %4263 = vmatprep.mubr.f32.mxu1 %v4162_v38  ;;  %8637 = vmatpush3.msra.mxu0 %v7473_v30  ;;  %v8219_v22 = vadd.f32 %v8218_v17, %v8217_v44  ;;  %v7546_v30 = vld [vmem:[%s14617_s12 + $0xdd0] sm:$0xff]  ;;  %v7544_v17 = vld [vmem:[%s14617_s12 + $0xdc0] sm:$0xff] }
 0x52f   : > { %8650 = vmatpush3.msra.mxu1 %v7519_v43  ;;  %8638 = vmatprep.subr.mxu0 %v7488_v3  ;;  %v8220_v18 = vpop.f32.mrf.mxu0  ;;  %v8255_v54 = vpop.f32.mrf.mxu1  ;;  %v7511_v43 = vld [vmem:[%s14617_s12 + $0xcb8] sm:$0xff]  ;;  %v7545_v3 = vld [vmem:[%s14617_s12 + $0xdc8] sm:$0xff]  ;;  %v7526_v38 = vld [vmem:[%s14617_s12 + $0xd30] sm:$0xff] }
 0x530   : > { %8651 = vmatprep.subr.mxu1 %v7534_v1  ;;  %8639 = vmatpush3.msra.mxu0 %v7472_v59  ;;  %v12265_v21 = vadd.f32 %v8219_v22, %v8178_v60  ;;  %v7530_v60 = vld [vmem:[%s14617_s12 + $0xd50] sm:$0xff]  ;;  %v7525_v22 = vld [vmem:[%s14617_s12 + $0xd28] sm:$0xff] }
 0x531   : > { %8652 = vmatpush3.msra.mxu1 %v7518_v10  ;;  %4339 = vmatmul.mubr.f32.vlgmr.msra.gmra.mxu0 %v4146_v25  ;;  %v8221_v47 = vpop.f32.mrf.mxu0  ;;  %v8256_v57 = vpop.f32.mrf.mxu1  ;;  %v7510_v59 = vld [vmem:[%s14617_s12 + $0xcb0] sm:$0xff] }
 0x532   : > { %4264 = vmatmul.mubr.f32.gmra.mxu1 %v4160_v8  ;;  %8653 = vmatprep.subr.mxu1 %v7533_v39  ;;  %v8222_v55 = vadd.f32 %v8221_v47, %v8220_v18  ;;  %v8257_v42 = vadd.f32 %v8256_v57, %v8255_v54  ;;  %v7509_v8 = vld [vmem:[%s14617_s12 + $0xca8] sm:$0xff]  ;;  %v7543_v39 = vld [vmem:[%s14617_s12 + $0xdb8] sm:$0xff]  ;;  %v7524_v18 = vld [vmem:[%s14617_s12 + $0xd20] sm:$0xff] }
 0x533   : > { %9586 = vmatprep.subr.mxu0 %v12190_v4  ;;  %4268 = vmatprep.mubr.f32.mxu1 %v4161_v5  ;;  %v7547_v5 = vld [vmem:[%s14617_s12 + $0xdd8] sm:$0xff]  ;;  %v7508_v54 = vld [vmem:[%s14617_s12 + $0xca0] sm:$0xff]  ;;  %v7542_v25 = vld [vmem:[%s14617_s12 + $0xdb0] sm:$0xff] }
 0x534   : > { %4343 = vmatprep.mubr.f32.mxu0 %v4166_v61  ;;  %8654 = vmatpush3.msra.mxu1 %v7517_v58  ;;  %v12287_v37 = vadd.f32 %v8222_v55, %v8181_v32  ;;  %v3062_v36 = vadd.f32 %v8257_v42, %v12098_v63  ;;  %v3141_v9 = vpop.f32.mrf.mxu0  ;;  %v4164_v63 = vsel %vm4137_vm3, %v4145_v56, %v4163_v6  ;;  %v7512_v32 = vld [vmem:[%s14617_s12 + $0xcc0] sm:$0xff]  ;;  %v7507_v58 = vld [vmem:[%s14617_s12 + $0xc98] sm:$0xff]  ;;  %v7541_v47 = vld [vmem:[%s14617_s12 + $0xda8] sm:$0xff] }
 0x535   : > { %9587 = vmatpush3.msra.mxu0 %v7551_v28  ;;  %8655 = vmatprep.subr.mxu1 %v7532_v29  ;;  %v7522_v57 = vld [vmem:[%s14617_s12 + $0xd10] sm:$0xff]  ;;  %v7540_v29 = vld [vmem:[%s14617_s12 + $0xda0] sm:$0xff]  ;;  %v7521_v55 = vld [vmem:[%s14617_s12 + $0xd08] sm:$0xff] }
 0x536   : > { %9588 = vmatprep.subr.mxu0 %v12190_v4  ;;  %8656 = vmatpush3.msra.mxu1 %v7516_v11  ;;  %v12295_v20 = vadd.f32 %v3141_v9, %v3062_v36  ;;  %v9497_v45 = vpop.f32.mrf.mxu0  ;;  %v7506_v28 = vld [vmem:[%s14617_s12 + $0xc90] sm:$0xff]  ;;  %v4008_v42 = vld [vmem:[#allocation2 + $0x98] sm:$0x7f]  ;;  %v7505_v61 = vld [vmem:[%s14617_s12 + $0xc88] sm:$0xff] }
 0x537   : > { %9589 = vmatpush3.msra.mxu0 %v7550_v0  ;;  %4269 = vmatmul.mubr.f32.gmra.mxu1 %v4159_v40  ;;  %v7539_v11 = vld [vmem:[%s14617_s12 + $0xd98] sm:$0xff]  ;;  %v7520_v0 = vld [vmem:[%s14617_s12 + $0xd00] sm:$0xff]  ;;  %v7538_v9 = vld [vmem:[%s14617_s12 + $0xd90] sm:$0xff] }
 0x538   : > { %4344 = vmatmul.mubr.f32.gmra.mxu0 %v4164_v63  ;;  %8657 = vmatprep.subr.mxu1 %v7531_v14  ;;  %v7504_v36 = vld [vmem:[%s14617_s12 + $0xc80] sm:$0xff]  ;;  %v4169_v14 = vrot.slane %v4008_v42, 3  ;;  %v12430_v63 = vld [vmem:[#allocation2 + $0x90] sm:$0x7f]  ;;  %v7577_v42 = vld [vmem:[%s14617_s12 + $0xec8] sm:$0xff] }
 0x539   : > { %9590 = vmatprep.subr.mxu0 %v12190_v4  ;;  %4348 = vmatprep.mubr.f32.mxu0 %v4165_v52  ;;  %v8258_v26 = vpop.f32.mrf.mxu1 }
 0x53a   : > { %8658 = vmatpush3.msra.mxu1 %v7515_v34  ;;  %4418 = vmatprep.mubr.f32.mxu1 %v4155_v51  ;;  %v3146_v49 = vpop.f32.mrf.mxu0  ;;  %v4170_v51 = vsel %vm4137_vm3, %v4154_v13, %v4169_v14 }
 0x53b   : > { %9591 = vmatpush3.msra.mxu0 %v7549_v15  ;;  %8659 = vmatprep.subr.mxu1 %v7530_v60  ;;  %v8259_v48 = vpop.f32.mrf.mxu1  ;;  %v7537_v15 = vld [vmem:[%s14617_s12 + $0xd88] sm:$0xff]  ;;  %v7567_v60 = vld [vmem:[%s14617_s12 + $0xe78] sm:$0xff] }
 0x53c   : > { %9592 = vmatprep.subr.mxu0 %v12190_v4  ;;  %8660 = vmatpush3.msra.mxu1 %v7514_v7  ;;  %v8260_v19 = vadd.f32 %v8259_v48, %v8258_v26  ;;  %v9500_v50 = vpop.f32.mrf.mxu0  ;;  %v7582_v7 = vld [vmem:[%s14617_s12 + $0xef0] sm:$0xff]  ;;  %v7536_v26 = vld [vmem:[%s14617_s12 + $0xd80] sm:$0xff]  ;;  %v7581_v48 = vld [vmem:[%s14617_s12 + $0xee8] sm:$0xff] }
 0x53d   : > { %9593 = vmatpush3.msra.mxu0 %v7548_v53  ;;  %8661 = vmatprep.subr.mxu1 %v7529_v33  ;;  %v4167_v53 = vrot.slane %v12430_v63, 3  ;;  %v12455_v33 = vld [vmem:[#allocation2 + $0xa0] sm:$0x7f]  ;;  %v7565_v50 = vld [vmem:[%s14617_s12 + $0xe68] sm:$0xff] }
 0x53e   : > { %4349 = vmatmul.mubr.f32.gmra.mxu0 %v4163_v6  ;;  %9594 = vmatprep.subr.mxu0 %v12190_v4  ;;  %v3067_v40 = vadd.f32 %v8260_v19, %v12265_v21  ;;  %v7523_v21 = vld [vmem:[%s14617_s12 + $0xd18] sm:$0xff]  ;;  %v4000_v6 = vld [vmem:[#allocation2 + $0x20] sm:$0xf8] }
 0x53f   : > { %8662 = vmatpush3.msra.mxu1 %v7513_v2  ;;  %9595 = vmatpush3.msra.mxu0 %v7547_v5  ;;  %v8261_v44 = vpop.f32.mrf.mxu1  ;;  %v4150_v45 = vrot.slane %v4000_v6, 3  ;;  %v7615_v2 = vld [vmem:[%s14617_s12 + $0xff8] sm:$0xff]  ;;  %v4168_v19 = vsel %vm4137_vm3, %v4151_v35, %v4167_v53 }
 0x540   : > { %8663 = vmatprep.subr.mxu1 %v7528_v24  ;;  %9596 = vmatprep.subr.mxu0 %v12190_v4  ;;  %v12350_v56 = vadd.f32 %v3146_v49, %v3067_v40  ;;  %v3151_v46 = vpop.f32.mrf.mxu0  ;;  %v7599_v24 = vld [vmem:[%s14617_s12 + $0xf78] sm:$0xff]  ;;  %v7580_v40 = vld [vmem:[%s14617_s12 + $0xee0] sm:$0xff] }
 0x541   : > { %8664 = vmatpush3.msra.mxu1 %v7512_v32  ;;  %9597 = vmatpush3.msra.mxu0 %v7546_v30  ;;  %v8262_v1 = vpop.f32.mrf.mxu1  ;;  %v4152_v12 = vsel %vm4137_vm3, %v4150_v45, %v4151_v35  ;;  %v4171_v32 = vrot.slane %v12455_v33, 3  ;;  %v7611_v6 = vld [vmem:[%s14617_s12 + $0xfd8] sm:$0xff]  ;;  %v7574_v33 = vld [vmem:[%s14617_s12 + $0xeb0] sm:$0xff] }
 0x542   : > { %8665 = vmatprep.subr.mxu1 %v7527_v62  ;;  %9598 = vmatprep.subr.mxu0 %v12190_v4  ;;  %v8263_v10 = vadd.f32 %v8262_v1, %v8261_v44  ;;  %v9503_v31 = vpop.f32.mrf.mxu0  ;;  %v7614_v62 = vld [vmem:[%s14617_s12 + $0xff0] sm:$0xff]  ;;  %v7564_v44 = vld [vmem:[%s14617_s12 + $0xe60] sm:$0xff] }
 0x543   : > { %8666 = vmatpush3.msra.mxu1 %v7511_v43  ;;  %9599 = vmatpush3.msra.mxu0 %v7545_v3 }
 0x544   : > { %8667 = vmatprep.subr.mxu1 %v7526_v38  ;;  %9600 = vmatprep.subr.mxu0 %v12190_v4  ;;  %v3072_v52 = vadd.f32 %v8263_v10, %v12287_v37  ;;  %v4002_v37 = vld [vmem:[#allocation2 + $0x30] sm:$0xf8]  ;;  %v4518_v38 = vld [vmem:[#allocation2 + $0x8] sm:$0xf0] }
 0x545   : > { %8668 = vmatpush3.msra.mxu1 %v7510_v59  ;;  %9601 = vmatpush3.msra.mxu0 %v7544_v17  ;;  %v4156_v34 = vrot.slane %v4002_v37, 3  ;;  %v4172_v59 = vsel %vm4137_vm3, %v12193_v41, %v4171_v32  ;;  %v12494_v17 = vld [vmem:[#allocation2 + $0x40] sm:$0xff]  ;;  %v7561_v37 = vld [vmem:[%s14617_s12 + $0xe48] sm:$0xff] }
 0x546   : > { %8669 = vmatprep.subr.mxu1 %v7525_v22  ;;  %9602 = vmatprep.subr.mxu0 %v12190_v4  ;;  %v12383_v23 = vadd.f32 %v3151_v46, %v3072_v52  ;;  %v7598_v46 = vld [vmem:[%s14617_s12 + $0xf70] sm:$0xff]  ;;  %v4662_v10 = vrot.slane %v12494_v17, 4  ;;  %v7613_v22 = vld [vmem:[%s14617_s12 + $0xfe8] sm:$0xff]  ;;  %v4661_v52 = vrot.slane %v4518_v38, 4 }
 0x547   : > { %8670 = vmatpush3.msra.mxu1 %v7509_v8  ;;  %9603 = vmatpush3.msra.mxu0 %v7543_v39  ;;  %v4158_v13 = vsel %vm4137_vm3, %v4156_v34, %v12193_v41  ;;  %v7563_v41 = vld [vmem:[%s14617_s12 + $0xe58] sm:$0xff]  ;;  %v7610_v34 = vld [vmem:[%s14617_s12 + $0xfd0] sm:$0xff]  ;;  %v7605_v38 = vld [vmem:[%s14617_s12 + $0xfa8] sm:$0xff] }
 0x548   : > { %8671 = vmatprep.subr.mxu1 %v7524_v18  ;;  %9604 = vmatprep.subr.mxu0 %v12190_v4  ;;  %v7597_v18 = vld [vmem:[%s14617_s12 + $0xf68] sm:$0xff] }
 0x549   : > { %8672 = vmatpush3.msra.mxu1 %v7508_v54  ;;  %9605 = vmatpush3.msra.mxu0 %v7542_v25  ;;  %v7578_v25 = vld [vmem:[%s14617_s12 + $0xed0] sm:$0xff]  ;;  %v7645_v17 = vld [vmem:[%s14617_s12 + $0x10e8] sm:$0xff] }
 0x54a   : > { %8673 = vmatprep.subr.mxu1 %v7523_v21  ;;  %9606 = vmatprep.subr.mxu0 %v12190_v4  ;;  %v7612_v21 = vld [vmem:[%s14617_s12 + $0xfe0] sm:$0xff] }
 0x54b   : > { %8674 = vmatpush3.msra.mxu1 %v7507_v58  ;;  %9607 = vmatpush3.msra.mxu0 %v7541_v47  ;;  %v4663_v47 = vsel %vm943_vm1, %v4661_v52, %v4662_v10 }
 0x54c   : > { %8675 = vmatprep.subr.mxu1 %v7522_v57  ;;  %9608 = vmatprep.subr.mxu0 %v12190_v4  ;;  %v7562_v57 = vld [vmem:[%s14617_s12 + $0xe50] sm:$0xff] }
 0x54d   : > { %8676 = vmatpush3.msra.mxu1 %v7506_v28  ;;  %9609 = vmatpush3.msra.mxu0 %v7540_v29 }
 0x54e   : > { %8677 = vmatprep.subr.mxu1 %v7521_v55  ;;  %9610 = vmatprep.subr.mxu0 %v12190_v4  ;;  %v7596_v55 = vld [vmem:[%s14617_s12 + $0xf60] sm:$0xff] }
 0x54f   : > { %8678 = vmatpush3.msra.mxu1 %v7505_v61  ;;  %9611 = vmatpush3.msra.mxu0 %v7539_v11  ;;  %v4520_v61 = vld [vmem:[#allocation2 + $0x18] sm:$0xf0] }
 0x550   : > { %8679 = vmatprep.subr.mxu1 %v7520_v0  ;;  %9612 = vmatprep.subr.mxu0 %v12190_v4  ;;  %v4667_v45 = vrot.slane %v4520_v61, 4 }
 0x551   : > { %8680 = vmatpush3.msra.mxu1 %v7504_v36  ;;  %9613 = vmatpush3.msra.mxu0 %v7538_v9  ;;  %v7595_v36 = vld [vmem:[%s14617_s12 + $0xf58] sm:$0xff] }
 0x552   : > { %4419 = vmatmul.mubr.f32.vlgmr.msra.gmra.mxu1 %v4152_v12  ;;  %9614 = vmatprep.subr.mxu0 %v12190_v4  ;;  %v7560_v12 = vld [vmem:[%s14617_s12 + $0xe40] sm:$0xff] }
 0x553   : > { %8709 = vmatprep.subr.mxu1 %v7583_v16  ;;  %4423 = vmatprep.mubr.f32.mxu1 %v4170_v51  ;;  %v7576_v16 = vld [vmem:[%s14617_s12 + $0xec0] sm:$0xff]  ;;  %v7594_v51 = vld [vmem:[%s14617_s12 + $0xf50] sm:$0xff] }
 0x554   : > { %9615 = vmatpush3.msra.mxu0 %v7537_v15  ;;  %8710 = vmatpush3.msra.mxu1 %v7567_v60  ;;  %v8315_v49 = vpop.f32.mrf.mxu1 }
 0x555   : > { %9616 = vmatprep.subr.mxu0 %v12190_v4  ;;  %8711 = vmatprep.subr.mxu1 %v7582_v7  ;;  %v7575_v7 = vld [vmem:[%s14617_s12 + $0xeb8] sm:$0xff] }
 0x556   : > { %9617 = vmatpush3.msra.mxu0 %v7536_v26  ;;  %9618 = vmatprep.mubr.msk.f32.mxu0 %vm9900_vm2, %v12190_v4  ;;  %v8316_v5 = vpop.f32.mrf.mxu1 }
 0x557   : > { %8712 = vmatpush3.msra.mxu1 %v7566_v27  ;;  %9619 = vmatmul.mubr.f32.vlgmr.msra.gmra.mxu0 %v4158_v13  ;;  %v8317_v30 = vadd.f32 %v8316_v5, %v8315_v49  ;;  %v7593_v13 = vld [vmem:[%s14617_s12 + $0xf48] sm:$0xff]  ;;  %v7608_v49 = vld [vmem:[%s14617_s12 + $0xfc0] sm:$0xff] }
 0x558   : > { %4424 = vmatmul.mubr.f32.gmra.mxu1 %v4168_v19  ;;  %8713 = vmatprep.subr.mxu1 %v7581_v48  ;;  %v7558_v48 = vld [vmem:[%s14617_s12 + $0xe30] sm:$0xff]  ;;  %v7592_v5 = vld [vmem:[%s14617_s12 + $0xf40] sm:$0xff]  ;;  %v7573_v19 = vld [vmem:[%s14617_s12 + $0xea8] sm:$0xff] }
 0x559   : > { %8750 = vmatprep.subr.mxu0 %v7615_v2  ;;  %4428 = vmatprep.mubr.f32.mxu1 %v4169_v14  ;;  %v3222_v43 = vadd.f32 %v8317_v30, %v12295_v20  ;;  %v8356_v3 = vpop.f32.mrf.mxu0  ;;  %v7579_v20 = vld [vmem:[%s14617_s12 + $0xed8] sm:$0xff] }
 0x55a   : > { %8714 = vmatpush3.msra.mxu1 %v7565_v50  ;;  %8751 = vmatpush3.msra.mxu0 %v7599_v24  ;;  %v8318_v1 = vpop.f32.mrf.mxu1  ;;  %v7607_v24 = vld [vmem:[%s14617_s12 + $0xfb8] sm:$0xff] }
 0x55b   : > { %8715 = vmatprep.subr.mxu1 %v7580_v40  ;;  %8752 = vmatprep.subr.mxu0 %v7614_v62  ;;  %v8357_v31 = vpop.f32.mrf.mxu0  ;;  %v7591_v30 = vld [vmem:[%s14617_s12 + $0xf38] sm:$0xff]  ;;  %v7572_v40 = vld [vmem:[%s14617_s12 + $0xea0] sm:$0xff] }
 0x55c   : > { %9621 = vmatprep.mubr.msk.f32.mxu0 %vm9900_vm2, %v12190_v4  ;;  %8716 = vmatpush3.msra.mxu1 %v7564_v44  ;;  %v8319_v8 = vpop.f32.mrf.mxu1  ;;  %v8358_v39 = vadd.f32 %v8357_v31, %v8356_v3  ;;  %v7606_v44 = vld [vmem:[%s14617_s12 + $0xfb0] sm:$0xff] }
 0x55d   : > { %8753 = vmatpush3.msra.mxu0 %v7598_v46  ;;  %4429 = vmatmul.mubr.f32.gmra.mxu1 %v4167_v53  ;;  %v8320_v54 = vadd.f32 %v8319_v8, %v8318_v1  ;;  %v7559_v53 = vld [vmem:[%s14617_s12 + $0xe38] sm:$0xff]  ;;  %v7590_v3 = vld [vmem:[%s14617_s12 + $0xf30] sm:$0xff]  ;;  %v7588_v8 = vld [vmem:[%s14617_s12 + $0xf20] sm:$0xff] }
 0x55e   : > { %9622 = vmatmul.mubr.f32.gmra.mxu0 %v4172_v59  ;;  %8717 = vmatprep.subr.mxu1 %v7579_v20  ;;  %v12514_v58 = vadd.f32 %v8358_v39, %v3222_v43  ;;  %v7556_v43 = vld [vmem:[%s14617_s12 + $0xe20] sm:$0xff]  ;;  %v7571_v46 = vld [vmem:[%s14617_s12 + $0xe98] sm:$0xff]  ;;  %v7589_v20 = vld [vmem:[%s14617_s12 + $0xf28] sm:$0xff] }
 0x55f   : > { %8754 = vmatprep.subr.mxu0 %v7613_v22  ;;  %8718 = vmatpush3.msra.mxu1 %v7563_v41  ;;  %v3227_v28 = vadd.f32 %v8320_v54, %v12350_v56  ;;  %v8321_v29 = vpop.f32.mrf.mxu1  ;;  %v12532_v56 = vld [vmem:[#allocation2 + $0x50] sm:$0xff]  ;;  %v7555_v1 = vld [vmem:[%s14617_s12 + $0xe18] sm:$0xff]  ;;  %v4517_v59 = vld [vmem:[#allocation2] sm:$0xf0] }
 0x560   : > { %4778 = vmatprep.mubr.f32.mxu1 %v4663_v47  ;;  %8755 = vmatpush3.msra.mxu0 %v7597_v18  ;;  %v8359_v11 = vpop.f32.mrf.mxu0  ;;  %v4668_v0 = vrot.slane %v12532_v56, 4  ;;  %v7570_v31 = vld [vmem:[%s14617_s12 + $0xe90] sm:$0xff]  ;;  %v7604_v22 = vld [vmem:[%s14617_s12 + $0xfa0] sm:$0xff]  ;;  %v7569_v39 = vld [vmem:[%s14617_s12 + $0xe88] sm:$0xff]  ;;  %v4658_v52 = vrot.slane %v4517_v59, 4  ;;  %v12641_v18 = vrot.slane %v12190_v4, 4 }
 0x561   : > { %8719 = vmatprep.subr.mxu1 %v7578_v25  ;;  %8756 = vmatprep.subr.mxu0 %v7612_v21  ;;  %v8322_v35 = vpop.f32.mrf.mxu1  ;;  %v7554_v41 = vld [vmem:[%s14617_s12 + $0xe10] sm:$0xff]  ;;  %v7603_v54 = vld [vmem:[%s14617_s12 + $0xf98] sm:$0xff]  ;;  %v7553_v25 = vld [vmem:[%s14617_s12 + $0xe08] sm:$0xff] }
 0x562   : > { %9624 = vmatprep.mubr.msk.f32.mxu0 %vm9900_vm2, %v12190_v4  ;;  %8720 = vmatpush3.msra.mxu1 %v7562_v57  ;;  %v8323_v9 = vadd.f32 %v8322_v35, %v8321_v29  ;;  %v8360_v14 = vpop.f32.mrf.mxu0  ;;  %v4669_v60 = vsel %vm943_vm1, %v4667_v45, %v4668_v0  ;;  %v12649_v21 = vld [vmem:[#allocation2 + $0x78] sm:$0xff]  ;;  %v7568_v57 = vld [vmem:[%s14617_s12 + $0xe80] sm:$0xff]  ;;  %v7585_v35 = vld [vmem:[%s14617_s12 + $0xf08] sm:$0xff] }
 0x563   : > { %8757 = vmatpush3.msra.mxu0 %v7596_v55  ;;  %8721 = vmatprep.subr.mxu1 %v7577_v42  ;;  %v8361_v63 = vadd.f32 %v8360_v14, %v8359_v11  ;;  %v7587_v47 = vld [vmem:[%s14617_s12 + $0xf18] sm:$0xff]  ;;  %v7552_v29 = vld [vmem:[%s14617_s12 + $0xe00] sm:$0xff]  ;;  %v7586_v55 = vld [vmem:[%s14617_s12 + $0xf10] sm:$0xff]  ;;  %v4660_v42 = vsel %vm943_vm1, %v4658_v52, %v12641_v18  ;;  %v4681_v61 = vrot.slane %v12649_v21, 4 }
 0x564   : > { %9625 = vmatmul.mubr.f32.gmra.mxu0 %v4171_v32  ;;  %8758 = vmatprep.subr.mxu0 %v7611_v6  ;;  %v3232_v15 = vadd.f32 %v8323_v9, %v12383_v23  ;;  %v7609_v23 = vld [vmem:[%s14617_s12 + $0xfc8] sm:$0xff]  ;;  %v7647_v6 = vld [vmem:[%s14617_s12 + $0x10f8] sm:$0xff]  ;;  %v7600_v9 = vld [vmem:[%s14617_s12 + $0xf80] sm:$0xff] }
 0x565   : > { %8722 = vmatpush3.msra.mxu1 %v7561_v37  ;;  %8759 = vmatpush3.msra.mxu0 %v7595_v36  ;;  %v12564_v26 = vadd.f32 %v8361_v63, %v3227_v28  ;;  %v7557_v32 = vld [vmem:[%s14617_s12 + $0xe28] sm:$0xff]  ;;  %v7602_v28 = vld [vmem:[%s14617_s12 + $0xf90] sm:$0xff]  ;;  %v7631_v36 = vld [vmem:[%s14617_s12 + $0x1078] sm:$0xff]  ;;  %v4682_v63 = vsel %vm943_vm1, %v4662_v10, %v4681_v61 }
 0x566   : > { %4858 = vmatprep.mubr.f32.mxu0 %v4669_v60  ;;  %8723 = vmatprep.subr.mxu1 %v7576_v16  ;;  %v8362_v27 = vpop.f32.mrf.mxu0  ;;  %v7601_v11 = vld [vmem:[%s14617_s12 + $0xf88] sm:$0xff]  ;;  %v4519_v37 = vld [vmem:[#allocation2 + $0x10] sm:$0xf0]  ;;  %v7643_v56 = vld [vmem:[%s14617_s12 + $0x10d8] sm:$0xff] }
 0x567   : > { %8760 = vmatprep.subr.mxu0 %v7610_v34  ;;  %8724 = vmatpush3.msra.mxu1 %v7560_v12  ;;  %v9865_v14 = vld [vmem:[#allocation2 + $0x48] sm:$0xff]  ;;  %v7646_v34 = vld [vmem:[%s14617_s12 + $0x10f0] sm:$0xff]  ;;  %v7584_v12 = vld [vmem:[%s14617_s12 + $0xf00] sm:$0xff]  ;;  %v4664_v60 = vrot.slane %v4519_v37, 4 }
 0x568   : > { %8761 = vmatpush3.msra.mxu0 %v7594_v51  ;;  %8725 = vmatprep.subr.mxu1 %v7575_v7  ;;  %v8363_v2 = vpop.f32.mrf.mxu0  ;;  %v4665_v45 = vrot.slane %v9865_v14, 4  ;;  %v12684_v16 = vld [vmem:[#allocation2 + $0x88] sm:$0xff]  ;;  %v7622_v14 = vld [vmem:[%s14617_s12 + $0x1030] sm:$0xff] }
 0x569   : > { %8762 = vmatprep.subr.mxu0 %v7609_v23  ;;  %8726 = vmatpush3.msra.mxu1 %v7559_v53  ;;  %v8364_v50 = vadd.f32 %v8363_v2, %v8362_v27  ;;  %v4685_v10 = vrot.slane %v12684_v16, 4  ;;  %v12703_v23 = vld [vmem:[#allocation2 + $0x80] sm:$0xff]  ;;  %v7629_v27 = vld [vmem:[%s14617_s12 + $0x1068] sm:$0xff] }
 0x56a   : > { %8763 = vmatpush3.msra.mxu0 %v7593_v13  ;;  %8727 = vmatprep.subr.mxu1 %v7574_v33  ;;  %v4666_v7 = vsel %vm943_vm1, %v4664_v60, %v4665_v45  ;;  %v7663_v33 = vld [vmem:[%s14617_s12 + $0x1178] sm:$0xff]  ;;  %v7628_v2 = vld [vmem:[%s14617_s12 + $0x1060] sm:$0xff]  ;;  %v7661_v59 = vld [vmem:[%s14617_s12 + $0x1168] sm:$0xff] }
 0x56b   : > { %8764 = vmatprep.subr.mxu0 %v7608_v49  ;;  %8728 = vmatpush3.msra.mxu1 %v7558_v48  ;;  %v12602_v62 = vadd.f32 %v8364_v50, %v3232_v15  ;;  %v7630_v15 = vld [vmem:[%s14617_s12 + $0x1070] sm:$0xff]  ;;  %v7644_v49 = vld [vmem:[%s14617_s12 + $0x10e0] sm:$0xff]  ;;  %v4686_v48 = vsel %vm943_vm1, %v4668_v0, %v4685_v10  ;;  %v7641_v52 = vld [vmem:[%s14617_s12 + $0x10c8] sm:$0xff] }
 0x56c   : > { %8765 = vmatpush3.msra.mxu0 %v7592_v5  ;;  %8729 = vmatprep.subr.mxu1 %v7573_v19  ;;  %v4683_v5 = vrot.slane %v12703_v23, 4  ;;  %v12730_v0 = vld [vmem:[#allocation2 + $0x60] sm:$0xff]  ;;  %v7657_v37 = vld [vmem:[%s14617_s12 + $0x1148] sm:$0xff] }
 0x56d   : > { %8766 = vmatprep.subr.mxu0 %v7607_v24  ;;  %8730 = vmatpush3.msra.mxu1 %v7557_v32  ;;  %v7662_v24 = vld [vmem:[%s14617_s12 + $0x1170] sm:$0xff]  ;;  %v4522_v32 = vld [vmem:[#allocation2 + $0x28] sm:$0xf0]  ;;  %v7636_v60 = vld [vmem:[%s14617_s12 + $0x10a0] sm:$0xff] }
 0x56e   : > { %8767 = vmatpush3.msra.mxu0 %v7591_v30  ;;  %8731 = vmatprep.subr.mxu1 %v7572_v40  ;;  %v4674_v40 = vrot.slane %v12730_v0, 4  ;;  %v7678_v0 = vld [vmem:[%s14617_s12 + $0x11f0] sm:$0xff] }
 0x56f   : > { %8768 = vmatprep.subr.mxu0 %v7606_v44  ;;  %8732 = vmatpush3.msra.mxu1 %v7556_v43 }
 0x570   : > { %8769 = vmatpush3.msra.mxu0 %v7590_v3  ;;  %8733 = vmatprep.subr.mxu1 %v7571_v46  ;;  %v4684_v3 = vsel %vm943_vm1, %v4665_v45, %v4683_v5  ;;  %v7627_v46 = vld [vmem:[%s14617_s12 + $0x1058] sm:$0xff]  ;;  %v7656_v45 = vld [vmem:[%s14617_s12 + $0x1140] sm:$0xff] }
 0x571   : > { %8770 = vmatprep.subr.mxu0 %v7605_v38  ;;  %8734 = vmatpush3.msra.mxu1 %v7555_v1  ;;  %v4673_v38 = vrot.slane %v4522_v32, 4 }
 0x572   : > { %8771 = vmatpush3.msra.mxu0 %v7589_v20  ;;  %8735 = vmatprep.subr.mxu1 %v7570_v31  ;;  %v7642_v20 = vld [vmem:[%s14617_s12 + $0x10d0] sm:$0xff] }
 0x573   : > { %8772 = vmatprep.subr.mxu0 %v7604_v22  ;;  %8736 = vmatpush3.msra.mxu1 %v7554_v41  ;;  %v4675_v31 = vsel %vm943_vm1, %v4673_v38, %v4674_v40  ;;  %v7626_v22 = vld [vmem:[%s14617_s12 + $0x1050] sm:$0xff] }
 0x574   : > { %8773 = vmatpush3.msra.mxu0 %v7588_v8  ;;  %8737 = vmatprep.subr.mxu1 %v7569_v39  ;;  %v7660_v39 = vld [vmem:[%s14617_s12 + $0x1160] sm:$0xff]  ;;  %v12872_v38 = vld [vmem:[#allocation2 + $0x90] sm:$0xff] }
 0x575   : > { %8774 = vmatprep.subr.mxu0 %v7603_v54  ;;  %8738 = vmatpush3.msra.mxu1 %v7553_v25 }
 0x576   : > { %8775 = vmatpush3.msra.mxu0 %v7587_v47  ;;  %8739 = vmatprep.subr.mxu1 %v7568_v57  ;;  %v7659_v57 = vld [vmem:[%s14617_s12 + $0x1158] sm:$0xff] }
 0x577   : > { %8776 = vmatprep.subr.mxu0 %v7602_v28  ;;  %8740 = vmatpush3.msra.mxu1 %v7552_v29 }
 0x578   : > { %8777 = vmatpush3.msra.mxu0 %v7586_v55  ;;  %4779 = vmatmul.mubr.f32.vlgmr.msra.gmra.mxu1 %v4660_v42  ;;  %v7640_v55 = vld [vmem:[%s14617_s12 + $0x10c0] sm:$0xff] }
 0x579   : > { %8778 = vmatprep.subr.mxu0 %v7601_v11  ;;  %8791 = vmatprep.subr.mxu1 %v7647_v6  ;;  %v7624_v42 = vld [vmem:[%s14617_s12 + $0x1040] sm:$0xff]  ;;  %v7639_v6 = vld [vmem:[%s14617_s12 + $0x10b8] sm:$0xff] }
 0x57a   : > { %4783 = vmatprep.mubr.f32.mxu1 %v4682_v63  ;;  %8779 = vmatpush3.msra.mxu0 %v7585_v35  ;;  %v8397_v51 = vpop.f32.mrf.mxu1  ;;  %v7623_v35 = vld [vmem:[%s14617_s12 + $0x1038] sm:$0xff] }
 0x57b   : > { %8792 = vmatpush3.msra.mxu1 %v7631_v36  ;;  %8780 = vmatprep.subr.mxu0 %v7600_v9 }
 0x57c   : > { %8793 = vmatprep.subr.mxu1 %v7646_v34  ;;  %8781 = vmatpush3.msra.mxu0 %v7584_v12  ;;  %v8398_v53 = vpop.f32.mrf.mxu1  ;;  %v7637_v34 = vld [vmem:[%s14617_s12 + $0x10a8] sm:$0xff]  ;;  %v12806_v12 = vld [vmem:[#allocation2] sm:$0xff] }
 0x57d   : > { %8794 = vmatpush3.msra.mxu1 %v7630_v15  ;;  %4859 = vmatmul.mubr.f32.vlgmr.msra.gmra.mxu0 %v4666_v7  ;;  %v8399_v13 = vadd.f32 %v8398_v53, %v8397_v51  ;;  %v7655_v15 = vld [vmem:[%s14617_s12 + $0x1138] sm:$0xff]  ;;  %v7620_v51 = vld [vmem:[%s14617_s12 + $0x1020] sm:$0xff]  ;;  %v7653_v53 = vld [vmem:[%s14617_s12 + $0x1128] sm:$0xff] }
 0x57e   : > { %4784 = vmatmul.mubr.f32.gmra.mxu1 %v12641_v18  ;;  %8795 = vmatprep.subr.mxu1 %v7645_v17  ;;  %v7654_v17 = vld [vmem:[%s14617_s12 + $0x1130] sm:$0xff]  ;;  %v7619_v7 = vld [vmem:[%s14617_s12 + $0x1018] sm:$0xff] }
 0x57f   : > { %9627 = vmatprep.subr.mxu0 %v12190_v4  ;;  %4788 = vmatprep.mubr.f32.mxu1 %v4681_v61  ;;  %v3382_v19 = vadd.f32 %v8399_v13, %v12514_v58  ;;  %v3461_v50 = vpop.f32.mrf.mxu0  ;;  %v7658_v61 = vld [vmem:[%s14617_s12 + $0x1150] sm:$0xff] }
 0x580   : > { %4863 = vmatprep.mubr.f32.mxu0 %v4686_v48  ;;  %8796 = vmatpush3.msra.mxu1 %v7629_v27  ;;  %v8400_v30 = vpop.f32.mrf.mxu1  ;;  %v7634_v27 = vld [vmem:[%s14617_s12 + $0x1090] sm:$0xff]  ;;  %v12848_v48 = vld [vmem:[#allocation2 + $0x98] sm:$0xff] }
 0x581   : > { %9628 = vmatpush3.msra.mxu0 %v7663_v33  ;;  %8797 = vmatprep.subr.mxu1 %v7644_v49  ;;  %v12733_v58 = vadd.f32 %v3461_v50, %v3382_v19  ;;  %v9538_v44 = vpop.f32.mrf.mxu0  ;;  %v7618_v13 = vld [vmem:[%s14617_s12 + $0x1010] sm:$0xff]  ;;  %v7652_v33 = vld [vmem:[%s14617_s12 + $0x1120] sm:$0xff]  ;;  %v7633_v49 = vld [vmem:[%s14617_s12 + $0x1088] sm:$0xff] }
 0x582   : > { %9629 = vmatprep.subr.mxu0 %v12190_v4  ;;  %8798 = vmatpush3.msra.mxu1 %v7628_v2  ;;  %v8401_v43 = vpop.f32.mrf.mxu1  ;;  %v7617_v2 = vld [vmem:[%s14617_s12 + $0x1008] sm:$0xff]  ;;  %v4521_v19 = vld [vmem:[#allocation2 + $0x20] sm:$0xf0]  ;;  %v7650_v44 = vld [vmem:[%s14617_s12 + $0x1110] sm:$0xff] }
 0x583   : > { %9630 = vmatpush3.msra.mxu0 %v7662_v24  ;;  %4789 = vmatmul.mubr.f32.gmra.mxu1 %v12641_v18  ;;  %v8402_v1 = vadd.f32 %v8401_v43, %v8400_v30  ;;  %v7632_v50 = vld [vmem:[%s14617_s12 + $0x1080] sm:$0xff]  ;;  %v9868_v24 = vld [vmem:[#allocation2 + $0x58] sm:$0xff]  ;;  %v4523_v30 = vld [vmem:[#allocation2 + $0x30] sm:$0xf0]  ;;  %v4689_v43 = vrot.slane %v12848_v48, 4 }
 0x584   : > { %4864 = vmatmul.mubr.f32.gmra.mxu0 %v4684_v3  ;;  %8799 = vmatprep.subr.mxu1 %v7643_v56  ;;  %v4671_v32 = vrot.slane %v9868_v24, 4  ;;  %v7616_v56 = vld [vmem:[%s14617_s12 + $0x1000] sm:$0xff]  ;;  %v4670_v3 = vrot.slane %v4521_v19, 4  ;;  %v7689_v19 = vld [vmem:[%s14617_s12 + $0x1248] sm:$0xff] }
 0x585   : > { %9631 = vmatprep.subr.mxu0 %v12190_v4  ;;  %4868 = vmatprep.mubr.f32.mxu0 %v4685_v10  ;;  %v8403_v41 = vpop.f32.mrf.mxu1  ;;  %v3387_v8 = vadd.f32 %v8402_v1, %v12564_v26  ;;  %v7625_v26 = vld [vmem:[%s14617_s12 + $0x1048] sm:$0xff]  ;;  %v7635_v10 = vld [vmem:[%s14617_s12 + $0x1098] sm:$0xff]  ;;  %v4676_v1 = vrot.slane %v4523_v30, 4 }
 0x586   : > { %8800 = vmatpush3.msra.mxu1 %v7627_v46  ;;  %4938 = vmatprep.mubr.f32.mxu1 %v4675_v31  ;;  %v3466_v54 = vpop.f32.mrf.mxu0  ;;  %v7695_v46 = vld [vmem:[%s14617_s12 + $0x1278] sm:$0xff] }
 0x587   : > { %9632 = vmatpush3.msra.mxu0 %v7661_v59  ;;  %8801 = vmatprep.subr.mxu1 %v7642_v20  ;;  %v8404_v25 = vpop.f32.mrf.mxu1  ;;  %v12761_v47 = vadd.f32 %v3466_v54, %v3387_v8  ;;  %v4672_v59 = vsel %vm943_vm1, %v4670_v3, %v4671_v32  ;;  %v7649_v20 = vld [vmem:[%s14617_s12 + $0x1108] sm:$0xff]  ;;  %v7679_v31 = vld [vmem:[%s14617_s12 + $0x11f8] sm:$0xff]  ;;  %v7648_v8 = vld [vmem:[%s14617_s12 + $0x1100] sm:$0xff] }
 0x588   : > { %9633 = vmatprep.subr.mxu0 %v12190_v4  ;;  %8802 = vmatpush3.msra.mxu1 %v7626_v22  ;;  %v8405_v28 = vadd.f32 %v8404_v25, %v8403_v41  ;;  %v9541_v29 = vpop.f32.mrf.mxu0  ;;  %v4690_v22 = vsel %vm943_vm1, %v4674_v40, %v4689_v43  ;;  %v7694_v41 = vld [vmem:[%s14617_s12 + $0x1270] sm:$0xff]  ;;  %v4678_v40 = vsel %vm943_vm1, %v4676_v1, %v12641_v18  ;;  %v7693_v54 = vld [vmem:[%s14617_s12 + $0x1268] sm:$0xff]  ;;  %v7727_v25 = vld [vmem:[%s14617_s12 + $0x1378] sm:$0xff] }
 0x589   : > { %9634 = vmatpush3.msra.mxu0 %v7660_v39  ;;  %8803 = vmatprep.subr.mxu1 %v7641_v52  ;;  %v4687_v39 = vrot.slane %v12872_v38, 4  ;;  %v7711_v29 = vld [vmem:[%s14617_s12 + $0x12f8] sm:$0xff] }
 0x58a   : > { %4869 = vmatmul.mubr.f32.gmra.mxu0 %v4683_v5  ;;  %9635 = vmatprep.subr.mxu0 %v12190_v4  ;;  %v3392_v11 = vadd.f32 %v8405_v28, %v12602_v62  ;;  %v7638_v62 = vld [vmem:[%s14617_s12 + $0x10b0] sm:$0xff]  ;;  %v7651_v5 = vld [vmem:[%s14617_s12 + $0x1118] sm:$0xff]  ;;  %v7677_v28 = vld [vmem:[%s14617_s12 + $0x11e8] sm:$0xff] }
 0x58b   : > { %8804 = vmatpush3.msra.mxu1 %v7625_v26  ;;  %9636 = vmatpush3.msra.mxu0 %v7659_v57  ;;  %v4688_v57 = vsel %vm943_vm1, %v4671_v32, %v4687_v39  ;;  %vm5206_vm1 = vcmask 1042432   ;;  %v7723_v32 = vld [vmem:[%s14617_s12 + $0x1358] sm:$0xff] }
 0x58c   : > { %8805 = vmatprep.subr.mxu1 %v7640_v55  ;;  %9637 = vmatprep.subr.mxu0 %v12190_v4  ;;  %v3471_v36 = vpop.f32.mrf.mxu0 }
 0x58d   : > { %8806 = vmatpush3.msra.mxu1 %v7624_v42  ;;  %9638 = vmatpush3.msra.mxu0 %v7658_v61  ;;  %v12794_v9 = vadd.f32 %v3471_v36, %v3392_v11  ;;  %v7692_v42 = vld [vmem:[%s14617_s12 + $0x1260] sm:$0xff]  ;;  %v7726_v61 = vld [vmem:[%s14617_s12 + $0x1370] sm:$0xff]  ;;  %v5038_v36 = vld [vmem:[#allocation2 + $0x8] sm:$0xe0] }
 0x58e   : > { %8807 = vmatprep.subr.mxu1 %v7639_v6  ;;  %9639 = vmatprep.subr.mxu0 %v12190_v4  ;;  %v9544_v63 = vpop.f32.mrf.mxu0  ;;  %v7621_v4 = vld [vmem:[%s14617_s12 + $0x1028] sm:$0xff]  ;;  %v12919_v11 = vld [vmem:[#allocation2 + $0x40] sm:$0xff] }
 0x58f   : > { %8808 = vmatpush3.msra.mxu1 %v7623_v35  ;;  %9640 = vmatpush3.msra.mxu0 %v7657_v37  ;;  %v7676_v6 = vld [vmem:[%s14617_s12 + $0x11e0] sm:$0xff]  ;;  %v7710_v37 = vld [vmem:[%s14617_s12 + $0x12f0] sm:$0xff] }
 0x590   : > { %8809 = vmatprep.subr.mxu1 %v7638_v62  ;;  %9641 = vmatprep.subr.mxu0 %v12806_v12 }
 0x591   : > { %8810 = vmatpush3.msra.mxu1 %v7622_v14  ;;  %9642 = vmatpush3.msra.mxu0 %v7656_v45  ;;  %v7691_v14 = vld [vmem:[%s14617_s12 + $0x1258] sm:$0xff]  ;;  %v5211_v45 = vrot.slane %v12919_v11, 5 }
 0x592   : > { %8811 = vmatprep.subr.mxu1 %v7637_v34  ;;  %9643 = vmatprep.subr.mxu0 %v12806_v12  ;;  %v7725_v34 = vld [vmem:[%s14617_s12 + $0x1368] sm:$0xff] }
 0x593   : > { %8812 = vmatpush3.msra.mxu1 %v7621_v4  ;;  %9644 = vmatpush3.msra.mxu0 %v7655_v15  ;;  %v7675_v4 = vld [vmem:[%s14617_s12 + $0x11d8] sm:$0xff] }
 0x594   : > { %8813 = vmatprep.subr.mxu1 %v7636_v60  ;;  %9645 = vmatprep.subr.mxu0 %v12806_v12 }
 0x595   : > { %8814 = vmatpush3.msra.mxu1 %v7620_v51  ;;  %9646 = vmatpush3.msra.mxu0 %v7654_v17  ;;  %v5210_v51 = vrot.slane %v5038_v36, 5  ;;  %v7709_v17 = vld [vmem:[%s14617_s12 + $0x12e8] sm:$0xff] }
 0x596   : > { %8815 = vmatprep.subr.mxu1 %v7635_v10  ;;  %9647 = vmatprep.subr.mxu0 %v12806_v12 }
 0x597   : > { %8816 = vmatpush3.msra.mxu1 %v7619_v7  ;;  %9648 = vmatpush3.msra.mxu0 %v7653_v53  ;;  %v7690_v7 = vld [vmem:[%s14617_s12 + $0x1250] sm:$0xff]  ;;  %v7724_v53 = vld [vmem:[%s14617_s12 + $0x1360] sm:$0xff] }
 0x598   : > { %8817 = vmatprep.subr.mxu1 %v7634_v27  ;;  %9649 = vmatprep.subr.mxu0 %v12806_v12  ;;  %v12949_v27 = vld [vmem:[#allocation2 + $0x50] sm:$0xff] }
 0x599   : > { %8818 = vmatpush3.msra.mxu1 %v7618_v13  ;;  %9650 = vmatpush3.msra.mxu0 %v7652_v33  ;;  %v5212_v33 = vsel %vm5206_vm1, %v5210_v51, %v5211_v45  ;;  %v5217_v30 = vrot.slane %v12949_v27, 5  ;;  %v7701_v51 = vld [vmem:[%s14617_s12 + $0x12a8] sm:$0xff] }
 0x59a   : > { %8819 = vmatprep.subr.mxu1 %v7633_v49  ;;  %9651 = vmatprep.subr.mxu0 %v12806_v12  ;;  %v7674_v49 = vld [vmem:[%s14617_s12 + $0x11d0] sm:$0xff] }
 0x59b   : > { %8820 = vmatpush3.msra.mxu1 %v7617_v2  ;;  %9652 = vmatpush3.msra.mxu0 %v7651_v5  ;;  %v7708_v5 = vld [vmem:[%s14617_s12 + $0x12e0] sm:$0xff] }
 0x59c   : > { %8821 = vmatprep.subr.mxu1 %v7632_v50  ;;  %9653 = vmatprep.subr.mxu0 %v12806_v12  ;;  %v5040_v50 = vld [vmem:[#allocation2 + $0x18] sm:$0xe0] }
 0x59d   : > { %8822 = vmatpush3.msra.mxu1 %v7616_v56  ;;  %9654 = vmatpush3.msra.mxu0 %v7650_v44  ;;  %v7673_v44 = vld [vmem:[%s14617_s12 + $0x11c8] sm:$0xff]  ;;  %v5216_v1 = vrot.slane %v5040_v50, 5  ;;  %v7699_v50 = vld [vmem:[%s14617_s12 + $0x1298] sm:$0xff] }
 0x59e   : > { %4939 = vmatmul.mubr.f32.vlgmr.msra.gmra.mxu1 %v4672_v59  ;;  %9655 = vmatprep.subr.mxu0 %v12806_v12  ;;  %v7688_v59 = vld [vmem:[%s14617_s12 + $0x1240] sm:$0xff] }
 0x59f   : > { %8851 = vmatprep.subr.mxu1 %v7695_v46  ;;  %4943 = vmatprep.mubr.f32.mxu1 %v4690_v22  ;;  %v7672_v22 = vld [vmem:[%s14617_s12 + $0x11c0] sm:$0xff] }
 0x5a0   : > { %9656 = vmatpush3.msra.mxu0 %v7649_v20  ;;  %8852 = vmatpush3.msra.mxu1 %v7679_v31  ;;  %v8457_v52 = vpop.f32.mrf.mxu1  ;;  %v7722_v31 = vld [vmem:[%s14617_s12 + $0x1350] sm:$0xff] }
 0x5a1   : > { %9657 = vmatprep.subr.mxu0 %v12806_v12  ;;  %8853 = vmatprep.subr.mxu1 %v7694_v41  ;;  %v5218_v41 = vsel %vm5206_vm1, %v5216_v1, %v5217_v30  ;;  %v7713_v1 = vld [vmem:[%s14617_s12 + $0x1308] sm:$0xff] }
 0x5a2   : > { %9658 = vmatpush3.msra.mxu0 %v7648_v8  ;;  %9659 = vmatprep.mubr.msk.f32.mxu0 %vm9900_vm2, %v12806_v12  ;;  %v8458_v26 = vpop.f32.mrf.mxu1  ;;  %v7706_v8 = vld [vmem:[%s14617_s12 + $0x12d0] sm:$0xff] }
 0x5a3   : > { %8854 = vmatpush3.msra.mxu1 %v7678_v0  ;;  %9660 = vmatmul.mubr.f32.vlgmr.msra.gmra.mxu0 %v4678_v40  ;;  %v8459_v55 = vadd.f32 %v8458_v26, %v8457_v52  ;;  %v7721_v0 = vld [vmem:[%s14617_s12 + $0x1348] sm:$0xff]  ;;  %v7671_v40 = vld [vmem:[%s14617_s12 + $0x11b8] sm:$0xff]  ;;  %v7720_v26 = vld [vmem:[%s14617_s12 + $0x1340] sm:$0xff] }
 0x5a4   : > { %4944 = vmatmul.mubr.f32.gmra.mxu1 %v4688_v57  ;;  %8855 = vmatprep.subr.mxu1 %v7693_v54  ;;  %v7705_v54 = vld [vmem:[%s14617_s12 + $0x12c8] sm:$0xff]  ;;  %v7670_v57 = vld [vmem:[%s14617_s12 + $0x11b0] sm:$0xff] }
 0x5a5   : > { %8892 = vmatprep.subr.mxu0 %v7727_v25  ;;  %4948 = vmatprep.mubr.f32.mxu1 %v4689_v43  ;;  %v8498_v35 = vpop.f32.mrf.mxu0  ;;  %v7707_v43 = vld [vmem:[%s14617_s12 + $0x12d8] sm:$0xff]  ;;  %v7686_v25 = vld [vmem:[%s14617_s12 + $0x1230] sm:$0xff] }
 0x5a6   : > { %8856 = vmatpush3.msra.mxu1 %v7677_v28  ;;  %8893 = vmatpush3.msra.mxu0 %v7711_v29  ;;  %v8460_v62 = vpop.f32.mrf.mxu1  ;;  %v7704_v29 = vld [vmem:[%s14617_s12 + $0x12c0] sm:$0xff] }
 0x5a7   : > { %8857 = vmatprep.subr.mxu1 %v7692_v42  ;;  %8894 = vmatprep.subr.mxu0 %v7726_v61  ;;  %v8499_v63 = vpop.f32.mrf.mxu0  ;;  %v7719_v61 = vld [vmem:[%s14617_s12 + $0x1338] sm:$0xff] }
 0x5a8   : > { %9662 = vmatprep.mubr.msk.f32.mxu0 %vm9900_vm2, %v12806_v12  ;;  %8858 = vmatpush3.msra.mxu1 %v7676_v6  ;;  %v8500_v15 = vadd.f32 %v8499_v63, %v8498_v35  ;;  %v8461_v60 = vpop.f32.mrf.mxu1  ;;  %v7669_v6 = vld [vmem:[%s14617_s12 + $0x11a8] sm:$0xff]  ;;  %v7703_v35 = vld [vmem:[%s14617_s12 + $0x12b8] sm:$0xff]  ;;  %v7702_v63 = vld [vmem:[%s14617_s12 + $0x12b0] sm:$0xff] }
 0x5a9   : > { %8895 = vmatpush3.msra.mxu0 %v7710_v37  ;;  %4949 = vmatmul.mubr.f32.gmra.mxu1 %v4687_v39  ;;  %v8462_v10 = vadd.f32 %v8461_v60, %v8460_v62  ;;  %v7684_v37 = vld [vmem:[%s14617_s12 + $0x1220] sm:$0xff]  ;;  %v7718_v62 = vld [vmem:[%s14617_s12 + $0x1330] sm:$0xff] }
 0x5aa   : > { %9663 = vmatmul.mubr.f32.gmra.mxu0 %v12641_v18  ;;  %8859 = vmatprep.subr.mxu1 %v7691_v14  ;;  %v12951_v13 = vadd.f32 %v8500_v15, %v8459_v55  ;;  %v7685_v55 = vld [vmem:[%s14617_s12 + $0x1228] sm:$0xff]  ;;  %v7668_v14 = vld [vmem:[%s14617_s12 + $0x11a0] sm:$0xff]  ;;  %v7667_v15 = vld [vmem:[%s14617_s12 + $0x1198] sm:$0xff] }
 0x5ab   : > { %8896 = vmatprep.subr.mxu0 %v7725_v34  ;;  %8860 = vmatpush3.msra.mxu1 %v7675_v4  ;;  %v8463_v2 = vpop.f32.mrf.mxu1  ;;  %v7683_v34 = vld [vmem:[%s14617_s12 + $0x1218] sm:$0xff]  ;;  %v7717_v4 = vld [vmem:[%s14617_s12 + $0x1328] sm:$0xff]  ;;  %v5037_v60 = vld [vmem:[#allocation2] sm:$0xe0] }
 0x5ac   : > { %5341 = vmatprep.mubr.f32.mxu1 %v5212_v33  ;;  %8897 = vmatpush3.msra.mxu0 %v7709_v17  ;;  %v8501_v24 = vpop.f32.mrf.mxu0  ;;  %v7682_v17 = vld [vmem:[%s14617_s12 + $0x1210] sm:$0xff]  ;;  %v7681_v33 = vld [vmem:[%s14617_s12 + $0x1208] sm:$0xff] }
 0x5ad   : > { %8861 = vmatprep.subr.mxu1 %v7690_v7  ;;  %8898 = vmatprep.subr.mxu0 %v7724_v53  ;;  %v8464_v56 = vpop.f32.mrf.mxu1  ;;  %v7666_v7 = vld [vmem:[%s14617_s12 + $0x1190] sm:$0xff]  ;;  %v7700_v53 = vld [vmem:[%s14617_s12 + $0x12a0] sm:$0xff] }
 0x5ae   : > { %9665 = vmatprep.mubr.msk.f32.mxu0 %vm9900_vm2, %v12806_v12  ;;  %8862 = vmatpush3.msra.mxu1 %v7674_v49  ;;  %v8502_v3 = vpop.f32.mrf.mxu0  ;;  %v8465_v46 = vadd.f32 %v8464_v56, %v8463_v2  ;;  %v5207_v49 = vrot.slane %v5037_v60, 5  ;;  %v13073_v2 = vrot.slane %v12806_v12, 5  ;;  %v7664_v56 = vld [vmem:[%s14617_s12 + $0x1180] sm:$0xff] }
 0x5af   : > { %8899 = vmatpush3.msra.mxu0 %v7708_v5  ;;  %8863 = vmatprep.subr.mxu1 %v7689_v19  ;;  %v8503_v20 = vadd.f32 %v8502_v3, %v8501_v24  ;;  %v7715_v5 = vld [vmem:[%s14617_s12 + $0x1318] sm:$0xff]  ;;  %v7665_v19 = vld [vmem:[%s14617_s12 + $0x1188] sm:$0xff]  ;;  %v7680_v24 = vld [vmem:[%s14617_s12 + $0x1200] sm:$0xff]  ;;  %v5230_v3 = vrot.slane %v12649_v21, 5 }
 0x5b0   : > { %9666 = vmatmul.mubr.f32.gmra.mxu0 %v12641_v18  ;;  %8900 = vmatprep.subr.mxu0 %v7723_v32  ;;  %v7687_v18 = vld [vmem:[%s14617_s12 + $0x1238] sm:$0xff]  ;;  %v7714_v32 = vld [vmem:[%s14617_s12 + $0x1310] sm:$0xff] }
 0x5b1   : > { %8864 = vmatpush3.msra.mxu1 %v7673_v44  ;;  %8901 = vmatpush3.msra.mxu0 %v7707_v43  ;;  %v12996_v39 = vadd.f32 %v8503_v20, %v8462_v10  ;;  %v7716_v10 = vld [vmem:[%s14617_s12 + $0x1320] sm:$0xff]  ;;  %v7698_v44 = vld [vmem:[%s14617_s12 + $0x1290] sm:$0xff]  ;;  %v5209_v43 = vsel %vm5206_vm1, %v5207_v49, %v13073_v2  ;;  %v7697_v20 = vld [vmem:[%s14617_s12 + $0x1288] sm:$0xff] }
 0x5b2   : > { %5421 = vmatprep.mubr.f32.mxu0 %v5218_v41  ;;  %8865 = vmatprep.subr.mxu1 %v7688_v59  ;;  %v8504_v52 = vpop.f32.mrf.mxu0  ;;  %v7759_v59 = vld [vmem:[%s14617_s12 + $0x1478] sm:$0xff]  ;;  %v5059_v21 = vld [vmem:[#allocation2 + $0xb0] sm:$0x1]  ;;  %v7712_v41 = vld [vmem:[%s14617_s12 + $0x1300] sm:$0xff] }
 0x5b3   : > { %8902 = vmatprep.subr.mxu0 %v7722_v31  ;;  %8866 = vmatpush3.msra.mxu1 %v7672_v22  ;;  %v5039_v31 = vld [vmem:[#allocation2 + $0x10] sm:$0xe0]  ;;  %v7743_v22 = vld [vmem:[%s14617_s12 + $0x13f8] sm:$0xff] }
 0x5b4   : > { %8903 = vmatpush3.msra.mxu0 %v7706_v8  ;;  %8867 = vmatprep.subr.mxu1 %v7687_v18  ;;  %v8505_v28 = vpop.f32.mrf.mxu0  ;;  %v5231_v18 = vsel %vm5206_vm1, %v5211_v45, %v5230_v3  ;;  %v7757_v45 = vld [vmem:[%s14617_s12 + $0x1468] sm:$0xff]  ;;  %v5060_v49 = vld [vmem:[#allocation2 + $0xb8] sm:$0x1] }
 0x5b5   : > { %8904 = vmatprep.subr.mxu0 %v7721_v0  ;;  %8868 = vmatpush3.msra.mxu1 %v7671_v40  ;;  %v8506_v42 = vadd.f32 %v8505_v28, %v8504_v52  ;;  %v7758_v0 = vld [vmem:[%s14617_s12 + $0x1470] sm:$0xff]  ;;  %v7696_v40 = vld [vmem:[%s14617_s12 + $0x1280] sm:$0xff]  ;;  %v5058_v52 = vld [vmem:[#allocation2 + $0xa8] sm:$0x1]  ;;  %v5234_v28 = vrot.slane %v12684_v16, 5 }
 0x5b6   : > { %8905 = vmatpush3.msra.mxu0 %v7705_v54  ;;  %8869 = vmatprep.subr.mxu1 %v7686_v25  ;;  %v7742_v54 = vld [vmem:[%s14617_s12 + $0x13f0] sm:$0xff]  ;;  %v5213_v25 = vrot.slane %v5039_v31, 5  ;;  %v7775_v16 = vld [vmem:[%s14617_s12 + $0x14f8] sm:$0xff] }
 0x5b7   : > { %8906 = vmatprep.subr.mxu0 %v7720_v26  ;;  %8870 = vmatpush3.msra.mxu1 %v7670_v57  ;;  %v13034_v36 = vadd.f32 %v8506_v42, %v8465_v46  ;;  %v13099_v46 = vld [vmem:[#allocation2 + $0x48] sm:$0xff]  ;;  %v5244_v26 = vrot.slane %v5059_v21, 5  ;;  %v7772_v21 = vld [vmem:[%s14617_s12 + $0x14e0] sm:$0xff] }
 0x5b8   : > { %8907 = vmatpush3.msra.mxu0 %v7704_v29  ;;  %8871 = vmatprep.subr.mxu1 %v7685_v55  ;;  %v5214_v8 = vrot.slane %v13099_v46, 5  ;;  %v5242_v55 = vrot.slane %v5058_v52, 5 }
 0x5b9   : > { %8908 = vmatprep.subr.mxu0 %v7719_v61  ;;  %8872 = vmatpush3.msra.mxu1 %v7669_v6  ;;  %v7741_v61 = vld [vmem:[%s14617_s12 + $0x13e8] sm:$0xff]  ;;  %v5061_v6 = vld [vmem:[#allocation2 + $0xc0] sm:$0x1] }
 0x5ba   : > { %8909 = vmatpush3.msra.mxu0 %v7703_v35  ;;  %8873 = vmatprep.subr.mxu1 %v7684_v37  ;;  %v5215_v29 = vsel %vm5206_vm1, %v5213_v25, %v5214_v8  ;;  %v5245_v37 = vsel %vm5206_vm1, %v5230_v3, %v5244_v26  ;;  %v7754_v3 = vld [vmem:[%s14617_s12 + $0x1450] sm:$0xff]  ;;  %v7752_v25 = vld [vmem:[%s14617_s12 + $0x1440] sm:$0xff] }
 0x5bb   : > { %8910 = vmatprep.subr.mxu0 %v7718_v62  ;;  %8874 = vmatpush3.msra.mxu1 %v7668_v14  ;;  %v7756_v62 = vld [vmem:[%s14617_s12 + $0x1460] sm:$0xff] }
 0x5bc   : > { %8911 = vmatpush3.msra.mxu0 %v7702_v63  ;;  %8875 = vmatprep.subr.mxu1 %v7683_v34  ;;  %v13145_v14 = vld [vmem:[#allocation2 + $0x60] sm:$0xff]  ;;  %v5235_v63 = vsel %vm5206_vm1, %v5217_v30, %v5234_v28  ;;  %v5042_v30 = vld [vmem:[#allocation2 + $0x28] sm:$0xe0] }
 0x5bd   : > { %8912 = vmatprep.subr.mxu0 %v7717_v4  ;;  %8876 = vmatpush3.msra.mxu1 %v7667_v15  ;;  %v7740_v34 = vld [vmem:[%s14617_s12 + $0x13e0] sm:$0xff]  ;;  %v5232_v4 = vrot.slane %v12703_v23, 5  ;;  %v7755_v23 = vld [vmem:[%s14617_s12 + $0x1458] sm:$0xff] }
 0x5be   : > { %8913 = vmatpush3.msra.mxu0 %v7701_v51  ;;  %8877 = vmatprep.subr.mxu1 %v7682_v17  ;;  %v7774_v51 = vld [vmem:[%s14617_s12 + $0x14f0] sm:$0xff]  ;;  %v5243_v17 = vsel %vm5206_vm1, %v13073_v2, %v5242_v55  ;;  %v7769_v55 = vld [vmem:[%s14617_s12 + $0x14c8] sm:$0xff] }
 0x5bf   : > { %8914 = vmatprep.subr.mxu0 %v7716_v10  ;;  %8878 = vmatpush3.msra.mxu1 %v7666_v7  ;;  %v5248_v10 = vrot.slane %v5061_v6, 5  ;;  %v7734_v6 = vld [vmem:[%s14617_s12 + $0x13b0] sm:$0xff] }
 0x5c0   : > { %8915 = vmatpush3.msra.mxu0 %v7700_v53  ;;  %8879 = vmatprep.subr.mxu1 %v7681_v33 }
 0x5c1   : > { %8916 = vmatprep.subr.mxu0 %v7715_v5  ;;  %8880 = vmatpush3.msra.mxu1 %v7665_v19  ;;  %v5233_v19 = vsel %vm5206_vm1, %v5214_v8, %v5232_v4 }
 0x5c2   : > { %8917 = vmatpush3.msra.mxu0 %v7699_v50  ;;  %8881 = vmatprep.subr.mxu1 %v7680_v24  ;;  %v7739_v50 = vld [vmem:[%s14617_s12 + $0x13d8] sm:$0xff]  ;;  %v5222_v24 = vrot.slane %v5042_v30, 5  ;;  %v7730_v30 = vld [vmem:[%s14617_s12 + $0x1390] sm:$0xff] }
 0x5c3   : > { %8918 = vmatprep.subr.mxu0 %v7714_v32  ;;  %8882 = vmatpush3.msra.mxu1 %v7664_v56 }
 0x5c4   : > { %8919 = vmatpush3.msra.mxu0 %v7698_v44  ;;  %5342 = vmatmul.mubr.f32.vlgmr.msra.gmra.mxu1 %v5209_v43  ;;  %v5249_v44 = vsel %vm5206_vm1, %v5234_v28, %v5248_v10  ;;  %v7773_v43 = vld [vmem:[%s14617_s12 + $0x14e8] sm:$0xff]  ;;  %v7746_v10 = vld [vmem:[%s14617_s12 + $0x1410] sm:$0xff] }
 0x5c5   : > { %8920 = vmatprep.subr.mxu0 %v7713_v1  ;;  %8933 = vmatprep.subr.mxu1 %v7759_v59  ;;  %v7738_v1 = vld [vmem:[%s14617_s12 + $0x13d0] sm:$0xff]  ;;  %v5246_v59 = vrot.slane %v5060_v49, 5  ;;  %v7763_v49 = vld [vmem:[%s14617_s12 + $0x1498] sm:$0xff] }
 0x5c6   : > { %5346 = vmatprep.mubr.f32.mxu1 %v5231_v18  ;;  %8921 = vmatpush3.msra.mxu0 %v7697_v20  ;;  %v8539_v57 = vpop.f32.mrf.mxu1 }
 0x5c7   : > { %8934 = vmatpush3.msra.mxu1 %v7743_v22  ;;  %8922 = vmatprep.subr.mxu0 %v7712_v41  ;;  %v7753_v22 = vld [vmem:[%s14617_s12 + $0x1448] sm:$0xff] }
 0x5c8   : > { %8935 = vmatprep.subr.mxu1 %v7758_v0  ;;  %8923 = vmatpush3.msra.mxu0 %v7696_v40  ;;  %v8540_v42 = vpop.f32.mrf.mxu1  ;;  %v7771_v0 = vld [vmem:[%s14617_s12 + $0x14d8] sm:$0xff] }
 0x5c9   : > { %8936 = vmatpush3.msra.mxu1 %v7742_v54  ;;  %5422 = vmatmul.mubr.f32.vlgmr.msra.gmra.mxu0 %v5215_v29  ;;  %v8541_v35 = vadd.f32 %v8540_v42, %v8539_v57  ;;  %v5247_v54 = vsel %vm5206_vm1, %v5232_v4, %v5246_v59  ;;  %v7736_v57 = vld [vmem:[%s14617_s12 + $0x13c0] sm:$0xff]  ;;  %v7735_v29 = vld [vmem:[%s14617_s12 + $0x13b8] sm:$0xff] }
 0x5ca   : > { %5347 = vmatmul.mubr.f32.gmra.mxu1 %v13073_v2  ;;  %8937 = vmatprep.subr.mxu1 %v7757_v45  ;;  %v7770_v45 = vld [vmem:[%s14617_s12 + $0x14d0] sm:$0xff]  ;;  %v7748_v4 = vld [vmem:[%s14617_s12 + $0x1420] sm:$0xff] }
 0x5cb   : > { %9668 = vmatprep.subr.mxu0 %v12806_v12  ;;  %5351 = vmatprep.mubr.f32.mxu1 %v5245_v37  ;;  %v3900_v15 = vadd.f32 %v8541_v35, %v12951_v13  ;;  %v3979_v60 = vpop.f32.mrf.mxu0  ;;  %v5223_v13 = vrot.slane %v13145_v14, 5  ;;  %v7768_v35 = vld [vmem:[%s14617_s12 + $0x14c0] sm:$0xff] }
 0x5cc   : > { %5426 = vmatprep.mubr.f32.mxu0 %v5235_v63  ;;  %8938 = vmatpush3.msra.mxu1 %v7741_v61  ;;  %v8542_v7 = vpop.f32.mrf.mxu1  ;;  %v7733_v63 = vld [vmem:[%s14617_s12 + $0x13a8] sm:$0xff] }
 0x5cd   : > { %9669 = vmatpush3.msra.mxu0 %v7775_v16  ;;  %8939 = vmatprep.subr.mxu1 %v7756_v62  ;;  %v3980_v53 = vadd.f32 %v3979_v60, %v3900_v15  ;;  %v9579_v33 = vpop.f32.mrf.mxu0  ;;  %v7749_v16 = vld [vmem:[%s14617_s12 + $0x1428] sm:$0xff]  ;;  %v7766_v15 = vld [vmem:[%s14617_s12 + $0x14b0] sm:$0xff]  ;;  %v7747_v60 = vld [vmem:[%s14617_s12 + $0x1418] sm:$0xff] }
 0x5ce   : > { %9670 = vmatprep.subr.mxu0 %v12806_v12  ;;  %8940 = vmatpush3.msra.mxu1 %v7740_v34  ;;  %v8543_v5 = vpop.f32.mrf.mxu1  ;;  %v7767_v34 = vld [vmem:[%s14617_s12 + $0x14b8] sm:$0xff]  ;;  %v7729_v33 = vld [vmem:[%s14617_s12 + $0x1388] sm:$0xff] }
 0x5cf   : > { %9671 = vmatpush3.msra.mxu0 %v7774_v51  ;;  %5352 = vmatmul.mubr.f32.gmra.mxu1 %v5243_v17  ;;  %v8544_v32 = vadd.f32 %v8543_v5, %v8542_v7  ;;  %v13171_v56 = vadd.f32 %v3980_v53, %v12733_v58  ;;  %v5224_v58 = vsel %vm5206_vm1, %v5222_v24, %v5223_v13  ;;  %v7731_v51 = vld [vmem:[%s14617_s12 + $0x1398] sm:$0xff]  ;;  %v7765_v17 = vld [vmem:[%s14617_s12 + $0x14a8] sm:$0xff]  ;;  %v7764_v7 = vld [vmem:[%s14617_s12 + $0x14a0] sm:$0xff] }
 0x5d0   : > { %5427 = vmatmul.mubr.f32.gmra.mxu0 %v5233_v19  ;;  %8941 = vmatprep.subr.mxu1 %v7755_v23  ;;  %v13279_v23 = vld [vmem:[#allocation2 + $0x58] sm:$0xff]  ;;  %v7745_v53 = vld [vmem:[%s14617_s12 + $0x1408] sm:$0xff]  ;;  %v5041_v5 = vld [vmem:[#allocation2 + $0x20] sm:$0xe0] }
 0x5d1   : > { %9672 = vmatprep.subr.mxu0 %v12806_v12  ;;  %5431 = vmatprep.mubr.f32.mxu0 %v5249_v44  ;;  %v8545_v20 = vpop.f32.mrf.mxu1  ;;  %v3905_v31 = vadd.f32 %v8544_v32, %v12996_v39  ;;  %v7737_v39 = vld [vmem:[%s14617_s12 + $0x13c8] sm:$0xff]  ;;  %v7744_v19 = vld [vmem:[%s14617_s12 + $0x1400] sm:$0xff]  ;;  %v5043_v24 = vld [vmem:[#allocation2 + $0x30] sm:$0xe0] }
 0x5d2   : > { %8942 = vmatpush3.msra.mxu1 %v7739_v50  ;;  %5501 = vmatprep.mubr.f32.mxu1 %v5224_v58  ;;  %v3984_v41 = vpop.f32.mrf.mxu0  ;;  %v5220_v50 = vrot.slane %v13279_v23, 5  ;;  %v7728_v32 = vld [vmem:[%s14617_s12 + $0x1380] sm:$0xff]  ;;  %v7762_v44 = vld [vmem:[%s14617_s12 + $0x1490] sm:$0xff]  ;;  %v7807_v58 = vld [vmem:[%s14617_s12 + $0x15f8] sm:$0xff] }
 0x5d3   : > { %9673 = vmatpush3.msra.mxu0 %v7773_v43  ;;  %8943 = vmatprep.subr.mxu1 %v7754_v3  ;;  %v8546_v8 = vpop.f32.mrf.mxu1  ;;  %v3985_v18 = vadd.f32 %v3984_v41, %v3905_v31  ;;  %v5238_v43 = vrot.slane %v12848_v48, 5  ;;  %v5219_v3 = vrot.slane %v5041_v5, 5  ;;  %v7791_v48 = vld [vmem:[%s14617_s12 + $0x1578] sm:$0xff]  ;;  %v5063_v31 = vld [vmem:[#allocation2 + $0xd0] sm:$0x1]  ;;  %v7760_v41 = vld [vmem:[%s14617_s12 + $0x1480] sm:$0xff] }
 0x5d4   : > { %9674 = vmatprep.subr.mxu0 %v12806_v12  ;;  %8944 = vmatpush3.msra.mxu1 %v7738_v1  ;;  %v8547_v40 = vadd.f32 %v8546_v8, %v8545_v20  ;;  %v9582_v52 = vpop.f32.mrf.mxu0  ;;  %v5225_v1 = vrot.slane %v5043_v24, 5  ;;  %v7761_v20 = vld [vmem:[%s14617_s12 + $0x1488] sm:$0xff]  ;;  %v5236_v8 = vrot.slane %v12872_v38, 5  ;;  %v7839_v38 = vld [vmem:[%s14617_s12 + $0x16f8] sm:$0xff] }
 0x5d5   : > { %9675 = vmatpush3.msra.mxu0 %v7772_v21  ;;  %8945 = vmatprep.subr.mxu1 %v7753_v22  ;;  %v13206_v26 = vadd.f32 %v3985_v18, %v12761_v47  ;;  %v7751_v47 = vld [vmem:[%s14617_s12 + $0x1438] sm:$0xff]  ;;  %v5221_v59 = vsel %vm5206_vm1, %v5219_v3, %v5220_v50  ;;  %v5239_v21 = vsel %vm5206_vm1, %v5223_v13, %v5238_v43  ;;  %v7806_v22 = vld [vmem:[%s14617_s12 + $0x15f0] sm:$0xff]  ;;  %v5062_v52 = vld [vmem:[#allocation2 + $0xc8] sm:$0x1] }
 0x5d6   : > { %5432 = vmatmul.mubr.f32.gmra.mxu0 %v5247_v54  ;;  %9676 = vmatprep.subr.mxu0 %v12806_v12  ;;  %v3910_v28 = vadd.f32 %v8547_v40, %v13034_v36  ;;  %v7750_v36 = vld [vmem:[%s14617_s12 + $0x1430] sm:$0xff]  ;;  %v5227_v13 = vsel %vm5206_vm1, %v5225_v1, %v13073_v2  ;;  %v7805_v40 = vld [vmem:[%s14617_s12 + $0x15e8] sm:$0xff]  ;;  %v7835_v1 = vld [vmem:[%s14617_s12 + $0x16d8] sm:$0xff] }
 0x5d7   : > { %8946 = vmatpush3.msra.mxu1 %v7737_v39  ;;  %9677 = vmatpush3.msra.mxu0 %v7771_v0  ;;  %v7790_v18 = vld [vmem:[%s14617_s12 + $0x1570] sm:$0xff]  ;;  %v5252_v39 = vrot.slane %v5063_v31, 5  ;;  %v7819_v31 = vld [vmem:[%s14617_s12 + $0x1658] sm:$0xff] }
 0x5d8   : > { %8947 = vmatprep.subr.mxu1 %v7752_v25  ;;  %9678 = vmatprep.subr.mxu0 %v12806_v12  ;;  %v3989_v42 = vpop.f32.mrf.mxu0  ;;  %v5237_v25 = vsel %vm5206_vm1, %v5220_v50, %v5236_v8  ;;  %v7786_v50 = vld [vmem:[%s14617_s12 + $0x1550] sm:$0xff] }
 0x5d9   : > { %8948 = vmatpush3.msra.mxu1 %v7736_v57  ;;  %9679 = vmatpush3.msra.mxu0 %v7770_v45  ;;  %v3990_v61 = vadd.f32 %v3989_v42, %v3910_v28  ;;  %v7789_v57 = vld [vmem:[%s14617_s12 + $0x1568] sm:$0xff]  ;;  %v7823_v45 = vld [vmem:[%s14617_s12 + $0x1678] sm:$0xff]  ;;  %v5250_v42 = vrot.slane %v5062_v52, 5 }
 0x5da   : > { %8949 = vmatprep.subr.mxu1 %v7751_v47  ;;  %9680 = vmatprep.subr.mxu0 %v12806_v12  ;;  %v9585_v37 = vpop.f32.mrf.mxu0  ;;  %v5253_v47 = vsel %vm5206_vm1, %v5238_v43, %v5252_v39  ;;  %v5603_v43 = vld [vmem:[#allocation2 + $0x18] sm:$0xc0]  ;;  %v7818_v39 = vld [vmem:[%s14617_s12 + $0x1650] sm:$0xff]  ;;  %v7833_v52 = vld [vmem:[%s14617_s12 + $0x16c8] sm:$0xff] }
 0x5db   : > { %8950 = vmatpush3.msra.mxu1 %v7735_v29  ;;  %9681 = vmatpush3.msra.mxu0 %v7769_v55  ;;  %v13240_v62 = vadd.f32 %v3990_v61, %v12794_v9  ;;  %v7732_v9 = vld [vmem:[%s14617_s12 + $0x13a0] sm:$0xff]  ;;  %v7838_v55 = vld [vmem:[%s14617_s12 + $0x16f0] sm:$0xff]  ;;  %v5064_v37 = vld [vmem:[#allocation2 + $0xd8] sm:$0x1] }
 0x5dc   : > { %8951 = vmatprep.subr.mxu1 %v7750_v36  ;;  %9682 = vmatprep.subr.mxu0 %v12806_v12  ;;  %v7804_v29 = vld [vmem:[%s14617_s12 + $0x15e0] sm:$0xff] }
 0x5dd   : > { %8952 = vmatpush3.msra.mxu1 %v7734_v6  ;;  %9683 = vmatpush3.msra.mxu0 %v7768_v35  ;;  %v7788_v36 = vld [vmem:[%s14617_s12 + $0x1560] sm:$0xff]  ;;  %v7822_v6 = vld [vmem:[%s14617_s12 + $0x1670] sm:$0xff]  ;;  %v5601_v35 = vld [vmem:[#allocation2 + $0x8] sm:$0xc0] }
 0x5de   : > { %8953 = vmatprep.subr.mxu1 %v7749_v16  ;;  %9684 = vmatprep.subr.mxu0 %v12806_v12 }
 0x5df   : > { %8954 = vmatpush3.msra.mxu1 %v7733_v63  ;;  %9685 = vmatpush3.msra.mxu0 %v7767_v34  ;;  %v7803_v63 = vld [vmem:[%s14617_s12 + $0x15d8] sm:$0xff]  ;;  %v5746_v34 = vrot.slane %v12919_v11, 6 }
 0x5e0   : > { %8955 = vmatprep.subr.mxu1 %v7748_v4  ;;  %9686 = vmatprep.subr.mxu0 %v12806_v12 }
 0x5e1   : > { %8956 = vmatpush3.msra.mxu1 %v7732_v9  ;;  %9687 = vmatpush3.msra.mxu0 %v7766_v15  ;;  %v5251_v9 = vsel %vm5206_vm1, %v5236_v8, %v5250_v42  ;;  %v7837_v15 = vld [vmem:[%s14617_s12 + $0x16e8] sm:$0xff] }
 0x5e2   : > { %8957 = vmatprep.subr.mxu1 %v7747_v60  ;;  %9688 = vmatprep.subr.mxu0 %v12806_v12  ;;  %v7787_v60 = vld [vmem:[%s14617_s12 + $0x1558] sm:$0xff] }
 0x5e3   : > { %8958 = vmatpush3.msra.mxu1 %v7731_v51  ;;  %9689 = vmatpush3.msra.mxu0 %v7765_v17 }
 0x5e4   : > { %8959 = vmatprep.subr.mxu1 %v7746_v10  ;;  %9690 = vmatprep.subr.mxu0 %v12806_v12  ;;  %v5745_v10 = vrot.slane %v5601_v35, 6  ;;  %v7796_v35 = vld [vmem:[%s14617_s12 + $0x15a0] sm:$0xff] }
 0x5e5   : > { %8960 = vmatpush3.msra.mxu1 %v7730_v30  ;;  %9691 = vmatpush3.msra.mxu0 %v7764_v7  ;;  %v7821_v30 = vld [vmem:[%s14617_s12 + $0x1668] sm:$0xff]  ;;  %v5254_v7 = vrot.slane %v5064_v37, 5 }
 0x5e6   : > { %8961 = vmatprep.subr.mxu1 %v7745_v53  ;;  %9692 = vmatprep.subr.mxu0 %v12806_v12 }
 0x5e7   : > { %8962 = vmatpush3.msra.mxu1 %v7729_v33  ;;  %9693 = vmatpush3.msra.mxu0 %v7763_v49  ;;  %v7802_v33 = vld [vmem:[%s14617_s12 + $0x15d0] sm:$0xff]  ;;  %v7836_v49 = vld [vmem:[%s14617_s12 + $0x16e0] sm:$0xff] }
 0x5e8   : > { %8963 = vmatprep.subr.mxu1 %v7744_v19  ;;  %9694 = vmatprep.subr.mxu0 %v12806_v12  ;;  %v5747_v19 = vsel %vm5741_vm4, %v5745_v10, %v5746_v34  ;;  %v7794_v10 = vld [vmem:[%s14617_s12 + $0x1590] sm:$0xff] }
 0x5e9   : > { %8964 = vmatpush3.msra.mxu1 %v7728_v32  ;;  %9695 = vmatpush3.msra.mxu0 %v7762_v44  ;;  %v7820_v32 = vld [vmem:[%s14617_s12 + $0x1660] sm:$0xff]  ;;  %v7801_v44 = vld [vmem:[%s14617_s12 + $0x15c8] sm:$0xff] }
 0x5ea   : > { %5502 = vmatmul.mubr.f32.vlgmr.msra.gmra.mxu1 %v5221_v59  ;;  %9696 = vmatprep.subr.mxu0 %v12806_v12  ;;  %v5752_v59 = vrot.slane %v12949_v27, 6 }
 0x5eb   : > { %8993 = vmatprep.subr.mxu1 %v7807_v58  ;;  %5506 = vmatprep.mubr.f32.mxu1 %v5239_v21  ;;  %v5255_v58 = vsel %vm5206_vm1, %v13073_v2, %v5254_v7  ;;  %v7778_v7 = vld [vmem:[%s14617_s12 + $0x1510] sm:$0xff] }
 0x5ec   : > { %9697 = vmatpush3.msra.mxu0 %v7761_v20  ;;  %8994 = vmatpush3.msra.mxu1 %v7791_v48  ;;  %v8599_v0 = vpop.f32.mrf.mxu1  ;;  %v7785_v48 = vld [vmem:[%s14617_s12 + $0x1548] sm:$0xff] }
 0x5ed   : > { %9698 = vmatprep.subr.mxu0 %v12806_v12  ;;  %8995 = vmatprep.subr.mxu1 %v7806_v22  ;;  %v5751_v22 = vrot.slane %v5603_v43, 6  ;;  %v7792_v43 = vld [vmem:[%s14617_s12 + $0x1580] sm:$0xff] }
 0x5ee   : > { %9699 = vmatpush3.msra.mxu0 %v7760_v41  ;;  %9700 = vmatprep.mubr.msk.f32.mxu0 %vm9900_vm2, %v12806_v12  ;;  %v8600_v54 = vpop.f32.mrf.mxu1  ;;  %v7800_v41 = vld [vmem:[%s14617_s12 + $0x15c0] sm:$0xff] }
 0x5ef   : > { %8996 = vmatpush3.msra.mxu1 %v7790_v18  ;;  %9701 = vmatmul.mubr.f32.vlgmr.msra.gmra.mxu0 %v5227_v13  ;;  %v8601_v28 = vadd.f32 %v8600_v54, %v8599_v0  ;;  %v7784_v18 = vld [vmem:[%s14617_s12 + $0x1540] sm:$0xff]  ;;  %v5753_v13 = vsel %vm5741_vm4, %v5751_v22, %v5752_v59  ;;  %v7799_v0 = vld [vmem:[%s14617_s12 + $0x15b8] sm:$0xff]  ;;  %v7809_v22 = vld [vmem:[%s14617_s12 + $0x1608] sm:$0xff] }
 0x5f0   : > { %5507 = vmatmul.mubr.f32.gmra.mxu1 %v5237_v25  ;;  %8997 = vmatprep.subr.mxu1 %v7805_v40  ;;  %v7817_v25 = vld [vmem:[%s14617_s12 + $0x1648] sm:$0xff] }
 0x5f1   : > { %9034 = vmatprep.subr.mxu0 %v7839_v38  ;;  %5511 = vmatprep.mubr.f32.mxu1 %v5253_v47  ;;  %v8640_v61 = vpop.f32.mrf.mxu0  ;;  %v7783_v38 = vld [vmem:[%s14617_s12 + $0x1538] sm:$0xff] }
 0x5f2   : > { %8998 = vmatpush3.msra.mxu1 %v7789_v57  ;;  %9035 = vmatpush3.msra.mxu0 %v7823_v45  ;;  %v8602_v16 = vpop.f32.mrf.mxu1  ;;  %v7798_v57 = vld [vmem:[%s14617_s12 + $0x15b0] sm:$0xff]  ;;  %v7832_v45 = vld [vmem:[%s14617_s12 + $0x16c0] sm:$0xff] }
 0x5f3   : > { %8999 = vmatprep.subr.mxu1 %v7804_v29  ;;  %9036 = vmatprep.subr.mxu0 %v7838_v55  ;;  %v8641_v4 = vpop.f32.mrf.mxu0  ;;  %v7816_v29 = vld [vmem:[%s14617_s12 + $0x1640] sm:$0xff]  ;;  %v7797_v55 = vld [vmem:[%s14617_s12 + $0x15a8] sm:$0xff] }
 0x5f4   : > { %9703 = vmatprep.mubr.msk.f32.mxu0 %vm9900_vm2, %v12806_v12  ;;  %9000 = vmatpush3.msra.mxu1 %v7788_v36  ;;  %v8642_v51 = vadd.f32 %v8641_v4, %v8640_v61  ;;  %v8603_v17 = vpop.f32.mrf.mxu1  ;;  %v7831_v36 = vld [vmem:[%s14617_s12 + $0x16b8] sm:$0xff]  ;;  %v7781_v61 = vld [vmem:[%s14617_s12 + $0x1528] sm:$0xff]  ;;  %v7814_v4 = vld [vmem:[%s14617_s12 + $0x1630] sm:$0xff] }
 0x5f5   : > { %9037 = vmatpush3.msra.mxu0 %v7822_v6  ;;  %5512 = vmatmul.mubr.f32.gmra.mxu1 %v5251_v9  ;;  %v8604_v53 = vadd.f32 %v8603_v17, %v8602_v16  ;;  %v7815_v6 = vld [vmem:[%s14617_s12 + $0x1638] sm:$0xff]  ;;  %v7830_v16 = vld [vmem:[%s14617_s12 + $0x16b0] sm:$0xff]  ;;  %v7813_v17 = vld [vmem:[%s14617_s12 + $0x1628] sm:$0xff] }
 0x5f6   : > { %9704 = vmatmul.mubr.f32.gmra.mxu0 %v13073_v2  ;;  %9001 = vmatprep.subr.mxu1 %v7803_v63  ;;  %v13382_v5 = vadd.f32 %v8642_v51, %v8601_v28  ;;  %v7782_v28 = vld [vmem:[%s14617_s12 + $0x1530] sm:$0xff]  ;;  %v7780_v63 = vld [vmem:[%s14617_s12 + $0x1520] sm:$0xff]  ;;  %v7795_v9 = vld [vmem:[%s14617_s12 + $0x1598] sm:$0xff] }
 0x5f7   : > { %9038 = vmatprep.subr.mxu0 %v7837_v15  ;;  %9002 = vmatpush3.msra.mxu1 %v7787_v60  ;;  %v8605_v24 = vpop.f32.mrf.mxu1  ;;  %v7829_v15 = vld [vmem:[%s14617_s12 + $0x16a8] sm:$0xff]  ;;  %v7779_v60 = vld [vmem:[%s14617_s12 + $0x1518] sm:$0xff]  ;;  %v5600_v51 = vld [vmem:[#allocation2] sm:$0xc0] }
 0x5f8   : > { %5876 = vmatprep.mubr.f32.mxu1 %v5747_v19  ;;  %9039 = vmatpush3.msra.mxu0 %v7821_v30  ;;  %v8643_v3 = vpop.f32.mrf.mxu0  ;;  %v7828_v30 = vld [vmem:[%s14617_s12 + $0x16a0] sm:$0xff] }
 0x5f9   : > { %9003 = vmatprep.subr.mxu1 %v7802_v33  ;;  %9040 = vmatprep.subr.mxu0 %v7836_v49  ;;  %v8606_v20 = vpop.f32.mrf.mxu1  ;;  %v7793_v33 = vld [vmem:[%s14617_s12 + $0x1588] sm:$0xff]  ;;  %v5742_v49 = vrot.slane %v5600_v51, 6  ;;  %v13504_v19 = vld [vmem:[#allocation2] sm:$0xff]  ;;  %v7886_v51 = vld [vmem:[%s14617_s12 + $0x1870] sm:$0xff] }
 0x5fa   : > { %9706 = vmatprep.mubr.msk.f32.mxu0 %vm9900_vm2, %v12806_v12  ;;  %9004 = vmatpush3.msra.mxu1 %v7786_v50  ;;  %v8644_v2 = vpop.f32.mrf.mxu0  ;;  %v8607_v21 = vadd.f32 %v8606_v20, %v8605_v24  ;;  %v7834_v12 = vld [vmem:[%s14617_s12 + $0x16d0] sm:$0xff]  ;;  %v13507_v50 = vrot.slane %v13504_v19, 6  ;;  %v7827_v24 = vld [vmem:[%s14617_s12 + $0x1698] sm:$0xff] }
 0x5fb   : > { %9041 = vmatpush3.msra.mxu0 %v7820_v32  ;;  %9005 = vmatprep.subr.mxu1 %v7801_v44  ;;  %v8645_v8 = vadd.f32 %v8644_v2, %v8643_v3  ;;  %v7777_v32 = vld [vmem:[%s14617_s12 + $0x1508] sm:$0xff]  ;;  %v7811_v44 = vld [vmem:[%s14617_s12 + $0x1618] sm:$0xff]  ;;  %v7826_v3 = vld [vmem:[%s14617_s12 + $0x1690] sm:$0xff] }
 0x5fc   : > { %9707 = vmatmul.mubr.f32.gmra.mxu0 %v5255_v58  ;;  %9042 = vmatprep.subr.mxu0 %v7835_v1  ;;  %v7776_v58 = vld [vmem:[%s14617_s12 + $0x1500] sm:$0xff]  ;;  %v7810_v1 = vld [vmem:[%s14617_s12 + $0x1610] sm:$0xff]  ;;  %v5744_v20 = vsel %vm5741_vm4, %v5742_v49, %v13507_v50  ;;  %v7825_v2 = vld [vmem:[%s14617_s12 + $0x1688] sm:$0xff] }
 0x5fd   : > { %9006 = vmatpush3.msra.mxu1 %v7785_v48  ;;  %9043 = vmatpush3.msra.mxu0 %v7819_v31  ;;  %v13428_v40 = vadd.f32 %v8645_v8, %v8604_v53  ;;  %v7812_v53 = vld [vmem:[%s14617_s12 + $0x1620] sm:$0xff]  ;;  %v13532_v48 = vld [vmem:[#allocation2 + $0x78] sm:$0xff]  ;;  %v5608_v8 = vld [vmem:[#allocation2 + $0xb0] sm:$0x3] }
 0x5fe   : > { %5956 = vmatprep.mubr.f32.mxu0 %v5753_v13  ;;  %9007 = vmatprep.subr.mxu1 %v7800_v41  ;;  %v8646_v54 = vpop.f32.mrf.mxu0  ;;  %v5765_v31 = vrot.slane %v13532_v48, 6  ;;  %v5602_v41 = vld [vmem:[#allocation2 + $0x10] sm:$0xc0]  ;;  %v5749_v13 = vrot.slane %v13099_v46, 6 }
 0x5ff   : > { %9044 = vmatprep.subr.mxu0 %v7834_v12  ;;  %9008 = vmatpush3.msra.mxu1 %v7784_v18  ;;  %v7855_v12 = vld [vmem:[%s14617_s12 + $0x1778] sm:$0xff]  ;;  %v7824_v18 = vld [vmem:[%s14617_s12 + $0x1680] sm:$0xff]  ;;  %v7854_v46 = vld [vmem:[%s14617_s12 + $0x1770] sm:$0xff] }
 0x600   : > { %9045 = vmatpush3.msra.mxu0 %v7818_v39  ;;  %9009 = vmatprep.subr.mxu1 %v7799_v0  ;;  %v8647_v47 = vpop.f32.mrf.mxu0  ;;  %v5766_v39 = vsel %vm5741_vm4, %v5746_v34, %v5765_v31  ;;  %v7870_v0 = vld [vmem:[%s14617_s12 + $0x17f0] sm:$0xff]  ;;  %v7869_v34 = vld [vmem:[%s14617_s12 + $0x17e8] sm:$0xff] }
 0x601   : > { %9046 = vmatprep.subr.mxu0 %v7833_v52  ;;  %9010 = vmatpush3.msra.mxu1 %v7783_v38  ;;  %v8648_v42 = vadd.f32 %v8647_v47, %v8646_v54  ;;  %v7808_v52 = vld [vmem:[%s14617_s12 + $0x1600] sm:$0xff]  ;;  %v5607_v38 = vld [vmem:[#allocation2 + $0xa8] sm:$0x3]  ;;  %v5748_v54 = vrot.slane %v5602_v41, 6 }
 0x602   : > { %9047 = vmatpush3.msra.mxu0 %v7817_v25  ;;  %9011 = vmatprep.subr.mxu1 %v7798_v57  ;;  %v5779_v25 = vrot.slane %v5608_v8, 6  ;;  %v13566_v57 = vld [vmem:[#allocation2 + $0x88] sm:$0xff]  ;;  %v5777_v47 = vrot.slane %v5607_v38, 6  ;;  %v7884_v41 = vld [vmem:[%s14617_s12 + $0x1860] sm:$0xff] }
 0x603   : > { %9048 = vmatprep.subr.mxu0 %v7832_v45  ;;  %9012 = vmatpush3.msra.mxu1 %v7782_v28  ;;  %v13466_v37 = vadd.f32 %v8648_v42, %v8607_v21  ;;  %v7871_v21 = vld [vmem:[%s14617_s12 + $0x17f8] sm:$0xff]  ;;  %v5769_v45 = vrot.slane %v13566_v57, 6  ;;  %v5750_v28 = vsel %vm5741_vm4, %v5748_v54, %v5749_v13  ;;  %v5610_v42 = vld [vmem:[#allocation2 + $0xc0] sm:$0x3]  ;;  %v7865_v8 = vld [vmem:[%s14617_s12 + $0x17c8] sm:$0xff] }
 0x604   : > { %9049 = vmatpush3.msra.mxu0 %v7816_v29  ;;  %9013 = vmatprep.subr.mxu1 %v7797_v55  ;;  %v7853_v55 = vld [vmem:[%s14617_s12 + $0x1768] sm:$0xff]  ;;  %v5778_v27 = vsel %vm5741_vm4, %v13507_v50, %v5777_v47 }
 0x605   : > { %9050 = vmatprep.subr.mxu0 %v7831_v36  ;;  %9014 = vmatpush3.msra.mxu1 %v7781_v61  ;;  %v5780_v61 = vsel %vm5741_vm4, %v5765_v31, %v5779_v25  ;;  %v7850_v31 = vld [vmem:[%s14617_s12 + $0x1750] sm:$0xff]  ;;  %v7848_v25 = vld [vmem:[%s14617_s12 + $0x1740] sm:$0xff] }
 0x606   : > { %9051 = vmatpush3.msra.mxu0 %v7815_v6  ;;  %9015 = vmatprep.subr.mxu1 %v7796_v35  ;;  %v7887_v6 = vld [vmem:[%s14617_s12 + $0x1878] sm:$0xff]  ;;  %v7868_v35 = vld [vmem:[%s14617_s12 + $0x17e0] sm:$0xff] }
 0x607   : > { %9052 = vmatprep.subr.mxu0 %v7830_v16  ;;  %9016 = vmatpush3.msra.mxu1 %v7780_v63  ;;  %v5770_v16 = vsel %vm5741_vm4, %v5752_v59, %v5769_v45  ;;  %v7852_v63 = vld [vmem:[%s14617_s12 + $0x1760] sm:$0xff]  ;;  %v5783_v59 = vrot.slane %v5610_v42, 6 }
 0x608   : > { %9053 = vmatpush3.msra.mxu0 %v7814_v4  ;;  %9017 = vmatprep.subr.mxu1 %v7795_v9  ;;  %v13588_v4 = vld [vmem:[#allocation2 + $0x80] sm:$0xff] }
 0x609   : > { %9054 = vmatprep.subr.mxu0 %v7829_v15  ;;  %9018 = vmatpush3.msra.mxu1 %v7779_v60  ;;  %v5767_v9 = vrot.slane %v13588_v4, 6  ;;  %v7880_v42 = vld [vmem:[%s14617_s12 + $0x1840] sm:$0xff] }
 0x60a   : > { %9055 = vmatpush3.msra.mxu0 %v7813_v17  ;;  %9019 = vmatprep.subr.mxu1 %v7794_v10  ;;  %v5605_v17 = vld [vmem:[#allocation2 + $0x28] sm:$0xc0] }
 0x60b   : > { %9056 = vmatprep.subr.mxu0 %v7828_v30  ;;  %9020 = vmatpush3.msra.mxu1 %v7778_v7  ;;  %v7867_v30 = vld [vmem:[%s14617_s12 + $0x17d8] sm:$0xff] }
 0x60c   : > { %9057 = vmatpush3.msra.mxu0 %v7812_v53  ;;  %9021 = vmatprep.subr.mxu1 %v7793_v33  ;;  %v5609_v33 = vld [vmem:[#allocation2 + $0xb8] sm:$0x3] }
 0x60d   : > { %9058 = vmatprep.subr.mxu0 %v7827_v24  ;;  %9022 = vmatpush3.msra.mxu1 %v7777_v32  ;;  %v5768_v24 = vsel %vm5741_vm4, %v5749_v13, %v5767_v9  ;;  %v7851_v32 = vld [vmem:[%s14617_s12 + $0x1758] sm:$0xff] }
 0x60e   : > { %9059 = vmatpush3.msra.mxu0 %v7811_v44  ;;  %9023 = vmatprep.subr.mxu1 %v7792_v43  ;;  %v5757_v44 = vrot.slane %v5605_v17, 6  ;;  %v7876_v17 = vld [vmem:[%s14617_s12 + $0x1820] sm:$0xff] }
 0x60f   : > { %9060 = vmatprep.subr.mxu0 %v7826_v3  ;;  %9024 = vmatpush3.msra.mxu1 %v7776_v58  ;;  %v5784_v58 = vsel %vm5741_vm4, %v5769_v45, %v5783_v59  ;;  %v7847_v45 = vld [vmem:[%s14617_s12 + $0x1738] sm:$0xff]  ;;  %v7842_v59 = vld [vmem:[%s14617_s12 + $0x1710] sm:$0xff] }
 0x610   : > { %9061 = vmatpush3.msra.mxu0 %v7810_v1  ;;  %5877 = vmatmul.mubr.f32.vlgmr.msra.gmra.mxu1 %v5744_v20  ;;  %v7885_v1 = vld [vmem:[%s14617_s12 + $0x1868] sm:$0xff]  ;;  %v7866_v20 = vld [vmem:[%s14617_s12 + $0x17d0] sm:$0xff] }
 0x611   : > { %9062 = vmatprep.subr.mxu0 %v7825_v2  ;;  %9075 = vmatprep.subr.mxu1 %v7871_v21  ;;  %v5781_v2 = vrot.slane %v5609_v33, 6  ;;  %v7856_v33 = vld [vmem:[%s14617_s12 + $0x1780] sm:$0xff] }
 0x612   : > { %5881 = vmatprep.mubr.f32.mxu1 %v5766_v39  ;;  %9063 = vmatpush3.msra.mxu0 %v7809_v22  ;;  %v8681_v11 = vpop.f32.mrf.mxu1  ;;  %v7883_v39 = vld [vmem:[%s14617_s12 + $0x1858] sm:$0xff] }
 0x613   : > { %9076 = vmatpush3.msra.mxu1 %v7855_v12  ;;  %9064 = vmatprep.subr.mxu0 %v7824_v18  ;;  %v5782_v38 = vsel %vm5741_vm4, %v5767_v9, %v5781_v2  ;;  %v7878_v9 = vld [vmem:[%s14617_s12 + $0x1830] sm:$0xff]  ;;  %v7903_v2 = vld [vmem:[%s14617_s12 + $0x18f8] sm:$0xff] }
 0x614   : > { %9077 = vmatprep.subr.mxu1 %v7870_v0  ;;  %9065 = vmatpush3.msra.mxu0 %v7808_v52  ;;  %v8682_v29 = vpop.f32.mrf.mxu1 }
 0x615   : > { %9078 = vmatpush3.msra.mxu1 %v7854_v46  ;;  %5957 = vmatmul.mubr.f32.vlgmr.msra.gmra.mxu0 %v5750_v28  ;;  %v8683_v36 = vadd.f32 %v8682_v29, %v8681_v11  ;;  %v7864_v46 = vld [vmem:[%s14617_s12 + $0x17c0] sm:$0xff]  ;;  %v7882_v11 = vld [vmem:[%s14617_s12 + $0x1850] sm:$0xff]  ;;  %v7881_v28 = vld [vmem:[%s14617_s12 + $0x1848] sm:$0xff] }
 0x616   : > { %5882 = vmatmul.mubr.f32.gmra.mxu1 %v13507_v50  ;;  %9079 = vmatprep.subr.mxu1 %v7869_v34 }
 0x617   : > { %9709 = vmatprep.subr.mxu0 %v13504_v19  ;;  %5886 = vmatprep.mubr.f32.mxu1 %v5780_v61  ;;  %v4421_v15 = vadd.f32 %v8683_v36, %v13382_v5  ;;  %v4500_v60 = vpop.f32.mrf.mxu0  ;;  %v5758_v5 = vrot.slane %v13145_v14, 6  ;;  %v7861_v61 = vld [vmem:[%s14617_s12 + $0x17a8] sm:$0xff]  ;;  %v7902_v14 = vld [vmem:[%s14617_s12 + $0x18f0] sm:$0xff] }
 0x618   : > { %5961 = vmatprep.mubr.f32.mxu0 %v5770_v16  ;;  %9080 = vmatpush3.msra.mxu1 %v7853_v55  ;;  %v8684_v10 = vpop.f32.mrf.mxu1  ;;  %v7846_v55 = vld [vmem:[%s14617_s12 + $0x1730] sm:$0xff]  ;;  %v7879_v16 = vld [vmem:[%s14617_s12 + $0x1838] sm:$0xff] }
 0x619   : > { %9710 = vmatpush3.msra.mxu0 %v7887_v6  ;;  %9081 = vmatprep.subr.mxu1 %v7868_v35  ;;  %v4501_v7 = vadd.f32 %v4500_v60, %v4421_v15  ;;  %v9620_v53 = vpop.f32.mrf.mxu0  ;;  %v7845_v35 = vld [vmem:[%s14617_s12 + $0x1728] sm:$0xff]  ;;  %v7859_v15 = vld [vmem:[%s14617_s12 + $0x1798] sm:$0xff] }
 0x61a   : > { %9711 = vmatprep.subr.mxu0 %v13504_v19  ;;  %9082 = vmatpush3.msra.mxu1 %v7852_v63  ;;  %v8685_v49 = vpop.f32.mrf.mxu1  ;;  %v7860_v63 = vld [vmem:[%s14617_s12 + $0x17a0] sm:$0xff]  ;;  %v7843_v60 = vld [vmem:[%s14617_s12 + $0x1718] sm:$0xff] }
 0x61b   : > { %9712 = vmatpush3.msra.mxu0 %v7886_v51  ;;  %5887 = vmatmul.mubr.f32.gmra.mxu1 %v5778_v27  ;;  %v8686_v43 = vadd.f32 %v8685_v49, %v8684_v10  ;;  %v13607_v3 = vadd.f32 %v4501_v7, %v13171_v56  ;;  %v5759_v56 = vsel %vm5741_vm4, %v5757_v44, %v5758_v5  ;;  %v7877_v51 = vld [vmem:[%s14617_s12 + $0x1828] sm:$0xff]  ;;  %v7858_v27 = vld [vmem:[%s14617_s12 + $0x1790] sm:$0xff]  ;;  %v7875_v7 = vld [vmem:[%s14617_s12 + $0x1818] sm:$0xff]  ;;  %v5755_v49 = vrot.slane %v13279_v23, 6 }
 0x61c   : > { %5962 = vmatmul.mubr.f32.gmra.mxu0 %v5768_v24  ;;  %9083 = vmatprep.subr.mxu1 %v7867_v30  ;;  %v7857_v10 = vld [vmem:[%s14617_s12 + $0x1788] sm:$0xff]  ;;  %v5604_v53 = vld [vmem:[#allocation2 + $0x20] sm:$0xc0]  ;;  %v5606_v24 = vld [vmem:[#allocation2 + $0x30] sm:$0xc0] }
 0x61d   : > { %9713 = vmatprep.subr.mxu0 %v13504_v19  ;;  %5966 = vmatprep.mubr.f32.mxu0 %v5784_v58  ;;  %v8687_v21 = vpop.f32.mrf.mxu1  ;;  %v4426_v22 = vadd.f32 %v8686_v43, %v13428_v40  ;;  %v7849_v40 = vld [vmem:[%s14617_s12 + $0x1748] sm:$0xff]  ;;  %v7874_v44 = vld [vmem:[%s14617_s12 + $0x1810] sm:$0xff]  ;;  %v13736_v43 = vld [vmem:[#allocation2 + $0x98] sm:$0xff] }
 0x61e   : > { %9084 = vmatpush3.msra.mxu1 %v7851_v32  ;;  %6036 = vmatprep.mubr.f32.mxu1 %v5759_v56  ;;  %v4505_v12 = vpop.f32.mrf.mxu0  ;;  %v7841_v30 = vld [vmem:[%s14617_s12 + $0x1708] sm:$0xff]  ;;  %v7840_v32 = vld [vmem:[%s14617_s12 + $0x1700] sm:$0xff]  ;;  %v5773_v58 = vrot.slane %v13736_v43, 6  ;;  %v7919_v23 = vld [vmem:[%s14617_s12 + $0x1978] sm:$0xff] }
 0x61f   : > { %9714 = vmatpush3.msra.mxu0 %v7885_v1  ;;  %9085 = vmatprep.subr.mxu1 %v7866_v20  ;;  %v8688_v18 = vpop.f32.mrf.mxu1  ;;  %v4506_v13 = vadd.f32 %v4505_v12, %v4426_v22  ;;  %v5754_v1 = vrot.slane %v5604_v53, 6  ;;  %v5760_v20 = vrot.slane %v5606_v24, 6  ;;  %v13760_v12 = vld [vmem:[#allocation2 + $0x90] sm:$0xff]  ;;  %v7948_v53 = vld [vmem:[%s14617_s12 + $0x1a60] sm:$0xff] }
 0x620   : > { %9715 = vmatprep.subr.mxu0 %v13504_v19  ;;  %9086 = vmatpush3.msra.mxu1 %v7850_v31  ;;  %v8689_v0 = vadd.f32 %v8688_v18, %v8687_v21  ;;  %v9623_v52 = vpop.f32.mrf.mxu0  ;;  %v7873_v31 = vld [vmem:[%s14617_s12 + $0x1808] sm:$0xff]  ;;  %v5612_v21 = vld [vmem:[#allocation2 + $0xd0] sm:$0x3]  ;;  %v5774_v22 = vsel %vm5741_vm4, %v5758_v5, %v5773_v58  ;;  %v5771_v18 = vrot.slane %v13760_v12, 6 }
 0x621   : > { %9716 = vmatpush3.msra.mxu0 %v7884_v41  ;;  %9087 = vmatprep.subr.mxu1 %v7865_v8  ;;  %v13642_v54 = vadd.f32 %v4506_v13, %v13206_v26  ;;  %v7863_v26 = vld [vmem:[%s14617_s12 + $0x17b8] sm:$0xff]  ;;  %v5756_v56 = vsel %vm5741_vm4, %v5754_v1, %v5755_v49  ;;  %v7918_v41 = vld [vmem:[%s14617_s12 + $0x1970] sm:$0xff]  ;;  %v7872_v8 = vld [vmem:[%s14617_s12 + $0x1800] sm:$0xff]  ;;  %v5762_v5 = vsel %vm5741_vm4, %v5760_v20, %v13507_v50  ;;  %v5787_v13 = vrot.slane %v5612_v21, 6 }
 0x622   : > { %5967 = vmatmul.mubr.f32.gmra.mxu0 %v5782_v38  ;;  %9717 = vmatprep.subr.mxu0 %v13504_v19  ;;  %v4431_v34 = vadd.f32 %v8689_v0, %v13466_v37  ;;  %v7862_v37 = vld [vmem:[%s14617_s12 + $0x17b0] sm:$0xff]  ;;  %v5611_v0 = vld [vmem:[#allocation2 + $0xc8] sm:$0x3]  ;;  %v7951_v52 = vld [vmem:[%s14617_s12 + $0x1a78] sm:$0xff] }
 0x623   : > { %9088 = vmatpush3.msra.mxu1 %v7849_v40  ;;  %9718 = vmatpush3.msra.mxu0 %v7883_v39  ;;  %v7917_v39 = vld [vmem:[%s14617_s12 + $0x1968] sm:$0xff]  ;;  %v7898_v24 = vld [vmem:[%s14617_s12 + $0x18d0] sm:$0xff]  ;;  %v6138_v1 = vld [vmem:[#allocation2 + $0x18] sm:$0x80] }
 0x624   : > { %9089 = vmatprep.subr.mxu1 %v7864_v46  ;;  %9719 = vmatprep.subr.mxu0 %v13504_v19  ;;  %v4510_v47 = vpop.f32.mrf.mxu0  ;;  %v5772_v46 = vsel %vm5741_vm4, %v5755_v49, %v5771_v18 }
 0x625   : > { %9090 = vmatpush3.msra.mxu1 %v7848_v25  ;;  %9720 = vmatpush3.msra.mxu0 %v7882_v11  ;;  %v4511_v29 = vadd.f32 %v4510_v47, %v4431_v34  ;;  %v7901_v25 = vld [vmem:[%s14617_s12 + $0x18e8] sm:$0xff]  ;;  %v7935_v11 = vld [vmem:[%s14617_s12 + $0x19f8] sm:$0xff]  ;;  %v5785_v47 = vrot.slane %v5611_v0, 6  ;;  %v7930_v0 = vld [vmem:[%s14617_s12 + $0x19d0] sm:$0xff] }
 0x626   : > { %9091 = vmatprep.subr.mxu1 %v7863_v26  ;;  %9721 = vmatprep.subr.mxu0 %v13504_v19  ;;  %v9626_v36 = vpop.f32.mrf.mxu0  ;;  %v5788_v26 = vsel %vm5741_vm4, %v5773_v58, %v5787_v13  ;;  %v7913_v58 = vld [vmem:[%s14617_s12 + $0x1948] sm:$0xff]  ;;  %v7946_v13 = vld [vmem:[%s14617_s12 + $0x1a50] sm:$0xff] }
 0x627   : > { %9092 = vmatpush3.msra.mxu1 %v7847_v45  ;;  %9722 = vmatpush3.msra.mxu0 %v7881_v28  ;;  %v13676_v6 = vadd.f32 %v4511_v29, %v13240_v62  ;;  %v7844_v62 = vld [vmem:[%s14617_s12 + $0x1720] sm:$0xff]  ;;  %v7950_v28 = vld [vmem:[%s14617_s12 + $0x1a70] sm:$0xff]  ;;  %v5613_v36 = vld [vmem:[#allocation2 + $0xd8] sm:$0x3] }
 0x628   : > { %9093 = vmatprep.subr.mxu1 %v7862_v37  ;;  %9723 = vmatprep.subr.mxu0 %v13504_v19  ;;  %v7916_v45 = vld [vmem:[%s14617_s12 + $0x1960] sm:$0xff] }
 0x629   : > { %9094 = vmatpush3.msra.mxu1 %v7846_v55  ;;  %9724 = vmatpush3.msra.mxu0 %v7880_v42  ;;  %v7900_v37 = vld [vmem:[%s14617_s12 + $0x18e0] sm:$0xff]  ;;  %v7934_v55 = vld [vmem:[%s14617_s12 + $0x19f0] sm:$0xff]  ;;  %v6136_v42 = vld [vmem:[#allocation2 + $0x8] sm:$0x80] }
 0x62a   : > { %9095 = vmatprep.subr.mxu1 %v7861_v61  ;;  %9725 = vmatprep.subr.mxu0 %v13504_v19 }
 0x62b   : > { %9096 = vmatpush3.msra.mxu1 %v7845_v35  ;;  %9726 = vmatpush3.msra.mxu0 %v7879_v16  ;;  %v7915_v35 = vld [vmem:[%s14617_s12 + $0x1958] sm:$0xff]  ;;  %v13800_v16 = vld [vmem:[#allocation2 + $0x40] sm:$0xff] }
 0x62c   : > { %9097 = vmatprep.subr.mxu1 %v7860_v63  ;;  %9727 = vmatprep.subr.mxu0 %v13504_v19  ;;  %v6281_v63 = vrot.slane %v13800_v16, 7 }
 0x62d   : > { %9098 = vmatpush3.msra.mxu1 %v7844_v62  ;;  %9728 = vmatpush3.msra.mxu0 %v7878_v9  ;;  %v5786_v9 = vsel %vm5741_vm4, %v5771_v18, %v5785_v47  ;;  %v6286_v18 = vrot.slane %v6138_v1, 7  ;;  %v7889_v1 = vld [vmem:[%s14617_s12 + $0x1888] sm:$0xff] }
 0x62e   : > { %9099 = vmatprep.subr.mxu1 %v7859_v15  ;;  %9729 = vmatprep.subr.mxu0 %v13504_v19  ;;  %v7949_v15 = vld [vmem:[%s14617_s12 + $0x1a68] sm:$0xff] }
 0x62f   : > { %9100 = vmatpush3.msra.mxu1 %v7843_v60  ;;  %9730 = vmatpush3.msra.mxu0 %v7877_v51  ;;  %v7899_v60 = vld [vmem:[%s14617_s12 + $0x18d8] sm:$0xff] }
 0x630   : > { %9101 = vmatprep.subr.mxu1 %v7858_v27  ;;  %9731 = vmatprep.subr.mxu0 %v13504_v19 }
 0x631   : > { %9102 = vmatpush3.msra.mxu1 %v7842_v59  ;;  %9732 = vmatpush3.msra.mxu0 %v7876_v17  ;;  %v6280_v59 = vrot.slane %v6136_v42, 7  ;;  %v7933_v17 = vld [vmem:[%s14617_s12 + $0x19e8] sm:$0xff]  ;;  %v7943_v42 = vld [vmem:[%s14617_s12 + $0x1a38] sm:$0xff] }
 0x632   : > { %9103 = vmatprep.subr.mxu1 %v7857_v10  ;;  %9733 = vmatprep.subr.mxu0 %v13504_v19  ;;  %v5789_v10 = vrot.slane %v5613_v36, 6  ;;  %v7893_v36 = vld [vmem:[%s14617_s12 + $0x18a8] sm:$0xff] }
 0x633   : > { %9104 = vmatpush3.msra.mxu1 %v7841_v30  ;;  %9734 = vmatpush3.msra.mxu0 %v7875_v7  ;;  %v7914_v7 = vld [vmem:[%s14617_s12 + $0x1950] sm:$0xff]  ;;  %v6282_v49 = vsel %vm6276_vm5, %v6280_v59, %v6281_v63  ;;  %v7891_v59 = vld [vmem:[%s14617_s12 + $0x1898] sm:$0xff] }
 0x634   : > { %9105 = vmatprep.subr.mxu1 %v7856_v33  ;;  %9735 = vmatprep.subr.mxu0 %v13504_v19  ;;  %v5790_v20 = vsel %vm5741_vm4, %v13507_v50, %v5789_v10  ;;  %v7925_v10 = vld [vmem:[%s14617_s12 + $0x19a8] sm:$0xff] }
 0x635   : > { %9106 = vmatpush3.msra.mxu1 %v7840_v32  ;;  %9736 = vmatpush3.msra.mxu0 %v7874_v44  ;;  %v7932_v44 = vld [vmem:[%s14617_s12 + $0x19e0] sm:$0xff] }
 0x636   : > { %6037 = vmatmul.mubr.f32.vlgmr.msra.gmra.mxu1 %v5756_v56  ;;  %9737 = vmatprep.subr.mxu0 %v13504_v19  ;;  %v7947_v56 = vld [vmem:[%s14617_s12 + $0x1a58] sm:$0xff] }
 0x637   : > { %9135 = vmatprep.subr.mxu1 %v7919_v23  ;;  %6041 = vmatprep.mubr.f32.mxu1 %v5774_v22  ;;  %v7897_v22 = vld [vmem:[%s14617_s12 + $0x18c8] sm:$0xff] }
 0x638   : > { %9738 = vmatpush3.msra.mxu0 %v7873_v31  ;;  %9136 = vmatpush3.msra.mxu1 %v7903_v2  ;;  %v8741_v40 = vpop.f32.mrf.mxu1  ;;  %v13841_v31 = vld [vmem:[#allocation2 + $0x50] sm:$0xff] }
 0x639   : > { %9739 = vmatprep.subr.mxu0 %v13504_v19  ;;  %9137 = vmatprep.subr.mxu1 %v7918_v41  ;;  %v6287_v2 = vrot.slane %v13841_v31, 7 }
 0x63a   : > { %9740 = vmatpush3.msra.mxu0 %v7872_v8  ;;  %9741 = vmatprep.mubr.msk.f32.mxu0 %vm9900_vm2, %v13504_v19  ;;  %v8742_v38 = vpop.f32.mrf.mxu1 }
 0x63b   : > { %9138 = vmatpush3.msra.mxu1 %v7902_v14  ;;  %9742 = vmatmul.mubr.f32.vlgmr.msra.gmra.mxu0 %v5762_v5  ;;  %v8743_v34 = vadd.f32 %v8742_v38, %v8741_v40  ;;  %v7912_v14 = vld [vmem:[%s14617_s12 + $0x1940] sm:$0xff] }
 0x63c   : > { %6042 = vmatmul.mubr.f32.gmra.mxu1 %v5772_v46  ;;  %9139 = vmatprep.subr.mxu1 %v7917_v39  ;;  %v7896_v40 = vld [vmem:[%s14617_s12 + $0x18c0] sm:$0xff]  ;;  %v6288_v39 = vsel %vm6276_vm5, %v6286_v18, %v6287_v2  ;;  %v7945_v46 = vld [vmem:[%s14617_s12 + $0x1a48] sm:$0xff]  ;;  %v7983_v18 = vld [vmem:[%s14617_s12 + $0x1b78] sm:$0xff] }
 0x63d   : > { %9176 = vmatprep.subr.mxu0 %v7951_v52  ;;  %6046 = vmatprep.mubr.f32.mxu1 %v5788_v26  ;;  %v8782_v29 = vpop.f32.mrf.mxu0  ;;  %v7911_v52 = vld [vmem:[%s14617_s12 + $0x1938] sm:$0xff]  ;;  %v7910_v26 = vld [vmem:[%s14617_s12 + $0x1930] sm:$0xff] }
 0x63e   : > { %9140 = vmatpush3.msra.mxu1 %v7901_v25  ;;  %9177 = vmatpush3.msra.mxu0 %v7935_v11  ;;  %v8744_v61 = vpop.f32.mrf.mxu1  ;;  %v7895_v25 = vld [vmem:[%s14617_s12 + $0x18b8] sm:$0xff] }
 0x63f   : > { %9141 = vmatprep.subr.mxu1 %v7916_v45  ;;  %9178 = vmatprep.subr.mxu0 %v7950_v28  ;;  %v8783_v62 = vpop.f32.mrf.mxu0  ;;  %v7944_v45 = vld [vmem:[%s14617_s12 + $0x1a40] sm:$0xff]  ;;  %v7894_v28 = vld [vmem:[%s14617_s12 + $0x18b0] sm:$0xff] }
 0x640   : > { %9744 = vmatprep.mubr.msk.f32.mxu0 %vm9900_vm2, %v13504_v19  ;;  %9142 = vmatpush3.msra.mxu1 %v7900_v37  ;;  %v8784_v51 = vadd.f32 %v8783_v62, %v8782_v29  ;;  %v8745_v27 = vpop.f32.mrf.mxu1  ;;  %v7928_v37 = vld [vmem:[%s14617_s12 + $0x19c0] sm:$0xff]  ;;  %v7909_v29 = vld [vmem:[%s14617_s12 + $0x1928] sm:$0xff] }
 0x641   : > { %9179 = vmatpush3.msra.mxu0 %v7934_v55  ;;  %6047 = vmatmul.mubr.f32.gmra.mxu1 %v5786_v9  ;;  %v8746_v30 = vadd.f32 %v8745_v27, %v8744_v61  ;;  %v7927_v61 = vld [vmem:[%s14617_s12 + $0x19b8] sm:$0xff]  ;;  %v7942_v9 = vld [vmem:[%s14617_s12 + $0x1a30] sm:$0xff]  ;;  %v7941_v27 = vld [vmem:[%s14617_s12 + $0x1a28] sm:$0xff] }
 0x642   : > { %9745 = vmatmul.mubr.f32.gmra.mxu0 %v13507_v50  ;;  %9143 = vmatprep.subr.mxu1 %v7915_v35  ;;  %v13822_v33 = vadd.f32 %v8784_v51, %v8743_v34  ;;  %v7931_v50 = vld [vmem:[%s14617_s12 + $0x19d8] sm:$0xff]  ;;  %v7929_v34 = vld [vmem:[%s14617_s12 + $0x19c8] sm:$0xff]  ;;  %v7908_v35 = vld [vmem:[%s14617_s12 + $0x1920] sm:$0xff] }
 0x643   : > { %9180 = vmatprep.subr.mxu0 %v7949_v15  ;;  %9144 = vmatpush3.msra.mxu1 %v7899_v60  ;;  %v8747_v32 = vpop.f32.mrf.mxu1  ;;  %v7892_v15 = vld [vmem:[%s14617_s12 + $0x18a0] sm:$0xff]  ;;  %v7926_v60 = vld [vmem:[%s14617_s12 + $0x19b0] sm:$0xff]  ;;  %v7907_v51 = vld [vmem:[%s14617_s12 + $0x1918] sm:$0xff] }
 0x644   : > { %6411 = vmatprep.mubr.f32.mxu1 %v6282_v49  ;;  %9181 = vmatpush3.msra.mxu0 %v7933_v17  ;;  %v8785_v23 = vpop.f32.mrf.mxu0  ;;  %v6135_v17 = vld [vmem:[#allocation2] sm:$0x80] }
 0x645   : > { %9145 = vmatprep.subr.mxu1 %v7914_v7  ;;  %9182 = vmatprep.subr.mxu0 %v7948_v53  ;;  %v8748_v21 = vpop.f32.mrf.mxu1  ;;  %v7940_v7 = vld [vmem:[%s14617_s12 + $0x1a20] sm:$0xff]  ;;  %v7890_v53 = vld [vmem:[%s14617_s12 + $0x1890] sm:$0xff] }
 0x646   : > { %9747 = vmatprep.mubr.msk.f32.mxu0 %vm9900_vm2, %v13504_v19  ;;  %9146 = vmatpush3.msra.mxu1 %v7898_v24  ;;  %v8786_v41 = vpop.f32.mrf.mxu0  ;;  %v8749_v8 = vadd.f32 %v8748_v21, %v8747_v32  ;;  %v7924_v49 = vld [vmem:[%s14617_s12 + $0x19a0] sm:$0xff]  ;;  %v7905_v24 = vld [vmem:[%s14617_s12 + $0x1908] sm:$0xff]  ;;  %v6277_v32 = vrot.slane %v6135_v17, 7  ;;  %v7998_v17 = vld [vmem:[%s14617_s12 + $0x1bf0] sm:$0xff] }
 0x647   : > { %9183 = vmatpush3.msra.mxu0 %v7932_v44  ;;  %9147 = vmatprep.subr.mxu1 %v7913_v58  ;;  %v8787_v5 = vadd.f32 %v8786_v41, %v8785_v23  ;;  %v13947_v44 = vrot.slane %v13504_v19, 7  ;;  %v7939_v58 = vld [vmem:[%s14617_s12 + $0x1a18] sm:$0xff]  ;;  %v7888_v21 = vld [vmem:[%s14617_s12 + $0x1880] sm:$0xff]  ;;  %v6300_v41 = vrot.slane %v13532_v48, 7 }
 0x648   : > { %9748 = vmatmul.mubr.f32.gmra.mxu0 %v5790_v20  ;;  %9184 = vmatprep.subr.mxu0 %v7947_v56  ;;  %v7923_v23 = vld [vmem:[%s14617_s12 + $0x1998] sm:$0xff]  ;;  %v7904_v20 = vld [vmem:[%s14617_s12 + $0x1900] sm:$0xff]  ;;  %v7938_v56 = vld [vmem:[%s14617_s12 + $0x1a10] sm:$0xff] }
 0x649   : > { %9148 = vmatpush3.msra.mxu1 %v7897_v22  ;;  %9185 = vmatpush3.msra.mxu0 %v7931_v50  ;;  %v13870_v38 = vadd.f32 %v8787_v5, %v8746_v30  ;;  %v7906_v30 = vld [vmem:[%s14617_s12 + $0x1910] sm:$0xff]  ;;  %v6279_v50 = vsel %vm6276_vm5, %v6277_v32, %v13947_v44  ;;  %v7967_v48 = vld [vmem:[%s14617_s12 + $0x1af8] sm:$0xff] }
 0x64a   : > { %6491 = vmatprep.mubr.f32.mxu0 %v6288_v39  ;;  %9149 = vmatprep.subr.mxu1 %v7912_v14  ;;  %v8788_v11 = vpop.f32.mrf.mxu0  ;;  %v7922_v22 = vld [vmem:[%s14617_s12 + $0x1990] sm:$0xff]  ;;  %v7921_v14 = vld [vmem:[%s14617_s12 + $0x1988] sm:$0xff]  ;;  %v6144_v32 = vld [vmem:[#allocation2 + $0xb8] sm:$0x7] }
 0x64b   : > { %9186 = vmatprep.subr.mxu0 %v7946_v13  ;;  %9150 = vmatpush3.msra.mxu1 %v7896_v40  ;;  %v6137_v5 = vld [vmem:[#allocation2 + $0x10] sm:$0x80]  ;;  %v6143_v13 = vld [vmem:[#allocation2 + $0xb0] sm:$0x7]  ;;  %v7936_v40 = vld [vmem:[%s14617_s12 + $0x1a00] sm:$0xff] }
 0x64c   : > { %9187 = vmatpush3.msra.mxu0 %v7930_v0  ;;  %9151 = vmatprep.subr.mxu1 %v7911_v52  ;;  %v8789_v47 = vpop.f32.mrf.mxu0  ;;  %v13988_v39 = vld [vmem:[#allocation2 + $0x48] sm:$0xff]  ;;  %v6301_v52 = vsel %vm6276_vm5, %v6281_v63, %v6300_v41 }
 0x64d   : > { %9188 = vmatprep.subr.mxu0 %v7945_v46  ;;  %9152 = vmatpush3.msra.mxu1 %v7895_v25  ;;  %v8790_v55 = vadd.f32 %v8789_v47, %v8788_v11  ;;  %v6284_v0 = vrot.slane %v13988_v39, 7  ;;  %v7982_v46 = vld [vmem:[%s14617_s12 + $0x1b70] sm:$0xff]  ;;  %v7920_v25 = vld [vmem:[%s14617_s12 + $0x1980] sm:$0xff]  ;;  %v6142_v11 = vld [vmem:[#allocation2 + $0xa8] sm:$0x7]  ;;  %v6304_v47 = vrot.slane %v13566_v57, 7 }
 0x64e   : > { %9189 = vmatpush3.msra.mxu0 %v7929_v34  ;;  %9153 = vmatprep.subr.mxu1 %v7910_v26  ;;  %v7966_v34 = vld [vmem:[%s14617_s12 + $0x1af0] sm:$0xff]  ;;  %v6283_v26 = vrot.slane %v6137_v5, 7  ;;  %v7981_v63 = vld [vmem:[%s14617_s12 + $0x1b68] sm:$0xff]  ;;  %v7999_v57 = vld [vmem:[%s14617_s12 + $0x1bf8] sm:$0xff] }
 0x64f   : > { %9190 = vmatprep.subr.mxu0 %v7944_v45  ;;  %9154 = vmatpush3.msra.mxu1 %v7894_v28  ;;  %v13908_v62 = vadd.f32 %v8790_v55, %v8749_v8  ;;  %v7937_v8 = vld [vmem:[%s14617_s12 + $0x1a08] sm:$0xff]  ;;  %v6314_v45 = vrot.slane %v6143_v13, 7  ;;  %v7996_v13 = vld [vmem:[%s14617_s12 + $0x1be0] sm:$0xff] }
 0x650   : > { %9191 = vmatpush3.msra.mxu0 %v7928_v37  ;;  %9155 = vmatprep.subr.mxu1 %v7909_v29  ;;  %v6285_v37 = vsel %vm6276_vm5, %v6283_v26, %v6284_v0  ;;  %v6312_v29 = vrot.slane %v6142_v11, 7  ;;  %v7976_v26 = vld [vmem:[%s14617_s12 + $0x1b40] sm:$0xff] }
 0x651   : > { %9192 = vmatprep.subr.mxu0 %v7943_v42  ;;  %9156 = vmatpush3.msra.mxu1 %v7893_v36  ;;  %v7965_v42 = vld [vmem:[%s14617_s12 + $0x1ae8] sm:$0xff]  ;;  %v6145_v36 = vld [vmem:[#allocation2 + $0xc0] sm:$0x7] }
 0x652   : > { %9193 = vmatpush3.msra.mxu0 %v7927_v61  ;;  %9157 = vmatprep.subr.mxu1 %v7908_v35  ;;  %v6315_v35 = vsel %vm6276_vm5, %v6300_v41, %v6314_v45  ;;  %v7978_v41 = vld [vmem:[%s14617_s12 + $0x1b50] sm:$0xff] }
 0x653   : > { %9194 = vmatprep.subr.mxu0 %v7942_v9  ;;  %9158 = vmatpush3.msra.mxu1 %v7892_v15  ;;  %v7980_v9 = vld [vmem:[%s14617_s12 + $0x1b60] sm:$0xff]  ;;  %v6305_v15 = vsel %vm6276_vm5, %v6287_v2, %v6304_v47  ;;  %v6140_v2 = vld [vmem:[#allocation2 + $0x28] sm:$0x80] }
 0x654   : > { %9195 = vmatpush3.msra.mxu0 %v7926_v60  ;;  %9159 = vmatprep.subr.mxu1 %v7907_v51  ;;  %v7964_v60 = vld [vmem:[%s14617_s12 + $0x1ae0] sm:$0xff]  ;;  %v6302_v51 = vrot.slane %v13588_v4, 7  ;;  %v7979_v4 = vld [vmem:[%s14617_s12 + $0x1b58] sm:$0xff] }
 0x655   : > { %9196 = vmatprep.subr.mxu0 %v7941_v27  ;;  %9160 = vmatpush3.msra.mxu1 %v7891_v59 }
 0x656   : > { %9197 = vmatpush3.msra.mxu0 %v7925_v10  ;;  %9161 = vmatprep.subr.mxu1 %v7906_v30  ;;  %v6313_v10 = vsel %vm6276_vm5, %v13947_v44, %v6312_v29  ;;  %v6318_v30 = vrot.slane %v6145_v36, 7  ;;  %v7993_v29 = vld [vmem:[%s14617_s12 + $0x1bc8] sm:$0xff]  ;;  %v14103_v36 = vld [vmem:[#allocation2] sm:$0xff] }
 0x657   : > { %9198 = vmatprep.subr.mxu0 %v7940_v7  ;;  %9162 = vmatpush3.msra.mxu1 %v7890_v53 }
 0x658   : > { %9199 = vmatpush3.msra.mxu0 %v7924_v49  ;;  %9163 = vmatprep.subr.mxu1 %v7905_v24 }
 0x659   : > { %9200 = vmatprep.subr.mxu0 %v7939_v58  ;;  %9164 = vmatpush3.msra.mxu1 %v7889_v1  ;;  %v6303_v1 = vsel %vm6276_vm5, %v6284_v0, %v6302_v51 }
 0x65a   : > { %9201 = vmatpush3.msra.mxu0 %v7923_v23  ;;  %9165 = vmatprep.subr.mxu1 %v7904_v20  ;;  %v7963_v23 = vld [vmem:[%s14617_s12 + $0x1ad8] sm:$0xff]  ;;  %v6292_v20 = vrot.slane %v6140_v2, 7  ;;  %v7954_v2 = vld [vmem:[%s14617_s12 + $0x1a90] sm:$0xff] }
 0x65b   : > { %9202 = vmatprep.subr.mxu0 %v7938_v56  ;;  %9166 = vmatpush3.msra.mxu1 %v7888_v21 }
 0x65c   : > { %9203 = vmatpush3.msra.mxu0 %v7922_v22  ;;  %6412 = vmatmul.mubr.f32.vlgmr.msra.gmra.mxu1 %v6279_v50  ;;  %v6319_v22 = vsel %vm6276_vm5, %v6304_v47, %v6318_v30  ;;  %v7997_v50 = vld [vmem:[%s14617_s12 + $0x1be8] sm:$0xff]  ;;  %v7970_v30 = vld [vmem:[%s14617_s12 + $0x1b10] sm:$0xff] }
 0x65d   : > { %9204 = vmatprep.subr.mxu0 %v7937_v8  ;;  %9217 = vmatprep.subr.mxu1 %v7983_v18  ;;  %v7962_v8 = vld [vmem:[%s14617_s12 + $0x1ad0] sm:$0xff]  ;;  %v6316_v18 = vrot.slane %v6144_v32, 7  ;;  %v6139_v32 = vld [vmem:[#allocation2 + $0x20] sm:$0x80] }
 0x65e   : > { %6416 = vmatprep.mubr.f32.mxu1 %v6301_v52  ;;  %9205 = vmatpush3.msra.mxu0 %v7921_v14  ;;  %v8823_v28 = vpop.f32.mrf.mxu1 }
 0x65f   : > { %9218 = vmatpush3.msra.mxu1 %v7967_v48  ;;  %9206 = vmatprep.subr.mxu0 %v7936_v40  ;;  %v7977_v48 = vld [vmem:[%s14617_s12 + $0x1b48] sm:$0xff] }
 0x660   : > { %9219 = vmatprep.subr.mxu1 %v7982_v46  ;;  %9207 = vmatpush3.msra.mxu0 %v7920_v25  ;;  %v8824_v55 = vpop.f32.mrf.mxu1  ;;  %v7995_v46 = vld [vmem:[%s14617_s12 + $0x1bd8] sm:$0xff] }
 0x661   : > { %9220 = vmatpush3.msra.mxu1 %v7966_v34  ;;  %6492 = vmatmul.mubr.f32.vlgmr.msra.gmra.mxu0 %v6285_v37  ;;  %v8825_v61 = vadd.f32 %v8824_v55, %v8823_v28  ;;  %v6317_v34 = vsel %vm6276_vm5, %v6302_v51, %v6316_v18  ;;  %v7960_v28 = vld [vmem:[%s14617_s12 + $0x1ac0] sm:$0xff]  ;;  %v7959_v37 = vld [vmem:[%s14617_s12 + $0x1ab8] sm:$0xff] }
 0x662   : > { %6417 = vmatmul.mubr.f32.gmra.mxu1 %v13947_v44  ;;  %9221 = vmatprep.subr.mxu1 %v7981_v63  ;;  %v7994_v63 = vld [vmem:[%s14617_s12 + $0x1bd0] sm:$0xff]  ;;  %v7972_v51 = vld [vmem:[%s14617_s12 + $0x1b20] sm:$0xff] }
 0x663   : > { %9750 = vmatprep.subr.mxu0 %v13504_v19  ;;  %6421 = vmatprep.mubr.f32.mxu1 %v6315_v35  ;;  %v4941_v27 = vadd.f32 %v8825_v61, %v13822_v33  ;;  %v5020_v59 = vpop.f32.mrf.mxu0  ;;  %v14036_v33 = vld [vmem:[#allocation2 + $0x60] sm:$0xff] }
 0x664   : > { %6496 = vmatprep.mubr.f32.mxu0 %v6305_v15  ;;  %9222 = vmatpush3.msra.mxu1 %v7965_v42  ;;  %v8826_v7 = vpop.f32.mrf.mxu1  ;;  %v6293_v53 = vrot.slane %v14036_v33, 7  ;;  %v7992_v61 = vld [vmem:[%s14617_s12 + $0x1bc0] sm:$0xff]  ;;  %v7957_v15 = vld [vmem:[%s14617_s12 + $0x1aa8] sm:$0xff] }
 0x665   : > { %9751 = vmatpush3.msra.mxu0 %v7999_v57  ;;  %9223 = vmatprep.subr.mxu1 %v7980_v9  ;;  %v5021_v49 = vadd.f32 %v5020_v59, %v4941_v27  ;;  %v9661_v24 = vpop.f32.mrf.mxu0  ;;  %v7973_v57 = vld [vmem:[%s14617_s12 + $0x1b28] sm:$0xff]  ;;  %v7990_v27 = vld [vmem:[%s14617_s12 + $0x1bb0] sm:$0xff]  ;;  %v7971_v59 = vld [vmem:[%s14617_s12 + $0x1b18] sm:$0xff] }
 0x666   : > { %9752 = vmatprep.subr.mxu0 %v13504_v19  ;;  %9224 = vmatpush3.msra.mxu1 %v7964_v60  ;;  %v8827_v58 = vpop.f32.mrf.mxu1  ;;  %v7991_v60 = vld [vmem:[%s14617_s12 + $0x1bb8] sm:$0xff] }
 0x667   : > { %9753 = vmatpush3.msra.mxu0 %v7998_v17  ;;  %6422 = vmatmul.mubr.f32.gmra.mxu1 %v6313_v10  ;;  %v8828_v56 = vadd.f32 %v8827_v58, %v8826_v7  ;;  %v14045_v21 = vadd.f32 %v5021_v49, %v13607_v3  ;;  %v6294_v3 = vsel %vm6276_vm5, %v6292_v20, %v6293_v53  ;;  %v7955_v17 = vld [vmem:[%s14617_s12 + $0x1a98] sm:$0xff]  ;;  %v7989_v10 = vld [vmem:[%s14617_s12 + $0x1ba8] sm:$0xff]  ;;  %v7988_v7 = vld [vmem:[%s14617_s12 + $0x1ba0] sm:$0xff] }
 0x668   : > { %6497 = vmatmul.mubr.f32.gmra.mxu0 %v6303_v1  ;;  %9225 = vmatprep.subr.mxu1 %v7979_v4  ;;  %v7969_v4 = vld [vmem:[%s14617_s12 + $0x1b08] sm:$0xff]  ;;  %v7987_v24 = vld [vmem:[%s14617_s12 + $0x1b98] sm:$0xff]  ;;  %v7968_v58 = vld [vmem:[%s14617_s12 + $0x1b00] sm:$0xff] }
 0x669   : > { %9754 = vmatprep.subr.mxu0 %v13504_v19  ;;  %6501 = vmatprep.mubr.f32.mxu0 %v6319_v22  ;;  %v8829_v14 = vpop.f32.mrf.mxu1  ;;  %v4946_v5 = vadd.f32 %v8828_v56, %v13870_v38  ;;  %v7961_v38 = vld [vmem:[%s14617_s12 + $0x1ac8] sm:$0xff]  ;;  %v14168_v1 = vld [vmem:[#allocation2 + $0x58] sm:$0xff]  ;;  %v6141_v20 = vld [vmem:[#allocation2 + $0x30] sm:$0x80] }
 0x66a   : > { %9226 = vmatpush3.msra.mxu1 %v7963_v23  ;;  %6571 = vmatprep.mubr.f32.mxu1 %v6294_v3  ;;  %v5025_v40 = vpop.f32.mrf.mxu0  ;;  %v7953_v49 = vld [vmem:[%s14617_s12 + $0x1a88] sm:$0xff]  ;;  %v6290_v23 = vrot.slane %v14168_v1, 7  ;;  %v7952_v56 = vld [vmem:[%s14617_s12 + $0x1a80] sm:$0xff]  ;;  %v7986_v22 = vld [vmem:[%s14617_s12 + $0x1b90] sm:$0xff] }
 0x66b   : > { %9755 = vmatpush3.msra.mxu0 %v7997_v50  ;;  %9227 = vmatprep.subr.mxu1 %v7978_v41  ;;  %v8830_v0 = vpop.f32.mrf.mxu1  ;;  %v5026_v52 = vadd.f32 %v5025_v40, %v4946_v5  ;;  %v6308_v50 = vrot.slane %v13736_v43, 7  ;;  %v6289_v41 = vrot.slane %v6139_v32, 7  ;;  %v8031_v3 = vld [vmem:[%s14617_s12 + $0x1cf8] sm:$0xff]  ;;  %v6147_v5 = vld [vmem:[#allocation2 + $0xd0] sm:$0x7]  ;;  %v7984_v40 = vld [vmem:[%s14617_s12 + $0x1b80] sm:$0xff] }
 0x66c   : > { %9756 = vmatprep.subr.mxu0 %v13504_v19  ;;  %9228 = vmatpush3.msra.mxu1 %v7962_v8  ;;  %v8831_v25 = vadd.f32 %v8830_v0, %v8829_v14  ;;  %v9664_v11 = vpop.f32.mrf.mxu0  ;;  %v6295_v8 = vrot.slane %v6141_v20, 7  ;;  %v7985_v14 = vld [vmem:[%s14617_s12 + $0x1b88] sm:$0xff]  ;;  %v8015_v43 = vld [vmem:[%s14617_s12 + $0x1c78] sm:$0xff]  ;;  %v6306_v0 = vrot.slane %v13760_v12, 7  ;;  %v8044_v32 = vld [vmem:[%s14617_s12 + $0x1d60] sm:$0xff] }
 0x66d   : > { %9757 = vmatpush3.msra.mxu0 %v7996_v13  ;;  %9229 = vmatprep.subr.mxu1 %v7977_v48  ;;  %v14080_v45 = vadd.f32 %v5026_v52, %v13642_v54  ;;  %v7975_v54 = vld [vmem:[%s14617_s12 + $0x1b38] sm:$0xff]  ;;  %v6291_v18 = vsel %vm6276_vm5, %v6289_v41, %v6290_v23  ;;  %v6309_v13 = vsel %vm6276_vm5, %v6293_v53, %v6308_v50  ;;  %v8030_v48 = vld [vmem:[%s14617_s12 + $0x1cf0] sm:$0xff]  ;;  %v6146_v11 = vld [vmem:[#allocation2 + $0xc8] sm:$0x7] }
 0x66e   : > { %6502 = vmatmul.mubr.f32.gmra.mxu0 %v6317_v34  ;;  %9758 = vmatprep.subr.mxu0 %v13504_v19  ;;  %v4951_v47 = vadd.f32 %v8831_v25, %v13908_v62  ;;  %v7974_v62 = vld [vmem:[%s14617_s12 + $0x1b30] sm:$0xff]  ;;  %v6297_v53 = vsel %vm6276_vm5, %v6295_v8, %v13947_v44  ;;  %v8029_v25 = vld [vmem:[%s14617_s12 + $0x1ce8] sm:$0xff]  ;;  %v8063_v12 = vld [vmem:[%s14617_s12 + $0x1df8] sm:$0xff] }
 0x66f   : > { %9230 = vmatpush3.msra.mxu1 %v7961_v38  ;;  %9759 = vmatpush3.msra.mxu0 %v7995_v46  ;;  %v8014_v52 = vld [vmem:[%s14617_s12 + $0x1c70] sm:$0xff]  ;;  %v6322_v38 = vrot.slane %v6147_v5, 7  ;;  %v8023_v5 = vld [vmem:[%s14617_s12 + $0x1cb8] sm:$0xff] }
 0x670   : > { %9231 = vmatprep.subr.mxu1 %v7976_v26  ;;  %9760 = vmatprep.subr.mxu0 %v13504_v19  ;;  %v5030_v55 = vpop.f32.mrf.mxu0  ;;  %v7958_v19 = vld [vmem:[%s14617_s12 + $0x1ab0] sm:$0xff]  ;;  %v6307_v26 = vsel %vm6276_vm5, %v6290_v23, %v6306_v0 }
 0x671   : > { %9232 = vmatpush3.msra.mxu1 %v7960_v28  ;;  %9761 = vmatpush3.msra.mxu0 %v7994_v63  ;;  %v5031_v42 = vadd.f32 %v5030_v55, %v4951_v47  ;;  %v8013_v28 = vld [vmem:[%s14617_s12 + $0x1c68] sm:$0xff]  ;;  %v8047_v63 = vld [vmem:[%s14617_s12 + $0x1d78] sm:$0xff]  ;;  %v6320_v55 = vrot.slane %v6146_v11, 7 }
 0x672   : > { %9233 = vmatprep.subr.mxu1 %v7975_v54  ;;  %9762 = vmatprep.subr.mxu0 %v14103_v36  ;;  %v9667_v35 = vpop.f32.mrf.mxu0  ;;  %v6323_v54 = vsel %vm6276_vm5, %v6308_v50, %v6322_v38  ;;  %v8043_v50 = vld [vmem:[%s14617_s12 + $0x1d58] sm:$0xff]  ;;  %v8006_v38 = vld [vmem:[%s14617_s12 + $0x1c30] sm:$0xff]  ;;  %v8021_v11 = vld [vmem:[%s14617_s12 + $0x1ca8] sm:$0xff] }
 0x673   : > { %9234 = vmatpush3.msra.mxu1 %v7959_v37  ;;  %9763 = vmatpush3.msra.mxu0 %v7993_v29  ;;  %v14116_v9 = vadd.f32 %v5031_v42, %v13676_v6  ;;  %v7956_v6 = vld [vmem:[%s14617_s12 + $0x1aa0] sm:$0xff]  ;;  %v8062_v29 = vld [vmem:[%s14617_s12 + $0x1df0] sm:$0xff] }
 0x674   : > { %9235 = vmatprep.subr.mxu1 %v7974_v62  ;;  %9764 = vmatprep.subr.mxu0 %v14103_v36  ;;  %v8028_v37 = vld [vmem:[%s14617_s12 + $0x1ce0] sm:$0xff] }
 0x675   : > { %9236 = vmatpush3.msra.mxu1 %v7958_v19  ;;  %9765 = vmatpush3.msra.mxu0 %v7992_v61  ;;  %v8012_v62 = vld [vmem:[%s14617_s12 + $0x1c60] sm:$0xff]  ;;  %v8046_v19 = vld [vmem:[%s14617_s12 + $0x1d70] sm:$0xff]  ;;  %v6148_v61 = vld [vmem:[#allocation2 + $0xd8] sm:$0x7] }
 0x676   : > { %9237 = vmatprep.subr.mxu1 %v7973_v57  ;;  %9766 = vmatprep.subr.mxu0 %v14103_v36  ;;  %v8027_v57 = vld [vmem:[%s14617_s12 + $0x1cd8] sm:$0xff] }
 0x677   : > { %9238 = vmatpush3.msra.mxu1 %v7957_v15  ;;  %9767 = vmatpush3.msra.mxu0 %v7991_v60  ;;  %v6321_v60 = vsel %vm6276_vm5, %v6306_v0, %v6320_v55  ;;  %v8019_v55 = vld [vmem:[%s14617_s12 + $0x1c98] sm:$0xff] }
 0x678   : > { %9239 = vmatprep.subr.mxu1 %v7972_v51  ;;  %9768 = vmatprep.subr.mxu0 %v14103_v36  ;;  %v8061_v51 = vld [vmem:[%s14617_s12 + $0x1de8] sm:$0xff] }
 0x679   : > { %9240 = vmatpush3.msra.mxu1 %v7956_v6  ;;  %9769 = vmatpush3.msra.mxu0 %v7990_v27  ;;  %v8011_v6 = vld [vmem:[%s14617_s12 + $0x1c58] sm:$0xff] }
 0x67a   : > { %9241 = vmatprep.subr.mxu1 %v7971_v59  ;;  %9770 = vmatprep.subr.mxu0 %v14103_v36 }
 0x67b   : > { %9242 = vmatpush3.msra.mxu1 %v7955_v17  ;;  %9771 = vmatpush3.msra.mxu0 %v7989_v10  ;;  %v8045_v17 = vld [vmem:[%s14617_s12 + $0x1d68] sm:$0xff]  ;;  %v6324_v10 = vrot.slane %v6148_v61, 7  ;;  %v8018_v61 = vld [vmem:[%s14617_s12 + $0x1c90] sm:$0xff] }
 0x67c   : > { %9243 = vmatprep.subr.mxu1 %v7970_v30  ;;  %9772 = vmatprep.subr.mxu0 %v14103_v36 }
 0x67d   : > { %9244 = vmatpush3.msra.mxu1 %v7954_v2  ;;  %9773 = vmatpush3.msra.mxu0 %v7988_v7  ;;  %v8026_v2 = vld [vmem:[%s14617_s12 + $0x1cd0] sm:$0xff]  ;;  %v8060_v7 = vld [vmem:[%s14617_s12 + $0x1de0] sm:$0xff]  ;;  %v6325_v20 = vsel %vm6276_vm5, %v13947_v44, %v6324_v10 }
 0x67e   : > { %9245 = vmatprep.subr.mxu1 %v7969_v4  ;;  %9774 = vmatprep.subr.mxu0 %v14103_v36  ;;  %v8000_v10 = vld [vmem:[%s14617_s12 + $0x1c00] sm:$0xff] }
 0x67f   : > { %9246 = vmatpush3.msra.mxu1 %v7953_v49  ;;  %9775 = vmatpush3.msra.mxu0 %v7987_v24  ;;  %v8010_v49 = vld [vmem:[%s14617_s12 + $0x1c50] sm:$0xff] }
 0x680   : > { %9247 = vmatprep.subr.mxu1 %v7968_v58  ;;  %9776 = vmatprep.subr.mxu0 %v14103_v36  ;;  %v8025_v58 = vld [vmem:[%s14617_s12 + $0x1cc8] sm:$0xff] }
 0x681   : > { %9248 = vmatpush3.msra.mxu1 %v7952_v56  ;;  %9777 = vmatpush3.msra.mxu0 %v7986_v22  ;;  %v8059_v56 = vld [vmem:[%s14617_s12 + $0x1dd8] sm:$0xff]  ;;  %v8009_v22 = vld [vmem:[%s14617_s12 + $0x1c48] sm:$0xff] }
 0x682   : > { %6572 = vmatmul.mubr.f32.vlgmr.msra.gmra.mxu1 %v6291_v18  ;;  %9778 = vmatprep.subr.mxu0 %v14103_v36  ;;  %v8058_v18 = vld [vmem:[%s14617_s12 + $0x1dd0] sm:$0xff] }
 0x683   : > { %9277 = vmatprep.subr.mxu1 %v8031_v3  ;;  %6576 = vmatprep.mubr.f32.mxu1 %v6309_v13 }
 0x684   : > { %9779 = vmatpush3.msra.mxu0 %v7985_v14  ;;  %9278 = vmatpush3.msra.mxu1 %v8015_v43  ;;  %v8883_v46 = vpop.f32.mrf.mxu1  ;;  %v8008_v14 = vld [vmem:[%s14617_s12 + $0x1c40] sm:$0xff]  ;;  %v8042_v43 = vld [vmem:[%s14617_s12 + $0x1d50] sm:$0xff] }
 0x685   : > { %9780 = vmatprep.subr.mxu0 %v14103_v36  ;;  %9279 = vmatprep.subr.mxu1 %v8030_v48  ;;  %v8057_v48 = vld [vmem:[%s14617_s12 + $0x1dc8] sm:$0xff] }
 0x686   : > { %9781 = vmatpush3.msra.mxu0 %v7984_v40  ;;  %9782 = vmatprep.mubr.msk.f32.mxu0 %vm9900_vm2, %v14103_v36  ;;  %v8884_v34 = vpop.f32.mrf.mxu1  ;;  %v8007_v40 = vld [vmem:[%s14617_s12 + $0x1c38] sm:$0xff] }
 0x687   : > { %9280 = vmatpush3.msra.mxu1 %v8014_v52  ;;  %9783 = vmatmul.mubr.f32.vlgmr.msra.gmra.mxu0 %v6297_v53  ;;  %v8885_v47 = vadd.f32 %v8884_v34, %v8883_v46  ;;  %v8041_v52 = vld [vmem:[%s14617_s12 + $0x1d48] sm:$0xff]  ;;  %v8056_v53 = vld [vmem:[%s14617_s12 + $0x1dc0] sm:$0xff]  ;;  %v8055_v34 = vld [vmem:[%s14617_s12 + $0x1db8] sm:$0xff] }
 0x688   : > { %6577 = vmatmul.mubr.f32.gmra.mxu1 %v6307_v26  ;;  %9281 = vmatprep.subr.mxu1 %v8029_v25  ;;  %v8040_v25 = vld [vmem:[%s14617_s12 + $0x1d40] sm:$0xff]  ;;  %v8005_v26 = vld [vmem:[%s14617_s12 + $0x1c28] sm:$0xff] }
 0x689   : > { %9318 = vmatprep.subr.mxu0 %v8063_v12  ;;  %6581 = vmatprep.mubr.f32.mxu1 %v6323_v54  ;;  %v8924_v42 = vpop.f32.mrf.mxu0  ;;  %v8054_v54 = vld [vmem:[%s14617_s12 + $0x1db0] sm:$0xff] }
 0x68a   : > { %9282 = vmatpush3.msra.mxu1 %v8013_v28  ;;  %9319 = vmatpush3.msra.mxu0 %v8047_v63  ;;  %v8886_v35 = vpop.f32.mrf.mxu1  ;;  %v8039_v28 = vld [vmem:[%s14617_s12 + $0x1d38] sm:$0xff]  ;;  %v8020_v63 = vld [vmem:[%s14617_s12 + $0x1ca0] sm:$0xff] }
 0x68b   : > { %9283 = vmatprep.subr.mxu1 %v8028_v37  ;;  %9320 = vmatprep.subr.mxu0 %v8062_v29  ;;  %v8925_v15 = vpop.f32.mrf.mxu0  ;;  %v8004_v37 = vld [vmem:[%s14617_s12 + $0x1c20] sm:$0xff]  ;;  %v8038_v29 = vld [vmem:[%s14617_s12 + $0x1d30] sm:$0xff] }
 0x68c   : > { %9785 = vmatprep.mubr.msk.f32.mxu0 %vm9900_vm2, %v14103_v36  ;;  %9284 = vmatpush3.msra.mxu1 %v8012_v62  ;;  %v8926_v27 = vadd.f32 %v8925_v15, %v8924_v42  ;;  %v8887_v59 = vpop.f32.mrf.mxu1  ;;  %v8053_v62 = vld [vmem:[%s14617_s12 + $0x1da8] sm:$0xff]  ;;  %v8003_v42 = vld [vmem:[%s14617_s12 + $0x1c18] sm:$0xff]  ;;  %v8036_v15 = vld [vmem:[%s14617_s12 + $0x1d20] sm:$0xff] }
 0x68d   : > { %9321 = vmatpush3.msra.mxu0 %v8046_v19  ;;  %6582 = vmatmul.mubr.f32.gmra.mxu1 %v6321_v60  ;;  %v8888_v30 = vadd.f32 %v8887_v59, %v8886_v35  ;;  %v8037_v19 = vld [vmem:[%s14617_s12 + $0x1d28] sm:$0xff]  ;;  %v8052_v35 = vld [vmem:[%s14617_s12 + $0x1da0] sm:$0xff] }
 0x68e   : > { %9786 = vmatmul.mubr.f32.gmra.mxu0 %v13947_v44  ;;  %9285 = vmatprep.subr.mxu1 %v8027_v57  ;;  %v14257_v4 = vadd.f32 %v8926_v27, %v8885_v47  ;;  %v8024_v44 = vld [vmem:[%s14617_s12 + $0x1cc0] sm:$0xff]  ;;  %v8002_v57 = vld [vmem:[%s14617_s12 + $0x1c10] sm:$0xff]  ;;  %v8017_v60 = vld [vmem:[%s14617_s12 + $0x1c88] sm:$0xff] }
 0x68f   : > { %9322 = vmatprep.subr.mxu0 %v8061_v51  ;;  %9286 = vmatpush3.msra.mxu1 %v8011_v6  ;;  %v8889_v24 = vpop.f32.mrf.mxu1  ;;  %v8051_v51 = vld [vmem:[%s14617_s12 + $0x1d98] sm:$0xff]  ;;  %v8001_v6 = vld [vmem:[%s14617_s12 + $0x1c08] sm:$0xff]  ;;  %v8016_v59 = vld [vmem:[%s14617_s12 + $0x1c80] sm:$0xff] }
 0x690   : > { %6854 = vmatprep.mubr.f32.mxu1 %v13800_v16  ;;  %9323 = vmatpush3.msra.mxu0 %v8045_v17  ;;  %v8927_v23 = vpop.f32.mrf.mxu0  ;;  %v8035_v27 = vld [vmem:[%s14617_s12 + $0x1d18] sm:$0xff]  ;;  %v8050_v17 = vld [vmem:[%s14617_s12 + $0x1d90] sm:$0xff] }
 0x691   : > { %9287 = vmatprep.subr.mxu1 %v8026_v2  ;;  %9324 = vmatprep.subr.mxu0 %v8060_v7  ;;  %v8890_v16 = vpop.f32.mrf.mxu1  ;;  %v8049_v2 = vld [vmem:[%s14617_s12 + $0x1d88] sm:$0xff]  ;;  %v8095_v7 = vld [vmem:[%s14617_s12 + $0x1ef8] sm:$0xff] }
 0x692   : > { %9788 = vmatprep.mubr.msk.f32.mxu0 %vm9900_vm2, %v14103_v36  ;;  %9288 = vmatpush3.msra.mxu1 %v8010_v49  ;;  %v8928_v41 = vpop.f32.mrf.mxu0  ;;  %v8891_v3 = vadd.f32 %v8890_v16, %v8889_v24  ;;  %v8033_v49 = vld [vmem:[%s14617_s12 + $0x1d08] sm:$0xff]  ;;  %v8079_v24 = vld [vmem:[%s14617_s12 + $0x1e78] sm:$0xff] }
 0x693   : > { %9325 = vmatpush3.msra.mxu0 %v8044_v32  ;;  %9289 = vmatprep.subr.mxu1 %v8025_v58  ;;  %v8929_v8 = vadd.f32 %v8928_v41, %v8927_v23  ;;  %v8048_v32 = vld [vmem:[%s14617_s12 + $0x1d80] sm:$0xff]  ;;  %v8094_v58 = vld [vmem:[%s14617_s12 + $0x1ef0] sm:$0xff] }
 0x694   : > { %9789 = vmatmul.mubr.f32.gmra.mxu0 %v6325_v20  ;;  %9326 = vmatprep.subr.mxu0 %v8059_v56  ;;  %v8032_v23 = vld [vmem:[%s14617_s12 + $0x1d00] sm:$0xff]  ;;  %v9881_v20 = vld [vmem:[#allocation2 + $0x78] sm:$0xff]  ;;  %v8078_v56 = vld [vmem:[%s14617_s12 + $0x1e70] sm:$0xff] }
 0x695   : > { %9290 = vmatpush3.msra.mxu1 %v8009_v22  ;;  %9327 = vmatpush3.msra.mxu0 %v8043_v50  ;;  %v14297_v13 = vadd.f32 %v8929_v8, %v8888_v30  ;;  %v8034_v30 = vld [vmem:[%s14617_s12 + $0x1d10] sm:$0xff]  ;;  %v8093_v22 = vld [vmem:[%s14617_s12 + $0x1ee8] sm:$0xff]  ;;  %v8111_v8 = vld [vmem:[%s14617_s12 + $0x1f78] sm:$0xff] }
 0x696   : > { %6934 = vmatprep.mubr.f32.mxu0 %v13841_v31  ;;  %9291 = vmatprep.subr.mxu1 %v8024_v44  ;;  %v8930_v0 = vpop.f32.mrf.mxu0  ;;  %v8022_v31 = vld [vmem:[%s14617_s12 + $0x1cb0] sm:$0xff]  ;;  %v8077_v50 = vld [vmem:[%s14617_s12 + $0x1e68] sm:$0xff] }
 0x697   : > { %9328 = vmatprep.subr.mxu0 %v8058_v18  ;;  %9292 = vmatpush3.msra.mxu1 %v8008_v14  ;;  %v6671_v18 = vld [vmem:[#allocation2 + $0xb0] sm:$0xf]  ;;  %v9882_v14 = vld [vmem:[#allocation2 + $0x88] sm:$0xff] }
 0x698   : > { %9329 = vmatpush3.msra.mxu0 %v8042_v43  ;;  %9293 = vmatprep.subr.mxu1 %v8023_v5  ;;  %v8931_v46 = vpop.f32.mrf.mxu0 }
 0x699   : > { %9330 = vmatprep.subr.mxu0 %v8057_v48  ;;  %9294 = vmatpush3.msra.mxu1 %v8007_v40  ;;  %v8932_v12 = vadd.f32 %v8931_v46, %v8930_v0  ;;  %v6670_v48 = vld [vmem:[#allocation2 + $0xa8] sm:$0xf]  ;;  %v8091_v0 = vld [vmem:[%s14617_s12 + $0x1ed8] sm:$0xff]  ;;  %v9883_v46 = vld [vmem:[#allocation2 + $0x80] sm:$0xff] }
 0x69a   : > { %9331 = vmatpush3.msra.mxu0 %v8041_v52  ;;  %9295 = vmatprep.subr.mxu1 %v8022_v31  ;;  %v8110_v52 = vld [vmem:[%s14617_s12 + $0x1f70] sm:$0xff] }
 0x69b   : > { %9332 = vmatprep.subr.mxu0 %v8056_v53  ;;  %9296 = vmatpush3.msra.mxu1 %v8006_v38  ;;  %v14336_v47 = vadd.f32 %v8932_v12, %v8891_v3  ;;  %v8092_v3 = vld [vmem:[%s14617_s12 + $0x1ee0] sm:$0xff] }
 0x69c   : > { %9333 = vmatpush3.msra.mxu0 %v8040_v25  ;;  %9297 = vmatprep.subr.mxu1 %v8021_v11  ;;  %v8090_v25 = vld [vmem:[%s14617_s12 + $0x1ed0] sm:$0xff] }
 0x69d   : > { %9334 = vmatprep.subr.mxu0 %v8055_v34  ;;  %9298 = vmatpush3.msra.mxu1 %v8005_v26  ;;  %v8109_v34 = vld [vmem:[%s14617_s12 + $0x1f68] sm:$0xff]  ;;  %v8074_v26 = vld [vmem:[%s14617_s12 + $0x1e50] sm:$0xff] }
 0x69e   : > { %9335 = vmatpush3.msra.mxu0 %v8039_v28  ;;  %9299 = vmatprep.subr.mxu1 %v8020_v63  ;;  %v8089_v28 = vld [vmem:[%s14617_s12 + $0x1ec8] sm:$0xff] }
 0x69f   : > { %9336 = vmatprep.subr.mxu0 %v8054_v54  ;;  %9300 = vmatpush3.msra.mxu1 %v8004_v37  ;;  %v8108_v54 = vld [vmem:[%s14617_s12 + $0x1f60] sm:$0xff]  ;;  %v8073_v37 = vld [vmem:[%s14617_s12 + $0x1e48] sm:$0xff] }
 0x6a0   : > { %9337 = vmatpush3.msra.mxu0 %v8038_v29  ;;  %9301 = vmatprep.subr.mxu1 %v8019_v55 }
 0x6a1   : > { %9338 = vmatprep.subr.mxu0 %v8053_v62  ;;  %9302 = vmatpush3.msra.mxu1 %v8003_v42  ;;  %v8107_v62 = vld [vmem:[%s14617_s12 + $0x1f58] sm:$0xff]  ;;  %v8072_v42 = vld [vmem:[%s14617_s12 + $0x1e40] sm:$0xff] }
 0x6a2   : > { %9339 = vmatpush3.msra.mxu0 %v8037_v19  ;;  %9303 = vmatprep.subr.mxu1 %v8018_v61 }
 0x6a3   : > { %9340 = vmatprep.subr.mxu0 %v8052_v35  ;;  %9304 = vmatpush3.msra.mxu1 %v8002_v57  ;;  %v8087_v35 = vld [vmem:[%s14617_s12 + $0x1eb8] sm:$0xff] }
 0x6a4   : > { %9341 = vmatpush3.msra.mxu0 %v8036_v15  ;;  %9305 = vmatprep.subr.mxu1 %v8017_v60  ;;  %v8106_v15 = vld [vmem:[%s14617_s12 + $0x1f50] sm:$0xff]  ;;  %v8071_v60 = vld [vmem:[%s14617_s12 + $0x1e38] sm:$0xff] }
 0x6a5   : > { %9342 = vmatprep.subr.mxu0 %v8051_v51  ;;  %9306 = vmatpush3.msra.mxu1 %v8001_v6  ;;  %v8105_v6 = vld [vmem:[%s14617_s12 + $0x1f48] sm:$0xff] }
 0x6a6   : > { %9343 = vmatpush3.msra.mxu0 %v8035_v27  ;;  %9307 = vmatprep.subr.mxu1 %v8016_v59  ;;  %v8070_v27 = vld [vmem:[%s14617_s12 + $0x1e30] sm:$0xff] }
 0x6a7   : > { %9344 = vmatprep.subr.mxu0 %v8050_v17  ;;  %9308 = vmatpush3.msra.mxu1 %v8000_v10  ;;  %v8104_v10 = vld [vmem:[%s14617_s12 + $0x1f40] sm:$0xff] }
 0x6a8   : > { %9345 = vmatpush3.msra.mxu0 %v8034_v30  ;;  %6855 = vmatmul.mubr.f32.vlgmr.msra.gmra.mxu1 %v14103_v36  ;;  %v8069_v30 = vld [vmem:[%s14617_s12 + $0x1e28] sm:$0xff] }
 0x6a9   : > { %9346 = vmatprep.subr.mxu0 %v8049_v2  ;;  %9359 = vmatprep.subr.mxu1 %v8095_v7  ;;  %v8084_v7 = vld [vmem:[%s14617_s12 + $0x1ea0] sm:$0xff] }
 0x6aa   : > { %6859 = vmatprep.mubr.f32.mxu1 %v9881_v20  ;;  %9347 = vmatpush3.msra.mxu0 %v8033_v49  ;;  %v8965_v16 = vpop.f32.mrf.mxu1  ;;  %v6673_v20 = vld [vmem:[#allocation2 + $0xc0] sm:$0xf] }
 0x6ab   : > { %9360 = vmatpush3.msra.mxu1 %v8079_v24  ;;  %9348 = vmatprep.subr.mxu0 %v8048_v32  ;;  %v8103_v24 = vld [vmem:[%s14617_s12 + $0x1f38] sm:$0xff]  ;;  %v8068_v32 = vld [vmem:[%s14617_s12 + $0x1e20] sm:$0xff] }
 0x6ac   : > { %9361 = vmatprep.subr.mxu1 %v8094_v58  ;;  %9349 = vmatpush3.msra.mxu0 %v8032_v23  ;;  %v8966_v41 = vpop.f32.mrf.mxu1  ;;  %v8083_v58 = vld [vmem:[%s14617_s12 + $0x1e98] sm:$0xff] }
 0x6ad   : > { %9362 = vmatpush3.msra.mxu1 %v8078_v56  ;;  %6935 = vmatmul.mubr.f32.vlgmr.msra.gmra.mxu0 %v13988_v39  ;;  %v8967_v44 = vadd.f32 %v8966_v41, %v8965_v16  ;;  %v8076_v39 = vld [vmem:[%s14617_s12 + $0x1e60] sm:$0xff]  ;;  %v8067_v23 = vld [vmem:[%s14617_s12 + $0x1e18] sm:$0xff]  ;;  %v8082_v56 = vld [vmem:[%s14617_s12 + $0x1e90] sm:$0xff] }
 0x6ae   : > { %6860 = vmatmul.mubr.f32.gmra.mxu1 %v14103_v36  ;;  %9363 = vmatprep.subr.mxu1 %v8093_v22  ;;  %v8101_v16 = vld [vmem:[%s14617_s12 + $0x1f28] sm:$0xff]  ;;  %v6672_v22 = vld [vmem:[#allocation2 + $0xb8] sm:$0xf] }
 0x6af   : > { %6939 = vmatprep.mubr.f32.mxu0 %v9882_v14  ;;  %9364 = vmatpush3.msra.mxu1 %v8077_v50  ;;  %v5504_v43 = vadd.f32 %v8967_v44, %v14257_v4  ;;  %v5583_v5 = vpop.f32.mrf.mxu0  ;;  %v8075_v4 = vld [vmem:[%s14617_s12 + $0x1e58] sm:$0xff]  ;;  %v8066_v50 = vld [vmem:[%s14617_s12 + $0x1e10] sm:$0xff]  ;;  %v8081_v41 = vld [vmem:[%s14617_s12 + $0x1e88] sm:$0xff] }
 0x6b0   : > { %9791 = vmatprep.subr.mxu0 %v14103_v36  ;;  %9365 = vmatprep.subr.mxu1 %v8092_v3  ;;  %v8968_v40 = vpop.f32.mrf.mxu1  ;;  %v8100_v3 = vld [vmem:[%s14617_s12 + $0x1f20] sm:$0xff]  ;;  %v8065_v44 = vld [vmem:[%s14617_s12 + $0x1e08] sm:$0xff] }
 0x6b1   : > { %9792 = vmatpush3.msra.mxu0 %v8111_v8  ;;  %6864 = vmatprep.mubr.f32.mxu1 %v6671_v18  ;;  %v5584_v31 = vadd.f32 %v5583_v5, %v5504_v43  ;;  %v9702_v53 = vpop.f32.mrf.mxu0  ;;  %v8080_v8 = vld [vmem:[%s14617_s12 + $0x1e80] sm:$0xff]  ;;  %v8099_v18 = vld [vmem:[%s14617_s12 + $0x1f18] sm:$0xff]  ;;  %v8097_v43 = vld [vmem:[%s14617_s12 + $0x1f08] sm:$0xff] }
 0x6b2   : > { %9366 = vmatpush3.msra.mxu1 %v8076_v39  ;;  %9793 = vmatprep.subr.mxu0 %v14103_v36  ;;  %v8969_v38 = vpop.f32.mrf.mxu1  ;;  %v8064_v14 = vld [vmem:[%s14617_s12 + $0x1e00] sm:$0xff]  ;;  %v8098_v39 = vld [vmem:[%s14617_s12 + $0x1f10] sm:$0xff]  ;;  %v9884_v5 = vld [vmem:[#allocation2 + $0x98] sm:$0xff] }
 0x6b3   : > { %6865 = vmatmul.mubr.f32.gmra.mxu1 %v6670_v48  ;;  %6940 = vmatmul.mubr.f32.gmra.mxu0 %v9883_v46  ;;  %v8970_v11 = vadd.f32 %v8969_v38, %v8968_v40  ;;  %v14453_v12 = vadd.f32 %v5584_v31, %v14045_v21  ;;  %v8096_v48 = vld [vmem:[%s14617_s12 + $0x1f00] sm:$0xff]  ;;  %v6675_v40 = vld [vmem:[#allocation2 + $0xd0] sm:$0xf]  ;;  %v6676_v53 = vld [vmem:[#allocation2 + $0xd8] sm:$0xf] }
 0x6b4   : > { %9367 = vmatprep.subr.mxu1 %v8091_v0  ;;  %9794 = vmatpush3.msra.mxu0 %v8110_v52  ;;  %v6674_v0 = vld [vmem:[#allocation2 + $0xc8] sm:$0xf] }
 0x6b5   : > { %9368 = vmatpush3.msra.mxu1 %v8075_v4  ;;  %7014 = vmatprep.mubr.f32.mxu1 %v14036_v33  ;;  %v8971_v63 = vpop.f32.mrf.mxu1  ;;  %v5509_v21 = vadd.f32 %v8970_v11, %v14297_v13  ;;  %v8088_v33 = vld [vmem:[%s14617_s12 + $0x1ec0] sm:$0xff] }
 0x6b6   : > { %9795 = vmatprep.subr.mxu0 %v14103_v36  ;;  %9369 = vmatprep.subr.mxu1 %v8090_v25  ;;  %v5588_v29 = vpop.f32.mrf.mxu0 }
 0x6b7   : > { %9796 = vmatpush3.msra.mxu0 %v8109_v34  ;;  %9370 = vmatpush3.msra.mxu1 %v8074_v26  ;;  %v8972_v55 = vpop.f32.mrf.mxu1  ;;  %v5589_v13 = vadd.f32 %v5588_v29, %v5509_v21 }
 0x6b8   : > { %9797 = vmatprep.subr.mxu0 %v14103_v36  ;;  %9371 = vmatprep.subr.mxu1 %v8089_v28  ;;  %v8973_v19 = vadd.f32 %v8972_v55, %v8971_v63  ;;  %v9705_v61 = vpop.f32.mrf.mxu0 }
 0x6b9   : > { %9798 = vmatpush3.msra.mxu0 %v8108_v54  ;;  %9372 = vmatpush3.msra.mxu1 %v8073_v37  ;;  %v14487_v57 = vadd.f32 %v5589_v13, %v14080_v45  ;;  %v8086_v45 = vld [vmem:[%s14617_s12 + $0x1eb0] sm:$0xff] }
 0x6ba   : > { %9799 = vmatprep.subr.mxu0 %v14103_v36  ;;  %9373 = vmatprep.subr.mxu1 %v8088_v33  ;;  %v5514_v51 = vadd.f32 %v8973_v19, %v14336_v47  ;;  %v8085_v47 = vld [vmem:[%s14617_s12 + $0x1ea8] sm:$0xff] }
 0x6bb   : > { %9800 = vmatpush3.msra.mxu0 %v8107_v62  ;;  %9374 = vmatpush3.msra.mxu1 %v8072_v42 }
 0x6bc   : > { %9801 = vmatprep.subr.mxu0 %v14103_v36  ;;  %9375 = vmatprep.subr.mxu1 %v8087_v35  ;;  %v5593_v59 = vpop.f32.mrf.mxu0 }
 0x6bd   : > { %9802 = vmatpush3.msra.mxu0 %v8106_v15  ;;  %9376 = vmatpush3.msra.mxu1 %v8071_v60  ;;  %v5594_v17 = vadd.f32 %v5593_v59, %v5514_v51 }
 0x6be   : > { %9803 = vmatprep.subr.mxu0 %v14103_v36  ;;  %9377 = vmatprep.subr.mxu1 %v8086_v45  ;;  %v9708_v2 = vpop.f32.mrf.mxu0 }
 0x6bf   : > { %9804 = vmatpush3.msra.mxu0 %v8105_v6  ;;  %9378 = vmatpush3.msra.mxu1 %v8070_v27  ;;  %v14521_v49 = vadd.f32 %v5594_v17, %v14116_v9  ;;  %v8102_v9 = vld [vmem:[%s14617_s12 + $0x1f30] sm:$0xff] }
 0x6c0   : > { %9805 = vmatprep.subr.mxu0 %v14103_v36  ;;  %9379 = vmatprep.subr.mxu1 %v8085_v47 }
 0x6c1   : > { %9806 = vmatpush3.msra.mxu0 %v8104_v10  ;;  %9380 = vmatpush3.msra.mxu1 %v8069_v30 }
 0x6c2   : > { %9807 = vmatprep.subr.mxu0 %v14103_v36  ;;  %9381 = vmatprep.subr.mxu1 %v8084_v7 }
 0x6c3   : > { %9808 = vmatpush3.msra.mxu0 %v8103_v24  ;;  %9382 = vmatpush3.msra.mxu1 %v8068_v32 }
 0x6c4   : > { %9809 = vmatprep.subr.mxu0 %v14103_v36  ;;  %9383 = vmatprep.subr.mxu1 %v8083_v58 }
 0x6c5   : > { %9810 = vmatpush3.msra.mxu0 %v8102_v9  ;;  %9384 = vmatpush3.msra.mxu1 %v8067_v23 }
 0x6c6   : > { %9811 = vmatprep.subr.mxu0 %v14103_v36  ;;  %6944 = vmatprep.mubr.f32.mxu0 %v6673_v20 }
 0x6c7   : > { %9385 = vmatprep.subr.mxu1 %v8082_v56  ;;  %9812 = vmatpush3.msra.mxu0 %v8101_v16 }
 0x6c8   : > { %6945 = vmatmul.mubr.f32.gmra.mxu0 %v6672_v22  ;;  %9386 = vmatpush3.msra.mxu1 %v8066_v50 }
 0x6c9   : > { %9813 = vmatprep.subr.mxu0 %v14103_v36  ;;  %9387 = vmatprep.subr.mxu1 %v8081_v41 }
 0x6ca   : > { %9814 = vmatpush3.msra.mxu0 %v8100_v3  ;;  %9388 = vmatpush3.msra.mxu1 %v8065_v44 }
 0x6cb   : > { %9815 = vmatprep.subr.mxu0 %v14103_v36  ;;  %9389 = vmatprep.subr.mxu1 %v8080_v8 }
 0x6cc   : > { %9816 = vmatpush3.msra.mxu0 %v8099_v18  ;;  %9390 = vmatpush3.msra.mxu1 %v8064_v14 }
 0x6cd   : > { %9817 = vmatprep.subr.mxu0 %v14103_v36  ;;  %7015 = vmatmul.mubr.f32.vlgmr.msra.gmra.mxu1 %v14168_v1  ;;  %v9885_v1 = vld [vmem:[#allocation2 + $0x90] sm:$0xff] }
 0x6ce   : > { %9818 = vmatpush3.msra.mxu0 %v8098_v39  ;;  %7019 = vmatprep.mubr.f32.mxu1 %v9884_v5 }
 0x6cf   : > { %9819 = vmatprep.subr.mxu0 %v14103_v36  ;;  %9823 = vmatprep.mubr.msk.f32.mxu0 %vm9900_vm2, %v14103_v36 }
 0x6d0   : > { %9820 = vmatpush3.msra.mxu0 %v8097_v43  ;;  %v9025_v11 = vpop.f32.mrf.mxu1 }
 0x6d1   : > { %9821 = vmatprep.subr.mxu0 %v14103_v36  ;;  %7020 = vmatmul.mubr.f32.gmra.mxu1 %v9885_v1 }
 0x6d2   : > { %9822 = vmatpush3.msra.mxu0 %v8096_v48  ;;  %7024 = vmatprep.mubr.f32.mxu1 %v6675_v40  ;;  %v9026_v63 = vpop.f32.mrf.mxu1 }
 0x6d3   : > { %9824 = vmatmul.mubr.f32.vlgmr.msra.gmra.mxu0 %v14103_v36  ;;  %v9027_v55 = vadd.f32 %v9026_v63, %v9025_v11 }
 0x6d4   : > { %9826 = vmatprep.mubr.msk.f32.mxu0 %vm9900_vm2, %v14103_v36 }
 0x6d5   : > { %7025 = vmatmul.mubr.f32.gmra.mxu1 %v6674_v0  ;;  %v9066_v52 = vpop.f32.mrf.mxu0 }
 0x6d6   : > { %v9028_v21 = vpop.f32.mrf.mxu1 }
 0x6d7   : > { %9827 = vmatmul.mubr.f32.gmra.mxu0 %v14103_v36  ;;  %v9067_v31 = vpop.f32.mrf.mxu0 }
 0x6d8   : > { %9829 = vmatprep.mubr.msk.f32.mxu0 %vm9900_vm2, %v14103_v36  ;;  %v9068_v4 = vadd.f32 %v9067_v31, %v9066_v52  ;;  %v9029_v54 = vpop.f32.mrf.mxu1 }
 0x6d9   : > { %v9030_v42 = vadd.f32 %v9029_v54, %v9028_v21 }
 0x6da   : > { %v5959_v62 = vadd.f32 %v9068_v4, %v9027_v55 }
 0x6db   : > { %9830 = vmatmul.mubr.f32.gmra.mxu0 %v6676_v53  ;;  %v9031_v37 = vpop.f32.mrf.mxu1 }
 0x6dc   : > { %v9069_v38 = vpop.f32.mrf.mxu0 }
 0x6dd   : > { %v9032_v29 = vpop.f32.mrf.mxu1 }
 0x6de   : > { %v9070_v46 = vpop.f32.mrf.mxu0  ;;  %v9033_v59 = vadd.f32 %v9032_v29, %v9031_v37 }
 0x6df   : > { %v9071_v25 = vadd.f32 %v9070_v46, %v9069_v38 }
 0x6e1   : > { %v5964_v45 = vadd.f32 %v9071_v25, %v9030_v42 }
 0x6e2   : > { %v9072_v34 = vpop.f32.mrf.mxu0 }
 0x6e4   : > { %v9073_v26 = vpop.f32.mrf.mxu0 }
 0x6e5   : > { %v9074_v28 = vadd.f32 %v9073_v26, %v9072_v34 }
 0x6e7   : > { %v5969_v7 = vadd.f32 %v9074_v28, %v9033_v59 }
 0x6f6   : > { %v9107_v33 = vpop.f32.mrf.mxu1 }
 0x6f8   : > { %v9108_v13 = vpop.f32.mrf.mxu1 }
 0x6f9   : > { %v9109_v36 = vadd.f32 %v9108_v13, %v9107_v33 }
 0x6fb   : > { %v6039_v19 = vadd.f32 %v9109_v36, %v5959_v62  ;;  %v6118_v61 = vpop.f32.mrf.mxu0 }
 0x6fc   : > { %v9110_v35 = vpop.f32.mrf.mxu1 }
 0x6fd   : > { %v6119_v15 = vadd.f32 %v6118_v61, %v6039_v19  ;;  %v9743_v60 = vpop.f32.mrf.mxu0 }
 0x6fe   : > { %v9111_v51 = vpop.f32.mrf.mxu1 }
 0x6ff   : > { %v9112_v6 = vadd.f32 %v9111_v51, %v9110_v35  ;;  %v6132_v27 = vadd.f32 %v6119_v15, %v14453_v12 }
 0x701   : > { %v9113_v47 = vpop.f32.mrf.mxu1  ;;  %v6044_v17 = vadd.f32 %v9112_v6, %v5964_v45 }
 0x702   : > { %v6123_v10 = vpop.f32.mrf.mxu0 }
 0x703   : > { %v9114_v30 = vpop.f32.mrf.mxu1  ;;  %v6124_v2 = vadd.f32 %v6123_v10, %v6044_v17 }
 0x704   : > { %v9115_v24 = vadd.f32 %v9114_v30, %v9113_v47  ;;  %v9746_v32 = vpop.f32.mrf.mxu0 }
 0x705   : > { %v6133_v58 = vadd.f32 %v6124_v2, %v14487_v57 }
 0x706   : > { %v6049_v9 = vadd.f32 %v9115_v24, %v5969_v7 }
 0x708   : > { %v6128_v23 = vpop.f32.mrf.mxu0 }
 0x709   : > { %v6129_v20 = vadd.f32 %v6128_v23, %v6049_v9 }
 0x70a   : > { %v9749_v56 = vpop.f32.mrf.mxu0 }
 0x70b   : > { %v6134_v16 = vadd.f32 %v6129_v20, %v14521_v49 }
 0x71c   : > { %v9167_v8 = vpop.f32.mrf.mxu1 }
 0x71e   : > { %v9168_v43 = vpop.f32.mrf.mxu1 }
 0x71f   : > { %v9169_v0 = vadd.f32 %v9168_v43, %v9167_v8  ;;  %v8112_v43 = vld [vmem:[%s14618_s13] ss:$0 sm:$0xff] }
 0x721   : > { %v9208_v22 = vpop.f32.mrf.mxu0 }
 0x722   : > { %v9170_v5 = vpop.f32.mrf.mxu1 }
 0x723   : > { %v9209_v50 = vpop.f32.mrf.mxu0 }
 0x724   : > { %v9210_v12 = vadd.f32 %v9209_v50, %v9208_v22  ;;  %v9171_v48 = vpop.f32.mrf.mxu1 }
 0x725   : > { %v9172_v53 = vadd.f32 %v9171_v48, %v9170_v5 }
 0x726   : > { %v6494_v31 = vadd.f32 %v9210_v12, %v9169_v0 }
 0x727   : > { %v9173_v57 = vpop.f32.mrf.mxu1 }
 0x728   : > { %v9211_v41 = vpop.f32.mrf.mxu0 }
 0x729   : > { %v9174_v40 = vpop.f32.mrf.mxu1 }
 0x72a   : > { %v9212_v3 = vpop.f32.mrf.mxu0  ;;  %v9175_v21 = vadd.f32 %v9174_v40, %v9173_v57 }
 0x72b   : > { %v9213_v44 = vadd.f32 %v9212_v3, %v9211_v41 }
 0x72d   : > { %v6499_v26 = vadd.f32 %v9213_v44, %v9172_v53 }
 0x72e   : > { %v9214_v18 = vpop.f32.mrf.mxu0 }
 0x730   : > { %v9215_v14 = vpop.f32.mrf.mxu0 }
 0x731   : > { %v9216_v39 = vadd.f32 %v9215_v14, %v9214_v18 }
 0x733   : > { %v6504_v13 = vadd.f32 %v9216_v39, %v9175_v21 }
 0x742   : > { %v9249_v1 = vpop.f32.mrf.mxu1 }
 0x744   : > { %v9250_v52 = vpop.f32.mrf.mxu1 }
 0x745   : > { %v9251_v49 = vadd.f32 %v9250_v52, %v9249_v1 }
 0x747   : > { %v6574_v4 = vadd.f32 %v9251_v49, %v6494_v31  ;;  %v6653_v38 = vpop.f32.mrf.mxu0 }
 0x748   : > { %v9252_v46 = vpop.f32.mrf.mxu1 }
 0x749   : > { %v6654_v25 = vadd.f32 %v6653_v38, %v6574_v4  ;;  %v9784_v11 = vpop.f32.mrf.mxu0 }
 0x74a   : > { %v9253_v34 = vpop.f32.mrf.mxu1 }
 0x74b   : > { %v9254_v28 = vadd.f32 %v9253_v34, %v9252_v46  ;;  %v6667_v63 = vadd.f32 %v6654_v25, %v6132_v27 }
 0x74d   : > { %v9255_v54 = vpop.f32.mrf.mxu1  ;;  %v6579_v37 = vadd.f32 %v9254_v28, %v6499_v26 }
 0x74e   : > { %v6658_v29 = vpop.f32.mrf.mxu0 }
 0x74f   : > { %v9256_v33 = vpop.f32.mrf.mxu1  ;;  %v6659_v55 = vadd.f32 %v6658_v29, %v6579_v37 }
 0x750   : > { %v9257_v62 = vadd.f32 %v9256_v33, %v9255_v54  ;;  %v9787_v36 = vpop.f32.mrf.mxu0 }
 0x751   : > { %v6668_v42 = vadd.f32 %v6659_v55, %v6133_v58 }
 0x752   : > { %v6584_v19 = vadd.f32 %v9257_v62, %v6504_v13 }
 0x754   : > { %v6663_v61 = vpop.f32.mrf.mxu0 }
 0x755   : > { %v6664_v35 = vadd.f32 %v6663_v61, %v6584_v19 }
 0x756   : > { %v9790_v15 = vpop.f32.mrf.mxu0 }
 0x757   : > { %v6669_v60 = vadd.f32 %v6664_v35, %v6134_v16 }
 0x768   : > { %v9309_v51 = vpop.f32.mrf.mxu1 }
 0x76a   : > { %v9310_v45 = vpop.f32.mrf.mxu1 }
 0x76b   : > { %v9311_v58 = vadd.f32 %v9310_v45, %v9309_v51 }
 0x76d   : > { %v9350_v6 = vpop.f32.mrf.mxu0 }
 0x76e   : > { %v9312_v59 = vpop.f32.mrf.mxu1 }
 0x76f   : > { %v9351_v27 = vpop.f32.mrf.mxu0 }
 0x770   : > { %v9313_v47 = vpop.f32.mrf.mxu1  ;;  %v9352_v7 = vadd.f32 %v9351_v27, %v9350_v6 }
 0x771   : > { %v9314_v20 = vadd.f32 %v9313_v47, %v9312_v59 }
 0x772   : > { %v6937_v23 = vadd.f32 %v9352_v7, %v9311_v58 }
 0x773   : > { %v9353_v17 = vpop.f32.mrf.mxu0  ;;  %v9315_v10 = vpop.f32.mrf.mxu1 }
 0x775   : > { %v9354_v30 = vpop.f32.mrf.mxu0  ;;  %v9316_v2 = vpop.f32.mrf.mxu1 }
 0x776   : > { %v9355_v56 = vadd.f32 %v9354_v30, %v9353_v17  ;;  %v9317_v41 = vadd.f32 %v9316_v2, %v9315_v10 }
 0x778   : > { %v6942_v8 = vadd.f32 %v9355_v56, %v9314_v20 }
 0x788   : > { %v9356_v24 = vpop.f32.mrf.mxu0 }
 0x78a   : > { %v9357_v22 = vpop.f32.mrf.mxu0 }
 0x78b   : > { %v9358_v18 = vadd.f32 %v9357_v22, %v9356_v24 }
 0x78d   : > { %v9391_v32 = vpop.f32.mrf.mxu1  ;;  %v6947_v52 = vadd.f32 %v9358_v18, %v9317_v41 }
 0x78f   : > { %v9392_v9 = vpop.f32.mrf.mxu1 }
 0x790   : > { %v9393_v16 = vadd.f32 %v9392_v9, %v9391_v32 }
 0x791   : > { %v9394_v50 = vpop.f32.mrf.mxu1 }
 0x792   : > { %v7017_v12 = vadd.f32 %v9393_v16, %v6937_v23 }
 0x793   : > { %v7096_v3 = vpop.f32.mrf.mxu0  ;;  %v9395_v44 = vpop.f32.mrf.mxu1 }
 0x794   : > { %v7097_v14 = vadd.f32 %v7096_v3, %v7017_v12  ;;  %v9396_v39 = vadd.f32 %v9395_v44, %v9394_v50 }
 0x795   : > { %v9825_v5 = vpop.f32.mrf.mxu0  ;;  %v9397_v48 = vpop.f32.mrf.mxu1 }
 0x796   : > { %v7110_v57 = vadd.f32 %v7097_v14, %v6667_v63  ;;  %v7022_v40 = vadd.f32 %v9396_v39, %v6942_v8 }
 0x797   : > { %v7101_v1 = vpop.f32.mrf.mxu0  ;;  %v9398_v0 = vpop.f32.mrf.mxu1 }
 0x798   : > { %v7120_v31 = vadd.f32 %v8112_v43, %v7110_v57  ;;  %v7102_v49 = vadd.f32 %v7101_v1, %v7022_v40  ;;  %v9399_v53 = vadd.f32 %v9398_v0, %v9397_v48 }
 0x799   : > { %v9828_v4 = vpop.f32.mrf.mxu0 }
 0x79a   : > { %7124 = vst.msk [vmem:[%s467_s18] sm:$0xff] %vm7123_vm6, %v7120_v31  ;;  %v7111_v38 = vadd.f32 %v7102_v49, %v6668_v42  ;;  %v7027_v46 = vadd.f32 %v9399_v53, %v6947_v52 }
 0x79b   : > { %v7106_v25 = vpop.f32.mrf.mxu0 }
 0x79c   : > { %v7121_v11 = vadd.f32 %v8112_v43, %v7111_v38  ;;  %v7107_v34 = vadd.f32 %v7106_v25, %v7027_v46 }
 0x79d   : > { %v9831_v26 = vpop.f32.mrf.mxu0 }
 0x79e   : > { %7125 = vst.msk [vmem:[%s467_s18 + $0x8] sm:$0xff] %vm7123_vm6, %v7121_v11  ;;  %v7112_v28 = vadd.f32 %v7107_v34, %v6669_v60 }
 0x7a0   : > { %v7122_v63 = vadd.f32 %v8112_v43, %v7112_v28 }
 0x7a2   : > { %7127 = vst.msk [vmem:[%s467_s18 + $0x10] sm:$0xf] %vm7126_vm7, %v7122_v63 }
 0x7a3 PF: > { %s24_s29 = sadd.s32 1, %s9892_s29  }
 0x7a4   : > { %p21_p4 = scmp.ge.s32.totalorder %s24_s29, 4  }
 0x7a6   :  { %23 = sbr.rel (!%p21_p4) target bundleno = 1 (0x1), region = 194 }

</bundles_post_ra>
